<compile_context>
chip_gen: v7x
topology: tpu7x:2x2x1
jax: 0.10.0
libtpu: 0.0.40
codegen_flags: <defaults>
</compile_context>

<pallas_src>
import functools

import jax
import jax.numpy as jnp
import numpy as np
from jax.experimental import pallas as pl
from jax.experimental.pallas import tpu as pltpu

EPS = 1e-5
_VMEM_LIMIT = 32 * 1024 * 1024  # safe scoped-VMEM request on v5e/v6e/v7x


# ----------------------------------------------------------------------------
# helpers
# ----------------------------------------------------------------------------
def _fold_bn(g, b, m, v):
    scale = g / jnp.sqrt(v + EPS)
    shift = b - m * scale
    return scale, shift


def _pick_row_tile(ho, bytes_per_out_row, budget=2 << 20):
    """Largest divisor of `ho` whose per-tile footprint stays under `budget`."""
    tr = 1
    for cand in range(1, ho + 1):
        if ho % cand == 0 and cand * bytes_per_out_row <= budget:
            tr = cand
    return tr


def _stack_row_windows(xp, nt, tr, stride, rows_in):
    """(N, Hp, Wp, C) -> (N*T, rows_in, Wp, C) overlapping row windows (halo only)."""
    n = xp.shape[0]
    wins = [xp[:, i * tr * stride: i * tr * stride + rows_in] for i in range(nt)]
    xw = jnp.stack(wins, axis=1)
    return xw.reshape(n * nt, rows_in, xp.shape[2], xp.shape[3])


def _conv3x3_taps(xwin, w_ref, tr, wo, cin, stride):
    """im2col-free 3x3 conv: 9 shifted (tr*wo, Cin)@(Cin, Cout) MXU taps, f32 acc."""
    cout = w_ref.shape[-1]
    acc = jnp.zeros((tr * wo, cout), jnp.float32)
    for di in range(3):
        for dj in range(3):
            patch = jax.lax.slice(
                xwin,
                (di, dj, 0),
                (di + (tr - 1) * stride + 1, dj + (wo - 1) * stride + 1, cin),
                (stride, stride, 1))
            acc = acc + jnp.dot(patch.reshape(tr * wo, cin), w_ref[di * 3 + dj],
                                preferred_element_type=jnp.float32)
    return acc


# ----------------------------------------------------------------------------
# Pallas kernels
# ----------------------------------------------------------------------------
def _conv1_ds_kernel(xw_ref, w1_ref, s1_ref, b1_ref, wd_ref, sd_ref, bd_ref,
                     y1_ref, res_ref, *, stride, tr, wo, cin):
    """conv3x3+BN+ReLU and fused 1x1-conv+BN downsample from the same x window."""
    xwin = xw_ref[0]                                    # (rows_in, Wp, Cin) bf16
    cout = y1_ref.shape[-1]

    acc = _conv3x3_taps(xwin, w1_ref, tr, wo, cin, stride)
    y = jnp.maximum(acc * s1_ref[...] + b1_ref[...], 0.0)
    y1_ref[...] = y.reshape(1, tr, wo, cout).astype(y1_ref.dtype)

    # 1x1 conv (stride) + BN residual: reads padded window at offset (1, 1).
    pd = jax.lax.slice(
        xwin, (1, 1, 0),
        (1 + (tr - 1) * stride + 1, 1 + (wo - 1) * stride + 1, cin),
        (stride, stride, 1)).reshape(tr * wo, cin)
    r = jnp.dot(pd, wd_ref[...], preferred_element_type=jnp.float32)
    r = r * sd_ref[...] + bd_ref[...]
    res_ref[...] = r.reshape(1, tr, wo, cout).astype(res_ref.dtype)


def _conv2_stats_kernel(xw_ref, w2_ref, s2_ref, b2_ref,
                        y2_ref, sum_ref, max_ref, *, tr, wo, cin):
    """conv3x3+BN plus CBAM channel-pool (per-batch channel sum/max) epilogue."""
    xwin = xw_ref[0]                                    # (rows_in, Wp, Cin) bf16
    cout = y2_ref.shape[-1]

    acc = _conv3x3_taps(xwin, w2_ref, tr, wo, cin, 1)
    y = acc * s2_ref[...] + b2_ref[...]
    y2_ref[...] = y.reshape(1, tr, wo, cout).astype(y2_ref.dtype)

    @pl.when(pl.program_id(1) == 0)
    def _():
        sum_ref[...] = jnp.zeros(sum_ref.shape, jnp.float32)
        max_ref[...] = jnp.full(max_ref.shape, -jnp.inf, jnp.float32)

    sum_ref[...] += jnp.sum(y, axis=0).reshape(1, 1, cout)
    max_ref[...] = jnp.maximum(max_ref[...],
                               jnp.max(y, axis=0).reshape(1, 1, cout))


def _cbam_fuse_kernel(wsa_ref, y2_ref, ca_ref, res_ref, o_ref, *, ho, wo):
    """y2*ca -> channel mean/max pool -> 7x7 spatial attn (49x2 VPU taps) ->
    sigmoid -> *sa -> +residual -> ReLU, all in one pass over the activation."""
    y2 = y2_ref[0].astype(jnp.float32)                  # (Ho, Wo, C)
    xca = y2 * ca_ref[...]                              # (1,1,C) broadcast
    pmean = jnp.mean(xca, axis=-1)                      # (Ho, Wo)  (XLU reduce)
    pmax = jnp.max(xca, axis=-1)                        # (Ho, Wo)

    def pad3(a):                                        # zero-pad by 3 (conv pad)
        zc = jnp.zeros((ho, 3), jnp.float32)
        a = jnp.concatenate([zc, a, zc], axis=1)
        zr = jnp.zeros((3, wo + 6), jnp.float32)
        return jnp.concatenate([zr, a, zr], axis=0)

    pm, px = pad3(pmean), pad3(pmax)

    sa = jnp.zeros((ho, wo), jnp.float32)
    for di in range(7):
        for dj in range(7):
            sa = sa + wsa_ref[di * 7 + dj] * \
                jax.lax.slice(pm, (di, dj), (di + ho, dj + wo))
            sa = sa + wsa_ref[49 + di * 7 + dj] * \
                jax.lax.slice(px, (di, dj), (di + ho, dj + wo))
    sa = jax.nn.sigmoid(sa)[:, :, None]                 # (Ho, Wo, 1)

    out = jnp.maximum(xca * sa + res_ref[0].astype(jnp.float32), 0.0)
    o_ref[0] = out.astype(o_ref.dtype)


# ----------------------------------------------------------------------------
# pallas_call wrappers
# ----------------------------------------------------------------------------
def conv1_and_downsample(x, w1_oihw, s1, b1, wd_io, sd, bd, *, stride):
    n, h, w, cin = x.shape
    cout = w1_oihw.shape[0]
    ho = (h - 1) // stride + 1
    wo = (w - 1) // stride + 1
    wp = w + 2

    xp = jnp.pad(x.astype(jnp.bfloat16), ((0, 0), (1, 1), (1, 1), (0, 0)))
    row_bytes = stride * wp * cin * 2 + wo * cout * (2 + 2 + 4)
    tr = _pick_row_tile(ho, row_bytes)
    nt = ho // tr
    rows_in = (tr - 1) * stride + 3
    xw = _stack_row_windows(xp, nt, tr, stride, rows_in)

    w1 = jnp.transpose(w1_oihw, (2, 3, 1, 0)).reshape(9, cin, cout).astype(jnp.bfloat16)
    wd = wd_io.astype(jnp.bfloat16)
    s1r = s1.reshape(1, cout).astype(jnp.float32)
    b1r = b1.reshape(1, cout).astype(jnp.float32)
    sdr = sd.reshape(1, cout).astype(jnp.float32)
    bdr = bd.reshape(1, cout).astype(jnp.float32)

    kernel = functools.partial(_conv1_ds_kernel, stride=stride, tr=tr, wo=wo, cin=cin)
    y1, res = pl.pallas_call(
        kernel,
        out_shape=(jax.ShapeDtypeStruct((n * nt, tr, wo, cout), jnp.bfloat16),
                   jax.ShapeDtypeStruct((n * nt, tr, wo, cout), jnp.bfloat16)),
        grid_spec=pltpu.PrefetchScalarGridSpec(
            num_scalar_prefetch=0,
            grid=(n, nt),
            in_specs=[
                pl.BlockSpec((1, rows_in, wp, cin), lambda b, i: (b * nt + i, 0, 0, 0)),
                pl.BlockSpec((9, cin, cout), lambda b, i: (0, 0, 0)),
                pl.BlockSpec((1, cout), lambda b, i: (0, 0)),
                pl.BlockSpec((1, cout), lambda b, i: (0, 0)),
                pl.BlockSpec((cin, cout), lambda b, i: (0, 0)),
                pl.BlockSpec((1, cout), lambda b, i: (0, 0)),
                pl.BlockSpec((1, cout), lambda b, i: (0, 0)),
            ],
            out_specs=(
                pl.BlockSpec((1, tr, wo, cout), lambda b, i: (b * nt + i, 0, 0, 0)),
                pl.BlockSpec((1, tr, wo, cout), lambda b, i: (b * nt + i, 0, 0, 0)),
            ),
        ),
        compiler_params=pltpu.CompilerParams(
            dimension_semantics=("parallel", "parallel"),
            vmem_limit_bytes=_VMEM_LIMIT),
    )(xw, w1, s1r, b1r, wd, sdr, bdr)
    return y1.reshape(n, ho, wo, cout), res.reshape(n, ho, wo, cout)


def conv2_with_pool_stats(y1, w2_oihw, s2, b2):
    n, h, w, cin = y1.shape
    cout = w2_oihw.shape[0]
    ho, wo = h, w
    wp = w + 2

    xp = jnp.pad(y1, ((0, 0), (1, 1), (1, 1), (0, 0)))
    row_bytes = wp * cin * 2 + wo * cout * (2 + 4)
    tr = _pick_row_tile(ho, row_bytes)
    nt = ho // tr
    rows_in = tr + 2
    xw = _stack_row_windows(xp, nt, tr, 1, rows_in)

    w2 = jnp.transpose(w2_oihw, (2, 3, 1, 0)).reshape(9, cin, cout).astype(jnp.bfloat16)
    s2r = s2.reshape(1, cout).astype(jnp.float32)
    b2r = b2.reshape(1, cout).astype(jnp.float32)

    kernel = functools.partial(_conv2_stats_kernel, tr=tr, wo=wo, cin=cin)
    y2, csum, cmax = pl.pallas_call(
        kernel,
        out_shape=(jax.ShapeDtypeStruct((n * nt, tr, wo, cout), jnp.bfloat16),
                   jax.ShapeDtypeStruct((n, 1, cout), jnp.float32),
                   jax.ShapeDtypeStruct((n, 1, cout), jnp.float32)),
        grid_spec=pltpu.PrefetchScalarGridSpec(
            num_scalar_prefetch=0,
            grid=(n, nt),    # reduction (row-tile) axis last, "arbitrary"
            in_specs=[
                pl.BlockSpec((1, rows_in, wp, cin), lambda b, i: (b * nt + i, 0, 0, 0)),
                pl.BlockSpec((9, cin, cout), lambda b, i: (0, 0, 0)),
                pl.BlockSpec((1, cout), lambda b, i: (0, 0)),
                pl.BlockSpec((1, cout), lambda b, i: (0, 0)),
            ],
            out_specs=(
                pl.BlockSpec((1, tr, wo, cout), lambda b, i: (b * nt + i, 0, 0, 0)),
                pl.BlockSpec((1, 1, cout), lambda b, i: (b, 0, 0)),
                pl.BlockSpec((1, 1, cout), lambda b, i: (b, 0, 0)),
            ),
        ),
        compiler_params=pltpu.CompilerParams(
            dimension_semantics=("parallel", "arbitrary"),
            vmem_limit_bytes=_VMEM_LIMIT),
    )(xw, w2, s2r, b2r)
    return y2.reshape(n, ho, wo, cout), csum[:, 0, :], cmax[:, 0, :]


def cbam_spatial_fuse(y2, ca, res, wsa):
    # TODO(synk): per-image (1,Ho,Wo,C) blocks; very large feature maps would
    # additionally want row tiling with a ±3-row halo for the 7x7 window.
    n, ho, wo, c = y2.shape
    kernel = functools.partial(_cbam_fuse_kernel, ho=ho, wo=wo)
    return pl.pallas_call(
        kernel,
        out_shape=jax.ShapeDtypeStruct((n, ho, wo, c), jnp.float32),
        grid_spec=pltpu.PrefetchScalarGridSpec(
            num_scalar_prefetch=0,
            grid=(n,),
            in_specs=[
                pl.BlockSpec(memory_space=pltpu.MemorySpace.SMEM),   # 7x7 weights (98,)
                pl.BlockSpec((1, ho, wo, c), lambda b: (b, 0, 0, 0)),
                pl.BlockSpec((1, 1, c), lambda b: (b, 0, 0)),
                pl.BlockSpec((1, ho, wo, c), lambda b: (b, 0, 0, 0)),
            ],
            out_specs=pl.BlockSpec((1, ho, wo, c), lambda b: (b, 0, 0, 0)),
        ),
        compiler_params=pltpu.CompilerParams(
            dimension_semantics=("parallel",),
            vmem_limit_bytes=_VMEM_LIMIT),
    )(wsa, y2, ca, res)


# ----------------------------------------------------------------------------
# BasicBlock forward
# ----------------------------------------------------------------------------
def basic_block_forward(x_nchw, p, *, stride=1):
    # TODO(synk): BatchNorm is inference-mode only (running stats folded into a
    # per-channel scale/shift); training-mode batch statistics are not reproduced.
    x = jnp.transpose(x_nchw, (0, 2, 3, 1)).astype(jnp.float32)      # NHWC
    n = x.shape[0]
    cout = p["conv1_w"].shape[0]

    s1, b1 = _fold_bn(p["bn1_g"], p["bn1_b"], p["bn1_m"], p["bn1_v"])
    s2, b2 = _fold_bn(p["bn2_g"], p["bn2_b"], p["bn2_m"], p["bn2_v"])
    sd, bd = _fold_bn(p["dbn_g"], p["dbn_b"], p["dbn_m"], p["dbn_v"])
    wd = jnp.transpose(p["down_w"][:, :, 0, 0], (1, 0))              # (Cin, Cout)

    # conv1 + BN + ReLU, with the 1x1-conv downsample residual fused in.
    y1, res = conv1_and_downsample(x, p["conv1_w"], s1, b1, wd, sd, bd,
                                   stride=stride)

    # conv2 + BN, with CBAM channel-pooling (sum/max over HW) as the epilogue.
    y2, csum, cmax = conv2_with_pool_stats(y1, p["conv2_w"], s2, b2)
    ho, wo = y2.shape[1], y2.shape[2]

    # Tiny shared-MLP channel attention in plain XLA (negligible FLOPs).
    avg = csum / float(ho * wo)
    mlp = lambda v: jax.nn.relu(v @ p["ca_w1"]) @ p["ca_w2"]
    ca = jax.nn.sigmoid(mlp(avg) + mlp(cmax)).reshape(n, 1, cout).astype(jnp.float32)

    # Fused CBAM spatial attention + residual add + final ReLU.
    wsa = p["sa_w"].reshape(98).astype(jnp.float32)                  # (2*7*7,)
    out = cbam_spatial_fuse(y2, ca, res, wsa)                        # (N, Ho, Wo, C)
    return jnp.transpose(out, (0, 3, 1, 2))                          # NCHW


# ----------------------------------------------------------------------------
# Pure-JAX f32 reference (for correctness check) & parameter init
# ----------------------------------------------------------------------------
def _ref_forward(x_nchw, p, *, stride=1):
    x = jnp.transpose(x_nchw, (0, 2, 3, 1)).astype(jnp.float32)

    def conv(z, w_oihw, s, pad):
        return jax.lax.conv_general_dilated(
            z, jnp.transpose(w_oihw, (2, 3, 1, 0)), (s, s),
            [(pad, pad), (pad, pad)],
            dimension_numbers=("NHWC", "HWIO", "NHWC"))

    def bn(z, g, b, m, v):
        return (z - m) * g / jnp.sqrt(v + EPS) + b

    out = jax.nn.relu(bn(conv(x, p["conv1_w"], stride, 1),
                         p["bn1_g"], p["bn1_b"], p["bn1_m"], p["bn1_v"]))
    out = bn(conv(out, p["conv2_w"], 1, 1),
             p["bn2_g"], p["bn2_b"], p["bn2_m"], p["bn2_v"])
    res = bn(conv(x, p["down_w"], stride, 0),
             p["dbn_g"], p["dbn_b"], p["dbn_m"], p["dbn_v"])

    avg = jnp.mean(out, axis=(1, 2))
    mx = jnp.max(out, axis=(1, 2))
    mlp = lambda v: jax.nn.relu(v @ p["ca_w1"]) @ p["ca_w2"]
    ca = jax.nn.sigmoid(mlp(avg) + mlp(mx))[:, None, None, :]
    out = out * ca
    sp = jnp.concatenate([jnp.mean(out, axis=-1, keepdims=True),
                          jnp.max(out, axis=-1, keepdims=True)], axis=-1)
    sa = jax.nn.sigmoid(conv(sp, p["sa_w"], 1, 3))
    out = out * sa
    out = jax.nn.relu(out + res)
    return jnp.transpose(out, (0, 3, 1, 2))


def init_params(key, cin, cout, reduction):
    ks = jax.random.split(key, 20)
    nrm = lambda k, s, sc=0.1: sc * jax.random.normal(k, s, jnp.float32)
    return {
        "conv1_w": nrm(ks[0], (cout, cin, 3, 3), 0.2),
        "bn1_g": 1.0 + nrm(ks[1], (cout,)),
        "bn1_b": nrm(ks[2], (cout,)),
        "bn1_m": nrm(ks[3], (cout,)),
        "bn1_v": 0.5 + jnp.abs(nrm(ks[4], (cout,), 0.5)),
        "conv2_w": nrm(ks[5], (cout, cout, 3, 3), 0.2),
        "bn2_g": 1.0 + nrm(ks[6], (cout,)),
        "bn2_b": nrm(ks[7], (cout,)),
        "bn2_m": nrm(ks[8], (cout,)),
        "bn2_v": 0.5 + jnp.abs(nrm(ks[9], (cout,), 0.5)),
        "down_w": nrm(ks[10], (cout, cin, 1, 1), 0.2),
        "dbn_g": 1.0 + nrm(ks[11], (cout,)),
        "dbn_b": nrm(ks[12], (cout,)),
        "dbn_m": nrm(ks[13], (cout,)),
        "dbn_v": 0.5 + jnp.abs(nrm(ks[14], (cout,), 0.5)),
        "ca_w1": nrm(ks[15], (cout, cout // reduction), 0.3),
        "ca_w2": nrm(ks[16], (cout // reduction, cout), 0.3),
        "sa_w": nrm(ks[17], (1, 2, 7, 7), 0.3),
    }


if __name__ == "__main__":
    key = jax.random.PRNGKey(0)
    kx, kp = jax.random.split(key)
    N, CIN, H, W = 2, 4, 16, 16
    COUT, STRIDE, RED = 8, 1, 4

    x = jax.random.normal(kx, (N, CIN, H, W), jnp.float32)
    params = init_params(kp, CIN, COUT, RED)

    fwd = jax.jit(functools.partial(basic_block_forward, stride=STRIDE))
    out = fwd(x, params)
    jax.block_until_ready(out)

    ref = _ref_forward(x, params, stride=STRIDE)
    out_np, ref_np = np.asarray(out), np.asarray(ref)
    # bf16 activations/weights (f32 accumulation) vs. f32 reference:
    rel_l2 = np.linalg.norm(out_np - ref_np) / (np.linalg.norm(ref_np) + 1e-12)
    assert rel_l2 < 2e-2, f"relative L2 error too high: {rel_l2}"
    np.testing.assert_allclose(out_np, ref_np, rtol=1e-1, atol=1e-1)
    assert out.shape == (N, COUT, H // STRIDE, W // STRIDE)
    print("KERNEL_OK")
</pallas_src>

<mosaic_0001>
module attributes {stable_mosaic.version = 11 : i64} {
  func.func @_conv1_ds_kernel(%arg0: i32, %arg1: i32, %arg2: memref<1x18x18x4xbf16, #tpu.memory_space<vmem>>, %arg3: memref<9x4x8xbf16, #tpu.memory_space<vmem>>, %arg4: memref<1x8xf32, #tpu.memory_space<vmem>>, %arg5: memref<1x8xf32, #tpu.memory_space<vmem>>, %arg6: memref<4x8xbf16, #tpu.memory_space<vmem>>, %arg7: memref<1x8xf32, #tpu.memory_space<vmem>>, %arg8: memref<1x8xf32, #tpu.memory_space<vmem>>, %arg9: memref<1x16x16x8xbf16, #tpu.memory_space<vmem>>, %arg10: memref<1x16x16x8xbf16, #tpu.memory_space<vmem>>) attributes {dimension_semantics = [#tpu.dimension_semantics<parallel>, #tpu.dimension_semantics<parallel>], iteration_bounds = array<i64: 2, 1>, scalar_prefetch = 0 : i64, scratch_operands = 0 : i64, tpu.core_type = #tpu.core_type<tc>, window_params = [{transform_indices = @transform_0, window_bounds = array<i64: 1, 18, 18, 4>}, {pipeline_mode = #tpu.pipeline_mode<synchronous>, transform_indices = @transform_1, window_bounds = array<i64: 9, 4, 8>}, {pipeline_mode = #tpu.pipeline_mode<synchronous>, transform_indices = @transform_2, window_bounds = array<i64: 1, 8>}, {pipeline_mode = #tpu.pipeline_mode<synchronous>, transform_indices = @transform_3, window_bounds = array<i64: 1, 8>}, {pipeline_mode = #tpu.pipeline_mode<synchronous>, transform_indices = @transform_4, window_bounds = array<i64: 4, 8>}, {pipeline_mode = #tpu.pipeline_mode<synchronous>, transform_indices = @transform_5, window_bounds = array<i64: 1, 8>}, {pipeline_mode = #tpu.pipeline_mode<synchronous>, transform_indices = @transform_6, window_bounds = array<i64: 1, 8>}, {transform_indices = @transform_7, window_bounds = array<i64: 1, 16, 16, 8>}, {transform_indices = @transform_8, window_bounds = array<i64: 1, 16, 16, 8>}]} {
    %c0 = arith.constant 0 : index
    %c0_0 = arith.constant 0 : index
    %c0_1 = arith.constant 0 : index
    %c0_2 = arith.constant 0 : index
    %0 = vector.load %arg2[%c0, %c0_0, %c0_1, %c0_2] : memref<1x18x18x4xbf16, #tpu.memory_space<vmem>>, vector<1x18x18x4xbf16>
    %1 = vector.shape_cast %0 : vector<1x18x18x4xbf16> to vector<18x18x4xbf16>
    %cst = arith.constant 0.000000e+00 : f32
    %2 = vector.broadcast %cst : f32 to vector<256x8xf32>
    %3 = vector.extract_strided_slice %1 {offsets = [0, 0, 0], sizes = [16, 16, 4], strides = [1, 1, 1]} : vector<18x18x4xbf16> to vector<16x16x4xbf16>
    %4 = vector.shape_cast %3 : vector<16x16x4xbf16> to vector<256x4xbf16>
    %c0_3 = arith.constant 0 : index
    %c0_4 = arith.constant 0 : index
    %c0_5 = arith.constant 0 : index
    %5 = vector.load %arg3[%c0_3, %c0_4, %c0_5] : memref<9x4x8xbf16, #tpu.memory_space<vmem>>, vector<1x4x8xbf16>
    %6 = vector.shape_cast %5 : vector<1x4x8xbf16> to vector<4x8xbf16>
    %cst_6 = arith.constant dense<0.000000e+00> : vector<256x8xf32>
    %7 = tpu.matmul %4, %6, %cst_6 {dimension_numbers = #tpu.dot_dimension_numbers<[1], [0], [0], [1], [0, 0, 1, 1], [], []>} : vector<256x4xbf16>, vector<4x8xbf16>, vector<256x8xf32> -> vector<256x8xf32>
    %8 = arith.addf %2, %7 : vector<256x8xf32>
    %9 = vector.extract_strided_slice %1 {offsets = [0, 1, 0], sizes = [16, 16, 4], strides = [1, 1, 1]} : vector<18x18x4xbf16> to vector<16x16x4xbf16>
    %10 = vector.shape_cast %9 : vector<16x16x4xbf16> to vector<256x4xbf16>
    %c1 = arith.constant 1 : index
    %c0_7 = arith.constant 0 : index
    %c0_8 = arith.constant 0 : index
    %11 = vector.load %arg3[%c1, %c0_7, %c0_8] : memref<9x4x8xbf16, #tpu.memory_space<vmem>>, vector<1x4x8xbf16>
    %12 = vector.shape_cast %11 : vector<1x4x8xbf16> to vector<4x8xbf16>
    %cst_9 = arith.constant dense<0.000000e+00> : vector<256x8xf32>
    %13 = tpu.matmul %10, %12, %cst_9 {dimension_numbers = #tpu.dot_dimension_numbers<[1], [0], [0], [1], [0, 0, 1, 1], [], []>} : vector<256x4xbf16>, vector<4x8xbf16>, vector<256x8xf32> -> vector<256x8xf32>
    %14 = arith.addf %8, %13 : vector<256x8xf32>
    %15 = vector.extract_strided_slice %1 {offsets = [0, 2, 0], sizes = [16, 16, 4], strides = [1, 1, 1]} : vector<18x18x4xbf16> to vector<16x16x4xbf16>
    %16 = vector.shape_cast %15 : vector<16x16x4xbf16> to vector<256x4xbf16>
    %c2 = arith.constant 2 : index
    %c0_10 = arith.constant 0 : index
    %c0_11 = arith.constant 0 : index
    %17 = vector.load %arg3[%c2, %c0_10, %c0_11] : memref<9x4x8xbf16, #tpu.memory_space<vmem>>, vector<1x4x8xbf16>
    %18 = vector.shape_cast %17 : vector<1x4x8xbf16> to vector<4x8xbf16>
    %cst_12 = arith.constant dense<0.000000e+00> : vector<256x8xf32>
    %19 = tpu.matmul %16, %18, %cst_12 {dimension_numbers = #tpu.dot_dimension_numbers<[1], [0], [0], [1], [0, 0, 1, 1], [], []>} : vector<256x4xbf16>, vector<4x8xbf16>, vector<256x8xf32> -> vector<256x8xf32>
    %20 = arith.addf %14, %19 : vector<256x8xf32>
    %21 = vector.extract_strided_slice %1 {offsets = [1, 0, 0], sizes = [16, 16, 4], strides = [1, 1, 1]} : vector<18x18x4xbf16> to vector<16x16x4xbf16>
    %22 = vector.shape_cast %21 : vector<16x16x4xbf16> to vector<256x4xbf16>
    %c3 = arith.constant 3 : index
    %c0_13 = arith.constant 0 : index
    %c0_14 = arith.constant 0 : index
    %23 = vector.load %arg3[%c3, %c0_13, %c0_14] : memref<9x4x8xbf16, #tpu.memory_space<vmem>>, vector<1x4x8xbf16>
    %24 = vector.shape_cast %23 : vector<1x4x8xbf16> to vector<4x8xbf16>
    %cst_15 = arith.constant dense<0.000000e+00> : vector<256x8xf32>
    %25 = tpu.matmul %22, %24, %cst_15 {dimension_numbers = #tpu.dot_dimension_numbers<[1], [0], [0], [1], [0, 0, 1, 1], [], []>} : vector<256x4xbf16>, vector<4x8xbf16>, vector<256x8xf32> -> vector<256x8xf32>
    %26 = arith.addf %20, %25 : vector<256x8xf32>
    %27 = vector.extract_strided_slice %1 {offsets = [1, 1, 0], sizes = [16, 16, 4], strides = [1, 1, 1]} : vector<18x18x4xbf16> to vector<16x16x4xbf16>
    %28 = vector.shape_cast %27 : vector<16x16x4xbf16> to vector<256x4xbf16>
    %c4 = arith.constant 4 : index
    %c0_16 = arith.constant 0 : index
    %c0_17 = arith.constant 0 : index
    %29 = vector.load %arg3[%c4, %c0_16, %c0_17] : memref<9x4x8xbf16, #tpu.memory_space<vmem>>, vector<1x4x8xbf16>
    %30 = vector.shape_cast %29 : vector<1x4x8xbf16> to vector<4x8xbf16>
    %cst_18 = arith.constant dense<0.000000e+00> : vector<256x8xf32>
    %31 = tpu.matmul %28, %30, %cst_18 {dimension_numbers = #tpu.dot_dimension_numbers<[1], [0], [0], [1], [0, 0, 1, 1], [], []>} : vector<256x4xbf16>, vector<4x8xbf16>, vector<256x8xf32> -> vector<256x8xf32>
    %32 = arith.addf %26, %31 : vector<256x8xf32>
    %33 = vector.extract_strided_slice %1 {offsets = [1, 2, 0], sizes = [16, 16, 4], strides = [1, 1, 1]} : vector<18x18x4xbf16> to vector<16x16x4xbf16>
    %34 = vector.shape_cast %33 : vector<16x16x4xbf16> to vector<256x4xbf16>
    %c5 = arith.constant 5 : index
    %c0_19 = arith.constant 0 : index
    %c0_20 = arith.constant 0 : index
    %35 = vector.load %arg3[%c5, %c0_19, %c0_20] : memref<9x4x8xbf16, #tpu.memory_space<vmem>>, vector<1x4x8xbf16>
    %36 = vector.shape_cast %35 : vector<1x4x8xbf16> to vector<4x8xbf16>
    %cst_21 = arith.constant dense<0.000000e+00> : vector<256x8xf32>
    %37 = tpu.matmul %34, %36, %cst_21 {dimension_numbers = #tpu.dot_dimension_numbers<[1], [0], [0], [1], [0, 0, 1, 1], [], []>} : vector<256x4xbf16>, vector<4x8xbf16>, vector<256x8xf32> -> vector<256x8xf32>
    %38 = arith.addf %32, %37 : vector<256x8xf32>
    %39 = vector.extract_strided_slice %1 {offsets = [2, 0, 0], sizes = [16, 16, 4], strides = [1, 1, 1]} : vector<18x18x4xbf16> to vector<16x16x4xbf16>
    %40 = vector.shape_cast %39 : vector<16x16x4xbf16> to vector<256x4xbf16>
    %c6 = arith.constant 6 : index
    %c0_22 = arith.constant 0 : index
    %c0_23 = arith.constant 0 : index
    %41 = vector.load %arg3[%c6, %c0_22, %c0_23] : memref<9x4x8xbf16, #tpu.memory_space<vmem>>, vector<1x4x8xbf16>
    %42 = vector.shape_cast %41 : vector<1x4x8xbf16> to vector<4x8xbf16>
    %cst_24 = arith.constant dense<0.000000e+00> : vector<256x8xf32>
    %43 = tpu.matmul %40, %42, %cst_24 {dimension_numbers = #tpu.dot_dimension_numbers<[1], [0], [0], [1], [0, 0, 1, 1], [], []>} : vector<256x4xbf16>, vector<4x8xbf16>, vector<256x8xf32> -> vector<256x8xf32>
    %44 = arith.addf %38, %43 : vector<256x8xf32>
    %45 = vector.extract_strided_slice %1 {offsets = [2, 1, 0], sizes = [16, 16, 4], strides = [1, 1, 1]} : vector<18x18x4xbf16> to vector<16x16x4xbf16>
    %46 = vector.shape_cast %45 : vector<16x16x4xbf16> to vector<256x4xbf16>
    %c7 = arith.constant 7 : index
    %c0_25 = arith.constant 0 : index
    %c0_26 = arith.constant 0 : index
    %47 = vector.load %arg3[%c7, %c0_25, %c0_26] : memref<9x4x8xbf16, #tpu.memory_space<vmem>>, vector<1x4x8xbf16>
    %48 = vector.shape_cast %47 : vector<1x4x8xbf16> to vector<4x8xbf16>
    %cst_27 = arith.constant dense<0.000000e+00> : vector<256x8xf32>
    %49 = tpu.matmul %46, %48, %cst_27 {dimension_numbers = #tpu.dot_dimension_numbers<[1], [0], [0], [1], [0, 0, 1, 1], [], []>} : vector<256x4xbf16>, vector<4x8xbf16>, vector<256x8xf32> -> vector<256x8xf32>
    %50 = arith.addf %44, %49 : vector<256x8xf32>
    %51 = vector.extract_strided_slice %1 {offsets = [2, 2, 0], sizes = [16, 16, 4], strides = [1, 1, 1]} : vector<18x18x4xbf16> to vector<16x16x4xbf16>
    %52 = vector.shape_cast %51 : vector<16x16x4xbf16> to vector<256x4xbf16>
    %c8 = arith.constant 8 : index
    %c0_28 = arith.constant 0 : index
    %c0_29 = arith.constant 0 : index
    %53 = vector.load %arg3[%c8, %c0_28, %c0_29] : memref<9x4x8xbf16, #tpu.memory_space<vmem>>, vector<1x4x8xbf16>
    %54 = vector.shape_cast %53 : vector<1x4x8xbf16> to vector<4x8xbf16>
    %cst_30 = arith.constant dense<0.000000e+00> : vector<256x8xf32>
    %55 = tpu.matmul %52, %54, %cst_30 {dimension_numbers = #tpu.dot_dimension_numbers<[1], [0], [0], [1], [0, 0, 1, 1], [], []>} : vector<256x4xbf16>, vector<4x8xbf16>, vector<256x8xf32> -> vector<256x8xf32>
    %56 = arith.addf %50, %55 : vector<256x8xf32>
    %c0_31 = arith.constant 0 : index
    %c0_32 = arith.constant 0 : index
    %57 = vector.load %arg4[%c0_31, %c0_32] : memref<1x8xf32, #tpu.memory_space<vmem>>, vector<1x8xf32>
    %58 = vector.broadcast %57 : vector<1x8xf32> to vector<256x8xf32>
    %59 = arith.mulf %56, %58 : vector<256x8xf32>
    %c0_33 = arith.constant 0 : index
    %c0_34 = arith.constant 0 : index
    %60 = vector.load %arg5[%c0_33, %c0_34] : memref<1x8xf32, #tpu.memory_space<vmem>>, vector<1x8xf32>
    %61 = vector.broadcast %60 : vector<1x8xf32> to vector<256x8xf32>
    %62 = arith.addf %59, %61 : vector<256x8xf32>
    %cst_35 = arith.constant 0.000000e+00 : f32
    %63 = vector.broadcast %cst_35 : f32 to vector<256x8xf32>
    %64 = arith.maximumf %62, %63 : vector<256x8xf32>
    %65 = vector.shape_cast %64 : vector<256x8xf32> to vector<1x16x16x8xf32>
    %66 = arith.truncf %65 : vector<1x16x16x8xf32> to vector<1x16x16x8xbf16>
    %c0_36 = arith.constant 0 : index
    %c0_37 = arith.constant 0 : index
    %c0_38 = arith.constant 0 : index
    %c0_39 = arith.constant 0 : index
    %67 = vector.load %arg9[%c0_36, %c0_37, %c0_38, %c0_39] : memref<1x16x16x8xbf16, #tpu.memory_space<vmem>>, vector<1x16x16x8xbf16>
    tpu.vector_store %arg9[%c0_36, %c0_37, %c0_38, %c0_39], %66 {strides = array<i32>} : memref<1x16x16x8xbf16, #tpu.memory_space<vmem>>, vector<1x16x16x8xbf16>,
    %68 = vector.extract_strided_slice %1 {offsets = [1, 1, 0], sizes = [16, 16, 4], strides = [1, 1, 1]} : vector<18x18x4xbf16> to vector<16x16x4xbf16>
    %69 = vector.shape_cast %68 : vector<16x16x4xbf16> to vector<256x4xbf16>
    %c0_40 = arith.constant 0 : index
    %c0_41 = arith.constant 0 : index
    %70 = vector.load %arg6[%c0_40, %c0_41] : memref<4x8xbf16, #tpu.memory_space<vmem>>, vector<4x8xbf16>
    %cst_42 = arith.constant dense<0.000000e+00> : vector<256x8xf32>
    %71 = tpu.matmul %69, %70, %cst_42 {dimension_numbers = #tpu.dot_dimension_numbers<[1], [0], [0], [1], [0, 0, 1, 1], [], []>} : vector<256x4xbf16>, vector<4x8xbf16>, vector<256x8xf32> -> vector<256x8xf32>
    %c0_43 = arith.constant 0 : index
    %c0_44 = arith.constant 0 : index
    %72 = vector.load %arg7[%c0_43, %c0_44] : memref<1x8xf32, #tpu.memory_space<vmem>>, vector<1x8xf32>
    %73 = vector.broadcast %72 : vector<1x8xf32> to vector<256x8xf32>
    %74 = arith.mulf %71, %73 : vector<256x8xf32>
    %c0_45 = arith.constant 0 : index
    %c0_46 = arith.constant 0 : index
    %75 = vector.load %arg8[%c0_45, %c0_46] : memref<1x8xf32, #tpu.memory_space<vmem>>, vector<1x8xf32>
    %76 = vector.broadcast %75 : vector<1x8xf32> to vector<256x8xf32>
    %77 = arith.addf %74, %76 : vector<256x8xf32>
    %78 = vector.shape_cast %77 : vector<256x8xf32> to vector<1x16x16x8xf32>
    %79 = arith.truncf %78 : vector<1x16x16x8xf32> to vector<1x16x16x8xbf16>
    %c0_47 = arith.constant 0 : index
    %c0_48 = arith.constant 0 : index
    %c0_49 = arith.constant 0 : index
    %c0_50 = arith.constant 0 : index
    %80 = vector.load %arg10[%c0_47, %c0_48, %c0_49, %c0_50] : memref<1x16x16x8xbf16, #tpu.memory_space<vmem>>, vector<1x16x16x8xbf16>
    tpu.vector_store %arg10[%c0_47, %c0_48, %c0_49, %c0_50], %79 {strides = array<i32>} : memref<1x16x16x8xbf16, #tpu.memory_space<vmem>>, vector<1x16x16x8xbf16>,
    return
  }
  func.func @transform_0(%arg0: i32, %arg1: i32) -> (i32, i32, i32, i32) {
    %c1_i32 = arith.constant 1 : i32
    %0 = arith.muli %arg0, %c1_i32 : i32
    %1 = arith.addi %0, %arg1 : i32
    %c0_i32 = arith.constant 0 : i32
    %c0_i32_0 = arith.constant 0 : i32
    %c0_i32_1 = arith.constant 0 : i32
    %c0_i32_2 = arith.constant 0 : i32
    return %1, %c0_i32, %c0_i32_0, %c0_i32_1 : i32, i32, i32, i32
  }
  func.func @transform_1(%arg0: i32, %arg1: i32) -> (i32, i32, i32) {
    %c0_i32 = arith.constant 0 : i32
    %c0_i32_0 = arith.constant 0 : i32
    %c0_i32_1 = arith.constant 0 : i32
    %c0_i32_2 = arith.constant 0 : i32
    return %c0_i32, %c0_i32_0, %c0_i32_1 : i32, i32, i32
  }
  func.func @transform_2(%arg0: i32, %arg1: i32) -> (i32, i32) {
    %c0_i32 = arith.constant 0 : i32
    %c0_i32_0 = arith.constant 0 : i32
    %c0_i32_1 = arith.constant 0 : i32
    return %c0_i32, %c0_i32_0 : i32, i32
  }
  func.func @transform_3(%arg0: i32, %arg1: i32) -> (i32, i32) {
    %c0_i32 = arith.constant 0 : i32
    %c0_i32_0 = arith.constant 0 : i32
    %c0_i32_1 = arith.constant 0 : i32
    return %c0_i32, %c0_i32_0 : i32, i32
  }
  func.func @transform_4(%arg0: i32, %arg1: i32) -> (i32, i32) {
    %c0_i32 = arith.constant 0 : i32
    %c0_i32_0 = arith.constant 0 : i32
    %c0_i32_1 = arith.constant 0 : i32
    return %c0_i32, %c0_i32_0 : i32, i32
  }
  func.func @transform_5(%arg0: i32, %arg1: i32) -> (i32, i32) {
    %c0_i32 = arith.constant 0 : i32
    %c0_i32_0 = arith.constant 0 : i32
    %c0_i32_1 = arith.constant 0 : i32
    return %c0_i32, %c0_i32_0 : i32, i32
  }
  func.func @transform_6(%arg0: i32, %arg1: i32) -> (i32, i32) {
    %c0_i32 = arith.constant 0 : i32
    %c0_i32_0 = arith.constant 0 : i32
    %c0_i32_1 = arith.constant 0 : i32
    return %c0_i32, %c0_i32_0 : i32, i32
  }
  func.func @transform_7(%arg0: i32, %arg1: i32) -> (i32, i32, i32, i32) {
    %c1_i32 = arith.constant 1 : i32
    %0 = arith.muli %arg0, %c1_i32 : i32
    %1 = arith.addi %0, %arg1 : i32
    %c0_i32 = arith.constant 0 : i32
    %c0_i32_0 = arith.constant 0 : i32
    %c0_i32_1 = arith.constant 0 : i32
    %c0_i32_2 = arith.constant 0 : i32
    return %1, %c0_i32, %c0_i32_0, %c0_i32_1 : i32, i32, i32, i32
  }
  func.func @transform_8(%arg0: i32, %arg1: i32) -> (i32, i32, i32, i32) {
    %c1_i32 = arith.constant 1 : i32
    %0 = arith.muli %arg0, %c1_i32 : i32
    %1 = arith.addi %0, %arg1 : i32
    %c0_i32 = arith.constant 0 : i32
    %c0_i32_0 = arith.constant 0 : i32
    %c0_i32_1 = arith.constant 0 : i32
    %c0_i32_2 = arith.constant 0 : i32
    return %1, %c0_i32, %c0_i32_0, %c0_i32_1 : i32, i32, i32, i32
  }
}

module attributes {stable_mosaic.version = 11 : i64} {
  func.func @_conv2_stats_kernel(%arg0: i32, %arg1: i32, %arg2: memref<1x18x18x8xbf16, #tpu.memory_space<vmem>>, %arg3: memref<9x8x8xbf16, #tpu.memory_space<vmem>>, %arg4: memref<1x8xf32, #tpu.memory_space<vmem>>, %arg5: memref<1x8xf32, #tpu.memory_space<vmem>>, %arg6: memref<1x16x16x8xbf16, #tpu.memory_space<vmem>>, %arg7: memref<1x1x8xf32, #tpu.memory_space<vmem>>, %arg8: memref<1x1x8xf32, #tpu.memory_space<vmem>>) attributes {dimension_semantics = [#tpu.dimension_semantics<parallel>, #tpu.dimension_semantics<arbitrary>], iteration_bounds = array<i64: 2, 1>, scalar_prefetch = 0 : i64, scratch_operands = 0 : i64, tpu.core_type = #tpu.core_type<tc>, window_params = [{transform_indices = @transform_0, window_bounds = array<i64: 1, 18, 18, 8>}, {pipeline_mode = #tpu.pipeline_mode<synchronous>, transform_indices = @transform_1, window_bounds = array<i64: 9, 8, 8>}, {pipeline_mode = #tpu.pipeline_mode<synchronous>, transform_indices = @transform_2, window_bounds = array<i64: 1, 8>}, {pipeline_mode = #tpu.pipeline_mode<synchronous>, transform_indices = @transform_3, window_bounds = array<i64: 1, 8>}, {transform_indices = @transform_4, window_bounds = array<i64: 1, 16, 16, 8>}, {transform_indices = @transform_5, window_bounds = array<i64: 1, 1, 8>}, {transform_indices = @transform_6, window_bounds = array<i64: 1, 1, 8>}]} {
    %c0 = arith.constant 0 : index
    %c0_0 = arith.constant 0 : index
    %c0_1 = arith.constant 0 : index
    %c0_2 = arith.constant 0 : index
    %0 = vector.load %arg2[%c0, %c0_0, %c0_1, %c0_2] : memref<1x18x18x8xbf16, #tpu.memory_space<vmem>>, vector<1x18x18x8xbf16>
    %1 = vector.shape_cast %0 : vector<1x18x18x8xbf16> to vector<18x18x8xbf16>
    %cst = arith.constant 0.000000e+00 : f32
    %2 = vector.broadcast %cst : f32 to vector<256x8xf32>
    %3 = vector.extract_strided_slice %1 {offsets = [0, 0, 0], sizes = [16, 16, 8], strides = [1, 1, 1]} : vector<18x18x8xbf16> to vector<16x16x8xbf16>
    %4 = vector.shape_cast %3 : vector<16x16x8xbf16> to vector<256x8xbf16>
    %c0_3 = arith.constant 0 : index
    %c0_4 = arith.constant 0 : index
    %c0_5 = arith.constant 0 : index
    %5 = vector.load %arg3[%c0_3, %c0_4, %c0_5] : memref<9x8x8xbf16, #tpu.memory_space<vmem>>, vector<1x8x8xbf16>
    %6 = vector.shape_cast %5 : vector<1x8x8xbf16> to vector<8x8xbf16>
    %cst_6 = arith.constant dense<0.000000e+00> : vector<256x8xf32>
    %7 = tpu.matmul %4, %6, %cst_6 {dimension_numbers = #tpu.dot_dimension_numbers<[1], [0], [0], [1], [0, 0, 1, 1], [], []>} : vector<256x8xbf16>, vector<8x8xbf16>, vector<256x8xf32> -> vector<256x8xf32>
    %8 = arith.addf %2, %7 : vector<256x8xf32>
    %9 = vector.extract_strided_slice %1 {offsets = [0, 1, 0], sizes = [16, 16, 8], strides = [1, 1, 1]} : vector<18x18x8xbf16> to vector<16x16x8xbf16>
    %10 = vector.shape_cast %9 : vector<16x16x8xbf16> to vector<256x8xbf16>
    %c1 = arith.constant 1 : index
    %c0_7 = arith.constant 0 : index
    %c0_8 = arith.constant 0 : index
    %11 = vector.load %arg3[%c1, %c0_7, %c0_8] : memref<9x8x8xbf16, #tpu.memory_space<vmem>>, vector<1x8x8xbf16>
    %12 = vector.shape_cast %11 : vector<1x8x8xbf16> to vector<8x8xbf16>
    %cst_9 = arith.constant dense<0.000000e+00> : vector<256x8xf32>
    %13 = tpu.matmul %10, %12, %cst_9 {dimension_numbers = #tpu.dot_dimension_numbers<[1], [0], [0], [1], [0, 0, 1, 1], [], []>} : vector<256x8xbf16>, vector<8x8xbf16>, vector<256x8xf32> -> vector<256x8xf32>
    %14 = arith.addf %8, %13 : vector<256x8xf32>
    %15 = vector.extract_strided_slice %1 {offsets = [0, 2, 0], sizes = [16, 16, 8], strides = [1, 1, 1]} : vector<18x18x8xbf16> to vector<16x16x8xbf16>
    %16 = vector.shape_cast %15 : vector<16x16x8xbf16> to vector<256x8xbf16>
    %c2 = arith.constant 2 : index
    %c0_10 = arith.constant 0 : index
    %c0_11 = arith.constant 0 : index
    %17 = vector.load %arg3[%c2, %c0_10, %c0_11] : memref<9x8x8xbf16, #tpu.memory_space<vmem>>, vector<1x8x8xbf16>
    %18 = vector.shape_cast %17 : vector<1x8x8xbf16> to vector<8x8xbf16>
    %cst_12 = arith.constant dense<0.000000e+00> : vector<256x8xf32>
    %19 = tpu.matmul %16, %18, %cst_12 {dimension_numbers = #tpu.dot_dimension_numbers<[1], [0], [0], [1], [0, 0, 1, 1], [], []>} : vector<256x8xbf16>, vector<8x8xbf16>, vector<256x8xf32> -> vector<256x8xf32>
    %20 = arith.addf %14, %19 : vector<256x8xf32>
    %21 = vector.extract_strided_slice %1 {offsets = [1, 0, 0], sizes = [16, 16, 8], strides = [1, 1, 1]} : vector<18x18x8xbf16> to vector<16x16x8xbf16>
    %22 = vector.shape_cast %21 : vector<16x16x8xbf16> to vector<256x8xbf16>
    %c3 = arith.constant 3 : index
    %c0_13 = arith.constant 0 : index
    %c0_14 = arith.constant 0 : index
    %23 = vector.load %arg3[%c3, %c0_13, %c0_14] : memref<9x8x8xbf16, #tpu.memory_space<vmem>>, vector<1x8x8xbf16>
    %24 = vector.shape_cast %23 : vector<1x8x8xbf16> to vector<8x8xbf16>
    %cst_15 = arith.constant dense<0.000000e+00> : vector<256x8xf32>
    %25 = tpu.matmul %22, %24, %cst_15 {dimension_numbers = #tpu.dot_dimension_numbers<[1], [0], [0], [1], [0, 0, 1, 1], [], []>} : vector<256x8xbf16>, vector<8x8xbf16>, vector<256x8xf32> -> vector<256x8xf32>
    %26 = arith.addf %20, %25 : vector<256x8xf32>
    %27 = vector.extract_strided_slice %1 {offsets = [1, 1, 0], sizes = [16, 16, 8], strides = [1, 1, 1]} : vector<18x18x8xbf16> to vector<16x16x8xbf16>
    %28 = vector.shape_cast %27 : vector<16x16x8xbf16> to vector<256x8xbf16>
    %c4 = arith.constant 4 : index
    %c0_16 = arith.constant 0 : index
    %c0_17 = arith.constant 0 : index
    %29 = vector.load %arg3[%c4, %c0_16, %c0_17] : memref<9x8x8xbf16, #tpu.memory_space<vmem>>, vector<1x8x8xbf16>
    %30 = vector.shape_cast %29 : vector<1x8x8xbf16> to vector<8x8xbf16>
    %cst_18 = arith.constant dense<0.000000e+00> : vector<256x8xf32>
    %31 = tpu.matmul %28, %30, %cst_18 {dimension_numbers = #tpu.dot_dimension_numbers<[1], [0], [0], [1], [0, 0, 1, 1], [], []>} : vector<256x8xbf16>, vector<8x8xbf16>, vector<256x8xf32> -> vector<256x8xf32>
    %32 = arith.addf %26, %31 : vector<256x8xf32>
    %33 = vector.extract_strided_slice %1 {offsets = [1, 2, 0], sizes = [16, 16, 8], strides = [1, 1, 1]} : vector<18x18x8xbf16> to vector<16x16x8xbf16>
    %34 = vector.shape_cast %33 : vector<16x16x8xbf16> to vector<256x8xbf16>
    %c5 = arith.constant 5 : index
    %c0_19 = arith.constant 0 : index
    %c0_20 = arith.constant 0 : index
    %35 = vector.load %arg3[%c5, %c0_19, %c0_20] : memref<9x8x8xbf16, #tpu.memory_space<vmem>>, vector<1x8x8xbf16>
    %36 = vector.shape_cast %35 : vector<1x8x8xbf16> to vector<8x8xbf16>
    %cst_21 = arith.constant dense<0.000000e+00> : vector<256x8xf32>
    %37 = tpu.matmul %34, %36, %cst_21 {dimension_numbers = #tpu.dot_dimension_numbers<[1], [0], [0], [1], [0, 0, 1, 1], [], []>} : vector<256x8xbf16>, vector<8x8xbf16>, vector<256x8xf32> -> vector<256x8xf32>
    %38 = arith.addf %32, %37 : vector<256x8xf32>
    %39 = vector.extract_strided_slice %1 {offsets = [2, 0, 0], sizes = [16, 16, 8], strides = [1, 1, 1]} : vector<18x18x8xbf16> to vector<16x16x8xbf16>
    %40 = vector.shape_cast %39 : vector<16x16x8xbf16> to vector<256x8xbf16>
    %c6 = arith.constant 6 : index
    %c0_22 = arith.constant 0 : index
    %c0_23 = arith.constant 0 : index
    %41 = vector.load %arg3[%c6, %c0_22, %c0_23] : memref<9x8x8xbf16, #tpu.memory_space<vmem>>, vector<1x8x8xbf16>
    %42 = vector.shape_cast %41 : vector<1x8x8xbf16> to vector<8x8xbf16>
    %cst_24 = arith.constant dense<0.000000e+00> : vector<256x8xf32>
    %43 = tpu.matmul %40, %42, %cst_24 {dimension_numbers = #tpu.dot_dimension_numbers<[1], [0], [0], [1], [0, 0, 1, 1], [], []>} : vector<256x8xbf16>, vector<8x8xbf16>, vector<256x8xf32> -> vector<256x8xf32>
    %44 = arith.addf %38, %43 : vector<256x8xf32>
    %45 = vector.extract_strided_slice %1 {offsets = [2, 1, 0], sizes = [16, 16, 8], strides = [1, 1, 1]} : vector<18x18x8xbf16> to vector<16x16x8xbf16>
    %46 = vector.shape_cast %45 : vector<16x16x8xbf16> to vector<256x8xbf16>
    %c7 = arith.constant 7 : index
    %c0_25 = arith.constant 0 : index
    %c0_26 = arith.constant 0 : index
    %47 = vector.load %arg3[%c7, %c0_25, %c0_26] : memref<9x8x8xbf16, #tpu.memory_space<vmem>>, vector<1x8x8xbf16>
    %48 = vector.shape_cast %47 : vector<1x8x8xbf16> to vector<8x8xbf16>
    %cst_27 = arith.constant dense<0.000000e+00> : vector<256x8xf32>
    %49 = tpu.matmul %46, %48, %cst_27 {dimension_numbers = #tpu.dot_dimension_numbers<[1], [0], [0], [1], [0, 0, 1, 1], [], []>} : vector<256x8xbf16>, vector<8x8xbf16>, vector<256x8xf32> -> vector<256x8xf32>
    %50 = arith.addf %44, %49 : vector<256x8xf32>
    %51 = vector.extract_strided_slice %1 {offsets = [2, 2, 0], sizes = [16, 16, 8], strides = [1, 1, 1]} : vector<18x18x8xbf16> to vector<16x16x8xbf16>
    %52 = vector.shape_cast %51 : vector<16x16x8xbf16> to vector<256x8xbf16>
    %c8 = arith.constant 8 : index
    %c0_28 = arith.constant 0 : index
    %c0_29 = arith.constant 0 : index
    %53 = vector.load %arg3[%c8, %c0_28, %c0_29] : memref<9x8x8xbf16, #tpu.memory_space<vmem>>, vector<1x8x8xbf16>
    %54 = vector.shape_cast %53 : vector<1x8x8xbf16> to vector<8x8xbf16>
    %cst_30 = arith.constant dense<0.000000e+00> : vector<256x8xf32>
    %55 = tpu.matmul %52, %54, %cst_30 {dimension_numbers = #tpu.dot_dimension_numbers<[1], [0], [0], [1], [0, 0, 1, 1], [], []>} : vector<256x8xbf16>, vector<8x8xbf16>, vector<256x8xf32> -> vector<256x8xf32>
    %56 = arith.addf %50, %55 : vector<256x8xf32>
    %c0_31 = arith.constant 0 : index
    %c0_32 = arith.constant 0 : index
    %57 = vector.load %arg4[%c0_31, %c0_32] : memref<1x8xf32, #tpu.memory_space<vmem>>, vector<1x8xf32>
    %58 = vector.broadcast %57 : vector<1x8xf32> to vector<256x8xf32>
    %59 = arith.mulf %56, %58 : vector<256x8xf32>
    %c0_33 = arith.constant 0 : index
    %c0_34 = arith.constant 0 : index
    %60 = vector.load %arg5[%c0_33, %c0_34] : memref<1x8xf32, #tpu.memory_space<vmem>>, vector<1x8xf32>
    %61 = vector.broadcast %60 : vector<1x8xf32> to vector<256x8xf32>
    %62 = arith.addf %59, %61 : vector<256x8xf32>
    %63 = vector.shape_cast %62 : vector<256x8xf32> to vector<1x16x16x8xf32>
    %64 = arith.truncf %63 : vector<1x16x16x8xf32> to vector<1x16x16x8xbf16>
    %c0_35 = arith.constant 0 : index
    %c0_36 = arith.constant 0 : index
    %c0_37 = arith.constant 0 : index
    %c0_38 = arith.constant 0 : index
    %65 = vector.load %arg6[%c0_35, %c0_36, %c0_37, %c0_38] : memref<1x16x16x8xbf16, #tpu.memory_space<vmem>>, vector<1x16x16x8xbf16>
    tpu.vector_store %arg6[%c0_35, %c0_36, %c0_37, %c0_38], %64 {strides = array<i32>} : memref<1x16x16x8xbf16, #tpu.memory_space<vmem>>, vector<1x16x16x8xbf16>,
    %c0_i32 = arith.constant 0 : i32
    %66 = arith.cmpi eq, %arg1, %c0_i32 : i32
    %67 = arith.extui %66 : i1 to i32
    %c0_i32_39 = arith.constant 0 : i32
    %68 = arith.cmpi ne, %67, %c0_i32_39 : i32
    scf.if %68 {
      %cst_54 = arith.constant 0.000000e+00 : f32
      %79 = vector.broadcast %cst_54 : f32 to vector<1x1x8xf32>
      %c0_55 = arith.constant 0 : index
      %c0_56 = arith.constant 0 : index
      %c0_57 = arith.constant 0 : index
      %80 = vector.load %arg7[%c0_55, %c0_56, %c0_57] : memref<1x1x8xf32, #tpu.memory_space<vmem>>, vector<1x1x8xf32>
      tpu.vector_store %arg7[%c0_55, %c0_56, %c0_57], %79 {strides = array<i32>} : memref<1x1x8xf32, #tpu.memory_space<vmem>>, vector<1x1x8xf32>,
      %cst_58 = arith.constant 0xFF800000 : f32
      %81 = vector.broadcast %cst_58 : f32 to vector<1x1x8xf32>
      %c0_59 = arith.constant 0 : index
      %c0_60 = arith.constant 0 : index
      %c0_61 = arith.constant 0 : index
      %82 = vector.load %arg8[%c0_59, %c0_60, %c0_61] : memref<1x1x8xf32, #tpu.memory_space<vmem>>, vector<1x1x8xf32>
      tpu.vector_store %arg8[%c0_59, %c0_60, %c0_61], %81 {strides = array<i32>} : memref<1x1x8xf32, #tpu.memory_space<vmem>>, vector<1x1x8xf32>,
    } else {
    }
    %c0_40 = arith.constant 0 : index
    %c0_41 = arith.constant 0 : index
    %c0_42 = arith.constant 0 : index
    %69 = vector.load %arg7[%c0_40, %c0_41, %c0_42] : memref<1x1x8xf32, #tpu.memory_space<vmem>>, vector<1x1x8xf32>
    %cst_43 = arith.constant dense<0.000000e+00> : vector<8xf32>
    %70 = vector.multi_reduction <add>, %62, %cst_43 [0] : vector<256x8xf32> to vector<8xf32>
    %71 = vector.shape_cast %70 : vector<8xf32> to vector<1x1x8xf32>
    %72 = arith.addf %69, %71 : vector<1x1x8xf32>
    %c0_44 = arith.constant 0 : index
    %c0_45 = arith.constant 0 : index
    %c0_46 = arith.constant 0 : index
    %73 = vector.load %arg7[%c0_44, %c0_45, %c0_46] : memref<1x1x8xf32, #tpu.memory_space<vmem>>, vector<1x1x8xf32>
    tpu.vector_store %arg7[%c0_44, %c0_45, %c0_46], %72 {strides = array<i32>} : memref<1x1x8xf32, #tpu.memory_space<vmem>>, vector<1x1x8xf32>,
    %c0_47 = arith.constant 0 : index
    %c0_48 = arith.constant 0 : index
    %c0_49 = arith.constant 0 : index
    %74 = vector.load %arg8[%c0_47, %c0_48, %c0_49] : memref<1x1x8xf32, #tpu.memory_space<vmem>>, vector<1x1x8xf32>
    %cst_50 = arith.constant dense<0xFF800000> : vector<8xf32>
    %75 = vector.multi_reduction <maximumf>, %62, %cst_50 [0] : vector<256x8xf32> to vector<8xf32>
    %76 = vector.shape_cast %75 : vector<8xf32> to vector<1x1x8xf32>
    %77 = arith.maximumf %74, %76 : vector<1x1x8xf32>
    %c0_51 = arith.constant 0 : index
    %c0_52 = arith.constant 0 : index
    %c0_53 = arith.constant 0 : index
    %78 = vector.load %arg8[%c0_51, %c0_52, %c0_53] : memref<1x1x8xf32, #tpu.memory_space<vmem>>, vector<1x1x8xf32>
    tpu.vector_store %arg8[%c0_51, %c0_52, %c0_53], %77 {strides = array<i32>} : memref<1x1x8xf32, #tpu.memory_space<vmem>>, vector<1x1x8xf32>,
    return
  }
  func.func @transform_0(%arg0: i32, %arg1: i32) -> (i32, i32, i32, i32) {
    %c1_i32 = arith.constant 1 : i32
    %0 = arith.muli %arg0, %c1_i32 : i32
    %1 = arith.addi %0, %arg1 : i32
    %c0_i32 = arith.constant 0 : i32
    %c0_i32_0 = arith.constant 0 : i32
    %c0_i32_1 = arith.constant 0 : i32
    %c0_i32_2 = arith.constant 0 : i32
    return %1, %c0_i32, %c0_i32_0, %c0_i32_1 : i32, i32, i32, i32
  }
  func.func @transform_1(%arg0: i32, %arg1: i32) -> (i32, i32, i32) {
    %c0_i32 = arith.constant 0 : i32
    %c0_i32_0 = arith.constant 0 : i32
    %c0_i32_1 = arith.constant 0 : i32
    %c0_i32_2 = arith.constant 0 : i32
    return %c0_i32, %c0_i32_0, %c0_i32_1 : i32, i32, i32
  }
  func.func @transform_2(%arg0: i32, %arg1: i32) -> (i32, i32) {
    %c0_i32 = arith.constant 0 : i32
    %c0_i32_0 = arith.constant 0 : i32
    %c0_i32_1 = arith.constant 0 : i32
    return %c0_i32, %c0_i32_0 : i32, i32
  }
  func.func @transform_3(%arg0: i32, %arg1: i32) -> (i32, i32) {
    %c0_i32 = arith.constant 0 : i32
    %c0_i32_0 = arith.constant 0 : i32
    %c0_i32_1 = arith.constant 0 : i32
    return %c0_i32, %c0_i32_0 : i32, i32
  }
  func.func @transform_4(%arg0: i32, %arg1: i32) -> (i32, i32, i32, i32) {
    %c1_i32 = arith.constant 1 : i32
    %0 = arith.muli %arg0, %c1_i32 : i32
    %1 = arith.addi %0, %arg1 : i32
    %c0_i32 = arith.constant 0 : i32
    %c0_i32_0 = arith.constant 0 : i32
    %c0_i32_1 = arith.constant 0 : i32
    %c0_i32_2 = arith.constant 0 : i32
    return %1, %c0_i32, %c0_i32_0, %c0_i32_1 : i32, i32, i32, i32
  }
  func.func @transform_5(%arg0: i32, %arg1: i32) -> (i32, i32, i32) {
    %c0_i32 = arith.constant 0 : i32
    %c0_i32_0 = arith.constant 0 : i32
    %c0_i32_1 = arith.constant 0 : i32
    return %arg0, %c0_i32, %c0_i32_0 : i32, i32, i32
  }
  func.func @transform_6(%arg0: i32, %arg1: i32) -> (i32, i32, i32) {
    %c0_i32 = arith.constant 0 : i32
    %c0_i32_0 = arith.constant 0 : i32
    %c0_i32_1 = arith.constant 0 : i32
    return %arg0, %c0_i32, %c0_i32_0 : i32, i32, i32
  }
}

module attributes {stable_mosaic.version = 11 : i64} {
  func.func @_cbam_fuse_kernel(%arg0: i32, %arg1: memref<98xf32, #tpu.memory_space<smem>>, %arg2: memref<1x16x16x8xbf16, #tpu.memory_space<vmem>>, %arg3: memref<1x1x8xf32, #tpu.memory_space<vmem>>, %arg4: memref<1x16x16x8xbf16, #tpu.memory_space<vmem>>, %arg5: memref<1x16x16x8xf32, #tpu.memory_space<vmem>>) attributes {dimension_semantics = [#tpu.dimension_semantics<parallel>], iteration_bounds = array<i64: 2>, scalar_prefetch = 0 : i64, scratch_operands = 0 : i64, tpu.core_type = #tpu.core_type<tc>, window_params = [{transform_indices = @transform_0, window_bounds = array<i64: 98>}, {transform_indices = @transform_1, window_bounds = array<i64: 1, 16, 16, 8>}, {transform_indices = @transform_2, window_bounds = array<i64: 1, 1, 8>}, {transform_indices = @transform_3, window_bounds = array<i64: 1, 16, 16, 8>}, {transform_indices = @transform_4, window_bounds = array<i64: 1, 16, 16, 8>}]} {
    %c0 = arith.constant 0 : index
    %c0_0 = arith.constant 0 : index
    %c0_1 = arith.constant 0 : index
    %c0_2 = arith.constant 0 : index
    %0 = vector.load %arg2[%c0, %c0_0, %c0_1, %c0_2] : memref<1x16x16x8xbf16, #tpu.memory_space<vmem>>, vector<1x16x16x8xbf16>
    %1 = vector.shape_cast %0 : vector<1x16x16x8xbf16> to vector<16x16x8xbf16>
    %2 = arith.extf %1 : vector<16x16x8xbf16> to vector<16x16x8xf32>
    %c0_3 = arith.constant 0 : index
    %c0_4 = arith.constant 0 : index
    %c0_5 = arith.constant 0 : index
    %3 = vector.load %arg3[%c0_3, %c0_4, %c0_5] : memref<1x1x8xf32, #tpu.memory_space<vmem>>, vector<1x1x8xf32>
    %4 = vector.broadcast %3 : vector<1x1x8xf32> to vector<16x16x8xf32>
    %5 = arith.mulf %2, %4 : vector<16x16x8xf32>
    %cst = arith.constant dense<0.000000e+00> : vector<16x16xf32>
    %6 = vector.multi_reduction <add>, %5, %cst [2] : vector<16x16x8xf32> to vector<16x16xf32>
    %cst_6 = arith.constant 8.000000e+00 : f32
    %7 = vector.broadcast %cst_6 : f32 to vector<16x16xf32>
    %8 = arith.divf %6, %7 : vector<16x16xf32>
    %cst_7 = arith.constant dense<0xFF800000> : vector<16x16xf32>
    %9 = vector.multi_reduction <maximumf>, %5, %cst_7 [2] : vector<16x16x8xf32> to vector<16x16xf32>
    %cst_8 = arith.constant 0.000000e+00 : f32
    %10 = vector.broadcast %cst_8 : f32 to vector<16x3xf32>
    %11 = tpu.concatenate %10, %8, %10 in 1 : vector<16x3xf32>, vector<16x16xf32>, vector<16x3xf32> -> vector<16x22xf32>
    %cst_9 = arith.constant 0.000000e+00 : f32
    %12 = vector.broadcast %cst_9 : f32 to vector<3x22xf32>
    %13 = tpu.concatenate %12, %11, %12 in 0 : vector<3x22xf32>, vector<16x22xf32>, vector<3x22xf32> -> vector<22x22xf32>
    %cst_10 = arith.constant 0.000000e+00 : f32
    %14 = vector.broadcast %cst_10 : f32 to vector<16x3xf32>
    %15 = tpu.concatenate %14, %9, %14 in 1 : vector<16x3xf32>, vector<16x16xf32>, vector<16x3xf32> -> vector<16x22xf32>
    %cst_11 = arith.constant 0.000000e+00 : f32
    %16 = vector.broadcast %cst_11 : f32 to vector<3x22xf32>
    %17 = tpu.concatenate %16, %15, %16 in 0 : vector<3x22xf32>, vector<16x22xf32>, vector<3x22xf32> -> vector<22x22xf32>
    %cst_12 = arith.constant 0.000000e+00 : f32
    %18 = vector.broadcast %cst_12 : f32 to vector<16x16xf32>
    %c0_13 = arith.constant 0 : index
    %19 = memref.load %arg1[%c0_13] : memref<98xf32, #tpu.memory_space<smem>>
    %20 = vector.extract_strided_slice %13 {offsets = [0, 0], sizes = [16, 16], strides = [1, 1]} : vector<22x22xf32> to vector<16x16xf32>
    %21 = vector.broadcast %19 : f32 to vector<16x16xf32>
    %22 = arith.mulf %21, %20 : vector<16x16xf32>
    %23 = arith.addf %18, %22 : vector<16x16xf32>
    %c49 = arith.constant 49 : index
    %24 = memref.load %arg1[%c49] : memref<98xf32, #tpu.memory_space<smem>>
    %25 = vector.extract_strided_slice %17 {offsets = [0, 0], sizes = [16, 16], strides = [1, 1]} : vector<22x22xf32> to vector<16x16xf32>
    %26 = vector.broadcast %24 : f32 to vector<16x16xf32>
    %27 = arith.mulf %26, %25 : vector<16x16xf32>
    %28 = arith.addf %23, %27 : vector<16x16xf32>
    %c1 = arith.constant 1 : index
    %29 = memref.load %arg1[%c1] : memref<98xf32, #tpu.memory_space<smem>>
    %30 = vector.extract_strided_slice %13 {offsets = [0, 1], sizes = [16, 16], strides = [1, 1]} : vector<22x22xf32> to vector<16x16xf32>
    %31 = vector.broadcast %29 : f32 to vector<16x16xf32>
    %32 = arith.mulf %31, %30 : vector<16x16xf32>
    %33 = arith.addf %28, %32 : vector<16x16xf32>
    %c50 = arith.constant 50 : index
    %34 = memref.load %arg1[%c50] : memref<98xf32, #tpu.memory_space<smem>>
    %35 = vector.extract_strided_slice %17 {offsets = [0, 1], sizes = [16, 16], strides = [1, 1]} : vector<22x22xf32> to vector<16x16xf32>
    %36 = vector.broadcast %34 : f32 to vector<16x16xf32>
    %37 = arith.mulf %36, %35 : vector<16x16xf32>
    %38 = arith.addf %33, %37 : vector<16x16xf32>
    %c2 = arith.constant 2 : index
    %39 = memref.load %arg1[%c2] : memref<98xf32, #tpu.memory_space<smem>>
    %40 = vector.extract_strided_slice %13 {offsets = [0, 2], sizes = [16, 16], strides = [1, 1]} : vector<22x22xf32> to vector<16x16xf32>
    %41 = vector.broadcast %39 : f32 to vector<16x16xf32>
    %42 = arith.mulf %41, %40 : vector<16x16xf32>
    %43 = arith.addf %38, %42 : vector<16x16xf32>
    %c51 = arith.constant 51 : index
    %44 = memref.load %arg1[%c51] : memref<98xf32, #tpu.memory_space<smem>>
    %45 = vector.extract_strided_slice %17 {offsets = [0, 2], sizes = [16, 16], strides = [1, 1]} : vector<22x22xf32> to vector<16x16xf32>
    %46 = vector.broadcast %44 : f32 to vector<16x16xf32>
    %47 = arith.mulf %46, %45 : vector<16x16xf32>
    %48 = arith.addf %43, %47 : vector<16x16xf32>
    %c3 = arith.constant 3 : index
    %49 = memref.load %arg1[%c3] : memref<98xf32, #tpu.memory_space<smem>>
    %50 = vector.extract_strided_slice %13 {offsets = [0, 3], sizes = [16, 16], strides = [1, 1]} : vector<22x22xf32> to vector<16x16xf32>
    %51 = vector.broadcast %49 : f32 to vector<16x16xf32>
    %52 = arith.mulf %51, %50 : vector<16x16xf32>
    %53 = arith.addf %48, %52 : vector<16x16xf32>
    %c52 = arith.constant 52 : index
    %54 = memref.load %arg1[%c52] : memref<98xf32, #tpu.memory_space<smem>>
    %55 = vector.extract_strided_slice %17 {offsets = [0, 3], sizes = [16, 16], strides = [1, 1]} : vector<22x22xf32> to vector<16x16xf32>
    %56 = vector.broadcast %54 : f32 to vector<16x16xf32>
    %57 = arith.mulf %56, %55 : vector<16x16xf32>
    %58 = arith.addf %53, %57 : vector<16x16xf32>
    %c4 = arith.constant 4 : index
    %59 = memref.load %arg1[%c4] : memref<98xf32, #tpu.memory_space<smem>>
    %60 = vector.extract_strided_slice %13 {offsets = [0, 4], sizes = [16, 16], strides = [1, 1]} : vector<22x22xf32> to vector<16x16xf32>
    %61 = vector.broadcast %59 : f32 to vector<16x16xf32>
    %62 = arith.mulf %61, %60 : vector<16x16xf32>
    %63 = arith.addf %58, %62 : vector<16x16xf32>
    %c53 = arith.constant 53 : index
    %64 = memref.load %arg1[%c53] : memref<98xf32, #tpu.memory_space<smem>>
    %65 = vector.extract_strided_slice %17 {offsets = [0, 4], sizes = [16, 16], strides = [1, 1]} : vector<22x22xf32> to vector<16x16xf32>
    %66 = vector.broadcast %64 : f32 to vector<16x16xf32>
    %67 = arith.mulf %66, %65 : vector<16x16xf32>
    %68 = arith.addf %63, %67 : vector<16x16xf32>
    %c5 = arith.constant 5 : index
    %69 = memref.load %arg1[%c5] : memref<98xf32, #tpu.memory_space<smem>>
    %70 = vector.extract_strided_slice %13 {offsets = [0, 5], sizes = [16, 16], strides = [1, 1]} : vector<22x22xf32> to vector<16x16xf32>
    %71 = vector.broadcast %69 : f32 to vector<16x16xf32>
    %72 = arith.mulf %71, %70 : vector<16x16xf32>
    %73 = arith.addf %68, %72 : vector<16x16xf32>
    %c54 = arith.constant 54 : index
    %74 = memref.load %arg1[%c54] : memref<98xf32, #tpu.memory_space<smem>>
    %75 = vector.extract_strided_slice %17 {offsets = [0, 5], sizes = [16, 16], strides = [1, 1]} : vector<22x22xf32> to vector<16x16xf32>
    %76 = vector.broadcast %74 : f32 to vector<16x16xf32>
    %77 = arith.mulf %76, %75 : vector<16x16xf32>
    %78 = arith.addf %73, %77 : vector<16x16xf32>
    %c6 = arith.constant 6 : index
    %79 = memref.load %arg1[%c6] : memref<98xf32, #tpu.memory_space<smem>>
    %80 = vector.extract_strided_slice %13 {offsets = [0, 6], sizes = [16, 16], strides = [1, 1]} : vector<22x22xf32> to vector<16x16xf32>
    %81 = vector.broadcast %79 : f32 to vector<16x16xf32>
    %82 = arith.mulf %81, %80 : vector<16x16xf32>
    %83 = arith.addf %78, %82 : vector<16x16xf32>
    %c55 = arith.constant 55 : index
    %84 = memref.load %arg1[%c55] : memref<98xf32, #tpu.memory_space<smem>>
    %85 = vector.extract_strided_slice %17 {offsets = [0, 6], sizes = [16, 16], strides = [1, 1]} : vector<22x22xf32> to vector<16x16xf32>
    %86 = vector.broadcast %84 : f32 to vector<16x16xf32>
    %87 = arith.mulf %86, %85 : vector<16x16xf32>
    %88 = arith.addf %83, %87 : vector<16x16xf32>
    %c7 = arith.constant 7 : index
    %89 = memref.load %arg1[%c7] : memref<98xf32, #tpu.memory_space<smem>>
    %90 = vector.extract_strided_slice %13 {offsets = [1, 0], sizes = [16, 16], strides = [1, 1]} : vector<22x22xf32> to vector<16x16xf32>
    %91 = vector.broadcast %89 : f32 to vector<16x16xf32>
    %92 = arith.mulf %91, %90 : vector<16x16xf32>
    %93 = arith.addf %88, %92 : vector<16x16xf32>
    %c56 = arith.constant 56 : index
    %94 = memref.load %arg1[%c56] : memref<98xf32, #tpu.memory_space<smem>>
    %95 = vector.extract_strided_slice %17 {offsets = [1, 0], sizes = [16, 16], strides = [1, 1]} : vector<22x22xf32> to vector<16x16xf32>
    %96 = vector.broadcast %94 : f32 to vector<16x16xf32>
    %97 = arith.mulf %96, %95 : vector<16x16xf32>
    %98 = arith.addf %93, %97 : vector<16x16xf32>
    %c8 = arith.constant 8 : index
    %99 = memref.load %arg1[%c8] : memref<98xf32, #tpu.memory_space<smem>>
    %100 = vector.extract_strided_slice %13 {offsets = [1, 1], sizes = [16, 16], strides = [1, 1]} : vector<22x22xf32> to vector<16x16xf32>
    %101 = vector.broadcast %99 : f32 to vector<16x16xf32>
    %102 = arith.mulf %101, %100 : vector<16x16xf32>
    %103 = arith.addf %98, %102 : vector<16x16xf32>
    %c57 = arith.constant 57 : index
    %104 = memref.load %arg1[%c57] : memref<98xf32, #tpu.memory_space<smem>>
    %105 = vector.extract_strided_slice %17 {offsets = [1, 1], sizes = [16, 16], strides = [1, 1]} : vector<22x22xf32> to vector<16x16xf32>
    %106 = vector.broadcast %104 : f32 to vector<16x16xf32>
    %107 = arith.mulf %106, %105 : vector<16x16xf32>
    %108 = arith.addf %103, %107 : vector<16x16xf32>
    %c9 = arith.constant 9 : index
    %109 = memref.load %arg1[%c9] : memref<98xf32, #tpu.memory_space<smem>>
    %110 = vector.extract_strided_slice %13 {offsets = [1, 2], sizes = [16, 16], strides = [1, 1]} : vector<22x22xf32> to vector<16x16xf32>
    %111 = vector.broadcast %109 : f32 to vector<16x16xf32>
    %112 = arith.mulf %111, %110 : vector<16x16xf32>
    %113 = arith.addf %108, %112 : vector<16x16xf32>
    %c58 = arith.constant 58 : index
    %114 = memref.load %arg1[%c58] : memref<98xf32, #tpu.memory_space<smem>>
    %115 = vector.extract_strided_slice %17 {offsets = [1, 2], sizes = [16, 16], strides = [1, 1]} : vector<22x22xf32> to vector<16x16xf32>
    %116 = vector.broadcast %114 : f32 to vector<16x16xf32>
    %117 = arith.mulf %116, %115 : vector<16x16xf32>
    %118 = arith.addf %113, %117 : vector<16x16xf32>
    %c10 = arith.constant 10 : index
    %119 = memref.load %arg1[%c10] : memref<98xf32, #tpu.memory_space<smem>>
    %120 = vector.extract_strided_slice %13 {offsets = [1, 3], sizes = [16, 16], strides = [1, 1]} : vector<22x22xf32> to vector<16x16xf32>
    %121 = vector.broadcast %119 : f32 to vector<16x16xf32>
    %122 = arith.mulf %121, %120 : vector<16x16xf32>
    %123 = arith.addf %118, %122 : vector<16x16xf32>
    %c59 = arith.constant 59 : index
    %124 = memref.load %arg1[%c59] : memref<98xf32, #tpu.memory_space<smem>>
    %125 = vector.extract_strided_slice %17 {offsets = [1, 3], sizes = [16, 16], strides = [1, 1]} : vector<22x22xf32> to vector<16x16xf32>
    %126 = vector.broadcast %124 : f32 to vector<16x16xf32>
    %127 = arith.mulf %126, %125 : vector<16x16xf32>
    %128 = arith.addf %123, %127 : vector<16x16xf32>
    %c11 = arith.constant 11 : index
    %129 = memref.load %arg1[%c11] : memref<98xf32, #tpu.memory_space<smem>>
    %130 = vector.extract_strided_slice %13 {offsets = [1, 4], sizes = [16, 16], strides = [1, 1]} : vector<22x22xf32> to vector<16x16xf32>
    %131 = vector.broadcast %129 : f32 to vector<16x16xf32>
    %132 = arith.mulf %131, %130 : vector<16x16xf32>
    %133 = arith.addf %128, %132 : vector<16x16xf32>
    %c60 = arith.constant 60 : index
    %134 = memref.load %arg1[%c60] : memref<98xf32, #tpu.memory_space<smem>>
    %135 = vector.extract_strided_slice %17 {offsets = [1, 4], sizes = [16, 16], strides = [1, 1]} : vector<22x22xf32> to vector<16x16xf32>
    %136 = vector.broadcast %134 : f32 to vector<16x16xf32>
    %137 = arith.mulf %136, %135 : vector<16x16xf32>
    %138 = arith.addf %133, %137 : vector<16x16xf32>
    %c12 = arith.constant 12 : index
    %139 = memref.load %arg1[%c12] : memref<98xf32, #tpu.memory_space<smem>>
    %140 = vector.extract_strided_slice %13 {offsets = [1, 5], sizes = [16, 16], strides = [1, 1]} : vector<22x22xf32> to vector<16x16xf32>
    %141 = vector.broadcast %139 : f32 to vector<16x16xf32>
    %142 = arith.mulf %141, %140 : vector<16x16xf32>
    %143 = arith.addf %138, %142 : vector<16x16xf32>
    %c61 = arith.constant 61 : index
    %144 = memref.load %arg1[%c61] : memref<98xf32, #tpu.memory_space<smem>>
    %145 = vector.extract_strided_slice %17 {offsets = [1, 5], sizes = [16, 16], strides = [1, 1]} : vector<22x22xf32> to vector<16x16xf32>
    %146 = vector.broadcast %144 : f32 to vector<16x16xf32>
    %147 = arith.mulf %146, %145 : vector<16x16xf32>
    %148 = arith.addf %143, %147 : vector<16x16xf32>
    %c13 = arith.constant 13 : index
    %149 = memref.load %arg1[%c13] : memref<98xf32, #tpu.memory_space<smem>>
    %150 = vector.extract_strided_slice %13 {offsets = [1, 6], sizes = [16, 16], strides = [1, 1]} : vector<22x22xf32> to vector<16x16xf32>
    %151 = vector.broadcast %149 : f32 to vector<16x16xf32>
    %152 = arith.mulf %151, %150 : vector<16x16xf32>
    %153 = arith.addf %148, %152 : vector<16x16xf32>
    %c62 = arith.constant 62 : index
    %154 = memref.load %arg1[%c62] : memref<98xf32, #tpu.memory_space<smem>>
    %155 = vector.extract_strided_slice %17 {offsets = [1, 6], sizes = [16, 16], strides = [1, 1]} : vector<22x22xf32> to vector<16x16xf32>
    %156 = vector.broadcast %154 : f32 to vector<16x16xf32>
    %157 = arith.mulf %156, %155 : vector<16x16xf32>
    %158 = arith.addf %153, %157 : vector<16x16xf32>
    %c14 = arith.constant 14 : index
    %159 = memref.load %arg1[%c14] : memref<98xf32, #tpu.memory_space<smem>>
    %160 = vector.extract_strided_slice %13 {offsets = [2, 0], sizes = [16, 16], strides = [1, 1]} : vector<22x22xf32> to vector<16x16xf32>
    %161 = vector.broadcast %159 : f32 to vector<16x16xf32>
    %162 = arith.mulf %161, %160 : vector<16x16xf32>
    %163 = arith.addf %158, %162 : vector<16x16xf32>
    %c63 = arith.constant 63 : index
    %164 = memref.load %arg1[%c63] : memref<98xf32, #tpu.memory_space<smem>>
    %165 = vector.extract_strided_slice %17 {offsets = [2, 0], sizes = [16, 16], strides = [1, 1]} : vector<22x22xf32> to vector<16x16xf32>
    %166 = vector.broadcast %164 : f32 to vector<16x16xf32>
    %167 = arith.mulf %166, %165 : vector<16x16xf32>
    %168 = arith.addf %163, %167 : vector<16x16xf32>
    %c15 = arith.constant 15 : index
    %169 = memref.load %arg1[%c15] : memref<98xf32, #tpu.memory_space<smem>>
    %170 = vector.extract_strided_slice %13 {offsets = [2, 1], sizes = [16, 16], strides = [1, 1]} : vector<22x22xf32> to vector<16x16xf32>
    %171 = vector.broadcast %169 : f32 to vector<16x16xf32>
    %172 = arith.mulf %171, %170 : vector<16x16xf32>
    %173 = arith.addf %168, %172 : vector<16x16xf32>
    %c64 = arith.constant 64 : index
    %174 = memref.load %arg1[%c64] : memref<98xf32, #tpu.memory_space<smem>>
    %175 = vector.extract_strided_slice %17 {offsets = [2, 1], sizes = [16, 16], strides = [1, 1]} : vector<22x22xf32> to vector<16x16xf32>
    %176 = vector.broadcast %174 : f32 to vector<16x16xf32>
    %177 = arith.mulf %176, %175 : vector<16x16xf32>
    %178 = arith.addf %173, %177 : vector<16x16xf32>
    %c16 = arith.constant 16 : index
    %179 = memref.load %arg1[%c16] : memref<98xf32, #tpu.memory_space<smem>>
    %180 = vector.extract_strided_slice %13 {offsets = [2, 2], sizes = [16, 16], strides = [1, 1]} : vector<22x22xf32> to vector<16x16xf32>
    %181 = vector.broadcast %179 : f32 to vector<16x16xf32>
    %182 = arith.mulf %181, %180 : vector<16x16xf32>
    %183 = arith.addf %178, %182 : vector<16x16xf32>
    %c65 = arith.constant 65 : index
    %184 = memref.load %arg1[%c65] : memref<98xf32, #tpu.memory_space<smem>>
    %185 = vector.extract_strided_slice %17 {offsets = [2, 2], sizes = [16, 16], strides = [1, 1]} : vector<22x22xf32> to vector<16x16xf32>
    %186 = vector.broadcast %184 : f32 to vector<16x16xf32>
    %187 = arith.mulf %186, %185 : vector<16x16xf32>
    %188 = arith.addf %183, %187 : vector<16x16xf32>
    %c17 = arith.constant 17 : index
    %189 = memref.load %arg1[%c17] : memref<98xf32, #tpu.memory_space<smem>>
    %190 = vector.extract_strided_slice %13 {offsets = [2, 3], sizes = [16, 16], strides = [1, 1]} : vector<22x22xf32> to vector<16x16xf32>
    %191 = vector.broadcast %189 : f32 to vector<16x16xf32>
    %192 = arith.mulf %191, %190 : vector<16x16xf32>
    %193 = arith.addf %188, %192 : vector<16x16xf32>
    %c66 = arith.constant 66 : index
    %194 = memref.load %arg1[%c66] : memref<98xf32, #tpu.memory_space<smem>>
    %195 = vector.extract_strided_slice %17 {offsets = [2, 3], sizes = [16, 16], strides = [1, 1]} : vector<22x22xf32> to vector<16x16xf32>
    %196 = vector.broadcast %194 : f32 to vector<16x16xf32>
    %197 = arith.mulf %196, %195 : vector<16x16xf32>
    %198 = arith.addf %193, %197 : vector<16x16xf32>
    %c18 = arith.constant 18 : index
    %199 = memref.load %arg1[%c18] : memref<98xf32, #tpu.memory_space<smem>>
    %200 = vector.extract_strided_slice %13 {offsets = [2, 4], sizes = [16, 16], strides = [1, 1]} : vector<22x22xf32> to vector<16x16xf32>
    %201 = vector.broadcast %199 : f32 to vector<16x16xf32>
    %202 = arith.mulf %201, %200 : vector<16x16xf32>
    %203 = arith.addf %198, %202 : vector<16x16xf32>
    %c67 = arith.constant 67 : index
    %204 = memref.load %arg1[%c67] : memref<98xf32, #tpu.memory_space<smem>>
    %205 = vector.extract_strided_slice %17 {offsets = [2, 4], sizes = [16, 16], strides = [1, 1]} : vector<22x22xf32> to vector<16x16xf32>
    %206 = vector.broadcast %204 : f32 to vector<16x16xf32>
    %207 = arith.mulf %206, %205 : vector<16x16xf32>
    %208 = arith.addf %203, %207 : vector<16x16xf32>
    %c19 = arith.constant 19 : index
    %209 = memref.load %arg1[%c19] : memref<98xf32, #tpu.memory_space<smem>>
    %210 = vector.extract_strided_slice %13 {offsets = [2, 5], sizes = [16, 16], strides = [1, 1]} : vector<22x22xf32> to vector<16x16xf32>
    %211 = vector.broadcast %209 : f32 to vector<16x16xf32>
    %212 = arith.mulf %211, %210 : vector<16x16xf32>
    %213 = arith.addf %208, %212 : vector<16x16xf32>
    %c68 = arith.constant 68 : index
    %214 = memref.load %arg1[%c68] : memref<98xf32, #tpu.memory_space<smem>>
    %215 = vector.extract_strided_slice %17 {offsets = [2, 5], sizes = [16, 16], strides = [1, 1]} : vector<22x22xf32> to vector<16x16xf32>
    %216 = vector.broadcast %214 : f32 to vector<16x16xf32>
    %217 = arith.mulf %216, %215 : vector<16x16xf32>
    %218 = arith.addf %213, %217 : vector<16x16xf32>
    %c20 = arith.constant 20 : index
    %219 = memref.load %arg1[%c20] : memref<98xf32, #tpu.memory_space<smem>>
    %220 = vector.extract_strided_slice %13 {offsets = [2, 6], sizes = [16, 16], strides = [1, 1]} : vector<22x22xf32> to vector<16x16xf32>
    %221 = vector.broadcast %219 : f32 to vector<16x16xf32>
    %222 = arith.mulf %221, %220 : vector<16x16xf32>
    %223 = arith.addf %218, %222 : vector<16x16xf32>
    %c69 = arith.constant 69 : index
    %224 = memref.load %arg1[%c69] : memref<98xf32, #tpu.memory_space<smem>>
    %225 = vector.extract_strided_slice %17 {offsets = [2, 6], sizes = [16, 16], strides = [1, 1]} : vector<22x22xf32> to vector<16x16xf32>
    %226 = vector.broadcast %224 : f32 to vector<16x16xf32>
    %227 = arith.mulf %226, %225 : vector<16x16xf32>
    %228 = arith.addf %223, %227 : vector<16x16xf32>
    %c21 = arith.constant 21 : index
    %229 = memref.load %arg1[%c21] : memref<98xf32, #tpu.memory_space<smem>>
    %230 = vector.extract_strided_slice %13 {offsets = [3, 0], sizes = [16, 16], strides = [1, 1]} : vector<22x22xf32> to vector<16x16xf32>
    %231 = vector.broadcast %229 : f32 to vector<16x16xf32>
    %232 = arith.mulf %231, %230 : vector<16x16xf32>
    %233 = arith.addf %228, %232 : vector<16x16xf32>
    %c70 = arith.constant 70 : index
    %234 = memref.load %arg1[%c70] : memref<98xf32, #tpu.memory_space<smem>>
    %235 = vector.extract_strided_slice %17 {offsets = [3, 0], sizes = [16, 16], strides = [1, 1]} : vector<22x22xf32> to vector<16x16xf32>
    %236 = vector.broadcast %234 : f32 to vector<16x16xf32>
    %237 = arith.mulf %236, %235 : vector<16x16xf32>
    %238 = arith.addf %233, %237 : vector<16x16xf32>
    %c22 = arith.constant 22 : index
    %239 = memref.load %arg1[%c22] : memref<98xf32, #tpu.memory_space<smem>>
    %240 = vector.extract_strided_slice %13 {offsets = [3, 1], sizes = [16, 16], strides = [1, 1]} : vector<22x22xf32> to vector<16x16xf32>
    %241 = vector.broadcast %239 : f32 to vector<16x16xf32>
    %242 = arith.mulf %241, %240 : vector<16x16xf32>
    %243 = arith.addf %238, %242 : vector<16x16xf32>
    %c71 = arith.constant 71 : index
    %244 = memref.load %arg1[%c71] : memref<98xf32, #tpu.memory_space<smem>>
    %245 = vector.extract_strided_slice %17 {offsets = [3, 1], sizes = [16, 16], strides = [1, 1]} : vector<22x22xf32> to vector<16x16xf32>
    %246 = vector.broadcast %244 : f32 to vector<16x16xf32>
    %247 = arith.mulf %246, %245 : vector<16x16xf32>
    %248 = arith.addf %243, %247 : vector<16x16xf32>
    %c23 = arith.constant 23 : index
    %249 = memref.load %arg1[%c23] : memref<98xf32, #tpu.memory_space<smem>>
    %250 = vector.extract_strided_slice %13 {offsets = [3, 2], sizes = [16, 16], strides = [1, 1]} : vector<22x22xf32> to vector<16x16xf32>
    %251 = vector.broadcast %249 : f32 to vector<16x16xf32>
    %252 = arith.mulf %251, %250 : vector<16x16xf32>
    %253 = arith.addf %248, %252 : vector<16x16xf32>
    %c72 = arith.constant 72 : index
    %254 = memref.load %arg1[%c72] : memref<98xf32, #tpu.memory_space<smem>>
    %255 = vector.extract_strided_slice %17 {offsets = [3, 2], sizes = [16, 16], strides = [1, 1]} : vector<22x22xf32> to vector<16x16xf32>
    %256 = vector.broadcast %254 : f32 to vector<16x16xf32>
    %257 = arith.mulf %256, %255 : vector<16x16xf32>
    %258 = arith.addf %253, %257 : vector<16x16xf32>
    %c24 = arith.constant 24 : index
    %259 = memref.load %arg1[%c24] : memref<98xf32, #tpu.memory_space<smem>>
    %260 = vector.extract_strided_slice %13 {offsets = [3, 3], sizes = [16, 16], strides = [1, 1]} : vector<22x22xf32> to vector<16x16xf32>
    %261 = vector.broadcast %259 : f32 to vector<16x16xf32>
    %262 = arith.mulf %261, %260 : vector<16x16xf32>
    %263 = arith.addf %258, %262 : vector<16x16xf32>
    %c73 = arith.constant 73 : index
    %264 = memref.load %arg1[%c73] : memref<98xf32, #tpu.memory_space<smem>>
    %265 = vector.extract_strided_slice %17 {offsets = [3, 3], sizes = [16, 16], strides = [1, 1]} : vector<22x22xf32> to vector<16x16xf32>
    %266 = vector.broadcast %264 : f32 to vector<16x16xf32>
    %267 = arith.mulf %266, %265 : vector<16x16xf32>
    %268 = arith.addf %263, %267 : vector<16x16xf32>
    %c25 = arith.constant 25 : index
    %269 = memref.load %arg1[%c25] : memref<98xf32, #tpu.memory_space<smem>>
    %270 = vector.extract_strided_slice %13 {offsets = [3, 4], sizes = [16, 16], strides = [1, 1]} : vector<22x22xf32> to vector<16x16xf32>
    %271 = vector.broadcast %269 : f32 to vector<16x16xf32>
    %272 = arith.mulf %271, %270 : vector<16x16xf32>
    %273 = arith.addf %268, %272 : vector<16x16xf32>
    %c74 = arith.constant 74 : index
    %274 = memref.load %arg1[%c74] : memref<98xf32, #tpu.memory_space<smem>>
    %275 = vector.extract_strided_slice %17 {offsets = [3, 4], sizes = [16, 16], strides = [1, 1]} : vector<22x22xf32> to vector<16x16xf32>
    %276 = vector.broadcast %274 : f32 to vector<16x16xf32>
    %277 = arith.mulf %276, %275 : vector<16x16xf32>
    %278 = arith.addf %273, %277 : vector<16x16xf32>
    %c26 = arith.constant 26 : index
    %279 = memref.load %arg1[%c26] : memref<98xf32, #tpu.memory_space<smem>>
    %280 = vector.extract_strided_slice %13 {offsets = [3, 5], sizes = [16, 16], strides = [1, 1]} : vector<22x22xf32> to vector<16x16xf32>
    %281 = vector.broadcast %279 : f32 to vector<16x16xf32>
    %282 = arith.mulf %281, %280 : vector<16x16xf32>
    %283 = arith.addf %278, %282 : vector<16x16xf32>
    %c75 = arith.constant 75 : index
    %284 = memref.load %arg1[%c75] : memref<98xf32, #tpu.memory_space<smem>>
    %285 = vector.extract_strided_slice %17 {offsets = [3, 5], sizes = [16, 16], strides = [1, 1]} : vector<22x22xf32> to vector<16x16xf32>
    %286 = vector.broadcast %284 : f32 to vector<16x16xf32>
    %287 = arith.mulf %286, %285 : vector<16x16xf32>
    %288 = arith.addf %283, %287 : vector<16x16xf32>
    %c27 = arith.constant 27 : index
    %289 = memref.load %arg1[%c27] : memref<98xf32, #tpu.memory_space<smem>>
    %290 = vector.extract_strided_slice %13 {offsets = [3, 6], sizes = [16, 16], strides = [1, 1]} : vector<22x22xf32> to vector<16x16xf32>
    %291 = vector.broadcast %289 : f32 to vector<16x16xf32>
    %292 = arith.mulf %291, %290 : vector<16x16xf32>
    %293 = arith.addf %288, %292 : vector<16x16xf32>
    %c76 = arith.constant 76 : index
    %294 = memref.load %arg1[%c76] : memref<98xf32, #tpu.memory_space<smem>>
    %295 = vector.extract_strided_slice %17 {offsets = [3, 6], sizes = [16, 16], strides = [1, 1]} : vector<22x22xf32> to vector<16x16xf32>
    %296 = vector.broadcast %294 : f32 to vector<16x16xf32>
    %297 = arith.mulf %296, %295 : vector<16x16xf32>
    %298 = arith.addf %293, %297 : vector<16x16xf32>
    %c28 = arith.constant 28 : index
    %299 = memref.load %arg1[%c28] : memref<98xf32, #tpu.memory_space<smem>>
    %300 = vector.extract_strided_slice %13 {offsets = [4, 0], sizes = [16, 16], strides = [1, 1]} : vector<22x22xf32> to vector<16x16xf32>
    %301 = vector.broadcast %299 : f32 to vector<16x16xf32>
    %302 = arith.mulf %301, %300 : vector<16x16xf32>
    %303 = arith.addf %298, %302 : vector<16x16xf32>
    %c77 = arith.constant 77 : index
    %304 = memref.load %arg1[%c77] : memref<98xf32, #tpu.memory_space<smem>>
    %305 = vector.extract_strided_slice %17 {offsets = [4, 0], sizes = [16, 16], strides = [1, 1]} : vector<22x22xf32> to vector<16x16xf32>
    %306 = vector.broadcast %304 : f32 to vector<16x16xf32>
    %307 = arith.mulf %306, %305 : vector<16x16xf32>
    %308 = arith.addf %303, %307 : vector<16x16xf32>
    %c29 = arith.constant 29 : index
    %309 = memref.load %arg1[%c29] : memref<98xf32, #tpu.memory_space<smem>>
    %310 = vector.extract_strided_slice %13 {offsets = [4, 1], sizes = [16, 16], strides = [1, 1]} : vector<22x22xf32> to vector<16x16xf32>
    %311 = vector.broadcast %309 : f32 to vector<16x16xf32>
    %312 = arith.mulf %311, %310 : vector<16x16xf32>
    %313 = arith.addf %308, %312 : vector<16x16xf32>
    %c78 = arith.constant 78 : index
    %314 = memref.load %arg1[%c78] : memref<98xf32, #tpu.memory_space<smem>>
    %315 = vector.extract_strided_slice %17 {offsets = [4, 1], sizes = [16, 16], strides = [1, 1]} : vector<22x22xf32> to vector<16x16xf32>
    %316 = vector.broadcast %314 : f32 to vector<16x16xf32>
    %317 = arith.mulf %316, %315 : vector<16x16xf32>
    %318 = arith.addf %313, %317 : vector<16x16xf32>
    %c30 = arith.constant 30 : index
    %319 = memref.load %arg1[%c30] : memref<98xf32, #tpu.memory_space<smem>>
    %320 = vector.extract_strided_slice %13 {offsets = [4, 2], sizes = [16, 16], strides = [1, 1]} : vector<22x22xf32> to vector<16x16xf32>
    %321 = vector.broadcast %319 : f32 to vector<16x16xf32>
    %322 = arith.mulf %321, %320 : vector<16x16xf32>
    %323 = arith.addf %318, %322 : vector<16x16xf32>
    %c79 = arith.constant 79 : index
    %324 = memref.load %arg1[%c79] : memref<98xf32, #tpu.memory_space<smem>>
    %325 = vector.extract_strided_slice %17 {offsets = [4, 2], sizes = [16, 16], strides = [1, 1]} : vector<22x22xf32> to vector<16x16xf32>
    %326 = vector.broadcast %324 : f32 to vector<16x16xf32>
    %327 = arith.mulf %326, %325 : vector<16x16xf32>
    %328 = arith.addf %323, %327 : vector<16x16xf32>
    %c31 = arith.constant 31 : index
    %329 = memref.load %arg1[%c31] : memref<98xf32, #tpu.memory_space<smem>>
    %330 = vector.extract_strided_slice %13 {offsets = [4, 3], sizes = [16, 16], strides = [1, 1]} : vector<22x22xf32> to vector<16x16xf32>
    %331 = vector.broadcast %329 : f32 to vector<16x16xf32>
    %332 = arith.mulf %331, %330 : vector<16x16xf32>
    %333 = arith.addf %328, %332 : vector<16x16xf32>
    %c80 = arith.constant 80 : index
    %334 = memref.load %arg1[%c80] : memref<98xf32, #tpu.memory_space<smem>>
    %335 = vector.extract_strided_slice %17 {offsets = [4, 3], sizes = [16, 16], strides = [1, 1]} : vector<22x22xf32> to vector<16x16xf32>
    %336 = vector.broadcast %334 : f32 to vector<16x16xf32>
    %337 = arith.mulf %336, %335 : vector<16x16xf32>
    %338 = arith.addf %333, %337 : vector<16x16xf32>
    %c32 = arith.constant 32 : index
    %339 = memref.load %arg1[%c32] : memref<98xf32, #tpu.memory_space<smem>>
    %340 = vector.extract_strided_slice %13 {offsets = [4, 4], sizes = [16, 16], strides = [1, 1]} : vector<22x22xf32> to vector<16x16xf32>
    %341 = vector.broadcast %339 : f32 to vector<16x16xf32>
    %342 = arith.mulf %341, %340 : vector<16x16xf32>
    %343 = arith.addf %338, %342 : vector<16x16xf32>
    %c81 = arith.constant 81 : index
    %344 = memref.load %arg1[%c81] : memref<98xf32, #tpu.memory_space<smem>>
    %345 = vector.extract_strided_slice %17 {offsets = [4, 4], sizes = [16, 16], strides = [1, 1]} : vector<22x22xf32> to vector<16x16xf32>
    %346 = vector.broadcast %344 : f32 to vector<16x16xf32>
    %347 = arith.mulf %346, %345 : vector<16x16xf32>
    %348 = arith.addf %343, %347 : vector<16x16xf32>
    %c33 = arith.constant 33 : index
    %349 = memref.load %arg1[%c33] : memref<98xf32, #tpu.memory_space<smem>>
    %350 = vector.extract_strided_slice %13 {offsets = [4, 5], sizes = [16, 16], strides = [1, 1]} : vector<22x22xf32> to vector<16x16xf32>
    %351 = vector.broadcast %349 : f32 to vector<16x16xf32>
    %352 = arith.mulf %351, %350 : vector<16x16xf32>
    %353 = arith.addf %348, %352 : vector<16x16xf32>
    %c82 = arith.constant 82 : index
    %354 = memref.load %arg1[%c82] : memref<98xf32, #tpu.memory_space<smem>>
    %355 = vector.extract_strided_slice %17 {offsets = [4, 5], sizes = [16, 16], strides = [1, 1]} : vector<22x22xf32> to vector<16x16xf32>
    %356 = vector.broadcast %354 : f32 to vector<16x16xf32>
    %357 = arith.mulf %356, %355 : vector<16x16xf32>
    %358 = arith.addf %353, %357 : vector<16x16xf32>
    %c34 = arith.constant 34 : index
    %359 = memref.load %arg1[%c34] : memref<98xf32, #tpu.memory_space<smem>>
    %360 = vector.extract_strided_slice %13 {offsets = [4, 6], sizes = [16, 16], strides = [1, 1]} : vector<22x22xf32> to vector<16x16xf32>
    %361 = vector.broadcast %359 : f32 to vector<16x16xf32>
    %362 = arith.mulf %361, %360 : vector<16x16xf32>
    %363 = arith.addf %358, %362 : vector<16x16xf32>
    %c83 = arith.constant 83 : index
    %364 = memref.load %arg1[%c83] : memref<98xf32, #tpu.memory_space<smem>>
    %365 = vector.extract_strided_slice %17 {offsets = [4, 6], sizes = [16, 16], strides = [1, 1]} : vector<22x22xf32> to vector<16x16xf32>
    %366 = vector.broadcast %364 : f32 to vector<16x16xf32>
    %367 = arith.mulf %366, %365 : vector<16x16xf32>
    %368 = arith.addf %363, %367 : vector<16x16xf32>
    %c35 = arith.constant 35 : index
    %369 = memref.load %arg1[%c35] : memref<98xf32, #tpu.memory_space<smem>>
    %370 = vector.extract_strided_slice %13 {offsets = [5, 0], sizes = [16, 16], strides = [1, 1]} : vector<22x22xf32> to vector<16x16xf32>
    %371 = vector.broadcast %369 : f32 to vector<16x16xf32>
    %372 = arith.mulf %371, %370 : vector<16x16xf32>
    %373 = arith.addf %368, %372 : vector<16x16xf32>
    %c84 = arith.constant 84 : index
    %374 = memref.load %arg1[%c84] : memref<98xf32, #tpu.memory_space<smem>>
    %375 = vector.extract_strided_slice %17 {offsets = [5, 0], sizes = [16, 16], strides = [1, 1]} : vector<22x22xf32> to vector<16x16xf32>
    %376 = vector.broadcast %374 : f32 to vector<16x16xf32>
    %377 = arith.mulf %376, %375 : vector<16x16xf32>
    %378 = arith.addf %373, %377 : vector<16x16xf32>
    %c36 = arith.constant 36 : index
    %379 = memref.load %arg1[%c36] : memref<98xf32, #tpu.memory_space<smem>>
    %380 = vector.extract_strided_slice %13 {offsets = [5, 1], sizes = [16, 16], strides = [1, 1]} : vector<22x22xf32> to vector<16x16xf32>
    %381 = vector.broadcast %379 : f32 to vector<16x16xf32>
    %382 = arith.mulf %381, %380 : vector<16x16xf32>
    %383 = arith.addf %378, %382 : vector<16x16xf32>
    %c85 = arith.constant 85 : index
    %384 = memref.load %arg1[%c85] : memref<98xf32, #tpu.memory_space<smem>>
    %385 = vector.extract_strided_slice %17 {offsets = [5, 1], sizes = [16, 16], strides = [1, 1]} : vector<22x22xf32> to vector<16x16xf32>
    %386 = vector.broadcast %384 : f32 to vector<16x16xf32>
    %387 = arith.mulf %386, %385 : vector<16x16xf32>
    %388 = arith.addf %383, %387 : vector<16x16xf32>
    %c37 = arith.constant 37 : index
    %389 = memref.load %arg1[%c37] : memref<98xf32, #tpu.memory_space<smem>>
    %390 = vector.extract_strided_slice %13 {offsets = [5, 2], sizes = [16, 16], strides = [1, 1]} : vector<22x22xf32> to vector<16x16xf32>
    %391 = vector.broadcast %389 : f32 to vector<16x16xf32>
    %392 = arith.mulf %391, %390 : vector<16x16xf32>
    %393 = arith.addf %388, %392 : vector<16x16xf32>
    %c86 = arith.constant 86 : index
    %394 = memref.load %arg1[%c86] : memref<98xf32, #tpu.memory_space<smem>>
    %395 = vector.extract_strided_slice %17 {offsets = [5, 2], sizes = [16, 16], strides = [1, 1]} : vector<22x22xf32> to vector<16x16xf32>
    %396 = vector.broadcast %394 : f32 to vector<16x16xf32>
    %397 = arith.mulf %396, %395 : vector<16x16xf32>
    %398 = arith.addf %393, %397 : vector<16x16xf32>
    %c38 = arith.constant 38 : index
    %399 = memref.load %arg1[%c38] : memref<98xf32, #tpu.memory_space<smem>>
    %400 = vector.extract_strided_slice %13 {offsets = [5, 3], sizes = [16, 16], strides = [1, 1]} : vector<22x22xf32> to vector<16x16xf32>
    %401 = vector.broadcast %399 : f32 to vector<16x16xf32>
    %402 = arith.mulf %401, %400 : vector<16x16xf32>
    %403 = arith.addf %398, %402 : vector<16x16xf32>
    %c87 = arith.constant 87 : index
    %404 = memref.load %arg1[%c87] : memref<98xf32, #tpu.memory_space<smem>>
    %405 = vector.extract_strided_slice %17 {offsets = [5, 3], sizes = [16, 16], strides = [1, 1]} : vector<22x22xf32> to vector<16x16xf32>
    %406 = vector.broadcast %404 : f32 to vector<16x16xf32>
    %407 = arith.mulf %406, %405 : vector<16x16xf32>
    %408 = arith.addf %403, %407 : vector<16x16xf32>
    %c39 = arith.constant 39 : index
    %409 = memref.load %arg1[%c39] : memref<98xf32, #tpu.memory_space<smem>>
    %410 = vector.extract_strided_slice %13 {offsets = [5, 4], sizes = [16, 16], strides = [1, 1]} : vector<22x22xf32> to vector<16x16xf32>
    %411 = vector.broadcast %409 : f32 to vector<16x16xf32>
    %412 = arith.mulf %411, %410 : vector<16x16xf32>
    %413 = arith.addf %408, %412 : vector<16x16xf32>
    %c88 = arith.constant 88 : index
    %414 = memref.load %arg1[%c88] : memref<98xf32, #tpu.memory_space<smem>>
    %415 = vector.extract_strided_slice %17 {offsets = [5, 4], sizes = [16, 16], strides = [1, 1]} : vector<22x22xf32> to vector<16x16xf32>
    %416 = vector.broadcast %414 : f32 to vector<16x16xf32>
    %417 = arith.mulf %416, %415 : vector<16x16xf32>
    %418 = arith.addf %413, %417 : vector<16x16xf32>
    %c40 = arith.constant 40 : index
    %419 = memref.load %arg1[%c40] : memref<98xf32, #tpu.memory_space<smem>>
    %420 = vector.extract_strided_slice %13 {offsets = [5, 5], sizes = [16, 16], strides = [1, 1]} : vector<22x22xf32> to vector<16x16xf32>
    %421 = vector.broadcast %419 : f32 to vector<16x16xf32>
    %422 = arith.mulf %421, %420 : vector<16x16xf32>
    %423 = arith.addf %418, %422 : vector<16x16xf32>
    %c89 = arith.constant 89 : index
    %424 = memref.load %arg1[%c89] : memref<98xf32, #tpu.memory_space<smem>>
    %425 = vector.extract_strided_slice %17 {offsets = [5, 5], sizes = [16, 16], strides = [1, 1]} : vector<22x22xf32> to vector<16x16xf32>
    %426 = vector.broadcast %424 : f32 to vector<16x16xf32>
    %427 = arith.mulf %426, %425 : vector<16x16xf32>
    %428 = arith.addf %423, %427 : vector<16x16xf32>
    %c41 = arith.constant 41 : index
    %429 = memref.load %arg1[%c41] : memref<98xf32, #tpu.memory_space<smem>>
    %430 = vector.extract_strided_slice %13 {offsets = [5, 6], sizes = [16, 16], strides = [1, 1]} : vector<22x22xf32> to vector<16x16xf32>
    %431 = vector.broadcast %429 : f32 to vector<16x16xf32>
    %432 = arith.mulf %431, %430 : vector<16x16xf32>
    %433 = arith.addf %428, %432 : vector<16x16xf32>
    %c90 = arith.constant 90 : index
    %434 = memref.load %arg1[%c90] : memref<98xf32, #tpu.memory_space<smem>>
    %435 = vector.extract_strided_slice %17 {offsets = [5, 6], sizes = [16, 16], strides = [1, 1]} : vector<22x22xf32> to vector<16x16xf32>
    %436 = vector.broadcast %434 : f32 to vector<16x16xf32>
    %437 = arith.mulf %436, %435 : vector<16x16xf32>
    %438 = arith.addf %433, %437 : vector<16x16xf32>
    %c42 = arith.constant 42 : index
    %439 = memref.load %arg1[%c42] : memref<98xf32, #tpu.memory_space<smem>>
    %440 = vector.extract_strided_slice %13 {offsets = [6, 0], sizes = [16, 16], strides = [1, 1]} : vector<22x22xf32> to vector<16x16xf32>
    %441 = vector.broadcast %439 : f32 to vector<16x16xf32>
    %442 = arith.mulf %441, %440 : vector<16x16xf32>
    %443 = arith.addf %438, %442 : vector<16x16xf32>
    %c91 = arith.constant 91 : index
    %444 = memref.load %arg1[%c91] : memref<98xf32, #tpu.memory_space<smem>>
    %445 = vector.extract_strided_slice %17 {offsets = [6, 0], sizes = [16, 16], strides = [1, 1]} : vector<22x22xf32> to vector<16x16xf32>
    %446 = vector.broadcast %444 : f32 to vector<16x16xf32>
    %447 = arith.mulf %446, %445 : vector<16x16xf32>
    %448 = arith.addf %443, %447 : vector<16x16xf32>
    %c43 = arith.constant 43 : index
    %449 = memref.load %arg1[%c43] : memref<98xf32, #tpu.memory_space<smem>>
    %450 = vector.extract_strided_slice %13 {offsets = [6, 1], sizes = [16, 16], strides = [1, 1]} : vector<22x22xf32> to vector<16x16xf32>
    %451 = vector.broadcast %449 : f32 to vector<16x16xf32>
    %452 = arith.mulf %451, %450 : vector<16x16xf32>
    %453 = arith.addf %448, %452 : vector<16x16xf32>
    %c92 = arith.constant 92 : index
    %454 = memref.load %arg1[%c92] : memref<98xf32, #tpu.memory_space<smem>>
    %455 = vector.extract_strided_slice %17 {offsets = [6, 1], sizes = [16, 16], strides = [1, 1]} : vector<22x22xf32> to vector<16x16xf32>
    %456 = vector.broadcast %454 : f32 to vector<16x16xf32>
    %457 = arith.mulf %456, %455 : vector<16x16xf32>
    %458 = arith.addf %453, %457 : vector<16x16xf32>
    %c44 = arith.constant 44 : index
    %459 = memref.load %arg1[%c44] : memref<98xf32, #tpu.memory_space<smem>>
    %460 = vector.extract_strided_slice %13 {offsets = [6, 2], sizes = [16, 16], strides = [1, 1]} : vector<22x22xf32> to vector<16x16xf32>
    %461 = vector.broadcast %459 : f32 to vector<16x16xf32>
    %462 = arith.mulf %461, %460 : vector<16x16xf32>
    %463 = arith.addf %458, %462 : vector<16x16xf32>
    %c93 = arith.constant 93 : index
    %464 = memref.load %arg1[%c93] : memref<98xf32, #tpu.memory_space<smem>>
    %465 = vector.extract_strided_slice %17 {offsets = [6, 2], sizes = [16, 16], strides = [1, 1]} : vector<22x22xf32> to vector<16x16xf32>
    %466 = vector.broadcast %464 : f32 to vector<16x16xf32>
    %467 = arith.mulf %466, %465 : vector<16x16xf32>
    %468 = arith.addf %463, %467 : vector<16x16xf32>
    %c45 = arith.constant 45 : index
    %469 = memref.load %arg1[%c45] : memref<98xf32, #tpu.memory_space<smem>>
    %470 = vector.extract_strided_slice %13 {offsets = [6, 3], sizes = [16, 16], strides = [1, 1]} : vector<22x22xf32> to vector<16x16xf32>
    %471 = vector.broadcast %469 : f32 to vector<16x16xf32>
    %472 = arith.mulf %471, %470 : vector<16x16xf32>
    %473 = arith.addf %468, %472 : vector<16x16xf32>
    %c94 = arith.constant 94 : index
    %474 = memref.load %arg1[%c94] : memref<98xf32, #tpu.memory_space<smem>>
    %475 = vector.extract_strided_slice %17 {offsets = [6, 3], sizes = [16, 16], strides = [1, 1]} : vector<22x22xf32> to vector<16x16xf32>
    %476 = vector.broadcast %474 : f32 to vector<16x16xf32>
    %477 = arith.mulf %476, %475 : vector<16x16xf32>
    %478 = arith.addf %473, %477 : vector<16x16xf32>
    %c46 = arith.constant 46 : index
    %479 = memref.load %arg1[%c46] : memref<98xf32, #tpu.memory_space<smem>>
    %480 = vector.extract_strided_slice %13 {offsets = [6, 4], sizes = [16, 16], strides = [1, 1]} : vector<22x22xf32> to vector<16x16xf32>
    %481 = vector.broadcast %479 : f32 to vector<16x16xf32>
    %482 = arith.mulf %481, %480 : vector<16x16xf32>
    %483 = arith.addf %478, %482 : vector<16x16xf32>
    %c95 = arith.constant 95 : index
    %484 = memref.load %arg1[%c95] : memref<98xf32, #tpu.memory_space<smem>>
    %485 = vector.extract_strided_slice %17 {offsets = [6, 4], sizes = [16, 16], strides = [1, 1]} : vector<22x22xf32> to vector<16x16xf32>
    %486 = vector.broadcast %484 : f32 to vector<16x16xf32>
    %487 = arith.mulf %486, %485 : vector<16x16xf32>
    %488 = arith.addf %483, %487 : vector<16x16xf32>
    %c47 = arith.constant 47 : index
    %489 = memref.load %arg1[%c47] : memref<98xf32, #tpu.memory_space<smem>>
    %490 = vector.extract_strided_slice %13 {offsets = [6, 5], sizes = [16, 16], strides = [1, 1]} : vector<22x22xf32> to vector<16x16xf32>
    %491 = vector.broadcast %489 : f32 to vector<16x16xf32>
    %492 = arith.mulf %491, %490 : vector<16x16xf32>
    %493 = arith.addf %488, %492 : vector<16x16xf32>
    %c96 = arith.constant 96 : index
    %494 = memref.load %arg1[%c96] : memref<98xf32, #tpu.memory_space<smem>>
    %495 = vector.extract_strided_slice %17 {offsets = [6, 5], sizes = [16, 16], strides = [1, 1]} : vector<22x22xf32> to vector<16x16xf32>
    %496 = vector.broadcast %494 : f32 to vector<16x16xf32>
    %497 = arith.mulf %496, %495 : vector<16x16xf32>
    %498 = arith.addf %493, %497 : vector<16x16xf32>
    %c48 = arith.constant 48 : index
    %499 = memref.load %arg1[%c48] : memref<98xf32, #tpu.memory_space<smem>>
    %500 = vector.extract_strided_slice %13 {offsets = [6, 6], sizes = [16, 16], strides = [1, 1]} : vector<22x22xf32> to vector<16x16xf32>
    %501 = vector.broadcast %499 : f32 to vector<16x16xf32>
    %502 = arith.mulf %501, %500 : vector<16x16xf32>
    %503 = arith.addf %498, %502 : vector<16x16xf32>
    %c97 = arith.constant 97 : index
    %504 = memref.load %arg1[%c97] : memref<98xf32, #tpu.memory_space<smem>>
    %505 = vector.extract_strided_slice %17 {offsets = [6, 6], sizes = [16, 16], strides = [1, 1]} : vector<22x22xf32> to vector<16x16xf32>
    %506 = vector.broadcast %504 : f32 to vector<16x16xf32>
    %507 = arith.mulf %506, %505 : vector<16x16xf32>
    %508 = arith.addf %503, %507 : vector<16x16xf32>
    %509 = arith.negf %508 : vector<16x16xf32>
    %510 = math.exp %509 : vector<16x16xf32>
    %cst_14 = arith.constant 1.000000e+00 : f32
    %511 = vector.broadcast %cst_14 : f32 to vector<16x16xf32>
    %512 = arith.addf %511, %510 : vector<16x16xf32>
    %513 = arith.divf %511, %512 : vector<16x16xf32>
    %514 = vector.shape_cast %513 : vector<16x16xf32> to vector<16x16x1xf32>
    %515 = vector.broadcast %514 : vector<16x16x1xf32> to vector<16x16x8xf32>
    %516 = arith.mulf %5, %515 : vector<16x16x8xf32>
    %c0_15 = arith.constant 0 : index
    %c0_16 = arith.constant 0 : index
    %c0_17 = arith.constant 0 : index
    %c0_18 = arith.constant 0 : index
    %517 = vector.load %arg4[%c0_15, %c0_16, %c0_17, %c0_18] : memref<1x16x16x8xbf16, #tpu.memory_space<vmem>>, vector<1x16x16x8xbf16>
    %518 = vector.shape_cast %517 : vector<1x16x16x8xbf16> to vector<16x16x8xbf16>
    %519 = arith.extf %518 : vector<16x16x8xbf16> to vector<16x16x8xf32>
    %520 = arith.addf %516, %519 : vector<16x16x8xf32>
    %cst_19 = arith.constant 0.000000e+00 : f32
    %521 = vector.broadcast %cst_19 : f32 to vector<16x16x8xf32>
    %522 = arith.maximumf %520, %521 : vector<16x16x8xf32>
    %c0_20 = arith.constant 0 : index
    %c0_21 = arith.constant 0 : index
    %c0_22 = arith.constant 0 : index
    %c0_23 = arith.constant 0 : index
    %523 = vector.load %arg5[%c0_20, %c0_21, %c0_22, %c0_23] : memref<1x16x16x8xf32, #tpu.memory_space<vmem>>, vector<1x16x16x8xf32>
    %524 = vector.shape_cast %523 : vector<1x16x16x8xf32> to vector<16x16x8xf32>
    %525 = vector.shape_cast %522 : vector<16x16x8xf32> to vector<1x16x16x8xf32>
    tpu.vector_store %arg5[%c0_20, %c0_21, %c0_22, %c0_23], %525 {strides = array<i32>} : memref<1x16x16x8xf32, #tpu.memory_space<vmem>>, vector<1x16x16x8xf32>,
    return
  }
  func.func @transform_0(%arg0: i32) -> i32 {
    %c0_i32 = arith.constant 0 : i32
    %c0_i32_0 = arith.constant 0 : i32
    return %c0_i32 : i32
  }
  func.func @transform_1(%arg0: i32) -> (i32, i32, i32, i32) {
    %c0_i32 = arith.constant 0 : i32
    %c0_i32_0 = arith.constant 0 : i32
    %c0_i32_1 = arith.constant 0 : i32
    %c0_i32_2 = arith.constant 0 : i32
    return %arg0, %c0_i32, %c0_i32_0, %c0_i32_1 : i32, i32, i32, i32
  }
  func.func @transform_2(%arg0: i32) -> (i32, i32, i32) {
    %c0_i32 = arith.constant 0 : i32
    %c0_i32_0 = arith.constant 0 : i32
    %c0_i32_1 = arith.constant 0 : i32
    return %arg0, %c0_i32, %c0_i32_0 : i32, i32, i32
  }
  func.func @transform_3(%arg0: i32) -> (i32, i32, i32, i32) {
    %c0_i32 = arith.constant 0 : i32
    %c0_i32_0 = arith.constant 0 : i32
    %c0_i32_1 = arith.constant 0 : i32
    %c0_i32_2 = arith.constant 0 : i32
    return %arg0, %c0_i32, %c0_i32_0, %c0_i32_1 : i32, i32, i32, i32
  }
  func.func @transform_4(%arg0: i32) -> (i32, i32, i32, i32) {
    %c0_i32 = arith.constant 0 : i32
    %c0_i32_0 = arith.constant 0 : i32
    %c0_i32_1 = arith.constant 0 : i32
    %c0_i32_2 = arith.constant 0 : i32
    return %arg0, %c0_i32, %c0_i32_0, %c0_i32_1 : i32, i32, i32, i32
  }
}

</mosaic_0001>

<bundles_post_ra>
// kernel: basic_block_forward.3
= control target key start
LH: loop header
LB: loop body
LE: loop exit
PB: predicated region body
PF: predicated region fallthrough
CT: control target
= control target key end

     0   :  { %s5118_s27 = smov 0   ;;  %s5120_s28 = smov 0   ;;  %s6521_s0 = inlined_call_operand.vmem [shape: bf16[2,18,18,4], index: 0, kind: input, shape index: {}]   ;;  %s6522_s1 = inlined_call_operand.vmem [shape: bf16[9,4,8], index: 1, kind: input, shape index: {}]   ;;  %s6523_s2 = inlined_call_operand.vmem [shape: f32[1,8], index: 2, kind: input, shape index: {}]   ;;  %s6524_s3 = inlined_call_operand.vmem [shape: f32[1,8], index: 3, kind: input, shape index: {}]   ;;  %s6525_s4 = inlined_call_operand.vmem [shape: bf16[4,8], index: 4, kind: input, shape index: {}]   ;;  %s6526_s5 = inlined_call_operand.vmem [shape: f32[1,8], index: 5, kind: input, shape index: {}]   ;;  %s6527_s6 = inlined_call_operand.vmem [shape: f32[1,8], index: 6, kind: input, shape index: {}]   ;;  %s6528_s7 = inlined_call_operand.vmem [shape: bf16[2,16,16,8], index: 7, kind: output, shape index: {0}]   ;;  %s6529_s8 = inlined_call_operand.vmem [shape: bf16[2,16,16,8], index: 8, kind: output, shape index: {1}]  }
   0x1   :  { %s5122_s29 = smov 0  }
   0x2 LB: > { %s31_s30 = sadd.s32 1, %s5067_s28  ;;  %p3845_p0 = scmp.ge.s32.totalorder %s5071_s29, 1  ;;  %s5071_s29 = sphi %s5122_s29, %s19_s29   ;;  %s5067_s28 = sphi %s5120_s28, %s6631_s28   ;;  %s5063_s27 = sphi %s5118_s27, %s6630_s27  }
   0x3   : > { %p33_p1 = scmp.ge.s32.totalorder %s31_s30, 2  ;;  %p285_p2 = scmp.lt.s32.totalorder %s5071_s29, 3 }
   0x5   : > { %s6633_s30 = smov (%p33_p1, %s31_s30), 0  ;;  %p286_p3 = pnand %p3845_p0, %p285_p2 }
   0x7   : > { %289 = sbr.rel (%p286_p3) target bundleno = 585 (0x249), region = 48 }
   0xe   : > { %vm890_vm0 = vcmask 1041408   ;;  %v3983_v0 = vld [vmem:[%s6522_s1 + $0x8] sm:$0x3]  ;;  %v3851_v1 = vld [vmem:[%s6522_s1 + $0x2] sm:$0x3]  ;;  %p328_p4 = scmp.lt.s32.totalorder %s5063_s27, 1 }
   0xf   : > { %4997 = vmatprep.subr.msk.bf16.mxu0 %vm890_vm0, %v3983_v0  ;;  %4993 = vmatprep.subr.msk.bf16.mxu1 %vm890_vm0, %v3851_v1  ;;  %v2011_v2 = vsel %vm890_vm0, %v3983_v0, 0  ;;  %v892_v3 = vsel %vm890_vm0, %v3851_v1, 0  ;;  %v4002_v4 = vld [vmem:[%s6522_s1 + $0xa] sm:$0x3]  ;;  %v403_v5 = vld [vmem:[%s6522_s1] sm:$0x3] }
  0x10   : > { %4534 = vmatpush3.bf16.msra.mxu0 %v2011_v2  ;;  %4398 = vmatpush3.bf16.msra.mxu1 %v892_v3  ;;  %s6635_s27 = smov (!%p328_p4, %s5063_s27), 1  ;;  %v5159_v6 = vld [vmem:[%s6522_s1 + $0xc] sm:$0x3]  ;;  %vm404_vm1 = vsmask.f32 3328  ;;  %v5168_v7 = vsel %vm890_vm0, %v4002_v4, 0 }
  0x11   : > { %4998 = vmatprep.subr.msk.bf16.mxu0 %vm890_vm0, %v4002_v4  ;;  %4994 = vmatprep.subr.msk.bf16.mxu1 %vm890_vm0, %v403_v5  ;;  %s5003_s19 = smul.u32 216, %s6635_s27  ;;  %vm405_vm2 = vsmask.f32 7440  ;;  %v5171_v8 = vsel %vm890_vm0, %v403_v5, 0  ;;  %v5175_v9 = vsel %vm890_vm0, %v5159_v6, 0  ;;  %vm841_vm3 = vcmask 31744  }
  0x12   : > { %v5180_v10 = vld [vmem:[%s6522_s1 + $0x4] sm:$0x3]  ;;  %vm5221_vm4 = vmor %vm404_vm1, %vm405_vm2  ;;  %vm1363_vm5 = vcmask 1042432   ;;  %vm1364_vm6 = vcmask 1046532   ;;  %vm3302_vm8 = vcmask 60416  }
  0x13   : > { %s5165_s22 = scalar_lea.vmem %s6521_s0, %s5003_s19  ;;  %v5206_v23 = vsel %vm890_vm0, %v5180_v10, 0  ;;  %vm5583_vm7 = vmor %vm1363_vm5, %vm1364_vm6  ;;  %s4161_s19 = sshll.u32 %s6635_s27, 7 }
  0x14   : > { %v5183_v11 = vld [vmem:[%s5165_s22] sm:$0xf]  ;;  %v5186_v12 = vld [vmem:[%s5165_s22 + $0x4] sm:$0xf]  ;;  %v351_v13 = vld [vmem:[%s5165_s22 + $0x8] sm:$0x1]  ;;  %s6255_s11 = scalar_lea.vmem %s6528_s7, %s4161_s19 }
  0x15   : > { %v408_v14 = vshrl.u32 %v5183_v11, 16  ;;  %v411_v15 = vshll.u32 %v5183_v11, 16  ;;  %v417_v16 = vshll.u32 %v5186_v12, 16  ;;  %v421_v17 = vshrl.u32 %v5186_v12, 16  ;;  %v5194_v18 = vld [vmem:[%s5165_s22 + $0xc] sm:$0xf] }
  0x16   : > { %v427_v19 = vshll.u32 %v351_v13, 16  ;;  %v5197_v20 = vld [vmem:[%s5165_s22 + $0x10] sm:$0xf]  ;;  %v5200_v21 = vld [vmem:[%s5165_s22 + $0x14] sm:$0x1]  ;;  %v432_v29 = vshrl.u32 %v5194_v18, 16 }
  0x17   : > { %v410_v24 = vrot.slane %v408_v14, 4  ;;  %v413_v25 = vrot.slane %v411_v15, 5  ;;  %v419_v26 = vrot.slane %v417_v16, 5  ;;  %v423_v27 = vrot.slane %v421_v17, 4  ;;  %v5214_v36 = vld [vmem:[%s5165_s22 + $0x18] sm:$0xf] }
  0x18   : > { %v429_v28 = vrot.slane %v427_v19, 5  ;;  %v435_v30 = vshll.u32 %v5194_v18, 16  ;;  %v441_v31 = vshll.u32 %v5197_v20, 16  ;;  %v445_v34 = vshrl.u32 %v5197_v20, 16  ;;  %v5217_v37 = vld [vmem:[%s5165_s22 + $0x1c] sm:$0xf] }
  0x19   : > { %v414_v32 = vor.u32 %v413_v25, %v410_v24  ;;  %v424_v33 = vor.u32 %v423_v27, %v419_v26  ;;  %v451_v35 = vshll.u32 %v5200_v21, 16  ;;  %v434_v39 = vrot.slane %v432_v29, 4  ;;  %v5227_v48 = vld [vmem:[%s5165_s22 + $0x20] sm:$0x1]  ;;  %v5238_v60 = vld [vmem:[%s5165_s22 + $0x24] sm:$0xf] }
  0x1a   : > { %v437_v40 = vrot.slane %v435_v30, 5  ;;  %v443_v41 = vrot.slane %v441_v31, 5  ;;  %v447_v45 = vrot.slane %v445_v34, 4  ;;  %v456_v49 = vshrl.u32 %v5214_v36, 16  ;;  %v5242_v1 = vld [vmem:[%s5165_s22 + $0x28] sm:$0xf] }
  0x1b   : > { %v415_v43 = vrot.slane %v414_v32, 4  ;;  %v425_v44 = vrot.slane %v424_v33, 4  ;;  %v453_v46 = vrot.slane %v451_v35, 5  ;;  %v459_v50 = vshll.u32 %v5214_v36, 16  ;;  %v5250_v13 = vld [vmem:[%s5165_s22 + $0x2c] sm:$0x1] }
  0x1c   : > { %v438_v47 = vor.u32 %v437_v40, %v434_v39  ;;  %v465_v51 = vshll.u32 %v5217_v37, 16  ;;  %v448_v54 = vor.u32 %v447_v45, %v443_v41  ;;  %v469_v55 = vshrl.u32 %v5217_v37, 16  ;;  %v5256_v19 = vld [vmem:[%s5165_s22 + $0x30] sm:$0xf]  ;;  %v5265_v32 = vld [vmem:[%s5165_s22 + $0x34] sm:$0xf] }
  0x1d   : > { %v420_v52 = vsel %vm5221_vm4, %v415_v43, %v419_v26  ;;  %v430_v53 = vsel %vm5221_vm4, %v425_v44, %v429_v28  ;;  %v458_v58 = vrot.slane %v456_v49, 4  ;;  %v461_v59 = vrot.slane %v459_v50, 5  ;;  %v5274_v39 = vld [vmem:[%s5165_s22 + $0x38] sm:$0x1] }
  0x1e   : > { %v3852_v56 = vcombine.low %v420_v52, %v430_v53  ;;  %v439_v57 = vrot.slane %v438_v47, 4  ;;  %v449_v61 = vrot.slane %v448_v54, 4  ;;  %v467_v62 = vrot.slane %v465_v51, 5 }
  0x1f   : > { %v471_v63 = vrot.slane %v469_v55, 4  ;;  %v475_v0 = vshll.u32 %v5227_v48, 16  ;;  %v462_v3 = vor.u32 %v461_v59, %v458_v58  ;;  %v480_v17 = vshrl.u32 %v5238_v60, 16  ;;  %v5292_v55 = vld [vmem:[%s5165_s22 + $0x40] sm:$0xf] }
  0x20   : > { %4399 = vmatprep.mubr.msk.bf16.mxu1 %vm841_vm3, %v3852_v56  ;;  %v444_v2 = vsel %vm5221_vm4, %v439_v57, %v443_v41  ;;  %v454_v14 = vsel %vm5221_vm4, %v449_v61, %v453_v46  ;;  %v483_v26 = vshll.u32 %v5238_v60, 16  ;;  %v489_v27 = vshll.u32 %v5242_v1, 16  ;;  %v5282_v46 = vld [vmem:[%s5165_s22 + $0x3c] sm:$0xf] }
  0x21   : > { %v472_v15 = vor.u32 %v471_v63, %v467_v62  ;;  %v477_v16 = vrot.slane %v475_v0, 5  ;;  %v5258_v24 = vcombine.low %v444_v2, %v454_v14  ;;  %v463_v25 = vrot.slane %v462_v3, 4  ;;  %v5302_v0 = vld [vmem:[%s5165_s22 + $0x44] sm:$0x1] }
  0x22   : > { %v482_v29 = vrot.slane %v480_v17, 4  ;;  %v493_v30 = vshrl.u32 %v5242_v1, 16  ;;  %v499_v31 = vshll.u32 %v5250_v13, 16  ;;  %v485_v34 = vrot.slane %v483_v26, 5 }
  0x23   : > { %6575 = vst [vmem:[#allocation2_spill] sm:$0xff] %v5258_v24  ;;  %v473_v28 = vrot.slane %v472_v15, 4  ;;  %4535 = vmatprep.mubr.msk.bf16.mxu0 %vm841_vm3, %v5258_v24  ;;  %4400 = vmatmul.mubr.msk.bf16.vlgmr.msra.gmra.mrb[0].mxu1 %vm841_vm3, %v5258_v24  ;;  %v468_v33 = vsel %vm5221_vm4, %v463_v25, %v467_v62  ;;  %v491_v35 = vrot.slane %v489_v27, 5  ;;  %v504_v40 = vshrl.u32 %v5256_v19, 16  ;;  %v5316_v27 = vld [vmem:[%s5165_s22 + $0x4c] sm:$0xf] }
  0x24   : > { %4432 = vmatpush3.bf16.msra.mxu1 %v5171_v8  ;;  %v495_v43 = vrot.slane %v493_v30, 4  ;;  %v501_v44 = vrot.slane %v499_v31, 5  ;;  %v507_v45 = vshll.u32 %v5256_v19, 16  ;;  %v486_v49 = vor.u32 %v485_v34, %v482_v29  ;;  %v5437_v24 = vld [vmem:[%s5165_s22 + $0x88] sm:$0xf] }
  0x25   : > { %v478_v41 = vsel %vm5221_vm4, %v473_v28, %v477_v16  ;;  %v506_v50 = vrot.slane %v504_v40, 4  ;;  %v513_v51 = vshll.u32 %v5265_v32, 16  ;;  %4995 = vmatprep.subr.msk.bf16.mxu1 %vm890_vm0, %v5180_v10  ;;  %v517_v8 = vshrl.u32 %v5265_v32, 16  ;;  %v5308_v16 = vld [vmem:[%s5165_s22 + $0x48] sm:$0xf] }
  0x26   : > { %v5284_v47 = vcombine.low %v468_v33, %v478_v41  ;;  %v496_v52 = vor.u32 %v495_v43, %v491_v35  ;;  %v509_v53 = vrot.slane %v507_v45, 5  ;;  %v523_v54 = vshll.u32 %v5274_v39, 16 }
  0x27   : > { %v487_v56 = vrot.slane %v486_v49, 4  ;;  %v515_v57 = vrot.slane %v513_v51, 5  ;;  %v528_v10 = vshrl.u32 %v5282_v46, 16  ;;  %v531_v58 = vshll.u32 %v5282_v46, 16  ;;  %v5334_v49 = vld [vmem:[%s5165_s22 + $0x54] sm:$0xf] }
  0x28   : > { %6576 = vst [vmem:[#allocation3_spill] sm:$0xff] %v5284_v47  ;;  %4536 = vmatmul.mubr.msk.bf16.vlgmr.msra.gmra.mrb[0].mxu0 %vm841_vm3, %v5284_v47  ;;  %4403 = vmatprep.mubr.msk.bf16.mxu1 %vm841_vm3, %v5284_v47  ;;  %v497_v59 = vrot.slane %v496_v52, 4  ;;  %v510_v61 = vor.u32 %v509_v53, %v506_v50  ;;  %v519_v62 = vrot.slane %v517_v8, 4  ;;  %v525_v63 = vrot.slane %v523_v54, 5  ;;  %v5340_v8 = vld [vmem:[%s5165_s22 + $0x58] sm:$0xf] }
  0x29   : > { %4568 = vmatpush3.bf16.msra.mxu0 %v5168_v7  ;;  %v492_v2 = vsel %vm5221_vm4, %v487_v56, %v491_v35  ;;  %v530_v3 = vrot.slane %v528_v10, 4  ;;  %v533_v14 = vrot.slane %v531_v58, 5  ;;  %v537_v15 = vshll.u32 %v5292_v55, 16  ;;  %v5324_v35 = vld [vmem:[%s5165_s22 + $0x50] sm:$0x1] }
  0x2a   : > { %4999 = vmatprep.subr.msk.bf16.mxu0 %vm890_vm0, %v5159_v6  ;;  %v502_v7 = vsel %vm5221_vm4, %v497_v59, %v501_v44  ;;  %v511_v17 = vrot.slane %v510_v61, 4  ;;  %v520_v25 = vor.u32 %v519_v62, %v515_v57  ;;  %v541_v26 = vshrl.u32 %v5292_v55, 16  ;;  %v5348_v62 = vld [vmem:[%s5165_s22 + $0x5c] sm:$0x1]  ;;  %v5502_v47 = vld [vmem:[%s5165_s22 + $0xa8] sm:$0xf] }
  0x2b   : > { %v5318_v28 = vcombine.low %v492_v2, %v502_v7  ;;  %v534_v29 = vor.u32 %v533_v14, %v530_v3  ;;  %v539_v30 = vrot.slane %v537_v15, 5  ;;  %v547_v31 = vshll.u32 %v5302_v0, 16  ;;  %v5359_v7 = vld [vmem:[%s5165_s22 + $0x60] sm:$0xf]  ;;  %6591 = vst [vmem:[#allocation18_spill] sm:$0xff] %v5502_v47 }
  0x2c   : > { %v516_v33 = vsel %vm5221_vm4, %v511_v17, %v515_v57  ;;  %v521_v6 = vrot.slane %v520_v25, 4  ;;  %v543_v34 = vrot.slane %v541_v26, 4  ;;  %v552_v40 = vshrl.u32 %v5308_v16, 16 }
  0x2d   : > { %6577 = vst [vmem:[#allocation4_spill] sm:$0xff] %v5318_v28  ;;  %4539 = vmatprep.mubr.msk.bf16.mxu0 %vm841_vm3, %v5318_v28  ;;  %4404 = vmatmul.mubr.msk.bf16.gmra.mrb[4].mxu1 %vm841_vm3, %v5318_v28  ;;  %v535_v41 = vrot.slane %v534_v29, 4  ;;  %v549_v43 = vrot.slane %v547_v31, 5  ;;  %v555_v44 = vshll.u32 %v5308_v16, 16  ;;  %v561_v45 = vshll.u32 %v5316_v27, 16 }
  0x2e   : > { %v526_v50 = vsel %vm5221_vm4, %v521_v6, %v525_v63  ;;  %v544_v51 = vor.u32 %v543_v34, %v539_v30  ;;  %v554_v52 = vrot.slane %v552_v40, 4  ;;  %v565_v53 = vshrl.u32 %v5316_v27, 16  ;;  %v5490_v28 = vld [vmem:[%s5165_s22 + $0xa4] sm:$0x1] }
  0x2f   : > { %v5342_v54 = vcombine.low %v516_v33, %v526_v50  ;;  %v540_v56 = vsel %vm5221_vm4, %v535_v41, %v539_v30  ;;  %v557_v57 = vrot.slane %v555_v44, 5  ;;  %v563_v10 = vrot.slane %v561_v45, 5  ;;  %v5364_v30 = vld [vmem:[%s5165_s22 + $0x64] sm:$0xf]  ;;  %6590 = vst [vmem:[#allocation17_spill] sm:$0xff] %v5490_v28 }
  0x30   : > { %v545_v58 = vrot.slane %v544_v51, 4  ;;  %v567_v59 = vrot.slane %v565_v53, 4  ;;  %v571_v61 = vshll.u32 %v5324_v35, 16  ;;  %v576_v63 = vshrl.u32 %v5334_v49, 16  ;;  %v5377_v51 = vld [vmem:[%s5165_s22 + $0x68] sm:$0x1] }
  0x31   : > { %6578 = vst [vmem:[#allocation5_spill] sm:$0xff] %v5342_v54  ;;  %4540 = vmatmul.mubr.msk.bf16.gmra.mrb[4].mxu0 %vm841_vm3, %v5342_v54  ;;  %4407 = vmatprep.mubr.msk.bf16.mxu1 %vm841_vm3, %v5342_v54  ;;  %v558_v2 = vor.u32 %v557_v57, %v554_v52  ;;  %v579_v3 = vshll.u32 %v5334_v49, 16  ;;  %v585_v14 = vshll.u32 %v5340_v8, 16  ;;  %v589_v15 = vshrl.u32 %v5340_v8, 16 }
  0x32   : > { %v550_v17 = vsel %vm5221_vm4, %v545_v58, %v549_v43  ;;  %v568_v25 = vor.u32 %v567_v59, %v563_v10  ;;  %v573_v26 = vrot.slane %v571_v61, 5  ;;  %v578_v29 = vrot.slane %v576_v63, 4  ;;  %v5387_v63 = vld [vmem:[%s5165_s22 + $0x70] sm:$0xf] }
  0x33   : > { %v5366_v31 = vcombine.low %v540_v56, %v550_v17  ;;  %v559_v33 = vrot.slane %v558_v2, 4  ;;  %v581_v6 = vrot.slane %v579_v3, 5  ;;  %v587_v34 = vrot.slane %v585_v14, 5  ;;  %v5382_v56 = vld [vmem:[%s5165_s22 + $0x6c] sm:$0xf] }
  0x34   : > { %v569_v40 = vrot.slane %v568_v25, 4  ;;  %v591_v41 = vrot.slane %v589_v15, 4  ;;  %v595_v44 = vshll.u32 %v5348_v62, 16  ;;  %v600_v45 = vshrl.u32 %v5359_v7, 16 }
  0x35   : > { %6579 = vst [vmem:[#allocation6_spill] sm:$0xff] %v5366_v31  ;;  %4543 = vmatprep.mubr.msk.bf16.mxu0 %vm841_vm3, %v5366_v31  ;;  %4408 = vmatmul.mubr.msk.bf16.gmra.mrb[8].mxu1 %vm841_vm3, %v5366_v31  ;;  %v564_v43 = vsel %vm5221_vm4, %v559_v33, %v563_v10  ;;  %v582_v50 = vor.u32 %v581_v6, %v578_v29  ;;  %v603_v52 = vshll.u32 %v5359_v7, 16  ;;  %v609_v53 = vshll.u32 %v5364_v30, 16  ;;  %v5401_v6 = vld [vmem:[%s5165_s22 + $0x74] sm:$0x1] }
  0x36   : > { %v574_v57 = vsel %vm5221_vm4, %v569_v40, %v573_v26  ;;  %v592_v58 = vor.u32 %v591_v41, %v587_v34  ;;  %v597_v59 = vrot.slane %v595_v44, 5  ;;  %v602_v61 = vrot.slane %v600_v45, 4  ;;  %v5406_v44 = vld [vmem:[%s5165_s22 + $0x78] sm:$0xf] }
  0x37   : > { %v5389_v10 = vcombine.low %v564_v43, %v574_v57  ;;  %v583_v2 = vrot.slane %v582_v50, 4  ;;  %v605_v3 = vrot.slane %v603_v52, 5  ;;  %v611_v14 = vrot.slane %v609_v53, 5  ;;  %v5411_v53 = vld [vmem:[%s5165_s22 + $0x7c] sm:$0xf] }
  0x38   : > { %v593_v15 = vrot.slane %v592_v58, 4  ;;  %v613_v17 = vshrl.u32 %v5364_v30, 16  ;;  %v619_v25 = vshll.u32 %v5377_v51, 16  ;;  %v624_v26 = vshrl.u32 %v5382_v56, 16 }
  0x39   : > { %6580 = vst [vmem:[#allocation7_spill] sm:$0xff] %v5389_v10  ;;  %4544 = vmatmul.mubr.msk.bf16.gmra.mrb[8].mxu0 %vm841_vm3, %v5389_v10  ;;  %4411 = vmatprep.mubr.msk.bf16.mxu1 %vm841_vm3, %v5389_v10  ;;  %v588_v29 = vsel %vm5221_vm4, %v583_v2, %v587_v34  ;;  %v606_v33 = vor.u32 %v605_v3, %v602_v61  ;;  %v627_v40 = vshll.u32 %v5382_v56, 16  ;;  %v633_v41 = vshll.u32 %v5387_v63, 16  ;;  %v5469_v10 = vld [vmem:[%s5165_s22 + $0x98] sm:$0x1] }
  0x3a   : > { %v598_v45 = vsel %vm5221_vm4, %v593_v15, %v597_v59  ;;  %v615_v43 = vrot.slane %v613_v17, 4  ;;  %v621_v50 = vrot.slane %v619_v25, 5  ;;  %v626_v52 = vrot.slane %v624_v26, 4  ;;  %v5425_v17 = vld [vmem:[%s5165_s22 + $0x80] sm:$0x1]  ;;  %6586 = vst [vmem:[#allocation13_spill] sm:$0xff] %v5469_v10 }
  0x3b   : > { %v5413_v34 = vcombine.low %v588_v29, %v598_v45  ;;  %v607_v57 = vrot.slane %v606_v33, 4  ;;  %v629_v58 = vrot.slane %v627_v40, 5  ;;  %v635_v61 = vrot.slane %v633_v41, 5  ;;  %v5430_v29 = vld [vmem:[%s5165_s22 + $0x84] sm:$0xf] }
  0x3c   : > { %v616_v2 = vor.u32 %v615_v43, %v611_v14  ;;  %v637_v3 = vshrl.u32 %v5387_v63, 16  ;;  %v643_v5 = vshll.u32 %v5401_v6, 16  ;;  %v648_v42 = vshrl.u32 %v5406_v44, 16 }
  0x3d   : > { %6581 = vst [vmem:[#allocation8_spill] sm:$0xff] %v5413_v34  ;;  %4547 = vmatprep.mubr.msk.bf16.mxu0 %vm841_vm3, %v5413_v34  ;;  %4412 = vmatmul.mubr.msk.bf16.gmra.mrb[12].mxu1 %vm841_vm3, %v5413_v34  ;;  %v612_v59 = vsel %vm5221_vm4, %v607_v57, %v611_v14  ;;  %v630_v15 = vor.u32 %v629_v58, %v626_v52  ;;  %v651_v25 = vshll.u32 %v5406_v44, 16  ;;  %v657_v26 = vshll.u32 %v5411_v53, 16 }
  0x3e   : > { %v617_v33 = vrot.slane %v616_v2, 4  ;;  %v639_v40 = vrot.slane %v637_v3, 4  ;;  %v645_v41 = vrot.slane %v643_v5, 5  ;;  %v650_v45 = vrot.slane %v648_v42, 4 }
  0x3f   : > { %v631_v43 = vrot.slane %v630_v15, 4  ;;  %v653_v22 = vrot.slane %v651_v25, 5  ;;  %v659_v4 = vrot.slane %v657_v26, 5  ;;  %v661_v14 = vshrl.u32 %v5411_v53, 16  ;;  %v5445_v25 = vld [vmem:[%s5165_s22 + $0x8c] sm:$0x1] }
  0x40   : > { %v622_v52 = vsel %vm5221_vm4, %v617_v33, %v621_v50  ;;  %v640_v57 = vor.u32 %v639_v40, %v635_v61  ;;  %v667_v58 = vshll.u32 %v5425_v17, 16  ;;  %v672_v2 = vshrl.u32 %v5430_v29, 16  ;;  %v5448_v26 = vld [vmem:[%s5165_s22 + $0x90] sm:$0xf] }
  0x41   : > { %v5440_v3 = vcombine.low %v612_v59, %v622_v52  ;;  %v636_v42 = vsel %vm5221_vm4, %v631_v43, %v635_v61  ;;  %v654_v5 = vor.u32 %v653_v22, %v650_v45  ;;  %v663_v15 = vrot.slane %v661_v14, 4  ;;  %6583 = vst [vmem:[#allocation10_spill] sm:$0xff] %v5448_v26 }
  0x42   : > { %v641_v50 = vrot.slane %v640_v57, 4  ;;  %v669_v33 = vrot.slane %v667_v58, 5  ;;  %v674_v40 = vrot.slane %v672_v2, 4  ;;  %v675_v34 = vshll.u32 %v5430_v29, 16  ;;  %v5461_v57 = vld [vmem:[%s5165_s22 + $0x94] sm:$0xf] }
  0x43   : > { %6582 = vst [vmem:[#allocation9_spill] sm:$0xff] %v5440_v3  ;;  %4548 = vmatmul.mubr.msk.bf16.gmra.mrb[12].mxu0 %vm841_vm3, %v5440_v3  ;;  %4415 = vmatprep.mubr.msk.bf16.mxu1 %vm841_vm3, %v5440_v3  ;;  %v655_v61 = vrot.slane %v654_v5, 4  ;;  %v664_v22 = vor.u32 %v663_v15, %v659_v4  ;;  %v681_v59 = vshll.u32 %v5437_v24, 16  ;;  %v685_v45 = vshrl.u32 %v5437_v24, 16  ;;  %6584 = vst [vmem:[#allocation11_spill] sm:$0xff] %v5461_v57 }
  0x44   : > { %v646_v43 = vsel %vm5221_vm4, %v641_v50, %v645_v41  ;;  %v677_v14 = vrot.slane %v675_v34, 5  ;;  %v691_v52 = vshll.u32 %v5445_v25, 16  ;;  %v696_v58 = vshrl.u32 %v5448_v26, 16  ;;  %v5472_v50 = vld [vmem:[%s5165_s22 + $0x9c] sm:$0xf] }
  0x45   : > { %v5464_v2 = vcombine.low %v636_v42, %v646_v43  ;;  %v660_v5 = vsel %vm5221_vm4, %v655_v61, %v659_v4  ;;  %v665_v15 = vrot.slane %v664_v22, 4  ;;  %v683_v3 = vrot.slane %v681_v59, 5  ;;  %6587 = vst [vmem:[#allocation14_spill] sm:$0xff] %v5472_v50 }
  0x46   : > { %v678_v31 = vor.u32 %v677_v14, %v674_v40  ;;  %v687_v54 = vrot.slane %v685_v45, 4  ;;  %v693_v41 = vrot.slane %v691_v52, 5  ;;  %v698_v34 = vrot.slane %v696_v58, 4  ;;  %v5487_v14 = vld [vmem:[%s5165_s22 + $0xa0] sm:$0xf] }
  0x47   : > { %6585 = vst [vmem:[#allocation12_spill] sm:$0xff] %v5464_v2  ;;  %4551 = vmatprep.mubr.msk.bf16.mxu0 %vm841_vm3, %v5464_v2  ;;  %4416 = vmatmul.mubr.msk.bf16.gmra.mrb[16].mxu1 %vm841_vm3, %v5464_v2  ;;  %v670_v4 = vsel %vm5221_vm4, %v665_v15, %v669_v33  ;;  %v699_v42 = vshll.u32 %v5448_v26, 16  ;;  %v705_v61 = vshll.u32 %v5461_v57, 16  ;;  %v709_v40 = vshrl.u32 %v5461_v57, 16  ;;  %6589 = vst [vmem:[#allocation16_spill] sm:$0xff] %v5487_v14 }
  0x48   : > { %v5483_v22 = vcombine.low %v660_v5, %v670_v4  ;;  %v679_v59 = vrot.slane %v678_v31, 4  ;;  %v688_v45 = vor.u32 %v687_v54, %v683_v3  ;;  %v715_v43 = vshll.u32 %v5469_v10, 16  ;;  %v5514_v26 = vld [vmem:[%s5165_s22 + $0xb0] sm:$0x1] }
  0x49   : > { %v701_v52 = vrot.slane %v699_v42, 5  ;;  %v707_v58 = vrot.slane %v705_v61, 5  ;;  %v711_v2 = vrot.slane %v709_v40, 4  ;;  %v720_v33 = vshrl.u32 %v5472_v50, 16  ;;  %6594 = vst [vmem:[#allocation21_spill] sm:$0xff] %v5514_v26 }
  0x4a   : > { %6588 = vst [vmem:[#allocation15_spill] sm:$0xff] %v5483_v22  ;;  %4419 = vmatprep.mubr.msk.bf16.mxu1 %vm841_vm3, %v5483_v22  ;;  %v684_v31 = vsel %vm5221_vm4, %v679_v59, %v683_v3  ;;  %v689_v54 = vrot.slane %v688_v45, 4  ;;  %v717_v5 = vrot.slane %v715_v43, 5  ;;  %v723_v15 = vshll.u32 %v5472_v50, 16  ;;  %v5509_v45 = vld [vmem:[%s5165_s22 + $0xac] sm:$0xf] }
  0x4b   : > { %4552 = vmatmul.mubr.msk.bf16.gmra.mrb[16].mxu0 %vm841_vm3, %v5483_v22  ;;  %v702_v4 = vor.u32 %v701_v52, %v698_v34  ;;  %v712_v42 = vor.u32 %v711_v2, %v707_v58  ;;  %v722_v61 = vrot.slane %v720_v33, 4  ;;  %v729_v40 = vshll.u32 %v5487_v14, 16  ;;  %6592 = vst [vmem:[#allocation19_spill] sm:$0xff] %v5509_v45 }
  0x4c   : > { %v694_v10 = vsel %vm5221_vm4, %v689_v54, %v693_v41  ;;  %v725_v57 = vrot.slane %v723_v15, 5  ;;  %v733_v3 = vshrl.u32 %v5487_v14, 16  ;;  %v739_v59 = vshll.u32 %v5490_v28, 16  ;;  %v5528_v15 = vld [vmem:[%s5165_s22 + $0xb4] sm:$0xf] }
  0x4d   : > { %v5511_v43 = vcombine.low %v684_v31, %v694_v10  ;;  %v703_v2 = vrot.slane %v702_v4, 4  ;;  %v713_v34 = vrot.slane %v712_v42, 4  ;;  %v731_v52 = vrot.slane %v729_v40, 5  ;;  %6595 = vst [vmem:[#allocation22_spill] sm:$0xff] %v5528_v15 }
  0x4e   : > { %v726_v33 = vor.u32 %v725_v57, %v722_v61  ;;  %v735_v22 = vrot.slane %v733_v3, 4  ;;  %v741_v50 = vrot.slane %v739_v59, 5  ;;  %v744_v41 = vshrl.u32 %v5502_v47, 16  ;;  %v5533_v3 = vld [vmem:[%s5165_s22 + $0xb8] sm:$0xf] }
  0x4f   : > { %6593 = vst [vmem:[#allocation20_spill] sm:$0xff] %v5511_v43  ;;  %4555 = vmatprep.mubr.msk.bf16.mxu0 %vm841_vm3, %v5511_v43  ;;  %4420 = vmatmul.mubr.msk.bf16.gmra.mrb[20].mxu1 %vm841_vm3, %v5511_v43  ;;  %v708_v10 = vsel %vm5221_vm4, %v703_v2, %v707_v58  ;;  %v718_v31 = vsel %vm5221_vm4, %v713_v34, %v717_v5  ;;  %v747_v57 = vshll.u32 %v5502_v47, 16  ;;  %v753_v54 = vshll.u32 %v5509_v45, 16  ;;  %v5556_v47 = vld [vmem:[%s5165_s22 + $0xc4] sm:$0xf] }
  0x50   : > { %v5530_v4 = vcombine.low %v708_v10, %v718_v31  ;;  %v727_v42 = vrot.slane %v726_v33, 4  ;;  %v736_v61 = vor.u32 %v735_v22, %v731_v52  ;;  %v746_v40 = vrot.slane %v744_v41, 4  ;;  %v5542_v33 = vld [vmem:[%s5165_s22 + $0xbc] sm:$0x1] }
  0x51   : > { %v749_v58 = vrot.slane %v747_v57, 5  ;;  %v755_v59 = vrot.slane %v753_v54, 5  ;;  %v757_v5 = vshrl.u32 %v5509_v45, 16  ;;  %v763_v2 = vshll.u32 %v5514_v26, 16  ;;  %6597 = vst [vmem:[#allocation24_spill] sm:$0xff] %v5542_v33 }
  0x52   : > { %6596 = vst [vmem:[#allocation23_spill] sm:$0xff] %v5530_v4  ;;  %4423 = vmatprep.mubr.msk.bf16.mxu1 %vm841_vm3, %v5530_v4  ;;  %v732_v34 = vsel %vm5221_vm4, %v727_v42, %v731_v52  ;;  %v737_v10 = vrot.slane %v736_v61, 4  ;;  %v768_v22 = vshrl.u32 %v5528_v15, 16  ;;  %v771_v41 = vshll.u32 %v5528_v15, 16  ;;  %v5550_v26 = vld [vmem:[%s5165_s22 + $0xc0] sm:$0xf] }
  0x53   : > { %4556 = vmatmul.mubr.msk.bf16.gmra.mrb[20].mxu0 %vm841_vm3, %v5530_v4  ;;  %v750_v31 = vor.u32 %v749_v58, %v746_v40  ;;  %v759_v57 = vrot.slane %v757_v5, 4  ;;  %v765_v54 = vrot.slane %v763_v2, 5  ;;  %v777_v43 = vshll.u32 %v5533_v3, 16 }
  0x54   : > { %v742_v52 = vsel %vm5221_vm4, %v737_v10, %v741_v50  ;;  %v770_v42 = vrot.slane %v768_v22, 4  ;;  %v773_v61 = vrot.slane %v771_v41, 5  ;;  %v781_v45 = vshrl.u32 %v5533_v3, 16  ;;  %v5569_v10 = vld [vmem:[%s5165_s22 + $0xc8] sm:$0x1] }
  0x55   : > { %v5558_v15 = vcombine.low %v732_v34, %v742_v52  ;;  %v751_v4 = vrot.slane %v750_v31, 4  ;;  %v760_v40 = vor.u32 %v759_v57, %v755_v59  ;;  %v779_v58 = vrot.slane %v777_v43, 5 }
  0x56   : > { %v774_v5 = vor.u32 %v773_v61, %v770_v42  ;;  %v783_v2 = vrot.slane %v781_v45, 4  ;;  %v787_v28 = vshll.u32 %v5542_v33, 16  ;;  %v1979_v14 = vshrl.u32 %v5550_v26, 16 }
  0x57   : > { %6598 = vst [vmem:[#allocation25_spill] sm:$0xff] %v5558_v15  ;;  %4559 = vmatprep.mubr.msk.bf16.mxu0 %vm841_vm3, %v5558_v15  ;;  %4424 = vmatmul.mubr.msk.bf16.gmra.mrb[24].mxu1 %vm841_vm3, %v5558_v15  ;;  %v756_v50 = vsel %vm5221_vm4, %v751_v4, %v755_v59  ;;  %v761_v34 = vrot.slane %v760_v40, 4  ;;  %v1982_v43 = vshll.u32 %v5550_v26, 16  ;;  %v1988_v45 = vshll.u32 %v5556_v47, 16 }
  0x58   : > { %v775_v22 = vrot.slane %v774_v5, 4  ;;  %v784_v41 = vor.u32 %v783_v2, %v779_v58  ;;  %v789_v31 = vrot.slane %v787_v28, 5  ;;  %v1981_v57 = vrot.slane %v1979_v14, 4 }
  0x59   : > { %v766_v52 = vsel %vm5221_vm4, %v761_v34, %v765_v54  ;;  %v1984_v42 = vrot.slane %v1982_v43, 5  ;;  %v1990_v61 = vrot.slane %v1988_v45, 5  ;;  %v1992_v15 = vshrl.u32 %v5556_v47, 16 }
  0x5a   : > { %v5576_v33 = vcombine.low %v756_v50, %v766_v52  ;;  %v780_v4 = vsel %vm5221_vm4, %v775_v22, %v779_v58  ;;  %v785_v59 = vrot.slane %v784_v41, 4  ;;  %v1998_v40 = vshll.u32 %v5569_v10, 16 }
  0x5b   : > { %v1985_v14 = vor.u32 %v1984_v42, %v1981_v57  ;;  %v1994_v54 = vrot.slane %v1992_v15, 4  ;;  %v3917_v5 = vrot.slane %v5194_v18, 9  ;;  %v1375_v2 = vrot.slane %v5197_v20, 5 }
  0x5c   : > { %4560 = vmatmul.mubr.msk.bf16.gmra.mrb[24].mxu0 %vm841_vm3, %v5576_v33  ;;  %4427 = vmatprep.mubr.msk.bf16.mxu1 %vm841_vm3, %v5576_v33  ;;  %v790_v58 = vsel %vm5221_vm4, %v785_v59, %v789_v31  ;;  %v2000_v50 = vrot.slane %v1998_v40, 5  ;;  %v5597_v34 = vcombine.low %v5194_v18, %v5197_v20  ;;  %v3918_v15 = vrot.slane %v5214_v36, 9 }
  0x5d   : > { %v5600_v43 = vcombine.low %v780_v4, %v790_v58  ;;  %v1986_v45 = vrot.slane %v1985_v14, 4  ;;  %v1995_v22 = vor.u32 %v1994_v54, %v1990_v61  ;;  %v1376_v41 = vsel %vm5583_vm7, %v3917_v5, %v1375_v2 }
  0x5e   : > { %v1377_v57 = vrot.slane %v1375_v2, 4  ;;  %v6601_v52 = vrot.slane %v5217_v37, 5  ;;  %v5612_v18 = vcombine.low %v5214_v36, %v5217_v37  ;;  %v3919_v40 = vrot.slane %v5238_v60, 9 }
  0x5f   : > { %4563 = vmatprep.mubr.msk.bf16.mxu0 %vm841_vm3, %v5600_v43  ;;  %4428 = vmatmul.mubr.msk.bf16.gmra.mrb[28].mxu1 %vm841_vm3, %v5600_v43  ;;  %v1991_v20 = vsel %vm5221_vm4, %v1986_v45, %v1990_v61  ;;  %v1996_v4 = vrot.slane %v1995_v22, 4  ;;  %v1389_v14 = vrot.slane %v5242_v1, 5  ;;  %v6603_v54 = vcombine.low %v5183_v11, %v5186_v12 }
  0x60   : > { %v1383_v31 = vsel %vm5583_vm7, %v3918_v15, %v6601_v52  ;;  %v6602_v42 = vmov %v6601_v52  ;;  %v6604_v36 = vrot.slane %v5200_v21, 5  ;;  %v6605_v5 = vrot.slane %v5227_v48, 5 }
  0x61   : > { %v1384_v59 = vrot.slane %v6602_v42, 4  ;;  %4433 = vmatprep.mubr.msk.bf16.mxu1 %vm841_vm3, %v6603_v54  ;;  %v1392_v2 = vrot.slane %v5250_v13, 5  ;;  %v5637_v58 = vcombine.low %v5238_v60, %v5242_v1  ;;  %v2001_v11 = vsel %vm5221_vm4, %v1996_v4, %v2000_v50 }
  0x62   : > { %v1379_v37 = vsel %vm5583_vm7, %v1377_v57, %v6604_v36  ;;  %v1390_v15 = vsel %vm5583_vm7, %v3919_v40, %v1389_v14  ;;  %v5647_v48 = vcombine.low %v1991_v20, %v2001_v11  ;;  %v1391_v45 = vrot.slane %v1389_v14, 4  ;;  %v5683_v14 = vld [vmem:[%s6522_s1 + $0x6] sm:$0x3] }
  0x63   : > { %v1386_v61 = vsel %vm5583_vm7, %v1384_v59, %v6605_v5  ;;  %v5641_v12 = vcombine.low %v1376_v41, %v1379_v37  ;;  %v3920_v22 = vrot.slane %v5256_v19, 9  ;;  %v1396_v13 = vrot.slane %v5265_v32, 5 }
  0x64   : > { %v5643_v21 = vcombine.low %v1383_v31, %v1386_v61  ;;  %v1399_v60 = vrot.slane %v5274_v39, 5  ;;  %v5654_v1 = vcombine.low %v5256_v19, %v5265_v32  ;;  %v3921_v50 = vrot.slane %v5282_v46, 9  ;;  %4564 = vmatmul.mubr.msk.bf16.gmra.mrb[28].mxu0 %vm841_vm3, %v5647_v48 }
  0x65   : > { %v1403_v41 = vrot.slane %v5292_v55, 5  ;;  %v1393_v57 = vsel %vm5583_vm7, %v1391_v45, %v1392_v2  ;;  %v1397_v52 = vsel %vm5583_vm7, %v3920_v22, %v1396_v13  ;;  %v1398_v31 = vrot.slane %v1396_v13, 4  ;;  %4569 = vmatprep.mubr.msk.bf16.mxu0 %vm841_vm3, %v5641_v12 }
  0x66   : > { %v1406_v39 = vrot.slane %v5302_v0, 5  ;;  %v5667_v19 = vcombine.low %v1390_v15, %v1393_v57  ;;  %v5673_v59 = vcombine.low %v5282_v46, %v5292_v55  ;;  %v3922_v4 = vrot.slane %v5308_v16, 9 }
  0x67   : > { %v1404_v32 = vsel %vm5583_vm7, %v3921_v50, %v1403_v41  ;;  %v1405_v42 = vrot.slane %v1403_v41, 4  ;;  %v1400_v20 = vsel %vm5583_vm7, %v1398_v31, %v1399_v60  ;;  %v1410_v0 = vrot.slane %v5316_v27, 5  ;;  %4434 = vmatmul.mubr.msk.bf16.vlgmr.msra.gmra.mrb[0].mxu1 %vm841_vm3, %v5597_v34  ;;  %v5729_v60 = vld [vmem:[%s6522_s1 + $0xe] sm:$0x3] }
  0x68   : > { %v1413_v40 = vrot.slane %v5324_v35, 5  ;;  %v5687_v54 = vcombine.low %v1397_v52, %v1400_v20  ;;  %v5693_v55 = vcombine.low %v5308_v16, %v5316_v27  ;;  %v3923_v36 = vrot.slane %v5334_v49, 9  ;;  %4466 = vmatpush3.bf16.msra.mxu1 %v5206_v23  ;;  %4437 = vmatprep.mubr.msk.bf16.mxu1 %vm841_vm3, %v5612_v18 }
  0x69   : > { %v1407_v46 = vsel %vm5583_vm7, %v1405_v42, %v1406_v39  ;;  %v1411_v37 = vsel %vm5583_vm7, %v3922_v4, %v1410_v0  ;;  %v1412_v5 = vrot.slane %v1410_v0, 4  ;;  %v1417_v61 = vrot.slane %v5340_v8, 5  ;;  %4996 = vmatprep.subr.msk.bf16.mxu1 %vm890_vm0, %v5683_v14 }
  0x6a   : > { %v5699_v35 = vcombine.low %v1404_v32, %v1407_v46  ;;  %v1420_v2 = vrot.slane %v5348_v62, 5  ;;  %v5707_v16 = vcombine.low %v5334_v49, %v5340_v8  ;;  %v3924_v27 = vrot.slane %v5359_v7, 9 }
  0x6b   : > { %v1424_v23 = vrot.slane %v5364_v30, 5  ;;  %v1414_v11 = vsel %vm5583_vm7, %v1412_v5, %v1413_v40  ;;  %v1418_v15 = vsel %vm5583_vm7, %v3923_v36, %v1417_v61  ;;  %v1419_v45 = vrot.slane %v1417_v61, 4  ;;  %v6606_v5 = vld [vmem:[#allocation10_spill] sm:$0xff] }
  0x6c   : > { %v1427_v62 = vrot.slane %v5377_v51, 5  ;;  %v5718_v22 = vcombine.low %v1411_v37, %v1414_v11  ;;  %v5724_v13 = vcombine.low %v5359_v7, %v5364_v30  ;;  %4570 = vmatmul.mubr.msk.bf16.vlgmr.msra.gmra.mrb[0].mxu0 %vm841_vm3, %v5643_v21  ;;  %v3925_v50 = vrot.slane %v5382_v56, 9 }
  0x6d   : > { %v1425_v49 = vsel %vm5583_vm7, %v3924_v27, %v1424_v23  ;;  %v1426_v8 = vrot.slane %v1424_v23, 4  ;;  %v1421_v51 = vsel %vm5583_vm7, %v1419_v45, %v1420_v2  ;;  %v1431_v41 = vrot.slane %v5387_v63, 5  ;;  %4602 = vmatpush3.bf16.msra.mxu0 %v5175_v9  ;;  %4573 = vmatprep.mubr.msk.bf16.mxu0 %vm841_vm3, %v5667_v19  ;;  %v6607_v2 = vld [vmem:[#allocation11_spill] sm:$0xff]  ;;  %v6608_v23 = vld [vmem:[#allocation13_spill] sm:$0xff] }
  0x6e   : > { %v1434_v57 = vrot.slane %v5401_v6, 5  ;;  %v5741_v7 = vcombine.low %v1418_v15, %v1421_v51  ;;  %v5747_v52 = vcombine.low %v5382_v56, %v5387_v63  ;;  %v3926_v31 = vrot.slane %v5406_v44, 9  ;;  %5000 = vmatprep.subr.msk.bf16.mxu0 %vm890_vm0, %v5729_v60  ;;  %v6610_v51 = vld [vmem:[#allocation16_spill] sm:$0xff] }
  0x6f   : > { %v1428_v30 = vsel %vm5583_vm7, %v1426_v8, %v1427_v62  ;;  %v1432_v6 = vsel %vm5583_vm7, %v3925_v50, %v1431_v41  ;;  %v1433_v9 = vrot.slane %v1431_v41, 4  ;;  %v1438_v32 = vrot.slane %v5411_v53, 5  ;;  %4438 = vmatmul.mubr.msk.bf16.gmra.mrb[4].mxu1 %vm841_vm3, %v5637_v58  ;;  %v6611_v41 = vld [vmem:[#allocation17_spill] sm:$0xff] }
  0x70   : > { %v5750_v39 = vcombine.low %v1425_v49, %v1428_v30  ;;  %v1441_v42 = vrot.slane %v5425_v17, 5  ;;  %v5762_v56 = vcombine.low %v5406_v44, %v5411_v53  ;;  %v3927_v63 = vrot.slane %v5430_v29, 9  ;;  %4441 = vmatprep.mubr.msk.bf16.mxu1 %vm841_vm3, %v5654_v1 }
  0x71   : > { %v1445_v20 = vrot.slane %v5437_v24, 5  ;;  %v1435_v4 = vsel %vm5583_vm7, %v1433_v9, %v1434_v57  ;;  %v1439_v0 = vsel %vm5583_vm7, %v3926_v31, %v1438_v32  ;;  %v1440_v40 = vrot.slane %v1438_v32, 4  ;;  %v6612_v31 = vld [vmem:[#allocation18_spill] sm:$0xff]  ;;  %v6613_v9 = vld [vmem:[#allocation19_spill] sm:$0xff] }
  0x72   : > { %v1448_v17 = vrot.slane %v5445_v25, 5  ;;  %v5773_v46 = vcombine.low %v1432_v6, %v1435_v4  ;;  %v5779_v36 = vcombine.low %v5430_v29, %v5437_v24  ;;  %v3928_v61 = vrot.slane %v6606_v5, 9  ;;  %v6609_v24 = vld [vmem:[#allocation14_spill] sm:$0xff]  ;;  %v6614_v4 = vld [vmem:[#allocation21_spill] sm:$0xff] }
  0x73   : > { %v1446_v44 = vsel %vm5583_vm7, %v3927_v63, %v1445_v20  ;;  %v1447_v53 = vrot.slane %v1445_v20, 4  ;;  %v1442_v37 = vsel %vm5583_vm7, %v1440_v40, %v1441_v42  ;;  %v1452_v27 = vrot.slane %v6607_v2, 5 }
  0x74   : > { %v1455_v11 = vrot.slane %v6608_v23, 5  ;;  %v5786_v25 = vcombine.low %v1439_v0, %v1442_v37  ;;  %v5792_v45 = vcombine.low %v6606_v5, %v6607_v2  ;;  %v3929_v29 = vrot.slane %v6609_v24, 9  ;;  %4574 = vmatmul.mubr.msk.bf16.gmra.mrb[4].mxu0 %vm841_vm3, %v5687_v54  ;;  %v6615_v5 = vld [vmem:[#allocation22_spill] sm:$0xff] }
  0x75   : > { %v1449_v15 = vsel %vm5583_vm7, %v1447_v53, %v1448_v17  ;;  %v1453_v49 = vsel %vm5583_vm7, %v3928_v61, %v1452_v27  ;;  %v1454_v8 = vrot.slane %v1452_v27, 4  ;;  %v1459_v50 = vrot.slane %v6610_v51, 5  ;;  %4577 = vmatprep.mubr.msk.bf16.mxu0 %vm841_vm3, %v5699_v35  ;;  %v6616_v27 = vld [vmem:[#allocation24_spill] sm:$0xff] }
  0x76   : > { %v5797_v62 = vcombine.low %v1446_v44, %v1449_v15  ;;  %v1462_v57 = vrot.slane %v6611_v41, 5  ;;  %v5807_v30 = vcombine.low %v6609_v24, %v6610_v51  ;;  %v3930_v6 = vrot.slane %v6612_v31, 9 }
  0x77   : > { %v1466_v32 = vrot.slane %v6613_v9, 5  ;;  %v1456_v42 = vsel %vm5583_vm7, %v1454_v8, %v1455_v11  ;;  %v1460_v63 = vsel %vm5583_vm7, %v3929_v29, %v1459_v50  ;;  %v1461_v20 = vrot.slane %v1459_v50, 4  ;;  %4442 = vmatmul.mubr.msk.bf16.gmra.mrb[8].mxu1 %vm841_vm3, %v5673_v59 }
  0x78   : > { %v1469_v0 = vrot.slane %v6614_v4, 5  ;;  %v5818_v40 = vcombine.low %v1453_v49, %v1456_v42  ;;  %v5824_v53 = vcombine.low %v6612_v31, %v6613_v9  ;;  %4445 = vmatprep.mubr.msk.bf16.mxu1 %vm841_vm3, %v5693_v55  ;;  %v3931_v61 = vrot.slane %v6615_v5, 9  ;;  %v5047_v42 = vld [vmem:[%s5165_s22 + $0x8] sm:$0x1] }
  0x79   : > { %v1467_v17 = vsel %vm5583_vm7, %v3930_v6, %v1466_v32  ;;  %v1468_v44 = vrot.slane %v1466_v32, 4  ;;  %v1463_v37 = vsel %vm5583_vm7, %v1461_v20, %v1462_v57  ;;  %v1473_v2 = vrot.slane %v5533_v3, 5  ;;  %v5048_v20 = vld [vmem:[%s5165_s22] sm:$0xf] }
  0x7a   : > { %v1476_v23 = vrot.slane %v6616_v27, 5  ;;  %v5833_v11 = vcombine.low %v1460_v63, %v1463_v37  ;;  %v5839_v24 = vcombine.low %v6615_v5, %v5533_v3  ;;  %v4001_v29 = vrot.slane %v5550_v26, 9 }
  0x7b   : > { %v1470_v15 = vsel %vm5583_vm7, %v1468_v44, %v1469_v0  ;;  %v1474_v8 = vsel %vm5583_vm7, %v3931_v61, %v1473_v2  ;;  %v1475_v51 = vrot.slane %v1473_v2, 4  ;;  %v2209_v50 = vrot.slane %v5556_v47, 5  ;;  %v3335_v61 = vld [vmem:[%s6525_s4] sm:$0x3] }
  0x7c   : > { %v5842_v49 = vcombine.low %v1467_v17, %v1470_v15  ;;  %v2212_v41 = vrot.slane %v5569_v10, 5  ;;  %4578 = vmatmul.mubr.msk.bf16.gmra.mrb[8].mxu0 %vm841_vm3, %v5718_v22  ;;  %v5860_v9 = vcombine.low %v5550_v26, %v5556_v47  ;;  %v5046_v47 = vld [vmem:[%s5165_s22 + $0x4] sm:$0xf]  ;;  %v1371_v63 = vrot.slane %v5047_v42, 5 }
  0x7d   : > { %v1477_v57 = vsel %vm5583_vm7, %v1475_v51, %v1476_v23  ;;  %v2210_v3 = vsel %vm5583_vm7, %v4001_v29, %v2209_v50  ;;  %v2211_v31 = vrot.slane %v2209_v50, 4  ;;  %4581 = vmatprep.mubr.msk.bf16.mxu0 %vm841_vm3, %v5741_v7  ;;  %v1368_v26 = vrot.slane %v5046_v47, 5  ;;  %v6617_v23 = vld [vmem:[#allocation3_spill] sm:$0xff]  ;;  %v6623_v50 = vld [vmem:[#allocation9_spill] sm:$0xff] }
  0x7e   : > { %v5856_v6 = vcombine.low %v1474_v8, %v1477_v57  ;;  %v3916_v4 = vrot.slane %v5048_v20, 9  ;;  %v1783_v5 = vsel %vm890_vm0, %v5683_v14, 0  ;;  %v2657_v2 = vsel %vm890_vm0, %v5729_v60, 0  ;;  %v4057_v14 = vld [vmem:[%s6522_s1 + $0x10] sm:$0x3]  ;;  %v6621_v51 = vld [vmem:[#allocation7_spill] sm:$0xff] }
  0x7f   : > { %v2213_v10 = vsel %vm5583_vm7, %v2211_v31, %v2212_v41  ;;  %4446 = vmatmul.mubr.msk.bf16.gmra.mrb[12].mxu1 %vm841_vm3, %v5707_v16  ;;  %v1370_v0 = vrot.slane %v1368_v26, 4  ;;  %v5984_v60 = vld [vmem:[%s5165_s22 + $0xd0] sm:$0xf]  ;;  %v3337_v15 = vsel %vm890_vm0, %v3335_v61, 0  ;;  %v2869_v29 = vsel %vm890_vm0, %v4057_v14, 0  ;;  %v6627_v41 = vld [vmem:[#allocation23_spill] sm:$0xff] }
  0x80   : > { %v5866_v32 = vcombine.low %v2210_v3, %v2213_v10  ;;  %4449 = vmatprep.mubr.msk.bf16.mxu1 %vm841_vm3, %v5724_v13  ;;  %v1369_v17 = vsel %vm5583_vm7, %v3916_v4, %v1368_v26  ;;  %v6618_v8 = vld [vmem:[#allocation4_spill] sm:$0xff]  ;;  %v2634_v57 = vshll.u32 %v5984_v60, 16  ;;  %v6628_v47 = vld [vmem:[#allocation25_spill] sm:$0xff]  ;;  %v2855_v38 = vrot.slane %v5984_v60, 5 }
  0x81   : > { %v1372_v44 = vsel %vm5583_vm7, %v1370_v0, %v1371_v63  ;;  %v402_v10 = vld [vmem:[%s5165_s22 + $0xd4] sm:$0x1] }
  0x82   : > { %v3933_v37 = vcombine.low %v1369_v17, %v1372_v44  ;;  %v2636_v3 = vrot.slane %v2634_v57, 5  ;;  %v2644_v63 = vshll.u32 %v402_v10, 16 }
  0x84   : > { %4582 = vmatmul.mubr.msk.bf16.gmra.mrb[12].mxu0 %vm841_vm3, %v5750_v39  ;;  %v2646_v20 = vrot.slane %v2644_v63, 5 }
  0x85   : > { %4585 = vmatprep.mubr.msk.bf16.mxu0 %vm841_vm3, %v5773_v46 }
  0x87   : > { %4450 = vmatmul.mubr.msk.bf16.gmra.mrb[16].mxu1 %vm841_vm3, %v5747_v52 }
  0x88   : > { %4453 = vmatprep.mubr.msk.bf16.mxu1 %vm841_vm3, %v5762_v56 }
  0x8c   : > { %4586 = vmatmul.mubr.msk.bf16.gmra.mrb[16].mxu0 %vm841_vm3, %v5786_v25 }
  0x8d   : > { %4589 = vmatprep.mubr.msk.bf16.mxu0 %vm841_vm3, %v5797_v62 }
  0x8f   : > { %4454 = vmatmul.mubr.msk.bf16.gmra.mrb[20].mxu1 %vm841_vm3, %v5779_v36 }
  0x90   : > { %4457 = vmatprep.mubr.msk.bf16.mxu1 %vm841_vm3, %v5792_v45 }
  0x94   : > { %4590 = vmatmul.mubr.msk.bf16.gmra.mrb[20].mxu0 %vm841_vm3, %v5818_v40 }
  0x95   : > { %4593 = vmatprep.mubr.msk.bf16.mxu0 %vm841_vm3, %v5833_v11 }
  0x97   : > { %4458 = vmatmul.mubr.msk.bf16.gmra.mrb[24].mxu1 %vm841_vm3, %v5807_v30 }
  0x98   : > { %4461 = vmatprep.mubr.msk.bf16.mxu1 %vm841_vm3, %v5824_v53 }
  0x9c   : > { %4594 = vmatmul.mubr.msk.bf16.gmra.mrb[24].mxu0 %vm841_vm3, %v5842_v49 }
  0x9d   : > { %4597 = vmatprep.mubr.msk.bf16.mxu0 %vm841_vm3, %v5856_v6 }
  0x9f   : > { %4462 = vmatmul.mubr.msk.bf16.gmra.mrb[28].mxu1 %vm841_vm3, %v5839_v24 }
  0xa0   : > { %4467 = vmatprep.mubr.msk.bf16.mxu1 %vm841_vm3, %v3933_v37 }
  0xa4   : > { %4598 = vmatmul.mubr.msk.bf16.gmra.mrb[28].mxu0 %vm841_vm3, %v5866_v32 }
  0xa5   : > { %4603 = vmatprep.mubr.msk.bf16.mxu0 %vm841_vm3, %v5612_v18 }
  0xa7   : > { %4468 = vmatmul.mubr.msk.bf16.vlgmr.msra.gmra.mrb[0].mxu1 %vm841_vm3, %v5641_v12  ;;  %v5981_v12 = vld [vmem:[%s5165_s22 + $0xcc] sm:$0xf]  ;;  %s6212_s22 = scalar_lea.vmem %s6529_s8, %s4161_s19 }
  0xa8   : > { %4500 = vmatpush3.bf16.msra.mxu1 %v1783_v5  ;;  %4471 = vmatprep.mubr.msk.bf16.mxu1 %vm841_vm3, %v5643_v21  ;;  %v4021_v27 = vcombine.low %v5981_v12, %v5984_v60 }
  0xa9   : > { %5002 = vmatprep.subr.msk.bf16.mxu1 %vm890_vm0, %v3335_v61 }
  0xac   : > { %4604 = vmatmul.mubr.msk.bf16.vlgmr.msra.gmra.mrb[0].mxu0 %vm841_vm3, %v5637_v58 }
  0xad   : > { %4636 = vmatpush3.bf16.msra.mxu0 %v2657_v2  ;;  %4607 = vmatprep.mubr.msk.bf16.mxu0 %vm841_vm3, %v5654_v1 }
  0xae   : > { %5001 = vmatprep.subr.msk.bf16.mxu0 %vm890_vm0, %v4057_v14 }
  0xaf   : > { %4472 = vmatmul.mubr.msk.bf16.gmra.mrb[4].mxu1 %vm841_vm3, %v5667_v19 }
  0xb0   : > { %4475 = vmatprep.mubr.msk.bf16.mxu1 %vm841_vm3, %v5687_v54 }
  0xb4   : > { %4608 = vmatmul.mubr.msk.bf16.gmra.mrb[4].mxu0 %vm841_vm3, %v5673_v59 }
  0xb5   : > { %4611 = vmatprep.mubr.msk.bf16.mxu0 %vm841_vm3, %v5693_v55 }
  0xb7   : > { %4476 = vmatmul.mubr.msk.bf16.gmra.mrb[8].mxu1 %vm841_vm3, %v5699_v35 }
  0xb8   : > { %4479 = vmatprep.mubr.msk.bf16.mxu1 %vm841_vm3, %v5718_v22 }
  0xbc   : > { %4612 = vmatmul.mubr.msk.bf16.gmra.mrb[8].mxu0 %vm841_vm3, %v5707_v16 }
  0xbd   : > { %4615 = vmatprep.mubr.msk.bf16.mxu0 %vm841_vm3, %v5724_v13 }
  0xbf   : > { %4480 = vmatmul.mubr.msk.bf16.gmra.mrb[12].mxu1 %vm841_vm3, %v5741_v7 }
  0xc0   : > { %4483 = vmatprep.mubr.msk.bf16.mxu1 %vm841_vm3, %v5750_v39 }
  0xc4   : > { %4616 = vmatmul.mubr.msk.bf16.gmra.mrb[12].mxu0 %vm841_vm3, %v5747_v52 }
  0xc5   : > { %4619 = vmatprep.mubr.msk.bf16.mxu0 %vm841_vm3, %v5762_v56 }
  0xc7   : > { %4484 = vmatmul.mubr.msk.bf16.gmra.mrb[16].mxu1 %vm841_vm3, %v5773_v46 }
  0xc8   : > { %4487 = vmatprep.mubr.msk.bf16.mxu1 %vm841_vm3, %v5786_v25 }
  0xcc   : > { %4620 = vmatmul.mubr.msk.bf16.gmra.mrb[16].mxu0 %vm841_vm3, %v5779_v36 }
  0xcd   : > { %4623 = vmatprep.mubr.msk.bf16.mxu0 %vm841_vm3, %v5792_v45 }
  0xcf   : > { %4488 = vmatmul.mubr.msk.bf16.gmra.mrb[20].mxu1 %vm841_vm3, %v5797_v62 }
  0xd0   : > { %4491 = vmatprep.mubr.msk.bf16.mxu1 %vm841_vm3, %v5818_v40 }
  0xd4   : > { %4624 = vmatmul.mubr.msk.bf16.gmra.mrb[20].mxu0 %vm841_vm3, %v5807_v30 }
  0xd5   : > { %4627 = vmatprep.mubr.msk.bf16.mxu0 %vm841_vm3, %v5824_v53 }
  0xd7   : > { %4492 = vmatmul.mubr.msk.bf16.gmra.mrb[24].mxu1 %vm841_vm3, %v5833_v11 }
  0xd8   : > { %4495 = vmatprep.mubr.msk.bf16.mxu1 %vm841_vm3, %v5842_v49 }
  0xdc   : > { %4628 = vmatmul.mubr.msk.bf16.gmra.mrb[24].mxu0 %vm841_vm3, %v5839_v24 }
  0xdd   : > { %4631 = vmatprep.mubr.msk.bf16.mxu0 %vm841_vm3, %v5860_v9 }
  0xdf   : > { %4496 = vmatmul.mubr.msk.bf16.gmra.mrb[28].mxu1 %vm841_vm3, %v5856_v6 }
  0xe0   : > { %4501 = vmatprep.mubr.msk.bf16.mxu1 %vm841_vm3, %v5597_v34  ;;  %v6619_v34 = vld [vmem:[#allocation5_spill] sm:$0xff] }
  0xe4   : > { %4632 = vmatmul.mubr.msk.bf16.gmra.mrb[28].mxu0 %vm841_vm3, %v4021_v27 }
  0xe5   : > { %4637 = vmatprep.mubr.msk.bf16.mxu0 %vm841_vm3, %v6617_v23 }
  0xe7   : > { %4502 = vmatmul.mubr.msk.bf16.vlgmr.msra.gmra.mrb[0].mxu1 %vm841_vm3, %v5612_v18  ;;  %v6620_v18 = vld [vmem:[#allocation6_spill] sm:$0xff] }
  0xe8   : > { %4704 = vmatpush3.bf16.msra.mxu1 %v3337_v15  ;;  %4505 = vmatprep.mubr.msk.bf16.mxu1 %vm841_vm3, %v5637_v58  ;;  %v6622_v58 = vld [vmem:[#allocation8_spill] sm:$0xff] }
  0xec   : > { %4638 = vmatmul.mubr.msk.bf16.vlgmr.msra.gmra.mrb[0].mxu0 %vm841_vm3, %v6618_v8 }
  0xed   : > { %4670 = vmatpush3.bf16.msra.mxu0 %v2869_v29  ;;  %4641 = vmatprep.mubr.msk.bf16.mxu0 %vm841_vm3, %v6619_v34 }
  0xef   : > { %4506 = vmatmul.mubr.msk.bf16.gmra.mrb[4].mxu1 %vm841_vm3, %v5654_v1  ;;  %v6624_v1 = vld [vmem:[#allocation12_spill] sm:$0xff] }
  0xf0   : > { %4509 = vmatprep.mubr.msk.bf16.mxu1 %vm841_vm3, %v5673_v59  ;;  %v6625_v59 = vld [vmem:[#allocation15_spill] sm:$0xff] }
  0xf4   : > { %4642 = vmatmul.mubr.msk.bf16.gmra.mrb[4].mxu0 %vm841_vm3, %v6620_v18 }
  0xf5   : > { %4645 = vmatprep.mubr.msk.bf16.mxu0 %vm841_vm3, %v6621_v51 }
  0xf7   : > { %4510 = vmatmul.mubr.msk.bf16.gmra.mrb[8].mxu1 %vm841_vm3, %v5693_v55  ;;  %v6626_v55 = vld [vmem:[#allocation20_spill] sm:$0xff] }
  0xf8   : > { %4513 = vmatprep.mubr.msk.bf16.mxu1 %vm841_vm3, %v5707_v16  ;;  %v2625_v16 = vshrl.u32 %v5981_v12, 16 }
  0xfc   : > { %4646 = vmatmul.mubr.msk.bf16.gmra.mrb[8].mxu0 %vm841_vm3, %v6622_v58 }
  0xfd   : > { %4649 = vmatprep.mubr.msk.bf16.mxu0 %vm841_vm3, %v6623_v50 }
  0xff   : > { %4514 = vmatmul.mubr.msk.bf16.gmra.mrb[12].mxu1 %vm841_vm3, %v5724_v13  ;;  %v2628_v13 = vshll.u32 %v5981_v12, 16 }
 0x100   : > { %4517 = vmatprep.mubr.msk.bf16.mxu1 %vm841_vm3, %v5747_v52  ;;  %v2638_v52 = vshrl.u32 %v5984_v60, 16 }
 0x102   : > { %v2640_v31 = vrot.slane %v2638_v52, 4 }
 0x104   : > { %4650 = vmatmul.mubr.msk.bf16.gmra.mrb[12].mxu0 %vm841_vm3, %v6624_v1  ;;  %v2641_v42 = vor.u32 %v2640_v31, %v2636_v3 }
 0x105   : > { %4653 = vmatprep.mubr.msk.bf16.mxu0 %vm841_vm3, %v6625_v59 }
 0x107   : > { %4518 = vmatmul.mubr.msk.bf16.gmra.mrb[16].mxu1 %vm841_vm3, %v5762_v56  ;;  %v2627_v56 = vrot.slane %v2625_v16, 4 }
 0x108   : > { %4521 = vmatprep.mubr.msk.bf16.mxu1 %vm841_vm3, %v5779_v36  ;;  %v2630_v36 = vrot.slane %v2628_v13, 5 }
 0x10a   : > { %v2631_v26 = vor.u32 %v2630_v36, %v2627_v56 }
 0x10c   : > { %4654 = vmatmul.mubr.msk.bf16.gmra.mrb[16].mxu0 %vm841_vm3, %v6626_v55 }
 0x10d   : > { %4657 = vmatprep.mubr.msk.bf16.mxu0 %vm841_vm3, %v6627_v41 }
 0x10f   : > { %4522 = vmatmul.mubr.msk.bf16.gmra.mrb[20].mxu1 %vm841_vm3, %v5792_v45  ;;  %v2632_v45 = vrot.slane %v2631_v26, 4 }
 0x110   : > { %4525 = vmatprep.mubr.msk.bf16.mxu1 %vm841_vm3, %v5807_v30  ;;  %v2642_v30 = vrot.slane %v2641_v42, 4 }
 0x111   : > { %v2637_v4 = vsel %vm5221_vm4, %v2632_v45, %v2636_v3 }
 0x112   : > { %v2647_v0 = vsel %vm5221_vm4, %v2642_v30, %v2646_v20  ;;  %v6226_v20 = vld [vmem:[%s6524_s3] ss:$0 sm:$0xff] }
 0x114   : > { %4658 = vmatmul.mubr.msk.bf16.gmra.mrb[20].mxu0 %vm841_vm3, %v6628_v47 }
 0x115   : > { %4661 = vmatprep.mubr.msk.bf16.mxu0 %vm841_vm3, %v5576_v33 }
 0x117   : > { %4526 = vmatmul.mubr.msk.bf16.gmra.mrb[24].mxu1 %vm841_vm3, %v5824_v53  ;;  %v4039_v53 = vcombine.low %v2637_v4, %v2647_v0 }
 0x118   : > { %4529 = vmatprep.mubr.msk.bf16.mxu1 %vm841_vm3, %v5839_v24  ;;  %v6629_v24 = vld [vmem:[#allocation2_spill] sm:$0xff] }
 0x11c   : > { %4662 = vmatmul.mubr.msk.bf16.gmra.mrb[24].mxu0 %vm841_vm3, %v5600_v43 }
 0x11d   : > { %4665 = vmatprep.mubr.msk.bf16.mxu0 %vm841_vm3, %v5647_v48 }
 0x11f   : > { %4530 = vmatmul.mubr.msk.bf16.gmra.mrb[28].mxu1 %vm841_vm3, %v5860_v9 }
 0x120   : > { %4705 = vmatprep.mubr.msk.bf16.mxu1 %vm841_vm3, %v6629_v24 }
 0x124   : > { %4666 = vmatmul.mubr.msk.bf16.gmra.mrb[28].mxu0 %vm841_vm3, %v4039_v53 }
 0x125   : > { %4671 = vmatprep.mubr.msk.bf16.mxu0 %vm841_vm3, %v5643_v21  ;;  %v4056_v21 = vrot.slane %v5981_v12, 9 }
 0x127   : > { %4706 = vmatmul.mubr.msk.bf16.vlgmr.msra.gmra.mrb[32].mxu1 %vm841_vm3, %v6617_v23 }
 0x128   : > { %4709 = vmatprep.mubr.msk.bf16.mxu1 %vm841_vm3, %v6618_v8 }
 0x12c   : > { %4672 = vmatmul.mubr.msk.bf16.vlgmr.msra.gmra.mrb[0].mxu0 %vm841_vm3, %v5667_v19  ;;  %v2857_v19 = vrot.slane %v2855_v38, 4 }
 0x12d   : > { %4675 = vmatprep.mubr.msk.bf16.mxu0 %vm841_vm3, %v5687_v54  ;;  %v2858_v54 = vrot.slane %v402_v10, 5  ;;  %v6219_v10 = vld [vmem:[%s6523_s2] ss:$0 sm:$0xff] }
 0x12f   : > { %4710 = vmatmul.mubr.msk.bf16.gmra.mrb[36].mxu1 %vm841_vm3, %v6619_v34 }
 0x130   : > { %4713 = vmatprep.mubr.msk.bf16.mxu1 %vm841_vm3, %v6620_v18 }
 0x134   : > { %4676 = vmatmul.mubr.msk.bf16.gmra.mrb[4].mxu0 %vm841_vm3, %v5699_v35  ;;  %v2856_v35 = vsel %vm5583_vm7, %v4056_v21, %v2855_v38 }
 0x135   : > { %4679 = vmatprep.mubr.msk.bf16.mxu0 %vm841_vm3, %v5718_v22  ;;  %v2859_v22 = vsel %vm5583_vm7, %v2857_v19, %v2858_v54 }
 0x137   : > { %4714 = vmatmul.mubr.msk.bf16.gmra.mrb[40].mxu1 %vm841_vm3, %v6621_v51 }
 0x138   : > { %4717 = vmatprep.mubr.msk.bf16.mxu1 %vm841_vm3, %v6622_v58 }
 0x13c   : > { %4680 = vmatmul.mubr.msk.bf16.gmra.mrb[8].mxu0 %vm841_vm3, %v5741_v7 }
 0x13d   : > { %4683 = vmatprep.mubr.msk.bf16.mxu0 %vm841_vm3, %v5750_v39 }
 0x13f   : > { %4718 = vmatmul.mubr.msk.bf16.gmra.mrb[44].mxu1 %vm841_vm3, %v6623_v50  ;;  %v6195_v50 = vld [vmem:[%s6526_s5] ss:$0 sm:$0xff] }
 0x140   : > { %4721 = vmatprep.mubr.msk.bf16.mxu1 %vm841_vm3, %v6624_v1 }
 0x144   : > { %4684 = vmatmul.mubr.msk.bf16.gmra.mrb[12].mxu0 %vm841_vm3, %v5773_v46 }
 0x145   : > { %4687 = vmatprep.mubr.msk.bf16.mxu0 %vm841_vm3, %v5786_v25 }
 0x147   : > { %4722 = vmatmul.mubr.msk.bf16.gmra.mrb[48].mxu1 %vm841_vm3, %v6625_v59  ;;  %v6200_v59 = vld [vmem:[%s6527_s6] ss:$0 sm:$0xff] }
 0x148   : > { %4725 = vmatprep.mubr.msk.bf16.mxu1 %vm841_vm3, %v6626_v55 }
 0x14c   : > { %4688 = vmatmul.mubr.msk.bf16.gmra.mrb[16].mxu0 %vm841_vm3, %v5797_v62 }
 0x14d   : > { %4691 = vmatprep.mubr.msk.bf16.mxu0 %vm841_vm3, %v5818_v40 }
 0x14f   : > { %4726 = vmatmul.mubr.msk.bf16.gmra.mrb[52].mxu1 %vm841_vm3, %v6627_v41 }
 0x150   : > { %4729 = vmatprep.mubr.msk.bf16.mxu1 %vm841_vm3, %v6628_v47 }
 0x154   : > { %4692 = vmatmul.mubr.msk.bf16.gmra.mrb[20].mxu0 %vm841_vm3, %v5833_v11 }
 0x155   : > { %4695 = vmatprep.mubr.msk.bf16.mxu0 %vm841_vm3, %v5842_v49 }
 0x157   : > { %4730 = vmatmul.mubr.msk.bf16.gmra.mrb[56].mxu1 %vm841_vm3, %v5576_v33  ;;  %v4058_v33 = vcombine.low %v2856_v35, %v2859_v22 }
 0x158   : > { %4733 = vmatprep.mubr.msk.bf16.mxu1 %vm841_vm3, %v5600_v43 }
 0x15c   : > { %4696 = vmatmul.mubr.msk.bf16.gmra.mrb[24].mxu0 %vm841_vm3, %v5856_v6 }
 0x15d   : > { %4699 = vmatprep.mubr.msk.bf16.mxu0 %vm841_vm3, %v5866_v32 }
 0x15f   : > { %4734 = vmatmul.mubr.msk.bf16.gmra.mrb[60].mxu1 %vm841_vm3, %v5647_v48 }
 0x164   : > { %4700 = vmatmul.mubr.msk.bf16.gmra.mrb[28].mxu0 %vm841_vm3, %v4058_v33 }
 0x1ba   : > { %v4503_v43 = vpop.f32.mrb[0].mxu1 }
 0x1bb   : > { %v1819_v7 = vpop.f32.mrb[1].mxu1 }
 0x1bc   : > { %v4504_v39 = vpop.f32.mrb[2].mxu1 }
 0x1bd   : > { %v6134_v46 = vpop.f32.mrb[3].mxu1 }
 0x1c2   : > { %v6136_v25 = vpop.f32.mrb[4].mxu1 }
 0x1c3   : > { %v6138_v62 = vpop.f32.mrb[5].mxu1 }
 0x1c4   : > { %v6140_v40 = vpop.f32.mrb[6].mxu1 }
 0x1c5   : > { %v6142_v11 = vpop.f32.mrb[7].mxu1 }
 0x1ca   : > { %v6144_v28 = vpop.f32.mrb[8].mxu1 }
 0x1cb   : > { %v6146_v49 = vpop.f32.mrb[9].mxu1 }
 0x1cc   : > { %v6148_v48 = vpop.f32.mrb[10].mxu1 }
 0x1cd   : > { %v6150_v6 = vpop.f32.mrb[11].mxu1 }
 0x1d2   : > { %v6152_v9 = vpop.f32.mrb[12].mxu1 }
 0x1d3   : > { %v6154_v32 = vpop.f32.mrb[13].mxu1 }
 0x1d4   : > { %v6156_v17 = vpop.f32.mrb[14].mxu1 }
 0x1d5   : > { %v6158_v44 = vpop.f32.mrb[15].mxu1 }
 0x1da   : > { %v6160_v37 = vpop.f32.mrb[16].mxu1 }
 0x1db   : > { %v6162_v5 = vpop.f32.mrb[17].mxu1 }
 0x1dc   : > { %v6164_v61 = vpop.f32.mrb[18].mxu1 }
 0x1dd   : > { %v6166_v2 = vpop.f32.mrb[19].mxu1 }
 0x1e2   : > { %v6168_v14 = vpop.f32.mrb[20].mxu1 }
 0x1e3   : > { %v6170_v12 = vpop.f32.mrb[21].mxu1 }
 0x1e4   : > { %v6172_v60 = vpop.f32.mrb[22].mxu1 }
 0x1e5   : > { %v6174_v27 = vpop.f32.mrb[23].mxu1 }
 0x1ea   : > { %v6176_v23 = vpop.f32.mrb[24].mxu1 }
 0x1eb   : > { %v6178_v15 = vpop.f32.mrb[25].mxu1 }
 0x1ec   : > { %v6180_v29 = vpop.f32.mrb[26].mxu1 }
 0x1ed   : > { %v6182_v8 = vpop.f32.mrb[27].mxu1 }
 0x1f2   : > { %v6184_v34 = vpop.f32.mrb[28].mxu1 }
 0x1f3   : > { %v6186_v18 = vpop.f32.mrb[29].mxu1 }
 0x1f4   : > { %v6188_v51 = vpop.f32.mrb[30].mxu1 }
 0x1f5   : > { %v6190_v58 = vpop.f32.mrb[31].mxu1 }
 0x1fa   : > { %v4707_v1 = vpop.f32.mrb[32].mxu1 }
 0x1fb   : > { %v3509_v55 = vmul.f32 %v4707_v1, %v6195_v50  ;;  %v3373_v16 = vpop.f32.mrb[33].mxu1 }
 0x1fc   : > { %v3507_v13 = vmul.f32 %v6195_v50, %v3373_v16  ;;  %v4708_v52 = vpop.f32.mrb[34].mxu1 }
 0x1fd   : > { %v3548_v41 = vadd.f32 %v6200_v59, %v3509_v55  ;;  %v3510_v57 = vmul.f32 %v4708_v52, %v6195_v50  ;;  %v3376_v56 = vpop.f32.mrb[35].mxu1 }
 0x1fe   : > { %v3546_v36 = vadd.f32 %v6200_v59, %v3507_v13  ;;  %v3508_v3 = vmul.f32 %v6195_v50, %v3376_v56 }
 0x1ff   : > { %v4673_v31 = vpop.f32.mrb[0].mxu0  ;;  %v4197_v47 = vpack.c.bf16 %v3548_v41, %v3548_v41  ;;  %v3549_v26 = vadd.f32 %v6200_v59, %v3510_v57 }
 0x200   : > { %v4737_v42 = vadd.f32 %v4673_v31, %v4503_v43  ;;  %v2905_v63 = vpop.f32.mrb[1].mxu0  ;;  %v4195_v45 = vpack.c.bf16 %v3546_v36, %v3546_v36  ;;  %v3547_v30 = vadd.f32 %v6200_v59, %v3508_v3 }
 0x201   : > { %v4738_v4 = vadd.f32 %v2905_v63, %v1819_v7  ;;  %3708 = vst.msk [vmem:[%s6212_s22 + $0x8] sm:$0xf] %vm3302_vm8, %v4197_v47  ;;  %v4674_v0 = vpop.f32.mrb[2].mxu0  ;;  %v4198_v53 = vpack.c.bf16 %v3549_v26, %v3549_v26 }
 0x202   : > { %v3073_v24 = vmul.f32 %v4737_v42, %v6219_v10  ;;  %v4739_v38 = vadd.f32 %v4674_v0, %v4504_v39  ;;  %3706 = vst.msk [vmem:[%s6212_s22] sm:$0xf] %vm3302_vm8, %v4195_v45  ;;  %v2908_v21 = vpop.f32.mrb[3].mxu0  ;;  %v4196_v19 = vpack.c.bf16 %v3547_v30, %v3547_v30  ;;  %v4711_v54 = vpop.f32.mrb[36].mxu1 }
 0x203   : > { %v3071_v35 = vmul.f32 %v4738_v4, %v6219_v10  ;;  %v4740_v22 = vadd.f32 %v2908_v21, %v6134_v46  ;;  %3709 = vst.msk [vmem:[%s6212_s22 + $0xc] sm:$0xf] %vm3302_vm8, %v4198_v53  ;;  %v3513_v33 = vmul.f32 %v4711_v54, %v6195_v50  ;;  %v3389_v43 = vpop.f32.mrb[37].mxu1 }
 0x204   : > { %v3112_v7 = vadd.f32 %v6226_v20, %v3073_v24  ;;  %v3074_v1 = vmul.f32 %v4739_v38, %v6219_v10  ;;  %3707 = vst.msk [vmem:[%s6212_s22 + $0x4] sm:$0xf] %vm3302_vm8, %v4196_v19  ;;  %v3511_v39 = vmul.f32 %v6195_v50, %v3389_v43  ;;  %v4712_v55 = vpop.f32.mrb[38].mxu1 }
 0x205   : > { %v3110_v16 = vadd.f32 %v6226_v20, %v3071_v35  ;;  %v3072_v13 = vmul.f32 %v4740_v22, %v6219_v10  ;;  %v3552_v46 = vadd.f32 %v6200_v59, %v3513_v33  ;;  %v3514_v52 = vmul.f32 %v4712_v55, %v6195_v50  ;;  %v3392_v41 = vpop.f32.mrb[39].mxu1 }
 0x206   : > { %v3144_v57 = vmax.f32 %v3112_v7, 0.0  ;;  %v3113_v56 = vadd.f32 %v6226_v20, %v3074_v1  ;;  %v3550_v36 = vadd.f32 %v6200_v59, %v3511_v39  ;;  %v3512_v3 = vmul.f32 %v6195_v50, %v3392_v41 }
 0x207   : > { %v3142_v31 = vmax.f32 %v3110_v16, 0.0  ;;  %v3111_v47 = vadd.f32 %v6226_v20, %v3072_v13  ;;  %v4677_v26 = vpop.f32.mrb[4].mxu0  ;;  %v4201_v42 = vpack.c.bf16 %v3552_v46, %v3552_v46  ;;  %v3553_v63 = vadd.f32 %v6200_v59, %v3514_v52 }
 0x208   : > { %v4165_v45 = vpack.c.bf16 %v3144_v57, %v3144_v57  ;;  %v3145_v30 = vmax.f32 %v3113_v56, 0.0  ;;  %v4741_v4 = vadd.f32 %v4677_v26, %v6136_v25  ;;  %v2921_v0 = vpop.f32.mrb[5].mxu0  ;;  %v4199_v53 = vpack.c.bf16 %v3550_v36, %v3550_v36 }
 0x209   : > { %v4163_v24 = vpack.c.bf16 %v3142_v31, %v3142_v31  ;;  %v3143_v38 = vmax.f32 %v3111_v47, 0.0  ;;  %v4742_v21 = vadd.f32 %v2921_v0, %v6138_v62  ;;  %3712 = vst.msk [vmem:[%s6212_s22 + $0x18] sm:$0xf] %vm3302_vm8, %v4201_v42  ;;  %v4678_v19 = vpop.f32.mrb[6].mxu0  ;;  %v4202_v54 = vpack.c.bf16 %v3553_v63, %v3553_v63 }
 0x20a   : > { %3305 = vst.msk [vmem:[%s6255_s11 + $0x8] sm:$0xf] %vm3302_vm8, %v4165_v45  ;;  %v4166_v35 = vpack.c.bf16 %v3145_v30, %v3145_v30  ;;  %v3077_v22 = vmul.f32 %v4741_v4, %v6219_v10  ;;  %v4743_v25 = vadd.f32 %v4678_v19, %v6140_v40  ;;  %3710 = vst.msk [vmem:[%s6212_s22 + $0x10] sm:$0xf] %vm3302_vm8, %v4199_v53  ;;  %v2924_v33 = vpop.f32.mrb[7].mxu0  ;;  %v4715_v62 = vpop.f32.mrb[40].mxu1 }
 0x20b   : > { %v3551_v43 = vadd.f32 %v6200_v59, %v3512_v3  ;;  %3303 = vst.msk [vmem:[%s6255_s11] sm:$0xf] %vm3302_vm8, %v4163_v24  ;;  %v4164_v7 = vpack.c.bf16 %v3143_v38, %v3143_v38  ;;  %v3075_v1 = vmul.f32 %v4742_v21, %v6219_v10  ;;  %v4744_v39 = vadd.f32 %v2924_v33, %v6142_v11  ;;  %v3405_v40 = vpop.f32.mrb[41].mxu1 }
 0x20c   : > { %3713 = vst.msk [vmem:[%s6212_s22 + $0x1c] sm:$0xf] %vm3302_vm8, %v4202_v54  ;;  %v3517_v55 = vmul.f32 %v4715_v62, %v6195_v50  ;;  %3306 = vst.msk [vmem:[%s6255_s11 + $0xc] sm:$0xf] %vm3302_vm8, %v4166_v35  ;;  %v3116_v16 = vadd.f32 %v6226_v20, %v3077_v22  ;;  %v3078_v13 = vmul.f32 %v4743_v25, %v6219_v10  ;;  %v4716_v41 = vpop.f32.mrb[42].mxu1 }
 0x20d   : > { %v4200_v46 = vpack.c.bf16 %v3551_v43, %v3551_v43  ;;  %v3515_v52 = vmul.f32 %v6195_v50, %v3405_v40  ;;  %3304 = vst.msk [vmem:[%s6255_s11 + $0x4] sm:$0xf] %vm3302_vm8, %v4164_v7  ;;  %v3114_v11 = vadd.f32 %v6226_v20, %v3075_v1  ;;  %v3076_v57 = vmul.f32 %v4744_v39, %v6219_v10  ;;  %v3408_v3 = vpop.f32.mrb[43].mxu1 }
 0x20e   : > { %v3556_v56 = vadd.f32 %v6200_v59, %v3517_v55  ;;  %v3518_v36 = vmul.f32 %v4716_v41, %v6195_v50  ;;  %v3148_v31 = vmax.f32 %v3116_v16, 0.0  ;;  %v3117_v47 = vadd.f32 %v6226_v20, %v3078_v13 }
 0x20f   : > { %3711 = vst.msk [vmem:[%s6212_s22 + $0x14] sm:$0xf] %vm3302_vm8, %v4200_v46  ;;  %v3554_v26 = vadd.f32 %v6200_v59, %v3515_v52  ;;  %v3516_v42 = vmul.f32 %v6195_v50, %v3408_v3  ;;  %v3146_v63 = vmax.f32 %v3114_v11, 0.0  ;;  %v3115_v45 = vadd.f32 %v6226_v20, %v3076_v57  ;;  %v4681_v30 = vpop.f32.mrb[8].mxu0 }
 0x210   : > { %v4205_v4 = vpack.c.bf16 %v3556_v56, %v3556_v56  ;;  %v3557_v0 = vadd.f32 %v6200_v59, %v3518_v36  ;;  %v4169_v53 = vpack.c.bf16 %v3148_v31, %v3148_v31  ;;  %v3149_v24 = vmax.f32 %v3117_v47, 0.0  ;;  %v2937_v21 = vpop.f32.mrb[9].mxu0 }
 0x211   : > { %v4745_v38 = vadd.f32 %v4681_v30, %v6144_v28  ;;  %v4203_v19 = vpack.c.bf16 %v3554_v26, %v3554_v26  ;;  %v4167_v54 = vpack.c.bf16 %v3146_v63, %v3146_v63  ;;  %v3147_v35 = vmax.f32 %v3115_v45, 0.0  ;;  %v4682_v25 = vpop.f32.mrb[10].mxu0 }
 0x212   : > { %v4746_v22 = vadd.f32 %v2937_v21, %v6146_v49  ;;  %3716 = vst.msk [vmem:[%s6212_s22 + $0x28] sm:$0xf] %vm3302_vm8, %v4205_v4  ;;  %v4206_v33 = vpack.c.bf16 %v3557_v0, %v3557_v0  ;;  %3309 = vst.msk [vmem:[%s6255_s11 + $0x18] sm:$0xf] %vm3302_vm8, %v4169_v53  ;;  %v4170_v43 = vpack.c.bf16 %v3149_v24, %v3149_v24  ;;  %v2940_v7 = vpop.f32.mrb[11].mxu0  ;;  %v4719_v49 = vpop.f32.mrb[44].mxu1 }
 0x213   : > { %v3081_v62 = vmul.f32 %v4745_v38, %v6219_v10  ;;  %v4747_v28 = vadd.f32 %v4682_v25, %v6148_v48  ;;  %3714 = vst.msk [vmem:[%s6212_s22 + $0x20] sm:$0xf] %vm3302_vm8, %v4203_v19  ;;  %v3555_v1 = vadd.f32 %v6200_v59, %v3516_v42  ;;  %3307 = vst.msk [vmem:[%s6255_s11 + $0x10] sm:$0xf] %vm3302_vm8, %v4167_v54  ;;  %v3421_v48 = vpop.f32.mrb[45].mxu1 }
 0x214   : > { %v4168_v39 = vpack.c.bf16 %v3147_v35, %v3147_v35  ;;  %v3079_v55 = vmul.f32 %v4746_v22, %v6219_v10  ;;  %v4748_v40 = vadd.f32 %v2940_v7, %v6150_v6  ;;  %3717 = vst.msk [vmem:[%s6212_s22 + $0x2c] sm:$0xf] %vm3302_vm8, %v4206_v33  ;;  %v3521_v16 = vmul.f32 %v4719_v49, %v6195_v50  ;;  %v4720_v11 = vpop.f32.mrb[46].mxu1 }
 0x215   : > { %3310 = vst.msk [vmem:[%s6255_s11 + $0x1c] sm:$0xf] %vm3302_vm8, %v4170_v43  ;;  %v3120_v13 = vadd.f32 %v6226_v20, %v3081_v62  ;;  %v3082_v46 = vmul.f32 %v4747_v28, %v6219_v10  ;;  %v4204_v52 = vpack.c.bf16 %v3555_v1, %v3555_v1  ;;  %v3519_v41 = vmul.f32 %v6195_v50, %v3421_v48  ;;  %v3424_v3 = vpop.f32.mrb[47].mxu1 }
 0x216   : > { %3308 = vst.msk [vmem:[%s6255_s11 + $0x14] sm:$0xf] %vm3302_vm8, %v4168_v39  ;;  %v3118_v6 = vadd.f32 %v6226_v20, %v3079_v55  ;;  %v3080_v57 = vmul.f32 %v4748_v40, %v6219_v10  ;;  %v3560_v56 = vadd.f32 %v6200_v59, %v3521_v16  ;;  %v3522_v36 = vmul.f32 %v4720_v11, %v6195_v50 }
 0x217   : > { %v3152_v31 = vmax.f32 %v3120_v13, 0.0  ;;  %v3121_v47 = vadd.f32 %v6226_v20, %v3082_v46  ;;  %3715 = vst.msk [vmem:[%s6212_s22 + $0x24] sm:$0xf] %vm3302_vm8, %v4204_v52  ;;  %v3558_v26 = vadd.f32 %v6200_v59, %v3519_v41  ;;  %v3520_v42 = vmul.f32 %v6195_v50, %v3424_v3  ;;  %v4685_v30 = vpop.f32.mrb[12].mxu0 }
 0x218   : > { %v3150_v63 = vmax.f32 %v3118_v6, 0.0  ;;  %v3119_v45 = vadd.f32 %v6226_v20, %v3080_v57  ;;  %v4209_v4 = vpack.c.bf16 %v3560_v56, %v3560_v56  ;;  %v3561_v0 = vadd.f32 %v6200_v59, %v3522_v36  ;;  %v2953_v21 = vpop.f32.mrb[13].mxu0 }
 0x219   : > { %v4173_v53 = vpack.c.bf16 %v3152_v31, %v3152_v31  ;;  %v3153_v24 = vmax.f32 %v3121_v47, 0.0  ;;  %v4749_v38 = vadd.f32 %v4685_v30, %v6152_v9  ;;  %v4207_v19 = vpack.c.bf16 %v3558_v26, %v3558_v26  ;;  %v4686_v25 = vpop.f32.mrb[14].mxu0 }
 0x21a   : > { %v4171_v54 = vpack.c.bf16 %v3150_v63, %v3150_v63  ;;  %v3151_v35 = vmax.f32 %v3119_v45, 0.0  ;;  %v4750_v22 = vadd.f32 %v2953_v21, %v6154_v32  ;;  %3720 = vst.msk [vmem:[%s6212_s22 + $0x38] sm:$0xf] %vm3302_vm8, %v4209_v4  ;;  %v4210_v33 = vpack.c.bf16 %v3561_v0, %v3561_v0  ;;  %v2956_v28 = vpop.f32.mrb[15].mxu0  ;;  %v4723_v32 = vpop.f32.mrb[48].mxu1 }
 0x21b   : > { %3313 = vst.msk [vmem:[%s6255_s11 + $0x28] sm:$0xf] %vm3302_vm8, %v4173_v53  ;;  %v4174_v43 = vpack.c.bf16 %v3153_v24, %v3153_v24  ;;  %v3085_v62 = vmul.f32 %v4749_v38, %v6219_v10  ;;  %v4751_v9 = vadd.f32 %v4686_v25, %v6156_v17  ;;  %3718 = vst.msk [vmem:[%s6212_s22 + $0x30] sm:$0xf] %vm3302_vm8, %v4207_v19  ;;  %v3437_v17 = vpop.f32.mrb[49].mxu1 }
 0x21c   : > { %v3559_v7 = vadd.f32 %v6200_v59, %v3520_v42  ;;  %3311 = vst.msk [vmem:[%s6255_s11 + $0x20] sm:$0xf] %vm3302_vm8, %v4171_v54  ;;  %v4172_v1 = vpack.c.bf16 %v3151_v35, %v3151_v35  ;;  %v3083_v49 = vmul.f32 %v4750_v22, %v6219_v10  ;;  %v4752_v39 = vadd.f32 %v2956_v28, %v6158_v44  ;;  %v4724_v46 = vpop.f32.mrb[50].mxu1 }
 0x21d   : > { %3721 = vst.msk [vmem:[%s6212_s22 + $0x3c] sm:$0xf] %vm3302_vm8, %v4210_v33  ;;  %v3525_v55 = vmul.f32 %v4723_v32, %v6195_v50  ;;  %3314 = vst.msk [vmem:[%s6255_s11 + $0x2c] sm:$0xf] %vm3302_vm8, %v4174_v43  ;;  %v3124_v40 = vadd.f32 %v6226_v20, %v3085_v62  ;;  %v3086_v16 = vmul.f32 %v4751_v9, %v6219_v10  ;;  %v3440_v6 = vpop.f32.mrb[51].mxu1 }
 0x21e   : > { %v4208_v48 = vpack.c.bf16 %v3559_v7, %v3559_v7  ;;  %v3523_v13 = vmul.f32 %v6195_v50, %v3437_v17  ;;  %3312 = vst.msk [vmem:[%s6255_s11 + $0x24] sm:$0xf] %vm3302_vm8, %v4172_v1  ;;  %v3122_v44 = vadd.f32 %v6226_v20, %v3083_v49  ;;  %v3084_v52 = vmul.f32 %v4752_v39, %v6219_v10 }
 0x21f   : > { %v3564_v41 = vadd.f32 %v6200_v59, %v3525_v55  ;;  %v3526_v11 = vmul.f32 %v4724_v46, %v6195_v50  ;;  %v3156_v57 = vmax.f32 %v3124_v40, 0.0  ;;  %v3125_v56 = vadd.f32 %v6226_v20, %v3086_v16  ;;  %v4689_v26 = vpop.f32.mrb[16].mxu0 }
 0x220   : > { %3719 = vst.msk [vmem:[%s6212_s22 + $0x34] sm:$0xf] %vm3302_vm8, %v4208_v48  ;;  %v3562_v36 = vadd.f32 %v6200_v59, %v3523_v13  ;;  %v3524_v3 = vmul.f32 %v6195_v50, %v3440_v6  ;;  %v3154_v31 = vmax.f32 %v3122_v44, 0.0  ;;  %v3123_v47 = vadd.f32 %v6226_v20, %v3084_v52  ;;  %v2969_v0 = vpop.f32.mrb[17].mxu0 }
 0x221   : > { %v4213_v42 = vpack.c.bf16 %v3564_v41, %v3564_v41  ;;  %v3565_v63 = vadd.f32 %v6200_v59, %v3526_v11  ;;  %v4177_v45 = vpack.c.bf16 %v3156_v57, %v3156_v57  ;;  %v3157_v30 = vmax.f32 %v3125_v56, 0.0  ;;  %v4690_v19 = vpop.f32.mrb[18].mxu0 }
 0x222   : > { %v4753_v4 = vadd.f32 %v4689_v26, %v6160_v37  ;;  %v4211_v53 = vpack.c.bf16 %v3562_v36, %v3562_v36  ;;  %v4175_v24 = vpack.c.bf16 %v3154_v31, %v3154_v31  ;;  %v3155_v38 = vmax.f32 %v3123_v47, 0.0  ;;  %v2972_v25 = vpop.f32.mrb[19].mxu0 }
 0x223   : > { %v4754_v21 = vadd.f32 %v2969_v0, %v6162_v5  ;;  %3724 = vst.msk [vmem:[%s6212_s22 + $0x48] sm:$0xf] %vm3302_vm8, %v4213_v42  ;;  %v4214_v54 = vpack.c.bf16 %v3565_v63, %v3565_v63  ;;  %3317 = vst.msk [vmem:[%s6255_s11 + $0x38] sm:$0xf] %vm3302_vm8, %v4177_v45  ;;  %v4178_v35 = vpack.c.bf16 %v3157_v30, %v3157_v30  ;;  %v4727_v5 = vpop.f32.mrb[52].mxu1 }
 0x224   : > { %v3089_v22 = vmul.f32 %v4753_v4, %v6219_v10  ;;  %v4755_v37 = vadd.f32 %v4690_v19, %v6164_v61  ;;  %3722 = vst.msk [vmem:[%s6212_s22 + $0x40] sm:$0xf] %vm3302_vm8, %v4211_v53  ;;  %v3563_v33 = vadd.f32 %v6200_v59, %v3524_v3  ;;  %3315 = vst.msk [vmem:[%s6255_s11 + $0x30] sm:$0xf] %vm3302_vm8, %v4175_v24  ;;  %v3453_v61 = vpop.f32.mrb[53].mxu1 }
 0x225   : > { %v4176_v43 = vpack.c.bf16 %v3155_v38, %v3155_v38  ;;  %v3087_v62 = vmul.f32 %v4754_v21, %v6219_v10  ;;  %v4756_v9 = vadd.f32 %v2972_v25, %v6166_v2  ;;  %3725 = vst.msk [vmem:[%s6212_s22 + $0x4c] sm:$0xf] %vm3302_vm8, %v4214_v54  ;;  %v3529_v28 = vmul.f32 %v4727_v5, %v6195_v50  ;;  %v4728_v39 = vpop.f32.mrb[54].mxu1 }
 0x226   : > { %3318 = vst.msk [vmem:[%s6255_s11 + $0x3c] sm:$0xf] %vm3302_vm8, %v4178_v35  ;;  %v3128_v7 = vadd.f32 %v6226_v20, %v3089_v22  ;;  %v3090_v32 = vmul.f32 %v4755_v37, %v6219_v10  ;;  %v4212_v1 = vpack.c.bf16 %v3563_v33, %v3563_v33  ;;  %v3527_v49 = vmul.f32 %v6195_v50, %v3453_v61  ;;  %v3456_v16 = vpop.f32.mrb[55].mxu1 }
 0x227   : > { %3316 = vst.msk [vmem:[%s6255_s11 + $0x34] sm:$0xf] %vm3302_vm8, %v4176_v43  ;;  %v3126_v2 = vadd.f32 %v6226_v20, %v3087_v62  ;;  %v3088_v55 = vmul.f32 %v4756_v9, %v6219_v10  ;;  %v3568_v17 = vadd.f32 %v6200_v59, %v3529_v28  ;;  %v3530_v40 = vmul.f32 %v4728_v39, %v6195_v50  ;;  %v4693_v11 = vpop.f32.mrb[20].mxu0 }
 0x228   : > { %v3160_v48 = vmax.f32 %v3128_v7, 0.0  ;;  %v3129_v13 = vadd.f32 %v6226_v20, %v3090_v32  ;;  %3723 = vst.msk [vmem:[%s6212_s22 + $0x44] sm:$0xf] %vm3302_vm8, %v4212_v1  ;;  %v3566_v46 = vadd.f32 %v6200_v59, %v3527_v49  ;;  %v3528_v44 = vmul.f32 %v6195_v50, %v3456_v16  ;;  %v2985_v31 = vpop.f32.mrb[21].mxu0 }
 0x229   : > { %v3158_v52 = vmax.f32 %v3126_v2, 0.0  ;;  %v3127_v41 = vadd.f32 %v6226_v20, %v3088_v55  ;;  %v4217_v6 = vpack.c.bf16 %v3568_v17, %v3568_v17  ;;  %v3569_v57 = vadd.f32 %v6200_v59, %v3530_v40  ;;  %v4694_v45 = vpop.f32.mrb[22].mxu0 }
 0x22a   : > { %v4181_v56 = vpack.c.bf16 %v3160_v48, %v3160_v48  ;;  %v3161_v36 = vmax.f32 %v3129_v13, 0.0  ;;  %v4757_v3 = vadd.f32 %v4693_v11, %v6168_v14  ;;  %v4215_v47 = vpack.c.bf16 %v3566_v46, %v3566_v46  ;;  %v2988_v53 = vpop.f32.mrb[23].mxu0 }
 0x22b   : > { %v4179_v26 = vpack.c.bf16 %v3158_v52, %v3158_v52  ;;  %v3159_v42 = vmax.f32 %v3127_v41, 0.0  ;;  %v4758_v63 = vadd.f32 %v2985_v31, %v6170_v12  ;;  %3728 = vst.msk [vmem:[%s6212_s22 + $0x58] sm:$0xf] %vm3302_vm8, %v4217_v6  ;;  %v4218_v30 = vpack.c.bf16 %v3569_v57, %v3569_v57  ;;  %v4731_v12 = vpop.f32.mrb[56].mxu1 }
 0x22c   : > { %3321 = vst.msk [vmem:[%s6255_s11 + $0x48] sm:$0xf] %vm3302_vm8, %v4181_v56  ;;  %v4182_v4 = vpack.c.bf16 %v3161_v36, %v3161_v36  ;;  %v3093_v0 = vmul.f32 %v4757_v3, %v6219_v10  ;;  %v4759_v14 = vadd.f32 %v4694_v45, %v6172_v60  ;;  %3726 = vst.msk [vmem:[%s6212_s22 + $0x50] sm:$0xf] %vm3302_vm8, %v4215_v47  ;;  %v3469_v60 = vpop.f32.mrb[57].mxu1 }
 0x22d   : > { %v3567_v24 = vadd.f32 %v6200_v59, %v3528_v44  ;;  %3319 = vst.msk [vmem:[%s6255_s11 + $0x40] sm:$0xf] %vm3302_vm8, %v4179_v26  ;;  %v4180_v38 = vpack.c.bf16 %v3159_v42, %v3159_v42  ;;  %v3091_v21 = vmul.f32 %v4758_v63, %v6219_v10  ;;  %v4760_v19 = vadd.f32 %v2988_v53, %v6174_v27  ;;  %v4732_v33 = vpop.f32.mrb[58].mxu1 }
 0x22e   : > { %3729 = vst.msk [vmem:[%s6212_s22 + $0x5c] sm:$0xf] %vm3302_vm8, %v4218_v30  ;;  %v3533_v54 = vmul.f32 %v4731_v12, %v6195_v50  ;;  %3322 = vst.msk [vmem:[%s6255_s11 + $0x4c] sm:$0xf] %vm3302_vm8, %v4182_v4  ;;  %v3132_v35 = vadd.f32 %v6226_v20, %v3093_v0  ;;  %v3094_v22 = vmul.f32 %v4759_v14, %v6219_v10  ;;  %v3472_v9 = vpop.f32.mrb[59].mxu1 }
 0x22f   : > { %v4216_v37 = vpack.c.bf16 %v3567_v24, %v3567_v24  ;;  %v3531_v25 = vmul.f32 %v6195_v50, %v3469_v60  ;;  %3320 = vst.msk [vmem:[%s6255_s11 + $0x44] sm:$0xf] %vm3302_vm8, %v4180_v38  ;;  %v3130_v27 = vadd.f32 %v6226_v20, %v3091_v21  ;;  %v3092_v5 = vmul.f32 %v4760_v19, %v6219_v10  ;;  %v4697_v39 = vpop.f32.mrb[24].mxu0 }
 0x230   : > { %v3572_v43 = vadd.f32 %v6200_v59, %v3533_v54  ;;  %v3534_v62 = vmul.f32 %v4732_v33, %v6195_v50  ;;  %v3164_v28 = vmax.f32 %v3132_v35, 0.0  ;;  %v3133_v61 = vadd.f32 %v6226_v20, %v3094_v22  ;;  %v3001_v48 = vpop.f32.mrb[25].mxu0 }
 0x231   : > { %3727 = vst.msk [vmem:[%s6212_s22 + $0x54] sm:$0xf] %vm3302_vm8, %v4216_v37  ;;  %v3570_v7 = vadd.f32 %v6200_v59, %v3531_v25  ;;  %v3532_v32 = vmul.f32 %v6195_v50, %v3472_v9  ;;  %v3162_v1 = vmax.f32 %v3130_v27, 0.0  ;;  %v3131_v49 = vadd.f32 %v6226_v20, %v3092_v5  ;;  %v4698_v41 = vpop.f32.mrb[26].mxu0 }
 0x232   : > { %v4221_v2 = vpack.c.bf16 %v3572_v43, %v3572_v43  ;;  %v3573_v55 = vadd.f32 %v6200_v59, %v3534_v62  ;;  %v4185_v17 = vpack.c.bf16 %v3164_v28, %v3164_v28  ;;  %v3165_v40 = vmax.f32 %v3133_v61, 0.0  ;;  %v3004_v56 = vpop.f32.mrb[27].mxu0 }
 0x233   : > { %v4761_v16 = vadd.f32 %v4697_v39, %v6176_v23  ;;  %v4219_v13 = vpack.c.bf16 %v3570_v7, %v3570_v7  ;;  %v4183_v46 = vpack.c.bf16 %v3162_v1, %v3162_v1  ;;  %v3163_v44 = vmax.f32 %v3131_v49, 0.0 }
 0x234   : > { %v4762_v52 = vadd.f32 %v3001_v48, %v6178_v15  ;;  %3732 = vst.msk [vmem:[%s6212_s22 + $0x68] sm:$0xf] %vm3302_vm8, %v4221_v2  ;;  %v4222_v11 = vpack.c.bf16 %v3573_v55, %v3573_v55  ;;  %3325 = vst.msk [vmem:[%s6255_s11 + $0x58] sm:$0xf] %vm3302_vm8, %v4185_v17  ;;  %v4186_v6 = vpack.c.bf16 %v3165_v40, %v3165_v40  ;;  %v4735_v15 = vpop.f32.mrb[60].mxu1 }
 0x235   : > { %v3097_v57 = vmul.f32 %v4761_v16, %v6219_v10  ;;  %v4763_v23 = vadd.f32 %v4698_v41, %v6180_v29  ;;  %3730 = vst.msk [vmem:[%s6212_s22 + $0x60] sm:$0xf] %vm3302_vm8, %v4219_v13  ;;  %v3571_v36 = vadd.f32 %v6200_v59, %v3532_v32  ;;  %3323 = vst.msk [vmem:[%s6255_s11 + $0x50] sm:$0xf] %vm3302_vm8, %v4183_v46  ;;  %v3485_v29 = vpop.f32.mrb[61].mxu1 }
 0x236   : > { %v4184_v3 = vpack.c.bf16 %v3163_v44, %v3163_v44  ;;  %v3095_v31 = vmul.f32 %v4762_v52, %v6219_v10  ;;  %v4764_v47 = vadd.f32 %v3004_v56, %v6182_v8  ;;  %3733 = vst.msk [vmem:[%s6212_s22 + $0x6c] sm:$0xf] %vm3302_vm8, %v4222_v11  ;;  %v3537_v26 = vmul.f32 %v4735_v15, %v6195_v50  ;;  %v4736_v4 = vpop.f32.mrb[62].mxu1 }
 0x237   : > { %3326 = vst.msk [vmem:[%s6255_s11 + $0x5c] sm:$0xf] %vm3302_vm8, %v4186_v6  ;;  %v3136_v42 = vadd.f32 %v6226_v20, %v3097_v57  ;;  %v3098_v63 = vmul.f32 %v4763_v23, %v6219_v10  ;;  %v4220_v45 = vpack.c.bf16 %v3571_v36, %v3571_v36  ;;  %v3535_v30 = vmul.f32 %v6195_v50, %v3485_v29  ;;  %v3488_v24 = vpop.f32.mrb[63].mxu1  ;;  %v4701_v35 = vpop.f32.mrb[28].mxu0 }
 0x238   : > { %3324 = vst.msk [vmem:[%s6255_s11 + $0x54] sm:$0xf] %vm3302_vm8, %v4184_v3  ;;  %v3134_v8 = vadd.f32 %v6226_v20, %v3095_v31  ;;  %v3096_v0 = vmul.f32 %v4764_v47, %v6219_v10  ;;  %v3576_v14 = vadd.f32 %v6200_v59, %v3537_v26  ;;  %v3538_v53 = vmul.f32 %v4736_v4, %v6195_v50  ;;  %v3017_v5 = vpop.f32.mrb[29].mxu0 }
 0x239   : > { %v3168_v12 = vmax.f32 %v3136_v42, 0.0  ;;  %v3137_v38 = vadd.f32 %v6226_v20, %v3098_v63  ;;  %3731 = vst.msk [vmem:[%s6212_s22 + $0x64] sm:$0xf] %vm3302_vm8, %v4220_v45  ;;  %v3574_v21 = vadd.f32 %v6200_v59, %v3535_v30  ;;  %v3536_v19 = vmul.f32 %v6195_v50, %v3488_v24  ;;  %v4702_v28 = vpop.f32.mrb[30].mxu0 }
 0x23a   : > { %v3166_v54 = vmax.f32 %v3134_v8, 0.0  ;;  %v3135_v60 = vadd.f32 %v6226_v20, %v3096_v0  ;;  %v4225_v22 = vpack.c.bf16 %v3576_v14, %v3576_v14  ;;  %v3577_v37 = vadd.f32 %v6200_v59, %v3538_v53  ;;  %v3020_v1 = vpop.f32.mrb[31].mxu0 }
 0x23b   : > { %v4189_v25 = vpack.c.bf16 %v3168_v12, %v3168_v12  ;;  %v3169_v33 = vmax.f32 %v3137_v38, 0.0  ;;  %v4765_v27 = vadd.f32 %v4701_v35, %v6184_v34  ;;  %v4223_v43 = vpack.c.bf16 %v3574_v21, %v3574_v21 }
 0x23c   : > { %v4187_v62 = vpack.c.bf16 %v3166_v54, %v3166_v54  ;;  %v3167_v9 = vmax.f32 %v3135_v60, 0.0  ;;  %v4766_v50 = vadd.f32 %v3017_v5, %v6186_v18  ;;  %3736 = vst.msk [vmem:[%s6212_s22 + $0x78] sm:$0xf] %vm3302_vm8, %v4225_v22  ;;  %v4226_v61 = vpack.c.bf16 %v3577_v37, %v3577_v37 }
 0x23d   : > { %3329 = vst.msk [vmem:[%s6255_s11 + $0x68] sm:$0xf] %vm3302_vm8, %v4189_v25  ;;  %v4190_v7 = vpack.c.bf16 %v3169_v33, %v3169_v33  ;;  %v3101_v32 = vmul.f32 %v4765_v27, %v6219_v10  ;;  %v4767_v34 = vadd.f32 %v4702_v28, %v6188_v51  ;;  %3734 = vst.msk [vmem:[%s6212_s22 + $0x70] sm:$0xf] %vm3302_vm8, %v4223_v43 }
 0x23e   : > { %v3575_v49 = vadd.f32 %v6200_v59, %v3536_v19  ;;  %3327 = vst.msk [vmem:[%s6255_s11 + $0x60] sm:$0xf] %vm3302_vm8, %v4187_v62  ;;  %v4188_v18 = vpack.c.bf16 %v3167_v9, %v3167_v9  ;;  %v3099_v39 = vmul.f32 %v4766_v50, %v6219_v10  ;;  %v4768_v2 = vadd.f32 %v3020_v1, %v6190_v58 }
 0x23f   : > { %3737 = vst.msk [vmem:[%s6212_s22 + $0x7c] sm:$0xf] %vm3302_vm8, %v4226_v61  ;;  %3330 = vst.msk [vmem:[%s6255_s11 + $0x6c] sm:$0xf] %vm3302_vm8, %v4190_v7  ;;  %v3140_v51 = vadd.f32 %v6226_v20, %v3101_v32  ;;  %v3102_v55 = vmul.f32 %v4767_v34, %v6219_v10 }
 0x240   : > { %v4224_v17 = vpack.c.bf16 %v3575_v49, %v3575_v49  ;;  %3328 = vst.msk [vmem:[%s6255_s11 + $0x64] sm:$0xf] %vm3302_vm8, %v4188_v18  ;;  %v3138_v59 = vadd.f32 %v6226_v20, %v3099_v39  ;;  %v3100_v40 = vmul.f32 %v4768_v2, %v6219_v10 }
 0x241   : > { %v3172_v58 = vmax.f32 %v3140_v51, 0.0  ;;  %v3141_v16 = vadd.f32 %v6226_v20, %v3102_v55 }
 0x242   : > { %3735 = vst.msk [vmem:[%s6212_s22 + $0x74] sm:$0xf] %vm3302_vm8, %v4224_v17  ;;  %v3170_v48 = vmax.f32 %v3138_v59, 0.0  ;;  %v3139_v13 = vadd.f32 %v6226_v20, %v3100_v40 }
 0x243   : > { %v4193_v46 = vpack.c.bf16 %v3172_v58, %v3172_v58  ;;  %v3173_v44 = vmax.f32 %v3141_v16, 0.0 }
 0x244   : > { %v4191_v52 = vpack.c.bf16 %v3170_v48, %v3170_v48  ;;  %v3171_v41 = vmax.f32 %v3139_v13, 0.0 }
 0x245   : > { %3333 = vst.msk [vmem:[%s6255_s11 + $0x78] sm:$0xf] %vm3302_vm8, %v4193_v46  ;;  %v4194_v11 = vpack.c.bf16 %v3173_v44, %v3173_v44 }
 0x246   : > { %3331 = vst.msk [vmem:[%s6255_s11 + $0x70] sm:$0xf] %vm3302_vm8, %v4191_v52  ;;  %v4192_v6 = vpack.c.bf16 %v3171_v41, %v3171_v41 }
 0x247   : > { %3334 = vst.msk [vmem:[%s6255_s11 + $0x7c] sm:$0xf] %vm3302_vm8, %v4194_v11 }
 0x248   : > { %3332 = vst.msk [vmem:[%s6255_s11 + $0x74] sm:$0xf] %vm3302_vm8, %v4192_v6 }
 0x249 PF: > { %s19_s29 = sadd.s32 1, %s5071_s29   ;;  %s6630_s27 = smov %s5067_s28 }
 0x24a   : > { %p16_p5 = scmp.ge.s32.totalorder %s19_s29, 4   ;;  %s6631_s28 = smov %s6633_s30 }
 0x24c   :  { %18 = sbr.rel (!%p16_p5) target bundleno = 2 (0x2), region = 98 }

// kernel: basic_block_forward.4
= control target key start
LH: loop header
LB: loop body
LE: loop exit
PB: predicated region body
PF: predicated region fallthrough
CT: control target
= control target key end

     0   :  { %s4655_s21 = smov 0   ;;  %s4657_s22 = smov 0   ;;  %s5915_s0 = inlined_call_operand.vmem [shape: bf16[2,18,18,8], index: 0, kind: input, shape index: {}]   ;;  %s5916_s1 = inlined_call_operand.vmem [shape: bf16[9,8,8], index: 1, kind: input, shape index: {}]   ;;  %s5917_s2 = inlined_call_operand.vmem [shape: f32[1,8], index: 2, kind: input, shape index: {}]   ;;  %s5918_s3 = inlined_call_operand.vmem [shape: f32[1,8], index: 3, kind: input, shape index: {}]   ;;  %s5919_s4 = inlined_call_operand.vmem [shape: bf16[2,16,16,8], index: 4, kind: output, shape index: {0}]   ;;  %s5920_s5 = inlined_call_operand.vmem [shape: f32[2,1,8], index: 5, kind: output, shape index: {1}]   ;;  %s5921_s6 = inlined_call_operand.vmem [shape: f32[2,1,8], index: 6, kind: output, shape index: {2}]  }
   0x1   :  { %s4659_s23 = smov 0  }
   0x2 LB: > { %s29_s24 = sadd.s32 1, %s4612_s22  ;;  %p3521_p0 = scmp.ge.s32.totalorder %s4616_s23, 1  ;;  %s4616_s23 = sphi %s4659_s23, %s17_s23   ;;  %s4612_s22 = sphi %s4657_s22, %s6000_s22   ;;  %s4608_s21 = sphi %s4655_s21, %s5999_s21  }
   0x3   : > { %p31_p1 = scmp.ge.s32.totalorder %s29_s24, 2  ;;  %p235_p2 = scmp.lt.s32.totalorder %s4616_s23, 3 }
   0x5   : > { %s6002_s24 = smov (%p31_p1, %s29_s24), 0  ;;  %p236_p3 = pnand %p3521_p0, %p235_p2 }
   0x7   : > { %239 = sbr.rel (%p236_p3) target bundleno = 580 (0x244), region = 36 }
   0xe   : > { %v3525_v0 = vld [vmem:[%s5916_s1 + $0x4] sm:$0xf]  ;;  %vm835_vm0 = vcmask 1043456   ;;  %v3657_v1 = vld [vmem:[%s5916_s1 + $0x10] sm:$0xf]  ;;  %p274_p4 = scmp.lt.s32.totalorder %s4608_s21, 1 }
   0xf   : > { %4535 = vmatprep.subr.msk.bf16.mxu1 %vm835_vm0, %v3525_v0  ;;  %4539 = vmatprep.subr.msk.bf16.mxu0 %vm835_vm0, %v3657_v1  ;;  %v837_v2 = vsel %vm835_vm0, %v3525_v0, 0  ;;  %v4683_v3 = vsel %vm835_vm0, %v3657_v1, 0  ;;  %v348_v4 = vld [vmem:[%s5916_s1] sm:$0xf]  ;;  %v3676_v5 = vld [vmem:[%s5916_s1 + $0x14] sm:$0xf] }
  0x10   : > { %5953 = vst [vmem:[#allocation2_spill] sm:$0xff] %v4683_v3  ;;  %3972 = vmatpush3.bf16.msra.mxu1 %v837_v2  ;;  %4108 = vmatpush3.bf16.msra.mxu0 %v4683_v3  ;;  %s6004_s21 = smov (!%p274_p4, %s4608_s21), 1  ;;  %vm349_vm1 = vsmask.f32 3328  ;;  %vm350_vm2 = vsmask.f32 7440 }
  0x11   : > { %4536 = vmatprep.subr.msk.bf16.mxu1 %vm835_vm0, %v348_v4  ;;  %4541 = vmatprep.subr.msk.bf16.mxu0 %vm835_vm0, %v3676_v5  ;;  %s4545_s9 = smul.u32 216, %s6004_s21  ;;  %v4703_v6 = vsel %vm835_vm0, %v348_v4, 0  ;;  %v4706_v7 = vsel %vm835_vm0, %v3676_v5, 0  ;;  %v4711_v8 = vld [vmem:[%s5916_s1 + $0x18] sm:$0xf]  ;;  %vm786_vm3 = vcmask 64512   ;;  %vm4747_vm4 = vmor %vm349_vm1, %vm350_vm2  ;;  %s5632_s7 = scalar_lea.vmem %s5920_s5, %s6004_s21 }
  0x12   : > { %v4735_v20 = vsel %vm835_vm0, %v4711_v8, 0  ;;  %vm1308_vm5 = vcmask 1042432   ;;  %vm1309_vm6 = vcmask 1046532   ;;  %s5638_s10 = scalar_lea.vmem %s5921_s6, %s6004_s21  ;;  %vm3252_vm8 = vcmask 57344   ;;  %s3785_s15 = sshll.u32 %s6004_s21, 7 }
  0x13   : > { %s4700_s12 = scalar_lea.vmem %s5915_s0, %s4545_s9  ;;  %vm4928_vm7 = vmor %vm1308_vm5, %vm1309_vm6  ;;  %s5678_s18 = scalar_lea.vmem %s5919_s4, %s3785_s15  ;;  %vm3215_vm9 = vcmask 60416  }
  0x14   : > { %v4714_v9 = vld [vmem:[%s4700_s12] sm:$0xf]  ;;  %v4717_v10 = vld [vmem:[%s4700_s12 + $0x4] sm:$0xf]  ;;  %v296_v11 = vld [vmem:[%s4700_s12 + $0x8] sm:$0x1] }
  0x15   : > { %v353_v12 = vshrl.u32 %v4714_v9, 16  ;;  %v356_v13 = vshll.u32 %v4714_v9, 16  ;;  %v362_v14 = vshll.u32 %v4717_v10, 16  ;;  %v366_v15 = vshrl.u32 %v4717_v10, 16  ;;  %v4725_v16 = vld [vmem:[%s4700_s12 + $0xc] sm:$0xf] }
  0x16   : > { %v372_v17 = vshll.u32 %v296_v11, 16  ;;  %v4728_v18 = vld [vmem:[%s4700_s12 + $0x10] sm:$0xf]  ;;  %v4731_v19 = vld [vmem:[%s4700_s12 + $0x14] sm:$0x1]  ;;  %v377_v26 = vshrl.u32 %v4725_v16, 16 }
  0x17   : > { %v355_v21 = vrot.slane %v353_v12, 4  ;;  %v358_v22 = vrot.slane %v356_v13, 5  ;;  %v364_v23 = vrot.slane %v362_v14, 5  ;;  %v368_v24 = vrot.slane %v366_v15, 4  ;;  %v4743_v33 = vld [vmem:[%s4700_s12 + $0x18] sm:$0xf] }
  0x18   : > { %v374_v25 = vrot.slane %v372_v17, 5  ;;  %v380_v27 = vshll.u32 %v4725_v16, 16  ;;  %v386_v28 = vshll.u32 %v4728_v18, 16  ;;  %v390_v31 = vshrl.u32 %v4728_v18, 16  ;;  %v4756_v39 = vld [vmem:[%s4700_s12 + $0x1c] sm:$0xf] }
  0x19   : > { %v359_v29 = vor.u32 %v358_v22, %v355_v21  ;;  %v369_v30 = vor.u32 %v368_v24, %v364_v23  ;;  %v396_v32 = vshll.u32 %v4731_v19, 16  ;;  %v379_v35 = vrot.slane %v377_v26, 4  ;;  %v4760_v46 = vld [vmem:[%s4700_s12 + $0x20] sm:$0x1]  ;;  %v4770_v57 = vld [vmem:[%s4700_s12 + $0x24] sm:$0xf] }
  0x1a   : > { %v382_v36 = vrot.slane %v380_v27, 5  ;;  %v388_v37 = vrot.slane %v386_v28, 5  ;;  %v4753_v38 = vcombine.low %v4725_v16, %v4728_v18  ;;  %v392_v42 = vrot.slane %v390_v31, 4  ;;  %v4775_v62 = vld [vmem:[%s4700_s12 + $0x28] sm:$0xf] }
  0x1b   : > { %v360_v40 = vrot.slane %v359_v29, 4  ;;  %v370_v41 = vrot.slane %v369_v30, 4  ;;  %v398_v43 = vrot.slane %v396_v32, 5  ;;  %v1323_v45 = vrot.slane %v4731_v19, 5  ;;  %v4783_v4 = vld [vmem:[%s4700_s12 + $0x2c] sm:$0x1] }
  0x1c   : > { %v383_v44 = vor.u32 %v382_v36, %v379_v35  ;;  %v401_v47 = vshrl.u32 %v4743_v33, 16  ;;  %v404_v48 = vshll.u32 %v4743_v33, 16  ;;  %v393_v51 = vor.u32 %v392_v42, %v388_v37  ;;  %v4789_v14 = vld [vmem:[%s4700_s12 + $0x30] sm:$0xf]  ;;  %v4801_v28 = vld [vmem:[%s4700_s12 + $0x34] sm:$0xf] }
  0x1d   : > { %v365_v49 = vsel %vm4747_vm4, %v360_v40, %v364_v23  ;;  %v375_v50 = vsel %vm4747_vm4, %v370_v41, %v374_v25  ;;  %v410_v52 = vshll.u32 %v4756_v39, 16  ;;  %v414_v60 = vshrl.u32 %v4756_v39, 16  ;;  %v4796_v23 = vld [vmem:[%s5916_s1 + $0x8] sm:$0xf]  ;;  %v4808_v32 = vld [vmem:[%s4700_s12 + $0x38] sm:$0x1] }
  0x1e   : > { %v3526_v53 = vcombine.low %v365_v49, %v375_v50  ;;  %v384_v54 = vrot.slane %v383_v44, 4  ;;  %v403_v55 = vrot.slane %v401_v47, 4  ;;  %v406_v56 = vrot.slane %v404_v48, 5  ;;  %v4816_v48 = vld [vmem:[%s4700_s12 + $0x3c] sm:$0xf] }
  0x1f   : > { %v394_v58 = vrot.slane %v393_v51, 4  ;;  %v412_v59 = vrot.slane %v410_v52, 5  ;;  %v420_v61 = vshll.u32 %v4760_v46, 16  ;;  %v1327_v1 = vrot.slane %v4756_v39, 5  ;;  %v4824_v52 = vld [vmem:[%s4700_s12 + $0x40] sm:$0xf] }
  0x20   : > { %3973 = vmatprep.mubr.msk.bf16.mxu1 %vm786_vm3, %v3526_v53  ;;  %v389_v63 = vsel %vm4747_vm4, %v384_v54, %v388_v37  ;;  %v407_v0 = vor.u32 %v406_v56, %v403_v55  ;;  %v1330_v2 = vrot.slane %v4760_v46, 5  ;;  %v416_v11 = vrot.slane %v414_v60, 4 }
  0x21   : > { %v399_v5 = vsel %vm4747_vm4, %v394_v58, %v398_v43  ;;  %v422_v12 = vrot.slane %v420_v61, 5  ;;  %v425_v13 = vshrl.u32 %v4770_v57, 16  ;;  %v428_v21 = vshll.u32 %v4770_v57, 16 }
  0x22   : > { %v3527_v15 = vcombine.low %v389_v63, %v399_v5  ;;  %v408_v17 = vrot.slane %v407_v0, 4  ;;  %v434_v22 = vshll.u32 %v4775_v62, 16  ;;  %v417_v24 = vor.u32 %v416_v11, %v412_v59  ;;  %v4836_v5 = vld [vmem:[%s4700_s12 + $0x44] sm:$0x1] }
  0x23   : > { %v427_v25 = vrot.slane %v425_v13, 4  ;;  %v438_v26 = vshrl.u32 %v4775_v62, 16  ;;  %v444_v27 = vshll.u32 %v4783_v4, 16  ;;  %v430_v30 = vrot.slane %v428_v21, 5  ;;  %v4841_v13 = vld [vmem:[%s4700_s12 + $0x48] sm:$0xf] }
  0x24   : > { %4109 = vmatprep.mubr.msk.bf16.mxu0 %vm786_vm3, %v3527_v15  ;;  %3974 = vmatmul.mubr.msk.bf16.vlgmr.msra.gmra.mrb[0].mxu1 %vm786_vm3, %v3527_v15  ;;  %v413_v29 = vsel %vm4747_vm4, %v408_v17, %v412_v59  ;;  %v436_v31 = vrot.slane %v434_v22, 5  ;;  %v449_v35 = vshrl.u32 %v4789_v14, 16  ;;  %v418_v36 = vrot.slane %v417_v24, 4  ;;  %v4848_v24 = vld [vmem:[%s4700_s12 + $0x4c] sm:$0xf] }
  0x25   : > { %4006 = vmatpush3.bf16.msra.mxu1 %v4703_v6  ;;  %v440_v37 = vrot.slane %v438_v26, 4  ;;  %v446_v40 = vrot.slane %v444_v27, 5  ;;  %v452_v41 = vshll.u32 %v4789_v14, 16  ;;  %v431_v42 = vor.u32 %v430_v30, %v427_v25 }
  0x26   : > { %v451_v43 = vrot.slane %v449_v35, 4  ;;  %v458_v44 = vshll.u32 %v4801_v28, 16  ;;  %v462_v47 = vshrl.u32 %v4801_v28, 16  ;;  %4537 = vmatprep.subr.msk.bf16.mxu1 %vm835_vm0, %v4796_v23  ;;  %v423_v49 = vsel %vm4747_vm4, %v418_v36, %v422_v12 }
  0x27   : > { %v441_v6 = vor.u32 %v440_v37, %v436_v31  ;;  %v454_v50 = vrot.slane %v452_v41, 5  ;;  %v468_v51 = vshll.u32 %v4808_v32, 16  ;;  %v4826_v53 = vcombine.low %v413_v29, %v423_v49 }
  0x28   : > { %v432_v54 = vrot.slane %v431_v42, 4  ;;  %v460_v55 = vrot.slane %v458_v44, 5  ;;  %v464_v56 = vrot.slane %v462_v47, 4  ;;  %v473_v61 = vshrl.u32 %v4816_v48, 16  ;;  %v4870_v42 = vld [vmem:[%s4700_s12 + $0x54] sm:$0xf] }
  0x29   : > { %5956 = vst [vmem:[#allocation3_spill] sm:$0xff] %v4826_v53  ;;  %v442_v58 = vrot.slane %v441_v6, 4  ;;  %v455_v59 = vor.u32 %v454_v50, %v451_v43  ;;  %v470_v60 = vrot.slane %v468_v51, 5  ;;  %4110 = vmatmul.mubr.msk.bf16.vlgmr.msra.gmra.mrb[0].mxu0 %vm786_vm3, %v4826_v53  ;;  %3977 = vmatprep.mubr.msk.bf16.mxu1 %vm786_vm3, %v4826_v53  ;;  %v476_v11 = vshll.u32 %v4816_v48, 16  ;;  %5958 = vst [vmem:[#allocation5_spill] sm:$0xff] %v4870_v42 }
  0x2a   : > { %v437_v63 = vsel %vm4747_vm4, %v432_v54, %v436_v31  ;;  %v465_v0 = vor.u32 %v464_v56, %v460_v55  ;;  %v482_v12 = vshll.u32 %v4824_v52, 16  ;;  %4142 = vmatpush3.bf16.msra.mxu0 %v4706_v7  ;;  %v475_v21 = vrot.slane %v473_v61, 4  ;;  %v4875_v6 = vld [vmem:[%s4700_s12 + $0x58] sm:$0xf] }
  0x2b   : > { %v447_v15 = vsel %vm4747_vm4, %v442_v58, %v446_v40  ;;  %v456_v17 = vrot.slane %v455_v59, 4  ;;  %v486_v22 = vshrl.u32 %v4824_v52, 16  ;;  %v478_v27 = vrot.slane %v476_v11, 5  ;;  %4542 = vmatprep.subr.msk.bf16.mxu0 %vm835_vm0, %v4711_v8  ;;  %v4865_v8 = vld [vmem:[%s4700_s12 + $0x50] sm:$0x1] }
  0x2c   : > { %v4850_v25 = vcombine.low %v437_v63, %v447_v15  ;;  %v466_v26 = vrot.slane %v465_v0, 4  ;;  %v484_v29 = vrot.slane %v482_v12, 5  ;;  %v492_v31 = vshll.u32 %v4836_v5, 16  ;;  %v4888_v11 = vld [vmem:[%s4700_s12 + $0x5c] sm:$0x1] }
  0x2d   : > { %v461_v7 = vsel %vm4747_vm4, %v456_v17, %v460_v55  ;;  %v488_v30 = vrot.slane %v486_v22, 4  ;;  %v497_v35 = vshrl.u32 %v4841_v13, 16  ;;  %v479_v37 = vor.u32 %v478_v27, %v475_v21  ;;  %v4892_v15 = vld [vmem:[%s4700_s12 + $0x60] sm:$0xf]  ;;  %v4897_v27 = vld [vmem:[%s4700_s12 + $0x64] sm:$0xf] }
  0x2e   : > { %5957 = vst [vmem:[#allocation4_spill] sm:$0xff] %v4850_v25  ;;  %4113 = vmatprep.mubr.msk.bf16.mxu0 %vm786_vm3, %v4850_v25  ;;  %3978 = vmatmul.mubr.msk.bf16.gmra.mrb[4].mxu1 %vm786_vm3, %v4850_v25  ;;  %v471_v36 = vsel %vm4747_vm4, %v466_v26, %v470_v60  ;;  %v500_v40 = vshll.u32 %v4841_v13, 16  ;;  %v506_v41 = vshll.u32 %v4848_v24, 16  ;;  %v494_v47 = vrot.slane %v492_v31, 5  ;;  %v5109_v25 = vld [vmem:[%s4700_s12 + $0xa8] sm:$0xf] }
  0x2f   : > { %v4872_v43 = vcombine.low %v461_v7, %v471_v36  ;;  %v489_v44 = vor.u32 %v488_v30, %v484_v29  ;;  %v499_v49 = vrot.slane %v497_v35, 4  ;;  %v480_v50 = vrot.slane %v479_v37, 4 }
  0x30   : > { %v502_v51 = vrot.slane %v500_v40, 5  ;;  %v508_v54 = vrot.slane %v506_v41, 5  ;;  %v510_v55 = vshrl.u32 %v4848_v24, 16  ;;  %v516_v58 = vshll.u32 %v4865_v8, 16 }
  0x31   : > { %5959 = vst [vmem:[#allocation6_spill] sm:$0xff] %v4872_v43  ;;  %3981 = vmatprep.mubr.msk.bf16.mxu1 %vm786_vm3, %v4872_v43  ;;  %v490_v56 = vrot.slane %v489_v44, 4  ;;  %v521_v59 = vshrl.u32 %v4870_v42, 16  ;;  %v524_v60 = vshll.u32 %v4870_v42, 16  ;;  %4114 = vmatmul.mubr.msk.bf16.gmra.mrb[4].mxu0 %vm786_vm3, %v4872_v43  ;;  %v485_v61 = vsel %vm4747_vm4, %v480_v50, %v484_v29 }
  0x32   : > { %v503_v63 = vor.u32 %v502_v51, %v499_v49  ;;  %v512_v0 = vrot.slane %v510_v55, 4  ;;  %v530_v12 = vshll.u32 %v4875_v6, 16  ;;  %v518_v21 = vrot.slane %v516_v58, 5 }
  0x33   : > { %v495_v17 = vsel %vm4747_vm4, %v490_v56, %v494_v47  ;;  %v523_v22 = vrot.slane %v521_v59, 4  ;;  %v526_v26 = vrot.slane %v524_v60, 5  ;;  %v534_v36 = vshrl.u32 %v4875_v6, 16  ;;  %v4911_v47 = vld [vmem:[%s4700_s12 + $0x68] sm:$0x1] }
  0x34   : > { %v4899_v7 = vcombine.low %v485_v61, %v495_v17  ;;  %v504_v29 = vrot.slane %v503_v63, 4  ;;  %v513_v30 = vor.u32 %v512_v0, %v508_v54  ;;  %v532_v31 = vrot.slane %v530_v12, 5 }
  0x35   : > { %v527_v35 = vor.u32 %v526_v26, %v523_v22  ;;  %v540_v37 = vshll.u32 %v4888_v11, 16  ;;  %v545_v40 = vshrl.u32 %v4892_v15, 16  ;;  %v548_v49 = vshll.u32 %v4892_v15, 16 }
  0x36   : > { %5960 = vst [vmem:[#allocation7_spill] sm:$0xff] %v4899_v7  ;;  %4117 = vmatprep.mubr.msk.bf16.mxu0 %vm786_vm3, %v4899_v7  ;;  %3982 = vmatmul.mubr.msk.bf16.gmra.mrb[8].mxu1 %vm786_vm3, %v4899_v7  ;;  %v509_v41 = vsel %vm4747_vm4, %v504_v29, %v508_v54  ;;  %v514_v44 = vrot.slane %v513_v30, 4  ;;  %v554_v50 = vshll.u32 %v4897_v27, 16  ;;  %v536_v55 = vrot.slane %v534_v36, 4  ;;  %v4919_v54 = vld [vmem:[%s4700_s12 + $0x6c] sm:$0xf] }
  0x37   : > { %v528_v51 = vrot.slane %v527_v35, 4  ;;  %v542_v56 = vrot.slane %v540_v37, 5  ;;  %v547_v58 = vrot.slane %v545_v40, 4  ;;  %v550_v60 = vrot.slane %v548_v49, 5  ;;  %v4935_v36 = vld [vmem:[%s4700_s12 + $0x70] sm:$0xf] }
  0x38   : > { %v519_v59 = vsel %vm4747_vm4, %v514_v44, %v518_v21  ;;  %v556_v61 = vrot.slane %v554_v50, 5  ;;  %v558_v63 = vshrl.u32 %v4897_v27, 16  ;;  %v537_v17 = vor.u32 %v536_v55, %v532_v31  ;;  %v5086_v7 = vld [vmem:[%s4700_s12 + $0xa0] sm:$0xf] }
  0x39   : > { %v4921_v0 = vcombine.low %v509_v41, %v519_v59  ;;  %v533_v12 = vsel %vm4747_vm4, %v528_v51, %v532_v31  ;;  %v564_v22 = vshll.u32 %v4911_v47, 16  ;;  %v551_v21 = vor.u32 %v550_v60, %v547_v58  ;;  %v4948_v51 = vld [vmem:[%s4700_s12 + $0x74] sm:$0x1] }
  0x3a   : > { %v560_v29 = vrot.slane %v558_v63, 4  ;;  %v3591_v30 = vrot.slane %v4725_v16, 9  ;;  %v1320_v35 = vrot.slane %v4728_v18, 5  ;;  %v538_v31 = vrot.slane %v537_v17, 4 }
  0x3b   : > { %5961 = vst [vmem:[#allocation8_spill] sm:$0xff] %v4921_v0  ;;  %4118 = vmatmul.mubr.msk.bf16.gmra.mrb[8].mxu0 %vm786_vm3, %v4921_v0  ;;  %3985 = vmatprep.mubr.msk.bf16.mxu1 %vm786_vm3, %v4921_v0  ;;  %v566_v37 = vrot.slane %v564_v22, 5  ;;  %v569_v40 = vshrl.u32 %v4919_v54, 16  ;;  %v572_v41 = vshll.u32 %v4919_v54, 16  ;;  %v552_v44 = vrot.slane %v551_v21, 4 }
  0x3c   : > { %v561_v49 = vor.u32 %v560_v29, %v556_v61  ;;  %v1321_v16 = vsel %vm4928_vm7, %v3591_v30, %v1320_v35  ;;  %v1322_v18 = vrot.slane %v1320_v35, 4  ;;  %v543_v50 = vsel %vm4747_vm4, %v538_v31, %v542_v56  ;;  %v4960_v56 = vld [vmem:[%s4700_s12 + $0x78] sm:$0xf]  ;;  %v4976_v31 = vld [vmem:[%s4700_s12 + $0x7c] sm:$0xf] }
  0x3d   : > { %v571_v55 = vrot.slane %v569_v40, 4  ;;  %v574_v58 = vrot.slane %v572_v41, 5  ;;  %v578_v59 = vshll.u32 %v4935_v36, 16  ;;  %v4951_v60 = vcombine.low %v533_v12, %v543_v50 }
  0x3e   : > { %v557_v63 = vsel %vm4747_vm4, %v552_v44, %v556_v61  ;;  %v562_v17 = vrot.slane %v561_v49, 4  ;;  %v1324_v22 = vsel %vm4928_vm7, %v1322_v18, %v1323_v45  ;;  %v582_v35 = vshrl.u32 %v4935_v36, 16  ;;  %v4981_v49 = vld [vmem:[%s4700_s12 + $0x80] sm:$0x1] }
  0x3f   : > { %5964 = vst [vmem:[#allocation9_spill] sm:$0xff] %v4951_v60  ;;  %v4962_v21 = vcombine.low %v1321_v16, %v1324_v22  ;;  %v575_v29 = vor.u32 %v574_v58, %v571_v55  ;;  %v580_v30 = vrot.slane %v578_v59, 5  ;;  %4121 = vmatprep.mubr.msk.bf16.mxu0 %vm786_vm3, %v4951_v60  ;;  %3986 = vmatmul.mubr.msk.bf16.gmra.mrb[12].mxu1 %vm786_vm3, %v4951_v60  ;;  %v588_v45 = vshll.u32 %v4948_v51, 16  ;;  %v5079_v60 = vld [vmem:[%s4700_s12 + $0x9c] sm:$0xf] }
  0x40   : > { %v567_v19 = vsel %vm4747_vm4, %v562_v17, %v566_v37  ;;  %v3592_v61 = vrot.slane %v4743_v33, 9  ;;  %v1329_v12 = vrot.slane %v1327_v1, 4  ;;  %v584_v44 = vrot.slane %v582_v35, 4 }
  0x41   : > { %5965 = vst [vmem:[#allocation10_spill] sm:$0xff] %v4962_v21  ;;  %v4978_v40 = vcombine.low %v557_v63, %v567_v19  ;;  %v576_v41 = vrot.slane %v575_v29, 4  ;;  %v593_v16 = vshrl.u32 %v4960_v56, 16  ;;  %v590_v18 = vrot.slane %v588_v45, 5  ;;  %v5007_v29 = vld [vmem:[%s4700_s12 + $0x84] sm:$0xf] }
  0x42   : > { %v1328_v37 = vsel %vm4928_vm7, %v3592_v61, %v1327_v1  ;;  %v1331_v50 = vsel %vm4928_vm7, %v1329_v12, %v1330_v2  ;;  %v596_v55 = vshll.u32 %v4960_v56, 16  ;;  %v585_v59 = vor.u32 %v584_v44, %v580_v30 }
  0x43   : > { %5966 = vst [vmem:[#allocation11_spill] sm:$0xff] %v4978_v40  ;;  %4122 = vmatmul.mubr.msk.bf16.gmra.mrb[12].mxu0 %vm786_vm3, %v4978_v40  ;;  %3989 = vmatprep.mubr.msk.bf16.mxu1 %vm786_vm3, %v4978_v40  ;;  %v581_v58 = vsel %vm4747_vm4, %v576_v41, %v580_v30  ;;  %v4999_v63 = vcombine.low %v1328_v37, %v1331_v50  ;;  %v595_v1 = vrot.slane %v593_v16, 4  ;;  %v602_v2 = vshll.u32 %v4976_v31, 16  ;;  %v5013_v16 = vld [vmem:[%s4700_s12 + $0x88] sm:$0xf] }
  0x44   : > { %4143 = vmatprep.mubr.msk.bf16.mxu0 %vm786_vm3, %v4962_v21  ;;  %v598_v46 = vrot.slane %v596_v55, 5  ;;  %v606_v17 = vshrl.u32 %v4976_v31, 16  ;;  %v612_v22 = vshll.u32 %v4981_v49, 16  ;;  %v586_v35 = vrot.slane %v585_v59, 4 }
  0x45   : > { %5967 = vst [vmem:[#allocation12_spill] sm:$0xff] %v4999_v63  ;;  %v3593_v30 = vrot.slane %v4770_v57, 9  ;;  %v1334_v19 = vrot.slane %v4775_v62, 5  ;;  %v1337_v45 = vrot.slane %v4783_v4, 5  ;;  %v604_v12 = vrot.slane %v602_v2, 5 }
  0x46   : > { %v599_v61 = vor.u32 %v598_v46, %v595_v1  ;;  %v608_v41 = vrot.slane %v606_v17, 4  ;;  %v614_v44 = vrot.slane %v612_v22, 5  ;;  %v591_v37 = vsel %vm4747_vm4, %v586_v35, %v590_v18  ;;  %v5023_v1 = vld [vmem:[%s4700_s12 + $0x8c] sm:$0x1] }
  0x47   : > { %v1335_v50 = vsel %vm4928_vm7, %v3593_v30, %v1334_v19  ;;  %v1336_v55 = vrot.slane %v1334_v19, 4  ;;  %v617_v59 = vshrl.u32 %v5007_v29, 16  ;;  %v5020_v3 = vcombine.low %v581_v58, %v591_v37 }
  0x48   : > { %v600_v40 = vrot.slane %v599_v61, 4  ;;  %v609_v4 = vor.u32 %v608_v41, %v604_v12  ;;  %v620_v46 = vshll.u32 %v5007_v29, 16  ;;  %v626_v18 = vshll.u32 %v5013_v16, 16  ;;  %v5037_v61 = vld [vmem:[%s4700_s12 + $0x90] sm:$0xf] }
  0x49   : > { %5968 = vst [vmem:[#allocation13_spill] sm:$0xff] %v5020_v3  ;;  %v1338_v2 = vsel %vm4928_vm7, %v1336_v55, %v1337_v45  ;;  %v619_v17 = vrot.slane %v617_v59, 4  ;;  %v630_v22 = vshrl.u32 %v5013_v16, 16  ;;  %3990 = vmatmul.mubr.msk.bf16.gmra.mrb[16].mxu1 %vm786_vm3, %v5020_v3  ;;  %v5042_v45 = vld [vmem:[%s5916_s1 + $0x1c] sm:$0xf]  ;;  %v1341_v59 = vrot.slane %v4801_v28, 5 }
  0x4a   : > { %v605_v58 = vsel %vm4747_vm4, %v600_v40, %v604_v12  ;;  %v610_v35 = vrot.slane %v609_v4, 4  ;;  %v5034_v30 = vcombine.low %v1335_v50, %v1338_v2  ;;  %v622_v19 = vrot.slane %v620_v46, 5  ;;  %5970 = vst [vmem:[#allocation15_spill] sm:$0xff] %v5042_v45  ;;  %v5056_v46 = vld [vmem:[%s4700_s12 + $0x94] sm:$0xf] }
  0x4b   : > { %4144 = vmatmul.mubr.msk.bf16.vlgmr.msra.gmra.mrb[0].mxu0 %vm786_vm3, %v4999_v63  ;;  %v628_v41 = vrot.slane %v626_v18, 5  ;;  %v632_v37 = vrot.slane %v630_v22, 4  ;;  %v636_v40 = vshll.u32 %v5023_v1, 16  ;;  %v3594_v12 = vrot.slane %v4789_v14, 9  ;;  %v5061_v3 = vld [vmem:[%s4700_s12 + $0x98] sm:$0x1] }
  0x4c   : > { %5969 = vst [vmem:[#allocation14_spill] sm:$0xff] %v5034_v30  ;;  %4176 = vmatpush3.bf16.msra.mxu0 %v4735_v20  ;;  %v615_v50 = vsel %vm4747_vm4, %v610_v35, %v614_v44  ;;  %4147 = vmatprep.mubr.msk.bf16.mxu0 %vm786_vm3, %v5034_v30  ;;  %v623_v55 = vor.u32 %v622_v19, %v619_v17  ;;  %v1344_v4 = vrot.slane %v4808_v32, 5  ;;  %v641_v20 = vshrl.u32 %v5037_v61, 16 }
  0x4d   : > { %v5058_v2 = vcombine.low %v605_v58, %v615_v50  ;;  %v633_v18 = vor.u32 %v632_v37, %v628_v41  ;;  %v638_v22 = vrot.slane %v636_v40, 5  ;;  %4543 = vmatprep.subr.msk.bf16.mxu0 %vm835_vm0, %v5042_v45  ;;  %v1342_v17 = vsel %vm4928_vm7, %v3594_v12, %v1341_v59 }
  0x4e   : > { %v624_v44 = vrot.slane %v623_v55, 4  ;;  %v1343_v35 = vrot.slane %v1341_v59, 4  ;;  %v644_v32 = vshll.u32 %v5037_v61, 16  ;;  %v643_v19 = vrot.slane %v641_v20, 4 }
  0x4f   : > { %5971 = vst [vmem:[#allocation16_spill] sm:$0xff] %v5058_v2  ;;  %3993 = vmatprep.mubr.msk.bf16.mxu1 %vm786_vm3, %v5058_v2  ;;  %v634_v58 = vrot.slane %v633_v18, 4  ;;  %v650_v37 = vshll.u32 %v5056_v46, 16  ;;  %v654_v40 = vshrl.u32 %v5056_v46, 16  ;;  %v660_v59 = vshll.u32 %v5061_v3, 16 }
  0x50   : > { %v629_v50 = vsel %vm4747_vm4, %v624_v44, %v628_v41  ;;  %v1345_v55 = vsel %vm4928_vm7, %v1343_v35, %v1344_v4  ;;  %v646_v12 = vrot.slane %v644_v32, 5  ;;  %v3595_v4 = vrot.slane %v4816_v48, 9 }
  0x51   : > { %v639_v2 = vsel %vm4747_vm4, %v634_v58, %v638_v22  ;;  %v5083_v18 = vcombine.low %v1342_v17, %v1345_v55  ;;  %v652_v20 = vrot.slane %v650_v37, 5  ;;  %v656_v0 = vrot.slane %v654_v40, 4  ;;  %v5099_v58 = vld [vmem:[%s4700_s12 + $0xa4] sm:$0x1] }
  0x52   : > { %v5088_v43 = vcombine.low %v629_v50, %v639_v2  ;;  %v647_v41 = vor.u32 %v646_v12, %v643_v19  ;;  %v662_v44 = vrot.slane %v660_v59, 5  ;;  %v1348_v32 = vrot.slane %v4824_v52, 5 }
  0x53   : > { %5972 = vst [vmem:[#allocation17_spill] sm:$0xff] %v5083_v18  ;;  %4148 = vmatmul.mubr.msk.bf16.gmra.mrb[4].mxu0 %vm786_vm3, %v5083_v18  ;;  %v657_v35 = vor.u32 %v656_v0, %v652_v20  ;;  %v1351_v22 = vrot.slane %v4836_v5, 5  ;;  %v665_v17 = vshrl.u32 %v5079_v60, 16  ;;  %v668_v19 = vshll.u32 %v5079_v60, 16 }
  0x54   : > { %5973 = vst [vmem:[#allocation18_spill] sm:$0xff] %v5088_v43  ;;  %3994 = vmatmul.mubr.msk.bf16.gmra.mrb[20].mxu1 %vm786_vm3, %v5088_v43  ;;  %v648_v2 = vrot.slane %v647_v41, 4  ;;  %v674_v37 = vshll.u32 %v5086_v7, 16  ;;  %v678_v0 = vshrl.u32 %v5086_v7, 16  ;;  %v1349_v5 = vsel %vm4928_vm7, %v3595_v4, %v1348_v32 }
  0x55   : > { %v658_v40 = vrot.slane %v657_v35, 4  ;;  %v1350_v50 = vrot.slane %v1348_v32, 4  ;;  %v667_v55 = vrot.slane %v665_v17, 4  ;;  %v670_v59 = vrot.slane %v668_v19, 5  ;;  %v5118_v32 = vld [vmem:[%s4700_s12 + $0xac] sm:$0xf] }
  0x56   : > { %v653_v12 = vsel %vm4747_vm4, %v648_v2, %v652_v20  ;;  %v676_v41 = vrot.slane %v674_v37, 5  ;;  %v680_v43 = vrot.slane %v678_v0, 4  ;;  %v684_v35 = vshll.u32 %v5099_v58, 16 }
  0x57   : > { %v663_v53 = vsel %vm4747_vm4, %v658_v40, %v662_v44  ;;  %v1352_v18 = vsel %vm4928_vm7, %v1350_v50, %v1351_v22  ;;  %v3596_v4 = vrot.slane %v4841_v13, 9  ;;  %v671_v2 = vor.u32 %v670_v59, %v667_v55 }
  0x58   : > { %v5120_v17 = vcombine.low %v653_v12, %v663_v53  ;;  %v5122_v20 = vcombine.low %v1349_v5, %v1352_v18  ;;  %v681_v19 = vor.u32 %v680_v43, %v676_v41  ;;  %v686_v37 = vrot.slane %v684_v35, 5  ;;  %v5132_v18 = vld [vmem:[%s4700_s12 + $0xb0] sm:$0x1] }
  0x59   : > { %v1355_v0 = vrot.slane %v4848_v24, 5  ;;  %v1358_v44 = vrot.slane %v4865_v8, 5  ;;  %v689_v22 = vshrl.u32 %v5109_v25, 16  ;;  %v672_v53 = vrot.slane %v671_v2, 4 }
  0x5a   : > { %5974 = vst [vmem:[#allocation19_spill] sm:$0xff] %v5120_v17  ;;  %5975 = vst [vmem:[#allocation20_spill] sm:$0xff] %v5122_v20  ;;  %3997 = vmatprep.mubr.msk.bf16.mxu1 %vm786_vm3, %v5120_v17  ;;  %4151 = vmatprep.mubr.msk.bf16.mxu0 %vm786_vm3, %v5122_v20  ;;  %v682_v40 = vrot.slane %v681_v19, 4  ;;  %v692_v43 = vshll.u32 %v5109_v25, 16  ;;  %v698_v5 = vshll.u32 %v5118_v32, 16  ;;  %v702_v12 = vshrl.u32 %v5118_v32, 16 }
  0x5b   : > { %v1356_v8 = vsel %vm4928_vm7, %v3596_v4, %v1355_v0  ;;  %v1357_v50 = vrot.slane %v1355_v0, 4  ;;  %v691_v55 = vrot.slane %v689_v22, 4  ;;  %v677_v59 = vsel %vm4747_vm4, %v672_v53, %v676_v41  ;;  %v5144_v17 = vld [vmem:[%s4700_s12 + $0xb4] sm:$0xf]  ;;  %v5156_v53 = vld [vmem:[%s4700_s12 + $0xb8] sm:$0xf] }
  0x5c   : > { %v687_v35 = vsel %vm4747_vm4, %v682_v40, %v686_v37  ;;  %v694_v2 = vrot.slane %v692_v43, 5  ;;  %v700_v19 = vrot.slane %v698_v5, 5  ;;  %v704_v0 = vrot.slane %v702_v12, 4 }
  0x5d   : > { %v5146_v20 = vcombine.low %v677_v59, %v687_v35  ;;  %v1359_v4 = vsel %vm4928_vm7, %v1357_v50, %v1358_v44  ;;  %v708_v22 = vshll.u32 %v5132_v18, 16  ;;  %v3597_v41 = vrot.slane %v4870_v42, 9  ;;  %v5162_v44 = vld [vmem:[%s4700_s12 + $0xbc] sm:$0x1] }
  0x5e   : > { %v5151_v30 = vcombine.low %v1356_v8, %v1359_v4  ;;  %v695_v63 = vor.u32 %v694_v2, %v691_v55  ;;  %v1362_v37 = vrot.slane %v4875_v6, 5  ;;  %v705_v40 = vor.u32 %v704_v0, %v700_v19 }
  0x5f   : > { %5976 = vst [vmem:[#allocation21_spill] sm:$0xff] %v5146_v20  ;;  %3998 = vmatmul.mubr.msk.bf16.gmra.mrb[24].mxu1 %vm786_vm3, %v5146_v20  ;;  %v710_v43 = vrot.slane %v708_v22, 5  ;;  %v1365_v5 = vrot.slane %v4888_v11, 5  ;;  %v713_v50 = vshrl.u32 %v5144_v17, 16  ;;  %v716_v59 = vshll.u32 %v5144_v17, 16 }
  0x60   : > { %5977 = vst [vmem:[#allocation22_spill] sm:$0xff] %v5151_v30  ;;  %4152 = vmatmul.mubr.msk.bf16.gmra.mrb[8].mxu0 %vm786_vm3, %v5151_v30  ;;  %v696_v8 = vrot.slane %v695_v63, 4  ;;  %v1363_v55 = vsel %vm4928_vm7, %v3597_v41, %v1362_v37  ;;  %v1364_v12 = vrot.slane %v1362_v37, 4  ;;  %v706_v35 = vrot.slane %v705_v40, 4 }
  0x61   : > { %v715_v2 = vrot.slane %v713_v50, 4  ;;  %v722_v4 = vshll.u32 %v5156_v53, 16  ;;  %v726_v11 = vshrl.u32 %v5156_v53, 16  ;;  %v718_v20 = vrot.slane %v716_v59, 5 }
  0x62   : > { %v701_v0 = vsel %vm4747_vm4, %v696_v8, %v700_v19  ;;  %v1366_v22 = vsel %vm4928_vm7, %v1364_v12, %v1365_v5  ;;  %v732_v63 = vshll.u32 %v5162_v44, 16  ;;  %v711_v41 = vsel %vm4747_vm4, %v706_v35, %v710_v43 }
  0x63   : > { %v5179_v37 = vcombine.low %v1363_v55, %v1366_v22  ;;  %v724_v40 = vrot.slane %v722_v4, 5  ;;  %v728_v50 = vrot.slane %v726_v11, 4  ;;  %v5181_v30 = vcombine.low %v701_v0, %v711_v41 }
  0x64   : > { %v719_v21 = vor.u32 %v718_v20, %v715_v2  ;;  %v734_v45 = vrot.slane %v732_v63, 5  ;;  %v3598_v42 = vrot.slane %v4892_v15, 9  ;;  %v1369_v5 = vrot.slane %v4897_v27, 5 }
  0x65   : > { %4155 = vmatprep.mubr.msk.bf16.mxu0 %vm786_vm3, %v5179_v37  ;;  %v729_v19 = vor.u32 %v728_v50, %v724_v40  ;;  %v1372_v8 = vrot.slane %v4911_v47, 5  ;;  %v3599_v43 = vrot.slane %v4919_v54, 9  ;;  %4001 = vmatprep.mubr.msk.bf16.mxu1 %vm786_vm3, %v5181_v30  ;;  %v3558_v20 = vcombine.low %v4714_v9, %v4717_v10 }
  0x66   : > { %v720_v55 = vrot.slane %v719_v21, 4  ;;  %v1376_v12 = vrot.slane %v4935_v36, 5  ;;  %v1379_v59 = vrot.slane %v4948_v51, 5  ;;  %v1370_v2 = vsel %vm4928_vm7, %v3598_v42, %v1369_v5 }
  0x67   : > { %v730_v35 = vrot.slane %v729_v19, 4  ;;  %v1371_v4 = vrot.slane %v1369_v5, 4  ;;  %v1383_v47 = vrot.slane %v4976_v31, 5  ;;  %v3600_v9 = vrot.slane %v4960_v56, 9 }
  0x68   : > { %v725_v11 = vsel %vm4747_vm4, %v720_v55, %v724_v40  ;;  %v1377_v21 = vsel %vm4928_vm7, %v3599_v43, %v1376_v12  ;;  %v1378_v0 = vrot.slane %v1376_v12, 4  ;;  %v1386_v42 = vrot.slane %v4981_v49, 5 }
  0x69   : > { %v735_v10 = vsel %vm4747_vm4, %v730_v35, %v734_v45  ;;  %v1373_v51 = vsel %vm4928_vm7, %v1371_v4, %v1372_v8  ;;  %v1385_v22 = vrot.slane %v1383_v47, 4  ;;  %v3601_v19 = vrot.slane %v5007_v29, 9 }
  0x6a   : > { %v5208_v63 = vcombine.low %v725_v11, %v735_v10  ;;  %v5210_v41 = vcombine.low %v1370_v2, %v1373_v51  ;;  %v1380_v40 = vsel %vm4928_vm7, %v1378_v0, %v1379_v59  ;;  %v1390_v5 = vrot.slane %v5013_v16, 5 }
  0x6b   : > { %v5214_v50 = vcombine.low %v1377_v21, %v1380_v40  ;;  %v1393_v49 = vrot.slane %v5023_v1, 5  ;;  %v1384_v45 = vsel %vm4928_vm7, %v3600_v9, %v1383_v47  ;;  %v1387_v8 = vsel %vm4928_vm7, %v1385_v22, %v1386_v42 }
  0x6c   : > { %4002 = vmatmul.mubr.msk.bf16.gmra.mrb[28].mxu1 %vm786_vm3, %v5208_v63  ;;  %4156 = vmatmul.mubr.msk.bf16.gmra.mrb[12].mxu0 %vm786_vm3, %v5210_v41  ;;  %v1392_v43 = vrot.slane %v1390_v5, 4  ;;  %v1397_v55 = vrot.slane %v5056_v46, 5  ;;  %v1404_v12 = vrot.slane %v5086_v7, 5  ;;  %v1391_v59 = vsel %vm4928_vm7, %v3601_v19, %v1390_v5 }
  0x6d   : > { %4007 = vmatprep.mubr.msk.bf16.mxu1 %vm786_vm3, %v3558_v20  ;;  %4159 = vmatprep.mubr.msk.bf16.mxu0 %vm786_vm3, %v5214_v50  ;;  %v5236_v20 = vcombine.low %v1384_v45, %v1387_v8  ;;  %v3602_v35 = vrot.slane %v5037_v61, 9  ;;  %v1400_v4 = vrot.slane %v5061_v3, 5  ;;  %v5242_v47 = vcombine.low %v4743_v33, %v4756_v39  ;;  %v5254_v3 = vld [vmem:[%s5916_s1 + $0xc] sm:$0xf] }
  0x6e   : > { %v1394_v1 = vsel %vm4928_vm7, %v1392_v43, %v1393_v49  ;;  %v1399_v2 = vrot.slane %v1397_v55, 4  ;;  %v3603_v11 = vrot.slane %v5079_v60, 9  ;;  %v1522_v21 = vsel %vm835_vm0, %v4796_v23, 0 }
  0x6f   : > { %v5247_v0 = vcombine.low %v1391_v59, %v1394_v1  ;;  %v1406_v9 = vrot.slane %v1404_v12, 4  ;;  %v1407_v10 = vrot.slane %v5099_v58, 5  ;;  %v1411_v51 = vrot.slane %v5118_v32, 5 }
  0x70   : > { %v1398_v33 = vsel %vm4928_vm7, %v3602_v35, %v1397_v55  ;;  %v1401_v39 = vsel %vm4928_vm7, %v1399_v2, %v1400_v4  ;;  %v5268_v23 = vcombine.low %v4770_v57, %v4775_v62  ;;  %v1405_v58 = vsel %vm4928_vm7, %v3603_v11, %v1404_v12 }
  0x71   : > { %v5274_v22 = vcombine.low %v4892_v15, %v4897_v27  ;;  %v1408_v42 = vsel %vm4928_vm7, %v1406_v9, %v1407_v10  ;;  %v3604_v40 = vrot.slane %v5109_v25, 9  ;;  %v1418_v19 = vrot.slane %v5156_v53, 5 }
  0x72   : > { %v5284_v57 = vcombine.low %v4919_v54, %v4935_v36  ;;  %v5288_v62 = vcombine.low %v1398_v33, %v1401_v39  ;;  %v1413_v15 = vrot.slane %v1411_v51, 4  ;;  %v1414_v27 = vrot.slane %v5132_v18, 5  ;;  %v344_v18 = vld [vmem:[%s4700_s12 + $0xc8] sm:$0x1] }
  0x73   : > { %v5293_v5 = vcombine.low %v4960_v56, %v4976_v31  ;;  %v5297_v49 = vcombine.low %v5007_v29, %v5013_v16  ;;  %v5301_v54 = vcombine.low %v5037_v61, %v5056_v46  ;;  %v5305_v36 = vcombine.low %v5079_v60, %v5086_v7  ;;  %v5324_v61 = vld [vmem:[%s4700_s12 + $0xc4] sm:$0xf] }
  0x74   : > { %4008 = vmatmul.mubr.msk.bf16.vlgmr.msra.gmra.mrb[0].mxu1 %vm786_vm3, %v4753_v38  ;;  %4160 = vmatmul.mubr.msk.bf16.gmra.mrb[16].mxu0 %vm786_vm3, %v5236_v20  ;;  %v5309_v45 = vcombine.low %v5109_v25, %v5118_v32  ;;  %v5313_v56 = vcombine.low %v4789_v14, %v4801_v28  ;;  %v5315_v31 = vcombine.low %v1405_v58, %v1408_v42  ;;  %v3605_v16 = vrot.slane %v5144_v17, 9  ;;  %v5978_v42 = vld [vmem:[#allocation5_spill] sm:$0xff] }
  0x75   : > { %4040 = vmatpush3.bf16.msra.mxu1 %v1522_v21  ;;  %4011 = vmatprep.mubr.msk.bf16.mxu1 %vm786_vm3, %v5242_v47  ;;  %v5319_v29 = vcombine.low %v5144_v17, %v5156_v53  ;;  %v1420_v7 = vrot.slane %v1418_v19, 4  ;;  %v1421_v60 = vrot.slane %v5162_v44, 5  ;;  %v1412_v14 = vsel %vm4928_vm7, %v3604_v40, %v1411_v51  ;;  %v5344_v17 = vld [vmem:[%s4700_s12 + $0xc0] sm:$0xf] }
  0x76   : > { %4163 = vmatprep.mubr.msk.bf16.mxu0 %vm786_vm3, %v5247_v0  ;;  %4538 = vmatprep.subr.msk.bf16.mxu1 %vm835_vm0, %v5254_v3  ;;  %v1415_v28 = vsel %vm4928_vm7, %v1413_v15, %v1414_v27  ;;  %v2154_v25 = vrot.slane %v5324_v61, 5  ;;  %v1419_v46 = vsel %vm4928_vm7, %v3605_v16, %v1418_v19  ;;  %v5349_v53 = vcombine.low %v4816_v48, %v4824_v52 }
  0x77   : > { %v1422_v32 = vsel %vm4928_vm7, %v1420_v7, %v1421_v60  ;;  %v5351_v44 = vcombine.low %v1412_v14, %v1415_v28  ;;  %v5355_v8 = vcombine.low %v4841_v13, %v4848_v24  ;;  %v1924_v43 = vshrl.u32 %v5344_v17, 16  ;;  %v3731_v60 = vld [vmem:[%s5916_s1 + $0x20] sm:$0xf]  ;;  %v4590_v14 = vld [vmem:[%s4700_s12 + $0x4] sm:$0xf] }
  0x78   : > { %v1927_v55 = vshll.u32 %v5344_v17, 16  ;;  %v1933_v12 = vshll.u32 %v5324_v61, 16  ;;  %v1937_v59 = vshrl.u32 %v5324_v61, 16  ;;  %v5361_v1 = vcombine.low %v1419_v46, %v1422_v32  ;;  %v4592_v32 = vld [vmem:[%s4700_s12] sm:$0xf] }
  0x79   : > { %v3675_v35 = vrot.slane %v5344_v17, 9  ;;  %v2156_v48 = vrot.slane %v2154_v25, 4  ;;  %v2157_v52 = vrot.slane %v344_v18, 5  ;;  %v1926_v2 = vrot.slane %v1924_v43, 4 }
  0x7a   : > { %v1929_v4 = vrot.slane %v1927_v55, 5  ;;  %v1935_v11 = vrot.slane %v1933_v12, 5  ;;  %v1939_v21 = vrot.slane %v1937_v59, 4  ;;  %v1943_v9 = vshll.u32 %v344_v18, 16 }
  0x7b   : > { %v2155_v10 = vsel %vm4928_vm7, %v3675_v35, %v2154_v25  ;;  %v2158_v51 = vsel %vm4928_vm7, %v2156_v48, %v2157_v52  ;;  %v5378_v40 = vcombine.low %v5978_v42, %v4875_v6  ;;  %v5979_v6 = vld [vmem:[#allocation15_spill] sm:$0xff]  ;;  %v1313_v28 = vrot.slane %v4590_v14, 5  ;;  %v5980_v48 = vld [vmem:[#allocation10_spill] sm:$0xff]  ;;  %v5981_v52 = vld [vmem:[#allocation12_spill] sm:$0xff] }
  0x7c   : > { %4012 = vmatmul.mubr.msk.bf16.gmra.mrb[4].mxu1 %vm786_vm3, %v5268_v23  ;;  %4164 = vmatmul.mubr.msk.bf16.gmra.mrb[20].mxu0 %vm786_vm3, %v5288_v62  ;;  %v1930_v13 = vor.u32 %v1929_v4, %v1926_v2  ;;  %v1940_v24 = vor.u32 %v1939_v21, %v1935_v11  ;;  %v1945_v58 = vrot.slane %v1943_v9, 5  ;;  %v5380_v19 = vcombine.low %v2155_v10, %v2158_v51  ;;  %v4591_v25 = vld [vmem:[%s4700_s12 + $0x8] sm:$0x1]  ;;  %v4593_v2 = vld [vmem:[%s5916_s1 + $0x10] sm:$0xf]  ;;  %v5983_v4 = vld [vmem:[#allocation17_spill] sm:$0xff] }
  0x7d   : > { %4015 = vmatprep.mubr.msk.bf16.mxu1 %vm786_vm3, %v5313_v56  ;;  %4167 = vmatprep.mubr.msk.bf16.mxu0 %vm786_vm3, %v5315_v31  ;;  %v2602_v7 = vsel %vm835_vm0, %v5979_v6, 0  ;;  %v1316_v46 = vrot.slane %v4591_v25, 5  ;;  %v3590_v18 = vrot.slane %v4592_v32, 9  ;;  %v1315_v43 = vrot.slane %v1313_v28, 4  ;;  %v5984_v21 = vld [vmem:[#allocation20_spill] sm:$0xff]  ;;  %v5991_v42 = vld [vmem:[#allocation9_spill] sm:$0xff] }
  0x7e   : > { %v1931_v33 = vrot.slane %v1930_v13, 4  ;;  %v1941_v39 = vrot.slane %v1940_v24, 4  ;;  %v1728_v35 = vsel %vm835_vm0, %v5254_v3, 0  ;;  %v5982_v3 = vld [vmem:[#allocation14_spill] sm:$0xff]  ;;  %v5475_v24 = vld [vmem:[%s4700_s12 + $0xcc] sm:$0xf] }
  0x7f   : > { %v1314_v55 = vsel %vm4928_vm7, %v3590_v18, %v1313_v28  ;;  %v1317_v12 = vsel %vm4928_vm7, %v1315_v43, %v1316_v46  ;;  %v5985_v13 = vld [vmem:[#allocation22_spill] sm:$0xff]  ;;  %v5478_v9 = vld [vmem:[%s4700_s12 + $0xd0] sm:$0xf]  ;;  %v2814_v10 = vsel %vm835_vm0, %v3731_v60, 0  ;;  %v2573_v14 = vshll.u32 %v5475_v24, 16  ;;  %v5997_v46 = vld [vmem:[#allocation19_spill] sm:$0xff] }
  0x80   : > { %v1936_v15 = vsel %vm4747_vm4, %v1931_v33, %v1935_v11  ;;  %v1946_v27 = vsel %vm4747_vm4, %v1941_v39, %v1945_v58  ;;  %v3607_v59 = vcombine.low %v1314_v55, %v1317_v12  ;;  %v5464_v11 = vcombine.low %v5344_v17, %v5324_v61  ;;  %v5986_v17 = vld [vmem:[#allocation3_spill] sm:$0xff]  ;;  %v5987_v51 = vld [vmem:[#allocation4_spill] sm:$0xff]  ;;  %v5988_v33 = vld [vmem:[#allocation6_spill] sm:$0xff] }
  0x81   : > { %v5386_v16 = vcombine.low %v1936_v15, %v1946_v27  ;;  %v3695_v61 = vcombine.low %v5475_v24, %v5478_v9  ;;  %v5989_v39 = vld [vmem:[#allocation7_spill] sm:$0xff]  ;;  %v5990_v58 = vld [vmem:[#allocation8_spill] sm:$0xff]  ;;  %v5993_v27 = vld [vmem:[#allocation13_spill] sm:$0xff]  ;;  %v2583_v28 = vshrl.u32 %v5478_v9, 16  ;;  %v2575_v32 = vrot.slane %v2573_v14, 5 }
  0x82   : > { %v5992_v15 = vld [vmem:[#allocation11_spill] sm:$0xff]  ;;  %v5994_v6 = vld [vmem:[#allocation16_spill] sm:$0xff]  ;;  %v5996_v25 = vld [vmem:[#allocation2_spill] sm:$0xff]  ;;  %v2800_v34 = vrot.slane %v5478_v9, 5  ;;  %v4618_v26 = vmov 0.0  }
  0x83   : > { %v2585_v43 = vrot.slane %v2583_v28, 4  ;;  %v347_v55 = vld [vmem:[%s4700_s12 + $0xd4] sm:$0x1]  ;;  %v5998_v12 = vld [vmem:[#allocation21_spill] sm:$0xff]  ;;  %3253 = vst.msk [vmem:[%s5632_s7] sm:$0x1] %vm3252_vm8, %v4618_v26 }
  0x84   : > { %4016 = vmatmul.mubr.msk.bf16.gmra.mrb[8].mxu1 %vm786_vm3, %v5349_v53  ;;  %4168 = vmatmul.mubr.msk.bf16.gmra.mrb[24].mxu0 %vm786_vm3, %v5351_v44 }
  0x85   : > { %4019 = vmatprep.mubr.msk.bf16.mxu1 %vm786_vm3, %v5355_v8  ;;  %4171 = vmatprep.mubr.msk.bf16.mxu0 %vm786_vm3, %v5361_v1 }
  0x8c   : > { %4020 = vmatmul.mubr.msk.bf16.gmra.mrb[12].mxu1 %vm786_vm3, %v5378_v40  ;;  %4172 = vmatmul.mubr.msk.bf16.gmra.mrb[28].mxu0 %vm786_vm3, %v5380_v19 }
  0x8d   : > { %4023 = vmatprep.mubr.msk.bf16.mxu1 %vm786_vm3, %v5274_v22  ;;  %4177 = vmatprep.mubr.msk.bf16.mxu0 %vm786_vm3, %v5242_v47 }
  0x94   : > { %4024 = vmatmul.mubr.msk.bf16.gmra.mrb[16].mxu1 %vm786_vm3, %v5284_v57  ;;  %4178 = vmatmul.mubr.msk.bf16.vlgmr.msra.gmra.mrb[0].mxu0 %vm786_vm3, %v5268_v23 }
  0x95   : > { %4210 = vmatpush3.bf16.msra.mxu0 %v2602_v7  ;;  %4027 = vmatprep.mubr.msk.bf16.mxu1 %vm786_vm3, %v5293_v5  ;;  %v5995_v7 = vld [vmem:[#allocation18_spill] sm:$0xff] }
  0x96   : > { %4181 = vmatprep.mubr.msk.bf16.mxu0 %vm786_vm3, %v5313_v56  ;;  %4544 = vmatprep.subr.msk.bf16.mxu0 %vm835_vm0, %v3731_v60  ;;  %v2570_v60 = vshrl.u32 %v5475_v24, 16 }
  0x9c   : > { %4028 = vmatmul.mubr.msk.bf16.gmra.mrb[20].mxu1 %vm786_vm3, %v5297_v49  ;;  %4182 = vmatmul.mubr.msk.bf16.gmra.mrb[4].mxu0 %vm786_vm3, %v5349_v53 }
  0x9d   : > { %4031 = vmatprep.mubr.msk.bf16.mxu1 %vm786_vm3, %v5301_v54  ;;  %4185 = vmatprep.mubr.msk.bf16.mxu0 %vm786_vm3, %v5355_v8 }
  0xa4   : > { %4032 = vmatmul.mubr.msk.bf16.gmra.mrb[24].mxu1 %vm786_vm3, %v5305_v36  ;;  %4186 = vmatmul.mubr.msk.bf16.gmra.mrb[8].mxu0 %vm786_vm3, %v5378_v40 }
  0xa5   : > { %4035 = vmatprep.mubr.msk.bf16.mxu1 %vm786_vm3, %v5309_v45  ;;  %4189 = vmatprep.mubr.msk.bf16.mxu0 %vm786_vm3, %v5274_v22 }
  0xac   : > { %4036 = vmatmul.mubr.msk.bf16.gmra.mrb[28].mxu1 %vm786_vm3, %v5319_v29  ;;  %4190 = vmatmul.mubr.msk.bf16.gmra.mrb[12].mxu0 %vm786_vm3, %v5284_v57 }
  0xad   : > { %4041 = vmatprep.mubr.msk.bf16.mxu1 %vm786_vm3, %v3607_v59  ;;  %4193 = vmatprep.mubr.msk.bf16.mxu0 %vm786_vm3, %v5293_v5 }
  0xb4   : > { %4042 = vmatmul.mubr.msk.bf16.vlgmr.msra.gmra.mrb[0].mxu1 %vm786_vm3, %v5980_v48  ;;  %4194 = vmatmul.mubr.msk.bf16.gmra.mrb[16].mxu0 %vm786_vm3, %v5297_v49 }
  0xb5   : > { %4074 = vmatpush3.bf16.msra.mxu1 %v1728_v35  ;;  %4045 = vmatprep.mubr.msk.bf16.mxu1 %vm786_vm3, %v5981_v52  ;;  %v2589_v35 = vshll.u32 %v347_v55, 16 }
  0xb6   : > { %4197 = vmatprep.mubr.msk.bf16.mxu0 %vm786_vm3, %v5301_v54  ;;  %4540 = vmatprep.subr.msk.bf16.mxu1 %vm835_vm0, %v4593_v2 }
  0xbc   : > { %4046 = vmatmul.mubr.msk.bf16.gmra.mrb[4].mxu1 %vm786_vm3, %v5982_v3  ;;  %4198 = vmatmul.mubr.msk.bf16.gmra.mrb[20].mxu0 %vm786_vm3, %v5305_v36 }
  0xbd   : > { %4049 = vmatprep.mubr.msk.bf16.mxu1 %vm786_vm3, %v5983_v4  ;;  %4201 = vmatprep.mubr.msk.bf16.mxu0 %vm786_vm3, %v5309_v45 }
  0xc4   : > { %4050 = vmatmul.mubr.msk.bf16.gmra.mrb[8].mxu1 %vm786_vm3, %v5984_v21  ;;  %4202 = vmatmul.mubr.msk.bf16.gmra.mrb[24].mxu0 %vm786_vm3, %v5319_v29 }
  0xc5   : > { %4053 = vmatprep.mubr.msk.bf16.mxu1 %vm786_vm3, %v5985_v13  ;;  %4205 = vmatprep.mubr.msk.bf16.mxu0 %vm786_vm3, %v5464_v11 }
  0xcc   : > { %4054 = vmatmul.mubr.msk.bf16.gmra.mrb[12].mxu1 %vm786_vm3, %v5179_v37  ;;  %4206 = vmatmul.mubr.msk.bf16.gmra.mrb[28].mxu0 %vm786_vm3, %v3695_v61  ;;  %v2591_v61 = vrot.slane %v2589_v35, 5 }
  0xcd   : > { %4057 = vmatprep.mubr.msk.bf16.mxu1 %vm786_vm3, %v5210_v41  ;;  %4211 = vmatprep.mubr.msk.bf16.mxu0 %vm786_vm3, %v5986_v17 }
  0xd4   : > { %4058 = vmatmul.mubr.msk.bf16.gmra.mrb[16].mxu1 %vm786_vm3, %v5214_v50  ;;  %4212 = vmatmul.mubr.msk.bf16.vlgmr.msra.gmra.mrb[0].mxu0 %vm786_vm3, %v5987_v51 }
  0xd5   : > { %4244 = vmatpush3.bf16.msra.mxu0 %v2814_v10  ;;  %4061 = vmatprep.mubr.msk.bf16.mxu1 %vm786_vm3, %v5236_v20 }
  0xd6   : > { %4215 = vmatprep.mubr.msk.bf16.mxu0 %vm786_vm3, %v5988_v33 }
  0xdc   : > { %4062 = vmatmul.mubr.msk.bf16.gmra.mrb[20].mxu1 %vm786_vm3, %v5247_v0  ;;  %4216 = vmatmul.mubr.msk.bf16.gmra.mrb[4].mxu0 %vm786_vm3, %v5989_v39 }
  0xdd   : > { %4065 = vmatprep.mubr.msk.bf16.mxu1 %vm786_vm3, %v5288_v62  ;;  %4219 = vmatprep.mubr.msk.bf16.mxu0 %vm786_vm3, %v5990_v58 }
  0xe4   : > { %4066 = vmatmul.mubr.msk.bf16.gmra.mrb[24].mxu1 %vm786_vm3, %v5315_v31  ;;  %4220 = vmatmul.mubr.msk.bf16.gmra.mrb[8].mxu0 %vm786_vm3, %v5991_v42 }
  0xe5   : > { %4069 = vmatprep.mubr.msk.bf16.mxu1 %vm786_vm3, %v5351_v44  ;;  %4223 = vmatprep.mubr.msk.bf16.mxu0 %vm786_vm3, %v5992_v15 }
  0xec   : > { %4070 = vmatmul.mubr.msk.bf16.gmra.mrb[28].mxu1 %vm786_vm3, %v5361_v1  ;;  %4224 = vmatmul.mubr.msk.bf16.gmra.mrb[12].mxu0 %vm786_vm3, %v5993_v27 }
  0xed   : > { %4075 = vmatprep.mubr.msk.bf16.mxu1 %vm786_vm3, %v4753_v38  ;;  %4227 = vmatprep.mubr.msk.bf16.mxu0 %vm786_vm3, %v5994_v6  ;;  %v2579_v38 = vshll.u32 %v5478_v9, 16 }
  0xef   : > { %v2581_v18 = vrot.slane %v2579_v38, 5 }
  0xf1   : > { %v2586_v59 = vor.u32 %v2585_v43, %v2581_v18 }
  0xf3   : > { %v2587_v2 = vrot.slane %v2586_v59, 4 }
  0xf4   : > { %4076 = vmatmul.mubr.msk.bf16.vlgmr.msra.gmra.mrb[0].mxu1 %vm786_vm3, %v5242_v47  ;;  %4228 = vmatmul.mubr.msk.bf16.gmra.mrb[16].mxu0 %vm786_vm3, %v5995_v7  ;;  %v2572_v47 = vrot.slane %v2570_v60, 4 }
  0xf5   : > { %4278 = vmatpush3.bf16.msra.mxu1 %v5996_v25  ;;  %4079 = vmatprep.mubr.msk.bf16.mxu1 %vm786_vm3, %v5268_v23 }
  0xf6   : > { %4231 = vmatprep.mubr.msk.bf16.mxu0 %vm786_vm3, %v5997_v46  ;;  %v2576_v23 = vor.u32 %v2575_v32, %v2572_v47 }
  0xf8   : > { %v2577_v48 = vrot.slane %v2576_v23, 4 }
  0xfc   : > { %4080 = vmatmul.mubr.msk.bf16.gmra.mrb[4].mxu1 %vm786_vm3, %v5313_v56  ;;  %4232 = vmatmul.mubr.msk.bf16.gmra.mrb[20].mxu0 %vm786_vm3, %v5998_v12  ;;  %v2582_v56 = vsel %vm4747_vm4, %v2577_v48, %v2581_v18 }
  0xfd   : > { %4083 = vmatprep.mubr.msk.bf16.mxu1 %vm786_vm3, %v5349_v53  ;;  %4235 = vmatprep.mubr.msk.bf16.mxu0 %vm786_vm3, %v5181_v30  ;;  %v2592_v53 = vsel %vm4747_vm4, %v2587_v2, %v2591_v61 }
  0xfe   : > { %v3713_v17 = vcombine.low %v2582_v56, %v2592_v53 }
 0x104   : > { %4084 = vmatmul.mubr.msk.bf16.gmra.mrb[8].mxu1 %vm786_vm3, %v5355_v8  ;;  %4236 = vmatmul.mubr.msk.bf16.gmra.mrb[24].mxu0 %vm786_vm3, %v5208_v63 }
 0x105   : > { %4087 = vmatprep.mubr.msk.bf16.mxu1 %vm786_vm3, %v5378_v40  ;;  %4239 = vmatprep.mubr.msk.bf16.mxu0 %vm786_vm3, %v5386_v16 }
 0x10c   : > { %4088 = vmatmul.mubr.msk.bf16.gmra.mrb[12].mxu1 %vm786_vm3, %v5274_v22  ;;  %4240 = vmatmul.mubr.msk.bf16.gmra.mrb[28].mxu0 %vm786_vm3, %v3713_v17 }
 0x10d   : > { %4091 = vmatprep.mubr.msk.bf16.mxu1 %vm786_vm3, %v5284_v57  ;;  %4245 = vmatprep.mubr.msk.bf16.mxu0 %vm786_vm3, %v5981_v52 }
 0x114   : > { %4092 = vmatmul.mubr.msk.bf16.gmra.mrb[16].mxu1 %vm786_vm3, %v5293_v5  ;;  %4246 = vmatmul.mubr.msk.bf16.vlgmr.msra.gmra.mrb[0].mxu0 %vm786_vm3, %v5982_v3  ;;  %v5663_v3 = vld [vmem:[%s5917_s2] ss:$0 sm:$0xff] }
 0x115   : > { %4095 = vmatprep.mubr.msk.bf16.mxu1 %vm786_vm3, %v5297_v49  ;;  %4249 = vmatprep.mubr.msk.bf16.mxu0 %vm786_vm3, %v5983_v4 }
 0x11c   : > { %4096 = vmatmul.mubr.msk.bf16.gmra.mrb[20].mxu1 %vm786_vm3, %v5301_v54  ;;  %4250 = vmatmul.mubr.msk.bf16.gmra.mrb[4].mxu0 %vm786_vm3, %v5984_v21  ;;  %v5668_v21 = vld [vmem:[%s5918_s3] ss:$0 sm:$0xff] }
 0x11d   : > { %4099 = vmatprep.mubr.msk.bf16.mxu1 %vm786_vm3, %v5305_v36  ;;  %4253 = vmatprep.mubr.msk.bf16.mxu0 %vm786_vm3, %v5985_v13 }
 0x124   : > { %4100 = vmatmul.mubr.msk.bf16.gmra.mrb[24].mxu1 %vm786_vm3, %v5309_v45  ;;  %4254 = vmatmul.mubr.msk.bf16.gmra.mrb[8].mxu0 %vm786_vm3, %v5179_v37  ;;  %v3730_v37 = vrot.slane %v5475_v24, 9 }
 0x125   : > { %4103 = vmatprep.mubr.msk.bf16.mxu1 %vm786_vm3, %v5319_v29  ;;  %4257 = vmatprep.mubr.msk.bf16.mxu0 %vm786_vm3, %v5210_v41  ;;  %v2802_v41 = vrot.slane %v2800_v34, 4 }
 0x12c   : > { %4104 = vmatmul.mubr.msk.bf16.gmra.mrb[28].mxu1 %vm786_vm3, %v5464_v11  ;;  %4258 = vmatmul.mubr.msk.bf16.gmra.mrb[12].mxu0 %vm786_vm3, %v5214_v50  ;;  %v2803_v50 = vrot.slane %v347_v55, 5 }
 0x12d   : > { %4125 = vmatprep.mubr.msk.bf16.mxu1 %vm786_vm3, %v5993_v27  ;;  %4261 = vmatprep.mubr.msk.bf16.mxu0 %vm786_vm3, %v5236_v20  ;;  %v2801_v20 = vsel %vm4928_vm7, %v3730_v37, %v2800_v34 }
 0x134   : > { %4126 = vmatmul.mubr.msk.bf16.vlgmr.msra.gmra.mrb[16].mxu1 %vm786_vm3, %v5994_v6  ;;  %4262 = vmatmul.mubr.msk.bf16.gmra.mrb[16].mxu0 %vm786_vm3, %v5247_v0  ;;  %v2804_v0 = vsel %vm4928_vm7, %v2802_v41, %v2803_v50 }
 0x135   : > { %4129 = vmatprep.mubr.msk.bf16.mxu1 %vm786_vm3, %v5995_v7  ;;  %4265 = vmatprep.mubr.msk.bf16.mxu0 %vm786_vm3, %v5288_v62  ;;  %v3732_v22 = vcombine.low %v2801_v20, %v2804_v0 }
 0x13c   : > { %4130 = vmatmul.mubr.msk.bf16.gmra.mrb[20].mxu1 %vm786_vm3, %v5997_v46  ;;  %4266 = vmatmul.mubr.msk.bf16.gmra.mrb[20].mxu0 %vm786_vm3, %v5315_v31 }
 0x13d   : > { %4133 = vmatprep.mubr.msk.bf16.mxu1 %vm786_vm3, %v5998_v12  ;;  %4269 = vmatprep.mubr.msk.bf16.mxu0 %vm786_vm3, %v5351_v44 }
 0x144   : > { %4134 = vmatmul.mubr.msk.bf16.gmra.mrb[24].mxu1 %vm786_vm3, %v5181_v30  ;;  %4270 = vmatmul.mubr.msk.bf16.gmra.mrb[24].mxu0 %vm786_vm3, %v5361_v1  ;;  %v4619_v30 = vmov -inf  }
 0x145   : > { %4137 = vmatprep.mubr.msk.bf16.mxu1 %vm786_vm3, %v5208_v63  ;;  %4273 = vmatprep.mubr.msk.bf16.mxu0 %vm786_vm3, %v5380_v19  ;;  %3254 = vst.msk [vmem:[%s5638_s10] sm:$0x1] %vm3252_vm8, %v4619_v30 }
 0x14c   : > { %4138 = vmatmul.mubr.msk.bf16.gmra.mrb[28].mxu1 %vm786_vm3, %v5386_v16  ;;  %4274 = vmatmul.mubr.msk.bf16.gmra.mrb[28].mxu0 %vm786_vm3, %v3732_v22 }
 0x1c7   : > { %v4077_v63 = vpop.f32.mrb[0].mxu1 }
 0x1c8   : > { %v1764_v57 = vpop.f32.mrb[1].mxu1 }
 0x1c9   : > { %v4078_v62 = vpop.f32.mrb[2].mxu1 }
 0x1ca   : > { %v1767_v5 = vpop.f32.mrb[3].mxu1 }
 0x1cf   : > { %v4081_v49 = vpop.f32.mrb[4].mxu1 }
 0x1d0   : > { %v1780_v54 = vpop.f32.mrb[5].mxu1 }
 0x1d1   : > { %v4082_v36 = vpop.f32.mrb[6].mxu1 }
 0x1d2   : > { %v1783_v45 = vpop.f32.mrb[7].mxu1 }
 0x1d7   : > { %v5644_v31 = vpop.f32.mrb[8].mxu1 }
 0x1d8   : > { %v5646_v29 = vpop.f32.mrb[9].mxu1 }
 0x1d9   : > { %v5648_v44 = vpop.f32.mrb[10].mxu1 }
 0x1da   : > { %v5650_v8 = vpop.f32.mrb[11].mxu1 }
 0x1df   : > { %v5652_v1 = vpop.f32.mrb[12].mxu1 }
 0x1e0   : > { %v5654_v40 = vpop.f32.mrb[13].mxu1 }
 0x1e1   : > { %v5656_v19 = vpop.f32.mrb[14].mxu1 }
 0x1e2   : > { %v5658_v16 = vpop.f32.mrb[15].mxu1 }
 0x1e7   : > { %v4247_v52 = vpop.f32.mrb[0].mxu0 }
 0x1e8   : > { %v4279_v4 = vadd.f32 %v4247_v52, %v4077_v63  ;;  %v2850_v11 = vpop.f32.mrb[1].mxu0 }
 0x1e9   : > { %v4280_v13 = vadd.f32 %v2850_v11, %v1764_v57  ;;  %v4248_v24 = vpop.f32.mrb[2].mxu0 }
 0x1ea   : > { %v3018_v9 = vmul.f32 %v4279_v4, %v5663_v3  ;;  %v4281_v10 = vadd.f32 %v4248_v24, %v4078_v62  ;;  %v2853_v51 = vpop.f32.mrb[3].mxu0 }
 0x1eb   : > { %v3016_v33 = vmul.f32 %v4280_v13, %v5663_v3  ;;  %v4282_v39 = vadd.f32 %v2853_v51, %v1767_v5 }
 0x1ec   : > { %v3057_v58 = vadd.f32 %v5668_v21, %v3018_v9  ;;  %v3019_v42 = vmul.f32 %v4281_v10, %v5663_v3 }
 0x1ed   : > { %v3055_v15 = vadd.f32 %v5668_v21, %v3016_v33  ;;  %v3017_v27 = vmul.f32 %v4282_v39, %v5663_v3 }
 0x1ee   : > { %v3788_v6 = vpack.c.bf16 %v3057_v58, %v3057_v58  ;;  %v3058_v7 = vadd.f32 %v5668_v21, %v3019_v42  ;;  %v3259_v48 = vsel %vm786_vm3, %v3057_v58, 0.0  ;;  %v3331_v34 = vsel %vm786_vm3, %v3057_v58, -inf }
 0x1ef   : > { %v3786_v60 = vpack.c.bf16 %v3055_v15, %v3055_v15  ;;  %v3056_v14 = vadd.f32 %v5668_v21, %v3017_v27  ;;  %v4251_v28 = vpop.f32.mrb[4].mxu0  ;;  %v3256_v47 = vsel %vm786_vm3, %v3055_v15, 0.0  ;;  %v3329_v20 = vsel %vm786_vm3, %v3055_v15, -inf }
 0x1f0   : > { %3218 = vst.msk [vmem:[%s5678_s18 + $0x8] sm:$0xf] %vm3215_vm9, %v3788_v6  ;;  %v3789_v25 = vpack.c.bf16 %v3058_v7, %v3058_v7  ;;  %v4283_v38 = vadd.f32 %v4251_v28, %v4081_v49  ;;  %v2866_v46 = vpop.f32.mrb[5].mxu0  ;;  %v3261_v37 = vsel %vm786_vm3, %v3058_v7, 0.0  ;;  %v3332_v4 = vsel %vm786_vm3, %v3058_v7, -inf }
 0x1f1   : > { %3216 = vst.msk [vmem:[%s5678_s18] sm:$0xf] %vm3215_vm9, %v3786_v60  ;;  %v3787_v32 = vpack.c.bf16 %v3056_v14, %v3056_v14  ;;  %v3257_v18 = vsel %vm786_vm3, %v3056_v14, 0.0  ;;  %v4284_v43 = vadd.f32 %v2866_v46, %v1780_v54  ;;  %v4252_v55 = vpop.f32.mrb[6].mxu0  ;;  %v3330_v9 = vsel %vm786_vm3, %v3056_v14, -inf }
 0x1f2   : > { %3219 = vst.msk [vmem:[%s5678_s18 + $0xc] sm:$0xf] %vm3215_vm9, %v3789_v25  ;;  %v3258_v12 = vadd.f32 %v3257_v18, %v3256_v47  ;;  %v3022_v23 = vmul.f32 %v4283_v38, %v5663_v3  ;;  %v4285_v59 = vadd.f32 %v4252_v55, %v4082_v36  ;;  %v2869_v35 = vpop.f32.mrb[7].mxu0 }
 0x1f3   : > { %3217 = vst.msk [vmem:[%s5678_s18 + $0x4] sm:$0xf] %vm3215_vm9, %v3787_v32  ;;  %v3020_v2 = vmul.f32 %v4284_v43, %v5663_v3  ;;  %v4286_v61 = vadd.f32 %v2869_v35, %v1783_v45 }
 0x1f4   : > { %v3260_v56 = vadd.f32 %v3259_v48, %v3258_v12  ;;  %v3061_v53 = vadd.f32 %v5668_v21, %v3022_v23  ;;  %v3023_v17 = vmul.f32 %v4285_v59, %v5663_v3 }
 0x1f5   : > { %v3059_v41 = vadd.f32 %v5668_v21, %v3020_v2  ;;  %v3021_v50 = vmul.f32 %v4286_v61, %v5663_v3 }
 0x1f6   : > { %v3792_v0 = vpack.c.bf16 %v3061_v53, %v3061_v53  ;;  %v3337_v22 = vsel %vm786_vm3, %v3061_v53, -inf  ;;  %v3262_v26 = vadd.f32 %v3261_v37, %v3260_v56  ;;  %v3062_v36 = vadd.f32 %v5668_v21, %v3023_v17 }
 0x1f7   : > { %v3338_v30 = vmax.f32 %v3331_v34, %v3337_v22  ;;  %v3790_v63 = vpack.c.bf16 %v3059_v41, %v3059_v41  ;;  %v3263_v57 = vsel %vm786_vm3, %v3059_v41, 0.0  ;;  %v3333_v62 = vsel %vm786_vm3, %v3059_v41, -inf  ;;  %v4255_v5 = vpop.f32.mrb[8].mxu0 }
 0x1f8   : > { %3222 = vst.msk [vmem:[%s5678_s18 + $0x18] sm:$0xf] %vm3215_vm9, %v3792_v0  ;;  %v3264_v49 = vadd.f32 %v3263_v57, %v3262_v26  ;;  %v3334_v54 = vmax.f32 %v3329_v20, %v3333_v62  ;;  %v3060_v45 = vadd.f32 %v5668_v21, %v3021_v50  ;;  %v2882_v52 = vpop.f32.mrb[9].mxu0  ;;  %v4287_v11 = vadd.f32 %v4255_v5, %v5644_v31 }
 0x1f9   : > { %3220 = vst.msk [vmem:[%s5678_s18 + $0x10] sm:$0xf] %vm3215_vm9, %v3790_v63  ;;  %v4288_v13 = vadd.f32 %v2882_v52, %v5646_v29  ;;  %v4256_v24 = vpop.f32.mrb[10].mxu0  ;;  %v3793_v10 = vpack.c.bf16 %v3062_v36, %v3062_v36  ;;  %v3339_v51 = vsel %vm786_vm3, %v3062_v36, -inf  ;;  %v3267_v60 = vsel %vm786_vm3, %v3061_v53, 0.0 }
 0x1fa   : > { %v3791_v33 = vpack.c.bf16 %v3060_v45, %v3060_v45  ;;  %v2885_v39 = vpop.f32.mrb[11].mxu0  ;;  %v3340_v58 = vmax.f32 %v3332_v4, %v3339_v51  ;;  %v3265_v42 = vsel %vm786_vm3, %v3060_v45, 0.0  ;;  %v3335_v15 = vsel %vm786_vm3, %v3060_v45, -inf }
 0x1fb   : > { %v3026_v27 = vmul.f32 %v4287_v11, %v5663_v3  ;;  %3223 = vst.msk [vmem:[%s5678_s18 + $0x1c] sm:$0xf] %vm3215_vm9, %v3793_v10  ;;  %v3266_v31 = vadd.f32 %v3265_v42, %v3264_v49  ;;  %v3336_v29 = vmax.f32 %v3330_v9, %v3335_v15  ;;  %v3024_v6 = vmul.f32 %v4288_v13, %v5663_v3 }
 0x1fc   : > { %3221 = vst.msk [vmem:[%s5678_s18 + $0x14] sm:$0xf] %vm3215_vm9, %v3791_v33  ;;  %v4289_v7 = vadd.f32 %v4256_v24, %v5648_v44  ;;  %v4290_v28 = vadd.f32 %v2885_v39, %v5650_v8  ;;  %v3269_v47 = vsel %vm786_vm3, %v3062_v36, 0.0 }
 0x1fd   : > { %v3065_v14 = vadd.f32 %v5668_v21, %v3026_v27  ;;  %v3268_v25 = vadd.f32 %v3267_v60, %v3266_v31  ;;  %v3063_v38 = vadd.f32 %v5668_v21, %v3024_v6 }
 0x1fe   : > { %v3027_v46 = vmul.f32 %v4289_v7, %v5663_v3  ;;  %v3025_v44 = vmul.f32 %v4290_v28, %v5663_v3 }
 0x1ff   : > { %v3796_v32 = vpack.c.bf16 %v3065_v14, %v3065_v14  ;;  %v3345_v18 = vsel %vm786_vm3, %v3065_v14, -inf  ;;  %v4259_v43 = vpop.f32.mrb[12].mxu0  ;;  %v3794_v12 = vpack.c.bf16 %v3063_v38, %v3063_v38  ;;  %v3270_v23 = vadd.f32 %v3269_v47, %v3268_v25 }
 0x200   : > { %v5735_v55 = vmax.f32 %v3338_v30, %v3345_v18  ;;  %v3271_v8 = vsel %vm786_vm3, %v3063_v38, 0.0  ;;  %v2898_v59 = vpop.f32.mrb[13].mxu0  ;;  %v3341_v35 = vsel %vm786_vm3, %v3063_v38, -inf  ;;  %v3066_v48 = vadd.f32 %v5668_v21, %v3027_v46 }
 0x201   : > { %3226 = vst.msk [vmem:[%s5678_s18 + $0x28] sm:$0xf] %vm3215_vm9, %v3796_v32  ;;  %v3064_v2 = vadd.f32 %v5668_v21, %v3025_v44  ;;  %v4291_v61 = vadd.f32 %v4259_v43, %v5652_v1  ;;  %v4260_v56 = vpop.f32.mrb[14].mxu0  ;;  %3224 = vst.msk [vmem:[%s5678_s18 + $0x20] sm:$0xf] %vm3215_vm9, %v3794_v12  ;;  %v3272_v53 = vadd.f32 %v3271_v8, %v3270_v23  ;;  %v3275_v62 = vsel %vm786_vm3, %v3065_v14, 0.0 }
 0x202   : > { %v5746_v17 = vmax.f32 %v3334_v54, %v3341_v35  ;;  %v4292_v34 = vadd.f32 %v2898_v59, %v5654_v40  ;;  %v4293_v37 = vadd.f32 %v4260_v56, %v5656_v19  ;;  %v2901_v41 = vpop.f32.mrb[15].mxu0  ;;  %v3797_v50 = vpack.c.bf16 %v3066_v48, %v3066_v48 }
 0x203   : > { %v3347_v20 = vsel %vm786_vm3, %v3066_v48, -inf  ;;  %v3795_v0 = vpack.c.bf16 %v3064_v2, %v3064_v2  ;;  %v3273_v1 = vsel %vm786_vm3, %v3064_v2, 0.0  ;;  %v3343_v26 = vsel %vm786_vm3, %v3064_v2, -inf }
 0x204   : > { %v5751_v22 = vmax.f32 %v3340_v58, %v3347_v20  ;;  %v3030_v30 = vmul.f32 %v4291_v61, %v5663_v3  ;;  %3227 = vst.msk [vmem:[%s5678_s18 + $0x2c] sm:$0xf] %vm3215_vm9, %v3797_v50  ;;  %v3274_v40 = vadd.f32 %v3273_v1, %v3272_v53  ;;  %v5760_v63 = vmax.f32 %v3336_v29, %v3343_v26 }
 0x205   : > { %3225 = vst.msk [vmem:[%s5678_s18 + $0x24] sm:$0xf] %vm3215_vm9, %v3795_v0  ;;  %v3028_v19 = vmul.f32 %v4292_v34, %v5663_v3  ;;  %v3031_v57 = vmul.f32 %v4293_v37, %v5663_v3  ;;  %v4294_v49 = vadd.f32 %v2901_v41, %v5658_v16  ;;  %v3277_v11 = vsel %vm786_vm3, %v3066_v48, 0.0 }
 0x206   : > { %v3069_v5 = vadd.f32 %v5668_v21, %v3030_v30  ;;  %v3276_v54 = vadd.f32 %v3275_v62, %v3274_v40 }
 0x207   : > { %v3067_v36 = vadd.f32 %v5668_v21, %v3028_v19  ;;  %v3070_v45 = vadd.f32 %v5668_v21, %v3031_v57  ;;  %v4127_v52 = vpop.f32.mrb[16].mxu1  ;;  %v4263_v4 = vpop.f32.mrb[16].mxu0  ;;  %v3029_v9 = vmul.f32 %v4294_v49, %v5663_v3 }
 0x208   : > { %v3800_v13 = vpack.c.bf16 %v3069_v5, %v3069_v5  ;;  %v3353_v24 = vsel %vm786_vm3, %v3069_v5, -inf  ;;  %v2056_v10 = vpop.f32.mrb[17].mxu1  ;;  %v2914_v51 = vpop.f32.mrb[17].mxu0  ;;  %v3278_v39 = vadd.f32 %v3277_v11, %v3276_v54  ;;  %v4295_v38 = vadd.f32 %v4263_v4, %v4127_v52 }
 0x209   : > { %v3354_v16 = vmax.f32 %v5735_v55, %v3353_v24  ;;  %v3798_v33 = vpack.c.bf16 %v3067_v36, %v3067_v36  ;;  %v3279_v58 = vsel %vm786_vm3, %v3067_v36, 0.0  ;;  %v4128_v42 = vpop.f32.mrb[18].mxu1  ;;  %v4264_v15 = vpop.f32.mrb[18].mxu0  ;;  %v3349_v27 = vsel %vm786_vm3, %v3067_v36, -inf }
 0x20a   : > { %3230 = vst.msk [vmem:[%s5678_s18 + $0x38] sm:$0xf] %vm3215_vm9, %v3800_v13  ;;  %v3801_v31 = vpack.c.bf16 %v3070_v45, %v3070_v45  ;;  %v3355_v29 = vsel %vm786_vm3, %v3070_v45, -inf  ;;  %v2059_v6 = vpop.f32.mrb[19].mxu1  ;;  %v2917_v7 = vpop.f32.mrb[19].mxu0  ;;  %v3280_v60 = vadd.f32 %v3279_v58, %v3278_v39  ;;  %v3350_v14 = vmax.f32 %v5746_v17, %v3349_v27 }
 0x20b   : > { %3228 = vst.msk [vmem:[%s5678_s18 + $0x30] sm:$0xf] %vm3215_vm9, %v3798_v33  ;;  %v3356_v28 = vmax.f32 %v5751_v22, %v3355_v29  ;;  %v3068_v25 = vadd.f32 %v5668_v21, %v3029_v9  ;;  %v4296_v46 = vadd.f32 %v2914_v51, %v2056_v10  ;;  %v4297_v47 = vadd.f32 %v4264_v15, %v4128_v42 }
 0x20c   : > { %3231 = vst.msk [vmem:[%s5678_s18 + $0x3c] sm:$0xf] %vm3215_vm9, %v3801_v31  ;;  %v4298_v32 = vadd.f32 %v2917_v7, %v2059_v6  ;;  %v3034_v23 = vmul.f32 %v4295_v38, %v5663_v3  ;;  %v3283_v59 = vsel %vm786_vm3, %v3069_v5, 0.0  ;;  %v3285_v26 = vsel %vm786_vm3, %v3070_v45, 0.0 }
 0x20d   : > { %v3799_v18 = vpack.c.bf16 %v3068_v25, %v3068_v25  ;;  %v3281_v44 = vsel %vm786_vm3, %v3068_v25, 0.0  ;;  %v3351_v43 = vsel %vm786_vm3, %v3068_v25, -inf  ;;  %v3032_v8 = vmul.f32 %v4296_v46, %v5663_v3 }
 0x20e   : > { %v3282_v55 = vadd.f32 %v3281_v44, %v3280_v60  ;;  %v3352_v12 = vmax.f32 %v5760_v63, %v3351_v43  ;;  %v3035_v35 = vmul.f32 %v4297_v47, %v5663_v3  ;;  %v3033_v48 = vmul.f32 %v4298_v32, %v5663_v3 }
 0x20f   : > { %3229 = vst.msk [vmem:[%s5678_s18 + $0x34] sm:$0xf] %vm3215_vm9, %v3799_v18  ;;  %v4131_v2 = vpop.f32.mrb[20].mxu1  ;;  %v4267_v61 = vpop.f32.mrb[20].mxu0  ;;  %v3073_v53 = vadd.f32 %v5668_v21, %v3034_v23  ;;  %v3071_v17 = vadd.f32 %v5668_v21, %v3032_v8 }
 0x210   : > { %v3284_v56 = vadd.f32 %v3283_v59, %v3282_v55  ;;  %v4299_v34 = vadd.f32 %v4267_v61, %v4131_v2  ;;  %v2072_v37 = vpop.f32.mrb[21].mxu1  ;;  %v2930_v41 = vpop.f32.mrb[21].mxu0  ;;  %v3074_v50 = vadd.f32 %v5668_v21, %v3035_v35  ;;  %v3072_v20 = vadd.f32 %v5668_v21, %v3033_v48 }
 0x211   : > { %v4300_v0 = vadd.f32 %v2930_v41, %v2072_v37  ;;  %v4132_v22 = vpop.f32.mrb[22].mxu1  ;;  %v4268_v1 = vpop.f32.mrb[22].mxu0  ;;  %v3804_v30 = vpack.c.bf16 %v3073_v53, %v3073_v53  ;;  %v3361_v40 = vsel %vm786_vm3, %v3073_v53, -inf  ;;  %v3802_v63 = vpack.c.bf16 %v3071_v17, %v3071_v17 }
 0x212   : > { %v2075_v19 = vpop.f32.mrb[23].mxu1  ;;  %v2933_v57 = vpop.f32.mrb[23].mxu0  ;;  %v5801_v62 = vmax.f32 %v3354_v16, %v3361_v40  ;;  %v3286_v5 = vadd.f32 %v3285_v26, %v3284_v56  ;;  %v3287_v49 = vsel %vm786_vm3, %v3071_v17, 0.0  ;;  %v3357_v54 = vsel %vm786_vm3, %v3071_v17, -inf }
 0x213   : > { %3234 = vst.msk [vmem:[%s5678_s18 + $0x48] sm:$0xf] %vm3215_vm9, %v3804_v30  ;;  %3232 = vst.msk [vmem:[%s5678_s18 + $0x40] sm:$0xf] %vm3215_vm9, %v3802_v63  ;;  %v5809_v36 = vmax.f32 %v3350_v14, %v3357_v54  ;;  %v3805_v45 = vpack.c.bf16 %v3074_v50, %v3074_v50  ;;  %v3363_v52 = vsel %vm786_vm3, %v3074_v50, -inf  ;;  %v3803_v13 = vpack.c.bf16 %v3072_v20, %v3072_v20 }
 0x214   : > { %v3288_v4 = vadd.f32 %v3287_v49, %v3286_v5  ;;  %v5812_v11 = vmax.f32 %v3356_v28, %v3363_v52  ;;  %v3289_v24 = vsel %vm786_vm3, %v3072_v20, 0.0  ;;  %v3359_v9 = vsel %vm786_vm3, %v3072_v20, -inf }
 0x215   : > { %3235 = vst.msk [vmem:[%s5678_s18 + $0x4c] sm:$0xf] %vm3215_vm9, %v3805_v45  ;;  %v3038_v10 = vmul.f32 %v4299_v34, %v5663_v3  ;;  %v3036_v51 = vmul.f32 %v4300_v0, %v5663_v3  ;;  %v4301_v16 = vadd.f32 %v4268_v1, %v4132_v22  ;;  %v3291_v33 = vsel %vm786_vm3, %v3073_v53, 0.0  ;;  %3233 = vst.msk [vmem:[%s5678_s18 + $0x44] sm:$0xf] %vm3215_vm9, %v3803_v13 }
 0x216   : > { %v3290_v39 = vadd.f32 %v3289_v24, %v3288_v4  ;;  %v5823_v58 = vmax.f32 %v3352_v12, %v3359_v9  ;;  %v4302_v42 = vadd.f32 %v2933_v57, %v2075_v19  ;;  %v3293_v32 = vsel %vm786_vm3, %v3074_v50, 0.0 }
 0x217   : > { %v4135_v15 = vpop.f32.mrb[24].mxu1  ;;  %v4271_v27 = vpop.f32.mrb[24].mxu0  ;;  %v3077_v31 = vadd.f32 %v5668_v21, %v3038_v10  ;;  %v3075_v29 = vadd.f32 %v5668_v21, %v3036_v51  ;;  %v3039_v6 = vmul.f32 %v4301_v16, %v5663_v3 }
 0x218   : > { %v4303_v7 = vadd.f32 %v4271_v27, %v4135_v15  ;;  %v2088_v60 = vpop.f32.mrb[25].mxu1  ;;  %v2946_v14 = vpop.f32.mrb[25].mxu0  ;;  %v3292_v28 = vadd.f32 %v3291_v33, %v3290_v39  ;;  %v3037_v25 = vmul.f32 %v4302_v42, %v5663_v3 }
 0x219   : > { %v4304_v38 = vadd.f32 %v2946_v14, %v2088_v60  ;;  %v4136_v46 = vpop.f32.mrb[26].mxu1  ;;  %v4272_v47 = vpop.f32.mrb[26].mxu0  ;;  %v3808_v18 = vpack.c.bf16 %v3077_v31, %v3077_v31  ;;  %v3369_v44 = vsel %vm786_vm3, %v3077_v31, -inf  ;;  %v3806_v43 = vpack.c.bf16 %v3075_v29, %v3075_v29 }
 0x21a   : > { %v2091_v55 = vpop.f32.mrb[27].mxu1  ;;  %v2949_v12 = vpop.f32.mrb[27].mxu0  ;;  %v3370_v23 = vmax.f32 %v5801_v62, %v3369_v44  ;;  %v3294_v8 = vadd.f32 %v3293_v32, %v3292_v28  ;;  %v3295_v59 = vsel %vm786_vm3, %v3075_v29, 0.0  ;;  %v3365_v35 = vsel %vm786_vm3, %v3075_v29, -inf }
 0x21b   : > { %3238 = vst.msk [vmem:[%s5678_s18 + $0x58] sm:$0xf] %vm3215_vm9, %v3808_v18  ;;  %3236 = vst.msk [vmem:[%s5678_s18 + $0x50] sm:$0xf] %vm3215_vm9, %v3806_v43  ;;  %v3366_v48 = vmax.f32 %v5809_v36, %v3365_v35  ;;  %v3078_v2 = vadd.f32 %v5668_v21, %v3039_v6  ;;  %v3076_v61 = vadd.f32 %v5668_v21, %v3037_v25  ;;  %v3299_v41 = vsel %vm786_vm3, %v3077_v31, 0.0 }
 0x21c   : > { %v3042_v56 = vmul.f32 %v4303_v7, %v5663_v3  ;;  %v3296_v53 = vadd.f32 %v3295_v59, %v3294_v8  ;;  %v3040_v17 = vmul.f32 %v4304_v38, %v5663_v3  ;;  %v4305_v34 = vadd.f32 %v4272_v47, %v4136_v46 }
 0x21d   : > { %v4306_v37 = vadd.f32 %v2949_v12, %v2091_v55  ;;  %v3809_v50 = vpack.c.bf16 %v3078_v2, %v3078_v2  ;;  %v3371_v20 = vsel %vm786_vm3, %v3078_v2, -inf  ;;  %v3807_v0 = vpack.c.bf16 %v3076_v61, %v3076_v61 }
 0x21e   : > { %v3372_v22 = vmax.f32 %v5812_v11, %v3371_v20  ;;  %v3297_v1 = vsel %vm786_vm3, %v3076_v61, 0.0  ;;  %v3367_v26 = vsel %vm786_vm3, %v3076_v61, -inf  ;;  %v3081_v30 = vadd.f32 %v5668_v21, %v3042_v56 }
 0x21f   : > { %v4139_v40 = vpop.f32.mrb[28].mxu1  ;;  %v4275_v63 = vpop.f32.mrb[28].mxu0  ;;  %3239 = vst.msk [vmem:[%s5678_s18 + $0x5c] sm:$0xf] %vm3215_vm9, %v3809_v50  ;;  %3237 = vst.msk [vmem:[%s5678_s18 + $0x54] sm:$0xf] %vm3215_vm9, %v3807_v0  ;;  %v3298_v19 = vadd.f32 %v3297_v1, %v3296_v53  ;;  %v3368_v57 = vmax.f32 %v5823_v58, %v3367_v26  ;;  %v3079_v62 = vadd.f32 %v5668_v21, %v3040_v17 }
 0x220   : > { %v3043_v5 = vmul.f32 %v4305_v34, %v5663_v3  ;;  %v2104_v49 = vpop.f32.mrb[29].mxu1  ;;  %v2962_v54 = vpop.f32.mrb[29].mxu0  ;;  %v3301_v36 = vsel %vm786_vm3, %v3078_v2, 0.0  ;;  %v3812_v45 = vpack.c.bf16 %v3081_v30, %v3081_v30  ;;  %v3377_v52 = vsel %vm786_vm3, %v3081_v30, -inf }
 0x221   : > { %v3041_v4 = vmul.f32 %v4306_v37, %v5663_v3  ;;  %v4140_v11 = vpop.f32.mrb[30].mxu1  ;;  %v4276_v13 = vpop.f32.mrb[30].mxu0  ;;  %v3300_v24 = vadd.f32 %v3299_v41, %v3298_v19  ;;  %v3378_v9 = vmax.f32 %v3370_v23, %v3377_v52  ;;  %v3810_v10 = vpack.c.bf16 %v3079_v62, %v3079_v62 }
 0x222   : > { %v3303_v51 = vsel %vm786_vm3, %v3079_v62, 0.0  ;;  %v2107_v16 = vpop.f32.mrb[31].mxu1  ;;  %v2965_v33 = vpop.f32.mrb[31].mxu0  ;;  %3242 = vst.msk [vmem:[%s5678_s18 + $0x68] sm:$0xf] %vm3215_vm9, %v3812_v45  ;;  %v3373_v39 = vsel %vm786_vm3, %v3079_v62, -inf  ;;  %v3082_v58 = vadd.f32 %v5668_v21, %v3043_v5  ;;  %v4307_v15 = vadd.f32 %v4275_v63, %v4139_v40 }
 0x223   : > { %v3080_v42 = vadd.f32 %v5668_v21, %v3041_v4  ;;  %3240 = vst.msk [vmem:[%s5678_s18 + $0x60] sm:$0xf] %vm3215_vm9, %v3810_v10  ;;  %v3302_v27 = vadd.f32 %v3301_v36, %v3300_v24  ;;  %v3374_v31 = vmax.f32 %v3366_v48, %v3373_v39  ;;  %v4308_v29 = vadd.f32 %v2962_v54, %v2104_v49  ;;  %v3328_v39 = vld [vmem:[%s5638_s10] sm:$0x1] }
 0x224   : > { %v4309_v6 = vadd.f32 %v4276_v13, %v4140_v11  ;;  %v3813_v7 = vpack.c.bf16 %v3082_v58, %v3082_v58  ;;  %v3379_v60 = vsel %vm786_vm3, %v3082_v58, -inf  ;;  %v3046_v32 = vmul.f32 %v4307_v15, %v5663_v3 }
 0x225   : > { %v3811_v14 = vpack.c.bf16 %v3080_v42, %v3080_v42  ;;  %v3304_v28 = vadd.f32 %v3303_v51, %v3302_v27  ;;  %v3380_v25 = vmax.f32 %v3372_v22, %v3379_v60  ;;  %v3305_v38 = vsel %vm786_vm3, %v3080_v42, 0.0 }
 0x226   : > { %v3375_v46 = vsel %vm786_vm3, %v3080_v42, -inf  ;;  %3243 = vst.msk [vmem:[%s5678_s18 + $0x6c] sm:$0xf] %vm3215_vm9, %v3813_v7  ;;  %v3044_v18 = vmul.f32 %v4308_v29, %v5663_v3  ;;  %v3047_v44 = vmul.f32 %v4309_v6, %v5663_v3  ;;  %v4310_v55 = vadd.f32 %v2965_v33, %v2107_v16  ;;  %v3255_v33 = vld [vmem:[%s5632_s7] sm:$0x1] }
 0x227   : > { %3241 = vst.msk [vmem:[%s5678_s18 + $0x64] sm:$0xf] %vm3215_vm9, %v3811_v14  ;;  %v3376_v47 = vmax.f32 %v3368_v57, %v3375_v46  ;;  %v3306_v43 = vadd.f32 %v3305_v38, %v3304_v28  ;;  %v3307_v12 = vsel %vm786_vm3, %v3081_v30, 0.0  ;;  %v3085_v23 = vadd.f32 %v5668_v21, %v3046_v32 }
 0x228   : > { %v3083_v8 = vadd.f32 %v5668_v21, %v3044_v18  ;;  %v3086_v59 = vadd.f32 %v5668_v21, %v3047_v44  ;;  %v3045_v48 = vmul.f32 %v4310_v55, %v5663_v3  ;;  %v3309_v2 = vsel %vm786_vm3, %v3082_v58, 0.0 }
 0x229   : > { %v3308_v35 = vadd.f32 %v3307_v12, %v3306_v43  ;;  %v3816_v61 = vpack.c.bf16 %v3085_v23, %v3085_v23  ;;  %v3385_v56 = vsel %vm786_vm3, %v3085_v23, -inf  ;;  %v3315_v62 = vsel %vm786_vm3, %v3085_v23, 0.0 }
 0x22a   : > { %v3814_v53 = vpack.c.bf16 %v3083_v8, %v3083_v8  ;;  %v3386_v17 = vmax.f32 %v3378_v9, %v3385_v56  ;;  %v3311_v37 = vsel %vm786_vm3, %v3083_v8, 0.0  ;;  %v3381_v41 = vsel %vm786_vm3, %v3083_v8, -inf }
 0x22b   : > { %v3310_v34 = vadd.f32 %v3309_v2, %v3308_v35  ;;  %3246 = vst.msk [vmem:[%s5678_s18 + $0x78] sm:$0xf] %vm3215_vm9, %v3816_v61  ;;  %v3382_v50 = vmax.f32 %v3374_v31, %v3381_v41  ;;  %v3817_v3 = vpack.c.bf16 %v3086_v59, %v3086_v59  ;;  %v3387_v20 = vsel %vm786_vm3, %v3086_v59, -inf }
 0x22c   : > { %3244 = vst.msk [vmem:[%s5678_s18 + $0x70] sm:$0xf] %vm3215_vm9, %v3814_v53  ;;  %v3388_v22 = vmax.f32 %v3380_v25, %v3387_v20  ;;  %v3084_v1 = vadd.f32 %v5668_v21, %v3045_v48  ;;  %v3317_v21 = vsel %vm786_vm3, %v3086_v59, 0.0 }
 0x22d   : > { %v3312_v0 = vadd.f32 %v3311_v37, %v3310_v34  ;;  %3247 = vst.msk [vmem:[%s5678_s18 + $0x7c] sm:$0xf] %vm3215_vm9, %v3817_v3 }
 0x22e   : > { %v3390_v26 = vmax.f32 %v3386_v17, %v3388_v22  ;;  %v3815_v30 = vpack.c.bf16 %v3084_v1, %v3084_v1  ;;  %v3313_v40 = vsel %vm786_vm3, %v3084_v1, 0.0  ;;  %v3383_v63 = vsel %vm786_vm3, %v3084_v1, -inf }
 0x22f   : > { %v3314_v19 = vadd.f32 %v3313_v40, %v3312_v0  ;;  %v3384_v57 = vmax.f32 %v3376_v47, %v3383_v63 }
 0x230   : > { %3245 = vst.msk [vmem:[%s5678_s18 + $0x74] sm:$0xf] %vm3215_vm9, %v3815_v30 }
 0x231   : > { %v3316_v5 = vadd.f32 %v3315_v62, %v3314_v19  ;;  %v3389_v49 = vmax.f32 %v3382_v50, %v3384_v57 }
 0x233   : > { %v3318_v54 = vadd.f32 %v3317_v21, %v3316_v5  ;;  %v3391_v36 = vmax.f32 %v3389_v49, %v3390_v26 }
 0x235   : > { %v3319_v45 = vrot.slane %v3318_v54, 4  ;;  %v3392_v52 = vrot.slane %v3391_v36, 4 }
 0x237   : > { %v3320_v4 = vadd.f32 %v3319_v45, %v3318_v54  ;;  %v3393_v11 = vmax.f32 %v3391_v36, %v3392_v52 }
 0x239   : > { %v3321_v13 = vrot.slane %v3320_v4, 2  ;;  %v3394_v24 = vrot.slane %v3393_v11, 2 }
 0x23b   : > { %v3322_v9 = vadd.f32 %v3321_v13, %v3320_v4  ;;  %v3395_v10 = vmax.f32 %v3393_v11, %v3394_v24 }
 0x23d   : > { %v3323_v51 = vrot.slane %v3322_v9, 1  ;;  %v3396_v16 = vrot.slane %v3395_v10, 1 }
 0x23f   : > { %v3324_v58 = vadd.f32 %v3323_v51, %v3322_v9  ;;  %v3397_v42 = vmax.f32 %v3395_v10, %v3396_v16 }
 0x241   : > { %v3325_v15 = vadd.f32 %v3324_v58, %v3255_v33  ;;  %v3398_v27 = vmax.f32 %v3328_v39, %v3397_v42 }
 0x243   : > { %3327 = vst.msk [vmem:[%s5632_s7] sm:$0x1] %vm3252_vm8, %v3325_v15  ;;  %3399 = vst.msk [vmem:[%s5638_s10] sm:$0x1] %vm3252_vm8, %v3398_v27 }
 0x244 PF: > { %s17_s23 = sadd.s32 1, %s4616_s23   ;;  %s5999_s21 = smov %s4612_s22 }
 0x245   : > { %p14_p5 = scmp.ge.s32.totalorder %s17_s23, 4   ;;  %s6000_s22 = smov %s6002_s24 }
 0x247   :  { %16 = sbr.rel (!%p14_p5) target bundleno = 2 (0x2), region = 102 }

// kernel: basic_block_forward.5
= control target key start
LH: loop header
LB: loop body
LE: loop exit
PB: predicated region body
PF: predicated region fallthrough
CT: control target
= control target key end

     0   :  { %9 = vsyncpa [#allocation3], 0  ;;  %s3739_s15 = smov 0   ;;  %s6618_s0 = inlined_call_operand.vmem [shape: f32[98], index: 0, kind: input, shape index: {}]   ;;  %s6619_s1 = inlined_call_operand.vmem [shape: bf16[2,16,16,8], index: 1, kind: input, shape index: {}]   ;;  %s6620_s2 = inlined_call_operand.vmem [shape: f32[2,1,8], index: 2, kind: input, shape index: {}]   ;;  %s6621_s3 = inlined_call_operand.vmem [shape: bf16[2,16,16,8], index: 3, kind: input, shape index: {}]   ;;  %s6622_s4 = inlined_call_operand.vmem [shape: f32[2,16,16,8], index: 4, kind: output, shape index: {}]  }
   0x1 LB: > { %s3371_s16 = sadd.s32 4294967295, %s3705_s15   ;;  %p3373_p0 = scmp.ge.s32.totalorder %s3705_s15, 1  ;;  %s3705_s15 = sphi %s3739_s15, %s15_s15  }
   0x2   : > { %p145_p1 = scmp.lt.s32.totalorder %s3705_s15, 3  ;;  %s158_s19 = sshll.u32 %s6618_s0, 4  ;;  %s159_s19 = int_to_ptr.vmem [resolvable:$true] %s158_s19 }
   0x3   : > { %p3655_p3 = scmp.eq.s32.totalorder %s3371_s16, 0  ;;  %s3680_s21 = scalar_lea.vmem %s159_s19, 16 }
   0x4   : > { %p3750_p2 = pnand %p3373_p0, %p145_p1  ;;  %p3681_p6 = scmp.ne.s32.totalorder %s159_s19, %s3680_s21 }
   0x5   : > { %p3688_p10 = scmp.lt.s32.totalorder %s159_s19, %s159_s19  ;;  %p3689_p11 = scmp.lt.s32.totalorder %s3680_s21, %s3680_s21 }
   0x6   : > { %p3651_p4 = pneg %p3750_p2 }
   0x7   : > { %p3690_p12 = por %p3689_p11, %p3688_p10 }
   0x8   : > { %p3652_p5 = pnand %p3655_p3, %p3651_p4 }
   0xa   : > { %p3682_p7 = pneg %p3652_p5 }
   0xc   : > { %p3683_p8 = pnand %p3682_p7, %p3681_p6 }
   0xe   : > { %p3684_p9 = pneg %p3683_p8 }
  0x10   : > { %p3691_p13 = pnand %p3690_p12, %p3684_p9 }
  0x12   : > { %3694 = shalt.err (!%p3691_p13)
}
  0x13   : > { %s3707_s22 = smov [#allocation2]   ;;  %193 = sbr.rel (%p3750_p2) target bundleno = 944 (0x3b0), region = 36 }
  0x14   : > { %3654 = dma.vmem_to_smem (!%p3652_p5), %s159_s19, 16, %s3707_s22, [#allocation3]  }
  0x1a   : > { %3700 = dma.done.wait (%p3655_p3), [#allocation3], 16  }
  0x1b   : > { %3702 = vsyncadd (%p3655_p3), [#allocation3], 4294967280 }
  0x1c   : > { %199 = sfence }
  0x1d   : > { %p228_p0 = scmp.lt.s32.totalorder %s3371_s16, 1  ;;  %vm349_vm0 = vcmask 64512   ;;  %vm619_vm1 = vcmask 154712   ;;  %vm756_vm2 = vcmask 1041409   ;;  %vm758_vm3 = vcmask 1042434   ;;  %s4129_s30 = sld [smem:[#allocation2 + $0x33]] }
  0x1e   : > { %vm760_vm4 = vcmask 1043459   ;;  %vm762_vm5 = vcmask 1044484   ;;  %vm764_vm6 = vcmask 1045509   ;;  %vm766_vm7 = vcmask 1046534   ;;  %s4131_s5 = sld [smem:[#allocation2 + $0x32]]  ;;  %s4147_s6 = sld [smem:[#allocation2 + $0x34]] }
  0x1f   : > { %s6934_s16 = smov (!%p228_p0, %s3371_s16), 1  ;;  %vm768_vm8 = vcmask 1047559   ;;  %vm779_vm9 = vcmask 23552   ;;  %vm782_vm10 = vcmask 154624   ;;  %vm787_vm11 = vcmask 1042432   ;;  %s4163_s7 = sld [smem:[#allocation2 + $0x35]] }
  0x20   : > { %s3486_s23 = sshll.u32 %s6934_s16, 7  ;;  %s235_s26 = scalar_lea.vmem %s6620_s2, %s6934_s16  ;;  %vm1190_vm12 = vcmask 1046528   ;;  %vm1477_vm13 = vcmask 1045504   ;;  %vm1764_vm14 = vcmask 1044480   ;;  %vm2051_vm15 = vcmask 1043456  }
  0x21   : > { %s3773_s29 = scalar_lea.vmem %s6619_s1, %s3486_s23  ;;  %v3775_v0 = vld [vmem:[%s235_s26] ss:$0 sm:$0xff]  ;;  %s4173_s8 = sld [smem:[#allocation2 + $0x1]] }
  0x22   : > { %v3617_v1 = vld [vmem:[%s3773_s29 + $0x8] sm:$0xff]   ;;  %v3490_v2 = vld [vmem:[%s3773_s29] sm:$0xff]   ;;  %v3618_v3 = vld [vmem:[%s3773_s29 + $0x10] sm:$0xff]   ;;  %s3708_s9 = smov 126   ;;  %s3709_s10 = smov 127  }
  0x23   : > { %v3495_v4 = vunpack.c.l.bf16 %v3617_v1  ;;  %v3491_v5 = vunpack.c.l.bf16 %v3490_v2  ;;  %v3496_v6 = vunpack.c.h.bf16 %v3617_v1  ;;  %v3492_v7 = vunpack.c.h.bf16 %v3490_v2  ;;  %v3619_v14 = vld [vmem:[%s3773_s29 + $0x18] sm:$0xff]   ;;  %v3620_v23 = vld [vmem:[%s3773_s29 + $0x20] sm:$0xff]   ;;  %v3621_v30 = vld [vmem:[%s3773_s29 + $0x28] sm:$0xff]   ;;  %s4204_s11 = sld [smem:[#allocation2 + $0x2]]  ;;  %s4210_s12 = sld [smem:[#allocation2 + $0x3]] }
  0x24   : > { %v3500_v8 = vunpack.c.h.bf16 %v3618_v3  ;;  %v3499_v9 = vunpack.c.l.bf16 %v3618_v3  ;;  %v3504_v17 = vunpack.c.h.bf16 %v3619_v14  ;;  %v3503_v18 = vunpack.c.l.bf16 %v3619_v14  ;;  %v3622_v37 = vld [vmem:[%s3773_s29 + $0x30] sm:$0xff]   ;;  %v3623_v44 = vld [vmem:[%s3773_s29 + $0x38] sm:$0xff]   ;;  %v3624_v51 = vld [vmem:[%s3773_s29 + $0x40] sm:$0xff]   ;;  %s3710_s13 = smov 125   ;;  %s3711_s14 = smov 124  }
  0x25   : > { %v3781_v10 = vmul.f32 %v3495_v4, %v3775_v0  ;;  %v3784_v11 = vmul.f32 %v3491_v5, %v3775_v0  ;;  %v3787_v12 = vmul.f32 %v3496_v6, %v3775_v0  ;;  %v3790_v13 = vmul.f32 %v3492_v7, %v3775_v0  ;;  %v3625_v58 = vld [vmem:[%s3773_s29 + $0x48] sm:$0xff]   ;;  %v3626_v2 = vld [vmem:[%s3773_s29 + $0x50] sm:$0xff]   ;;  %s4263_s17 = sld [smem:[#allocation2 + $0x4]]  ;;  %s4289_s18 = sld [smem:[#allocation2 + $0x5]] }
  0x26   : > { %v3802_v21 = vmul.f32 %v3500_v8, %v3775_v0  ;;  %v3805_v22 = vmul.f32 %v3499_v9, %v3775_v0  ;;  %v3809_v24 = vmul.f32 %v3504_v17, %v3775_v0  ;;  %v3812_v25 = vmul.f32 %v3503_v18, %v3775_v0  ;;  %v3627_v9 = vld [vmem:[%s3773_s29 + $0x58] sm:$0xff]   ;;  %s4309_s19 = sld [smem:[#allocation2 + $0x36]]  ;;  %s3400_s21 = sld [smem:[#allocation2 + $0x8]] }
  0x27   : > { %6691 = vst [vmem:[#allocation5_spill] sm:$0xff] %v3781_v10  ;;  %6692 = vst [vmem:[#allocation6_spill] sm:$0xff] %v3784_v11  ;;  %v356_v15 = vsel %vm349_vm0, %v3781_v10, 0.0  ;;  %v350_v16 = vsel %vm349_vm0, %v3784_v11, 0.0  ;;  %v359_v19 = vsel %vm349_vm0, %v3787_v12, 0.0  ;;  %v353_v20 = vsel %vm349_vm0, %v3790_v13, 0.0 }
  0x28   : > { %6693 = vst [vmem:[#allocation7_spill] sm:$0xff] %v3787_v12  ;;  %6694 = vst [vmem:[#allocation8_spill] sm:$0xff] %v3790_v13  ;;  %357 = vadd.xlane.f32.xlu1 %v356_v15  ;;  %351 = vadd.xlane.f32.xlu0 %v350_v16  ;;  %v365_v26 = vsel %vm349_vm0, %v3802_v21, 0.0  ;;  %v362_v27 = vsel %vm349_vm0, %v3805_v22, 0.0  ;;  %v3508_v28 = vunpack.c.h.bf16 %v3620_v23  ;;  %v3507_v29 = vunpack.c.l.bf16 %v3620_v23  ;;  %s4325_s20 = sld [smem:[#allocation2 + $0x6]]  ;;  %s4341_s22 = sld [smem:[#allocation2 + $0x37]] }
  0x29   : > { %6695 = vst [vmem:[#allocation9_spill] sm:$0xff] %v3802_v21  ;;  %6696 = vst [vmem:[#allocation10_spill] sm:$0xff] %v3805_v22  ;;  %v371_v31 = vsel %vm349_vm0, %v3809_v24, 0.0  ;;  %v368_v32 = vsel %vm349_vm0, %v3812_v25, 0.0  ;;  %v3512_v35 = vunpack.c.h.bf16 %v3621_v30  ;;  %v3511_v36 = vunpack.c.l.bf16 %v3621_v30  ;;  %s3712_s24 = smov 123   ;;  %s3401_s25 = sld [smem:[#allocation2 + $0x39]] }
  0x2a   : > { %6697 = vst [vmem:[#allocation11_spill] sm:$0xff] %v3809_v24  ;;  %6698 = vst [vmem:[#allocation12_spill] sm:$0xff] %v3812_v25  ;;  %v3824_v33 = vmul.f32 %v3508_v28, %v3775_v0  ;;  %v3827_v34 = vmul.f32 %v3507_v29, %v3775_v0  ;;  %v3516_v38 = vunpack.c.h.bf16 %v3622_v37  ;;  %v3515_v39 = vunpack.c.l.bf16 %v3622_v37  ;;  %s3402_s26 = sld [smem:[#allocation2 + $0x9]]  ;;  %s3713_s27 = smov 122  }
  0x2b   : > { %v3835_v42 = vmul.f32 %v3512_v35, %v3775_v0  ;;  %v3838_v43 = vmul.f32 %v3511_v36, %v3775_v0  ;;  %v3520_v45 = vunpack.c.h.bf16 %v3623_v44  ;;  %v3519_v46 = vunpack.c.l.bf16 %v3623_v44  ;;  %s3403_s28 = sld [smem:[#allocation2 + $0x3a]] }
  0x2c   : > { %360 = vadd.xlane.f32.xlu1 %v359_v19  ;;  %354 = vadd.xlane.f32.xlu0 %v353_v20  ;;  %6699 = vst [vmem:[#allocation13_spill] sm:$0xff] %v3824_v33  ;;  %6700 = vst [vmem:[#allocation14_spill] sm:$0xff] %v3827_v34  ;;  %v377_v40 = vsel %vm349_vm0, %v3824_v33, 0.0  ;;  %v374_v41 = vsel %vm349_vm0, %v3827_v34, 0.0  ;;  %v3846_v49 = vmul.f32 %v3516_v38, %v3775_v0  ;;  %v3524_v53 = vunpack.c.h.bf16 %v3624_v51  ;;  %v3628_v20 = vld [vmem:[%s3773_s29 + $0x60] sm:$0xff]  }
  0x2d   : > { %6701 = vst [vmem:[#allocation15_spill] sm:$0xff] %v3835_v42  ;;  %6702 = vst [vmem:[#allocation16_spill] sm:$0xff] %v3838_v43  ;;  %v383_v47 = vsel %vm349_vm0, %v3835_v42, 0.0  ;;  %v380_v48 = vsel %vm349_vm0, %v3838_v43, 0.0  ;;  %v3849_v50 = vmul.f32 %v3515_v39, %v3775_v0  ;;  %v3853_v52 = vmul.f32 %v3520_v45, %v3775_v0 }
  0x2e   : > { %6703 = vst [vmem:[#allocation17_spill] sm:$0xff] %v3846_v49  ;;  %v389_v54 = vsel %vm349_vm0, %v3846_v49, 0.0  ;;  %v3860_v56 = vmul.f32 %v3519_v46, %v3775_v0  ;;  %v3523_v57 = vunpack.c.l.bf16 %v3624_v51  ;;  %v3866_v60 = vmul.f32 %v3524_v53, %v3775_v0  ;;  %v3631_v51 = vld [vmem:[%s3773_s29 + $0x78] sm:$0xff]  }
  0x2f   : > { %6704 = vst [vmem:[#allocation18_spill] sm:$0xff] %v3849_v50  ;;  %6705 = vst [vmem:[#allocation19_spill] sm:$0xff] %v3853_v52  ;;  %v386_v55 = vsel %vm349_vm0, %v3849_v50, 0.0  ;;  %v395_v59 = vsel %vm349_vm0, %v3853_v52, 0.0  ;;  %v3528_v63 = vunpack.c.h.bf16 %v3625_v58  ;;  %v3527_v1 = vunpack.c.l.bf16 %v3625_v58 }
  0x30   : > { %366 = vadd.xlane.f32.xlu1 %v365_v26  ;;  %363 = vadd.xlane.f32.xlu0 %v362_v27  ;;  %6706 = vst [vmem:[#allocation20_spill] sm:$0xff] %v3860_v56  ;;  %6707 = vst [vmem:[#allocation21_spill] sm:$0xff] %v3866_v60  ;;  %v392_v61 = vsel %vm349_vm0, %v3860_v56, 0.0  ;;  %v3871_v62 = vmul.f32 %v3523_v57, %v3775_v0  ;;  %v3532_v3 = vunpack.c.h.bf16 %v3626_v2  ;;  %v3531_v4 = vunpack.c.l.bf16 %v3626_v2 }
  0x31   : > { %v401_v5 = vsel %vm349_vm0, %v3866_v60, 0.0  ;;  %v3879_v7 = vmul.f32 %v3528_v63, %v3775_v0  ;;  %v3882_v8 = vmul.f32 %v3527_v1, %v3775_v0  ;;  %v3536_v15 = vunpack.c.h.bf16 %v3627_v9 }
  0x32   : > { %6708 = vst [vmem:[#allocation22_spill] sm:$0xff] %v3871_v62  ;;  %v398_v6 = vsel %vm349_vm0, %v3871_v62, 0.0  ;;  %v3886_v14 = vmul.f32 %v3532_v3, %v3775_v0  ;;  %v3893_v18 = vmul.f32 %v3531_v4, %v3775_v0  ;;  %v3535_v19 = vunpack.c.l.bf16 %v3627_v9 }
  0x33   : > { %6709 = vst [vmem:[#allocation23_spill] sm:$0xff] %v3879_v7  ;;  %6710 = vst [vmem:[#allocation24_spill] sm:$0xff] %v3882_v8  ;;  %v407_v16 = vsel %vm349_vm0, %v3879_v7, 0.0  ;;  %v404_v17 = vsel %vm349_vm0, %v3882_v8, 0.0  ;;  %v3897_v23 = vmul.f32 %v3536_v15, %v3775_v0  ;;  %v3540_v26 = vunpack.c.h.bf16 %v3628_v20 }
  0x34   : > { %372 = vadd.xlane.f32.xlu1 %v371_v31  ;;  %369 = vadd.xlane.f32.xlu0 %v368_v32  ;;  %6711 = vst [vmem:[#allocation25_spill] sm:$0xff] %v3886_v14  ;;  %6712 = vst [vmem:[#allocation26_spill] sm:$0xff] %v3893_v18  ;;  %v413_v27 = vsel %vm349_vm0, %v3886_v14, 0.0  ;;  %v410_v28 = vsel %vm349_vm0, %v3893_v18, 0.0  ;;  %v3904_v29 = vmul.f32 %v3535_v19, %v3775_v0  ;;  %v3539_v30 = vunpack.c.l.bf16 %v3628_v20  ;;  %v3629_v31 = vld [vmem:[%s3773_s29 + $0x68] sm:$0xff]  }
  0x35   : > { %6713 = vst [vmem:[#allocation27_spill] sm:$0xff] %v3897_v23  ;;  %v419_v32 = vsel %vm349_vm0, %v3897_v23, 0.0  ;;  %v3910_v35 = vmul.f32 %v3540_v26, %v3775_v0  ;;  %v3544_v38 = vunpack.c.h.bf16 %v3629_v31  ;;  %v3543_v39 = vunpack.c.l.bf16 %v3629_v31 }
  0x36   : > { %6714 = vst [vmem:[#allocation28_spill] sm:$0xff] %v3904_v29  ;;  %v416_v36 = vsel %vm349_vm0, %v3904_v29, 0.0  ;;  %v3915_v37 = vmul.f32 %v3539_v30, %v3775_v0  ;;  %v485_v9 = vsel %vm349_vm0, %v3781_v10, -inf  ;;  %v494_v15 = vsel %vm349_vm0, %v3802_v21, -inf }
  0x37   : > { %6715 = vst [vmem:[#allocation29_spill] sm:$0xff] %v3910_v35  ;;  %v425_v45 = vsel %vm349_vm0, %v3910_v35, 0.0  ;;  %v497_v19 = vsel %vm349_vm0, %v3812_v25, -inf  ;;  %v506_v20 = vsel %vm349_vm0, %v3824_v33, -inf  ;;  %v503_v26 = vsel %vm349_vm0, %v3827_v34, -inf }
  0x38   : > { %378 = vadd.xlane.f32.xlu1 %v377_v40  ;;  %375 = vadd.xlane.f32.xlu0 %v374_v41  ;;  %6716 = vst [vmem:[#allocation30_spill] sm:$0xff] %v3915_v37  ;;  %v3630_v40 = vld [vmem:[%s3773_s29 + $0x70] sm:$0xff]   ;;  %v422_v46 = vsel %vm349_vm0, %v3915_v37, 0.0  ;;  %v518_v30 = vsel %vm349_vm0, %v3846_v49, -inf  ;;  %v515_v31 = vsel %vm349_vm0, %v3849_v50, -inf  ;;  %s3404_s29 = sld [smem:[#allocation2 + $0xa]] }
  0x39   : > { %v3548_v41 = vunpack.c.h.bf16 %v3630_v40  ;;  %v3547_v44 = vunpack.c.l.bf16 %v3630_v40  ;;  %v536_v40 = vsel %vm349_vm0, %v3879_v7, -inf }
  0x3b   : > { %v3930_v53 = vmul.f32 %v3548_v41, %v3775_v0  ;;  %v3937_v58 = vmul.f32 %v3547_v44, %v3775_v0  ;;  %v533_v41 = vsel %vm349_vm0, %v3882_v8, -inf  ;;  %v542_v44 = vsel %vm349_vm0, %v3886_v14, -inf }
  0x3c   : > { %384 = vadd.xlane.f32.xlu1 %v383_v47  ;;  %381 = vadd.xlane.f32.xlu0 %v380_v48  ;;  %v3923_v47 = vmul.f32 %v3544_v38, %v3775_v0  ;;  %v3926_v48 = vmul.f32 %v3543_v39, %v3775_v0  ;;  %v530_v38 = vsel %vm349_vm0, %v3866_v60, -inf  ;;  %v527_v39 = vsel %vm349_vm0, %v3871_v62, -inf }
  0x3d   : > { %6719 = vst [vmem:[#allocation33_spill] sm:$0xff] %v3930_v53  ;;  %6720 = vst [vmem:[#allocation34_spill] sm:$0xff] %v3937_v58  ;;  %v434_v63 = vsel %vm349_vm0, %v3937_v58, 0.0 }
  0x3e   : > { %6717 = vst [vmem:[#allocation31_spill] sm:$0xff] %v3923_v47  ;;  %6718 = vst [vmem:[#allocation32_spill] sm:$0xff] %v3926_v48  ;;  %v428_v57 = vsel %vm349_vm0, %v3926_v48, 0.0 }
  0x40   : > { %390 = vadd.xlane.f32.xlu1 %v389_v54  ;;  %387 = vadd.xlane.f32.xlu0 %v386_v55  ;;  %v3552_v54 = vunpack.c.h.bf16 %v3631_v51  ;;  %v431_v55 = vsel %vm349_vm0, %v3923_v47, 0.0 }
  0x42   : > { %v3944_v1 = vmul.f32 %v3552_v54, %v3775_v0  ;;  %v554_v54 = vsel %vm349_vm0, %v3910_v35, -inf }
  0x44   : > { %396 = vadd.xlane.f32.xlu1 %v395_v59  ;;  %393 = vadd.xlane.f32.xlu0 %v392_v61  ;;  %v3551_v59 = vunpack.c.l.bf16 %v3631_v51  ;;  %v437_v61 = vsel %vm349_vm0, %v3930_v53, 0.0  ;;  %6721 = vst [vmem:[#allocation35_spill] sm:$0xff] %v3944_v1  ;;  %v443_v3 = vsel %vm349_vm0, %v3944_v1, 0.0  ;;  %v545_v51 = vsel %vm349_vm0, %v3904_v29, -inf }
  0x46   : > { %v3947_v2 = vmul.f32 %v3551_v59, %v3775_v0  ;;  %v488_v0 = vsel %vm349_vm0, %v3787_v12, -inf  ;;  %v557_v59 = vsel %vm349_vm0, %v3926_v48, -inf }
  0x48   : > { %402 = vadd.xlane.f32.xlu1 %v401_v5  ;;  %399 = vadd.xlane.f32.xlu0 %v398_v6  ;;  %6722 = vst [vmem:[#allocation36_spill] sm:$0xff] %v3947_v2  ;;  %v440_v4 = vsel %vm349_vm0, %v3947_v2, 0.0  ;;  %v482_v5 = vsel %vm349_vm0, %v3790_v13, -inf  ;;  %v479_v6 = vsel %vm349_vm0, %v3784_v11, -inf }
  0x4c   : > { %408 = vadd.xlane.f32.xlu1 %v407_v16  ;;  %405 = vadd.xlane.f32.xlu0 %v404_v17  ;;  %v491_v16 = vsel %vm349_vm0, %v3805_v22, -inf  ;;  %v500_v17 = vsel %vm349_vm0, %v3809_v24, -inf }
  0x50   : > { %414 = vadd.xlane.f32.xlu1 %v413_v27  ;;  %411 = vadd.xlane.f32.xlu0 %v410_v28  ;;  %v512_v27 = vsel %vm349_vm0, %v3835_v42, -inf  ;;  %v509_v28 = vsel %vm349_vm0, %v3838_v43, -inf }
  0x54   : > { %420 = vadd.xlane.f32.xlu1 %v419_v32  ;;  %417 = vadd.xlane.f32.xlu0 %v416_v36  ;;  %v524_v32 = vsel %vm349_vm0, %v3853_v52, -inf  ;;  %v521_v36 = vsel %vm349_vm0, %v3860_v56, -inf }
  0x58   : > { %426 = vadd.xlane.f32.xlu1 %v425_v45  ;;  %423 = vadd.xlane.f32.xlu0 %v422_v46  ;;  %v539_v45 = vsel %vm349_vm0, %v3893_v18, -inf  ;;  %v548_v46 = vsel %vm349_vm0, %v3897_v23, -inf }
  0x5c   : > { %432 = vadd.xlane.f32.xlu1 %v431_v55  ;;  %429 = vadd.xlane.f32.xlu0 %v428_v57  ;;  %v551_v55 = vsel %vm349_vm0, %v3915_v37, -inf  ;;  %v560_v57 = vsel %vm349_vm0, %v3923_v47, -inf }
  0x60   : > { %438 = vadd.xlane.f32.xlu1 %v437_v61  ;;  %435 = vadd.xlane.f32.xlu0 %v434_v63  ;;  %v566_v61 = vsel %vm349_vm0, %v3930_v53, -inf  ;;  %v563_v63 = vsel %vm349_vm0, %v3937_v58, -inf }
  0x64   : > { %444 = vadd.xlane.f32.xlu1 %v443_v3  ;;  %441 = vadd.xlane.f32.xlu0 %v440_v4  ;;  %v572_v3 = vsel %vm349_vm0, %v3944_v1, -inf  ;;  %v569_v4 = vsel %vm349_vm0, %v3947_v2, -inf }
  0x68   : > { %483 = vmax.xlane.f32.xlu1 %v482_v5  ;;  %480 = vmax.xlane.f32.xlu0 %v479_v6 }
  0x6c   : > { %489 = vmax.xlane.f32.xlu1 %v488_v0  ;;  %486 = vmax.xlane.f32.xlu0 %v485_v9 }
  0x70   : > { %495 = vmax.xlane.f32.xlu1 %v494_v15  ;;  %492 = vmax.xlane.f32.xlu0 %v491_v16 }
  0x74   : > { %501 = vmax.xlane.f32.xlu1 %v500_v17  ;;  %498 = vmax.xlane.f32.xlu0 %v497_v19 }
  0x78   : > { %507 = vmax.xlane.f32.xlu1 %v506_v20  ;;  %504 = vmax.xlane.f32.xlu0 %v503_v26 }
  0x7c   : > { %513 = vmax.xlane.f32.xlu1 %v512_v27  ;;  %510 = vmax.xlane.f32.xlu0 %v509_v28 }
  0x80   : > { %519 = vmax.xlane.f32.xlu1 %v518_v30  ;;  %516 = vmax.xlane.f32.xlu0 %v515_v31 }
  0x84   : > { %525 = vmax.xlane.f32.xlu1 %v524_v32  ;;  %522 = vmax.xlane.f32.xlu0 %v521_v36 }
  0x88   : > { %531 = vmax.xlane.f32.xlu1 %v530_v38  ;;  %528 = vmax.xlane.f32.xlu0 %v527_v39 }
  0x8c   : > { %537 = vmax.xlane.f32.xlu1 %v536_v40  ;;  %534 = vmax.xlane.f32.xlu0 %v533_v41 }
  0x90   : > { %543 = vmax.xlane.f32.xlu1 %v542_v44  ;;  %540 = vmax.xlane.f32.xlu0 %v539_v45 }
  0x94   : > { %549 = vmax.xlane.f32.xlu1 %v548_v46  ;;  %546 = vmax.xlane.f32.xlu0 %v545_v51 }
  0x98   : > { %555 = vmax.xlane.f32.xlu1 %v554_v54  ;;  %552 = vmax.xlane.f32.xlu0 %v551_v55 }
  0x9c   : > { %561 = vmax.xlane.f32.xlu1 %v560_v57  ;;  %558 = vmax.xlane.f32.xlu0 %v557_v59 }
  0xa0   : > { %567 = vmax.xlane.f32.xlu1 %v566_v61  ;;  %564 = vmax.xlane.f32.xlu0 %v563_v63 }
  0xa4   : > { %573 = vmax.xlane.f32.xlu1 %v572_v3  ;;  %570 = vmax.xlane.f32.xlu0 %v569_v4  ;;  %v607_v3 = vlaneseq }
  0xa6   : > { %v608_v1 = vand.u32 127, %v607_v3  ;;  %v4065_v37 = vshrl.u32 %v607_v3, 7 }
  0xa8   : > { %v614_v48 = vadd.s32 4294967285, %v608_v1  ;;  %v609_v47 = vadd.s32 4294967293, %v608_v1  ;;  %6723 = vst [vmem:[#allocation37_spill] sm:$0xff] %v4065_v37 }
  0xaa   : > { %v4070_v23 = vsub.s32 %v614_v48, %v4065_v37  ;;  %v4073_v8 = vsub.s32 %v609_v47, %v4065_v37 }
  0xb5   : > { %v358_v5 = vpop.xlane.xlu1 %357  ;;  %v352_v6 = vpop.xlane.xlu0 %351 }
  0xb6   : > { %v449_v7 = vmul.f32 0.125, %v358_v5  ;;  %v447_v62 = vmul.f32 0.125, %v352_v6 }
  0xb8   : > { %v624_v48 = vrot.slane %v449_v7, %v4073_v8 }
  0xb9   : > { %v361_v0 = vpop.xlane.xlu1 %360  ;;  %v355_v9 = vpop.xlane.xlu0 %354 }
  0xba   : > { %v450_v18 = vmul.f32 0.125, %v361_v0  ;;  %v448_v14 = vmul.f32 0.125, %v355_v9  ;;  %v613_v0 = vrot.slane %v447_v62, %v4073_v8 }
  0xbc   : > { %v628_v52 = vrot.slane %v450_v18, %v4070_v23  ;;  %v618_v1 = vrot.slane %v448_v14, %v4070_v23 }
  0xbd   : > { %v367_v15 = vpop.xlane.xlu1 %366  ;;  %v364_v16 = vpop.xlane.xlu0 %363 }
  0xbe   : > { %v452_v3 = vmul.f32 0.125, %v367_v15  ;;  %v451_v50 = vmul.f32 0.125, %v364_v16  ;;  %v629_v5 = vsel %vm619_vm1, %v628_v52, %v624_v48  ;;  %v620_v6 = vsel %vm619_vm1, %v618_v1, %v613_v0 }
  0xbf   : > { %v757_v62 = vsel %vm756_vm2, %v629_v5, %v620_v6 }
  0xc0   : > { %v637_v18 = vrot.slane %v452_v3, %v4070_v23  ;;  %v633_v14 = vrot.slane %v451_v50, %v4073_v8 }
  0xc1   : > { %v373_v17 = vpop.xlane.xlu1 %372  ;;  %v370_v19 = vpop.xlane.xlu0 %369 }
  0xc2   : > { %v454_v49 = vmul.f32 0.125, %v373_v17  ;;  %v453_v43 = vmul.f32 0.125, %v370_v19  ;;  %v638_v52 = vsel %vm619_vm1, %v637_v18, %v633_v14 }
  0xc4   : > { %v646_v15 = vrot.slane %v454_v49, %v4070_v23  ;;  %v642_v16 = vrot.slane %v453_v43, %v4073_v8 }
  0xc5   : > { %v379_v20 = vpop.xlane.xlu1 %378  ;;  %v376_v26 = vpop.xlane.xlu0 %375 }
  0xc6   : > { %v456_v17 = vmul.f32 0.125, %v379_v20  ;;  %v455_v19 = vmul.f32 0.125, %v376_v26  ;;  %v647_v1 = vsel %vm619_vm1, %v646_v15, %v642_v16 }
  0xc8   : > { %v655_v3 = vrot.slane %v456_v17, %v4070_v23  ;;  %v651_v50 = vrot.slane %v455_v19, %v4073_v8 }
  0xc9   : > { %v4017_v27 = vpop.xlane.xlu1 %384  ;;  %v4019_v28 = vpop.xlane.xlu0 %381 }
  0xca   : > { %v458_v49 = vmul.f32 0.125, %v4017_v27  ;;  %v457_v43 = vmul.f32 0.125, %v4019_v28 }
  0xcc   : > { %v664_v15 = vrot.slane %v458_v49, %v4070_v23 }
  0xcd   : > { %v4021_v30 = vpop.xlane.xlu1 %390  ;;  %v4023_v31 = vpop.xlane.xlu0 %387 }
  0xce   : > { %v460_v48 = vmul.f32 0.125, %v4021_v30  ;;  %v459_v0 = vmul.f32 0.125, %v4023_v31 }
  0xd1   : > { %v4025_v32 = vpop.xlane.xlu1 %396  ;;  %v4027_v36 = vpop.xlane.xlu0 %393 }
  0xd2   : > { %v462_v30 = vmul.f32 0.125, %v4025_v32  ;;  %v461_v31 = vmul.f32 0.125, %v4027_v36  ;;  %v669_v32 = vrot.slane %v459_v0, %v4073_v8 }
  0xd5   : > { %v4029_v38 = vpop.xlane.xlu1 %402  ;;  %v4031_v39 = vpop.xlane.xlu0 %399 }
  0xd9   : > { %v4033_v40 = vpop.xlane.xlu1 %408  ;;  %v4035_v41 = vpop.xlane.xlu0 %405 }
  0xdd   : > { %v4037_v44 = vpop.xlane.xlu1 %414  ;;  %v4039_v45 = vpop.xlane.xlu0 %411 }
  0xe1   : > { %v4041_v46 = vpop.xlane.xlu1 %420  ;;  %v4043_v51 = vpop.xlane.xlu0 %417 }
  0xe5   : > { %v4045_v54 = vpop.xlane.xlu1 %426  ;;  %v4047_v55 = vpop.xlane.xlu0 %423 }
  0xe9   : > { %v4049_v57 = vpop.xlane.xlu1 %432  ;;  %v4051_v59 = vpop.xlane.xlu0 %429 }
  0xed   : > { %v4053_v61 = vpop.xlane.xlu1 %438  ;;  %v4055_v63 = vpop.xlane.xlu0 %435 }
  0xf1   : > { %v4057_v4 = vpop.xlane.xlu1 %444  ;;  %v4059_v2 = vpop.xlane.xlu0 %441 }
  0xf5   : > { %v4061_v58 = vpop.xlane.xlu1 %483  ;;  %v4063_v53 = vpop.xlane.xlu0 %480 }
  0xf6   : > { %v835_v27 = vrot.slane %v4061_v58, %v4070_v23 }
  0xf9   : > { %v4067_v35 = vpop.xlane.xlu1 %489  ;;  %v487_v29 = vpop.xlane.xlu0 %486 }
  0xfa   : > { %v844_v20 = vrot.slane %v4067_v35, %v4070_v23  ;;  %v840_v26 = vrot.slane %v487_v29, %v4073_v8  ;;  %v831_v35 = vrot.slane %v4063_v53, %v4073_v8 }
  0xfc   : > { %v845_v16 = vsel %vm619_vm1, %v844_v20, %v840_v26  ;;  %v682_v26 = vrot.slane %v462_v30, %v4070_v23 }
  0xfd   : > { %v496_v60 = vpop.xlane.xlu1 %495  ;;  %v493_v56 = vpop.xlane.xlu0 %492 }
  0xfe   : > { %v853_v5 = vrot.slane %v496_v60, %v4070_v23  ;;  %v849_v6 = vrot.slane %v493_v56, %v4073_v8 }
 0x100   : > { %v854_v36 = vsel %vm619_vm1, %v853_v5, %v849_v6  ;;  %v759_v5 = vsel %vm758_vm3, %v638_v52, %v757_v62  ;;  %v656_v6 = vsel %vm619_vm1, %v655_v3, %v651_v50 }
 0x101   : > { %v502_v47 = vpop.xlane.xlu1 %501  ;;  %v499_v9 = vpop.xlane.xlu0 %498 }
 0x102   : > { %v862_v29 = vrot.slane %v502_v47, %v4070_v23  ;;  %v858_v28 = vrot.slane %v499_v9, %v4073_v8  ;;  %v660_v47 = vrot.slane %v457_v43, %v4073_v8  ;;  %v673_v9 = vrot.slane %v460_v48, %v4070_v23 }
 0x103   : > { %v678_v43 = vrot.slane %v461_v31, %v4073_v8 }
 0x104   : > { %v674_v52 = vsel %vm619_vm1, %v673_v9, %v669_v32 }
 0x105   : > { %v508_v7 = vpop.xlane.xlu1 %507  ;;  %v505_v42 = vpop.xlane.xlu0 %504 }
 0x106   : > { %v871_v60 = vrot.slane %v508_v7, %v4070_v23  ;;  %v867_v56 = vrot.slane %v505_v42, %v4073_v8  ;;  %v836_v42 = vsel %vm619_vm1, %v835_v27, %v831_v35  ;;  %v863_v7 = vsel %vm619_vm1, %v862_v29, %v858_v28 }
 0x107   : > { %v972_v48 = vsel %vm756_vm2, %v845_v16, %v836_v42  ;;  %v761_v27 = vsel %vm760_vm4, %v647_v1, %v759_v5  ;;  %v665_v35 = vsel %vm619_vm1, %v664_v15, %v660_v47  ;;  %v683_v1 = vsel %vm619_vm1, %v682_v26, %v678_v43 }
 0x108   : > { %v872_v0 = vsel %vm619_vm1, %v871_v60, %v867_v56  ;;  %v763_v60 = vsel %vm762_vm5, %v656_v6, %v761_v27  ;;  %v464_v26 = vmul.f32 0.125, %v4029_v38  ;;  %v463_v43 = vmul.f32 0.125, %v4031_v39 }
 0x109   : > { %v514_v18 = vpop.xlane.xlu1 %513  ;;  %v511_v14 = vpop.xlane.xlu0 %510  ;;  %v765_v15 = vsel %vm764_vm6, %v665_v35, %v763_v60  ;;  %v465_v6 = vmul.f32 0.125, %v4035_v41  ;;  %v470_v27 = vmul.f32 0.125, %v4041_v46  ;;  %v469_v35 = vmul.f32 0.125, %v4043_v51 }
 0x10a   : > { %v880_v58 = vrot.slane %v514_v18, %v4070_v23  ;;  %v876_v53 = vrot.slane %v511_v14, %v4073_v8  ;;  %v973_v18 = vsel %vm758_vm3, %v854_v36, %v972_v48  ;;  %v466_v48 = vmul.f32 0.125, %v4033_v40 }
 0x10b   : > { %v974_v29 = vsel %vm760_vm4, %v863_v7, %v973_v18  ;;  %v1057_v7 = vstv %s4129_s30  ;;  %v468_v18 = vmul.f32 0.125, %v4037_v44  ;;  %v1085_v41 = vstv %s4147_s6  ;;  %s3405_s30 = sld [smem:[#allocation2 + $0x3b]]  ;;  %s3407_s6 = sld [smem:[#allocation2 + $0x3c]] }
 0x10c   : > { %v881_v14 = vsel %vm619_vm1, %v880_v58, %v876_v53  ;;  %v975_v3 = vsel %vm762_vm5, %v872_v0, %v974_v29  ;;  %v767_v53 = vsel %vm766_vm7, %v674_v52, %v765_v15  ;;  %v687_v29 = vrot.slane %v463_v43, %v4073_v8 }
 0x10d   : > { %v520_v17 = vpop.xlane.xlu1 %519  ;;  %v517_v19 = vpop.xlane.xlu0 %516  ;;  %v976_v56 = vsel %vm764_vm6, %v881_v14, %v975_v3  ;;  %v769_v36 = vsel %vm768_vm8, %v683_v1, %v767_v53  ;;  %v467_v14 = vmul.f32 0.125, %v4039_v45  ;;  %v691_v45 = vrot.slane %v464_v26, %v4070_v23 }
 0x10e   : > { %v889_v49 = vrot.slane %v520_v17, %v4070_v23  ;;  %v885_v20 = vrot.slane %v517_v19, %v4073_v8  ;;  %v696_v51 = vrot.slane %v465_v6, %v4073_v8  ;;  %v472_v3 = vmul.f32 0.125, %v4045_v54 }
 0x10f   : > { %v705_v52 = vrot.slane %v467_v14, %v4073_v8  ;;  %v473_v60 = vmul.f32 0.125, %v4051_v59  ;;  %v718_v15 = vrot.slane %v470_v27, %v4070_v23  ;;  %v692_v59 = vsel %vm619_vm1, %v691_v45, %v687_v29 }
 0x110   : > { %v890_v28 = vsel %vm619_vm1, %v889_v49, %v885_v20  ;;  %v1029_v49 = vstv %s4131_s5  ;;  %v780_v20 = vsel %vm779_vm9, 0.0, %v769_v36  ;;  %v727_v36 = vrot.slane %v472_v3, %v4070_v23  ;;  %s3406_s5 = sld [smem:[#allocation2 + $0xb]] }
 0x111   : > { %v526_v30 = vpop.xlane.xlu1 %525  ;;  %v523_v62 = vpop.xlane.xlu0 %522  ;;  %v977_v16 = vsel %vm766_vm7, %v890_v28, %v976_v56  ;;  %v4193_v44 = vsel %vm782_vm10, %v780_v20, 0.0  ;;  %v700_v28 = vrot.slane %v466_v48, %v4070_v23  ;;  %v732_v26 = vrot.slane %v473_v60, %v4073_v8 }
 0x112   : > { %v898_v50 = vrot.slane %v526_v30, %v4070_v23  ;;  %v894_v31 = vrot.slane %v523_v62, %v4073_v8  ;;  %v709_v62 = vrot.slane %v468_v18, %v4070_v23  ;;  %v788_v56 = vrot.slane %v4193_v44, 5 }
 0x113   : > { %v701_v53 = vsel %vm619_vm1, %v700_v28, %v696_v51  ;;  %v476_v18 = vmul.f32 0.125, %v4053_v61  ;;  %v475_v14 = vmul.f32 0.125, %v4055_v63  ;;  %v477_v27 = vmul.f32 0.125, %v4059_v2 }
 0x114   : > { %v899_v58 = vsel %vm619_vm1, %v898_v50, %v894_v31  ;;  %v471_v50 = vmul.f32 0.125, %v4047_v55  ;;  %v474_v31 = vmul.f32 0.125, %v4049_v57  ;;  %v1015_v57 = vstv %s4173_s8  ;;  %s3409_s8 = sld [smem:[#allocation2 + $0x3d]] }
 0x115   : > { %v978_v47 = vsel %vm768_vm8, %v899_v58, %v977_v16  ;;  %v4151_v9 = vpop.xlane.xlu1 %531  ;;  %v4153_v32 = vpop.xlane.xlu0 %528  ;;  %v714_v16 = vrot.slane %v469_v35, %v4073_v8  ;;  %v1113_v58 = vstv %s4163_s7  ;;  %v4239_v48 = vsel %vm787_vm11, 0.0, %v788_v56  ;;  %s3408_s7 = sld [smem:[#allocation2 + $0xc]] }
 0x116   : > { %v988_v17 = vsel %vm779_vm9, 0.0, %v978_v47  ;;  %v710_v47 = vsel %vm619_vm1, %v709_v62, %v705_v52  ;;  %v736_v20 = vrot.slane %v474_v31, %v4070_v23  ;;  %v1043_v28 = vstv %s4204_s11  ;;  %s3410_s11 = sld [smem:[#allocation2 + $0xd]] }
 0x117   : > { %v4158_v19 = vsel %vm782_vm10, %v988_v17, 0.0  ;;  %v723_v17 = vrot.slane %v471_v50, %v4073_v8  ;;  %v719_v6 = vsel %vm619_vm1, %v718_v15, %v714_v16  ;;  %v1071_v51 = vstv %s4210_s12  ;;  %s3411_s12 = sld [smem:[#allocation2 + $0x3e]] }
 0x118   : > { %v994_v42 = vrot.slane %v4158_v19, 5  ;;  %v737_v63 = vsel %vm619_vm1, %v736_v20, %v732_v26  ;;  %v745_v2 = vrot.slane %v476_v18, %v4070_v23  ;;  %v741_v52 = vrot.slane %v475_v14, %v4073_v8 }
 0x119   : > { %v4169_v0 = vpop.xlane.xlu1 %537  ;;  %v4171_v5 = vpop.xlane.xlu0 %534  ;;  %v728_v61 = vsel %vm619_vm1, %v727_v36, %v723_v17  ;;  %v750_v60 = vrot.slane %v477_v27, %v4073_v8  ;;  %v1044_v17 = vmul.f32 %v1043_v28, %v4239_v48 }
 0x11a   : > { %v4181_v38 = vsel %vm787_vm11, 0.0, %v994_v42  ;;  %v916_v3 = vrot.slane %v4169_v0, %v4070_v23  ;;  %v912_v50 = vrot.slane %v4171_v5, %v4073_v8  ;;  %v907_v5 = vrot.slane %v4151_v9, %v4070_v23 }
 0x11b   : > { %v1058_v39 = vmul.f32 %v1057_v7, %v4181_v38  ;;  %v1030_v40 = vmul.f32 %v1029_v49, %v4181_v38  ;;  %v1086_v1 = vmul.f32 %v1085_v41, %v4181_v38  ;;  %v1114_v43 = vmul.f32 %v1113_v58, %v4181_v38 }
 0x11c   : > { %v746_v20 = vsel %vm619_vm1, %v745_v2, %v741_v52  ;;  %v917_v9 = vsel %vm619_vm1, %v916_v3, %v912_v50  ;;  %v1099_v2 = vstv %s4263_s17  ;;  %s3414_s17 = sld [smem:[#allocation2 + $0xf]] }
 0x11d   : > { %v4198_v30 = vpop.xlane.xlu1 %543  ;;  %1062 = vrot.lane.b32.xlu0 %v1058_v39, %s3708_s9  ;;  %1034 = vrot.lane.b32.xlu1 %v1030_v40, %s3709_s10  ;;  %v4202_v46 = vpop.xlane.xlu0 %540  ;;  %v770_v39 = vsel %vm756_vm2, %v701_v53, %v692_v59  ;;  %v478_v40 = vmul.f32 0.125, %v4057_v4  ;;  %v1016_v4 = vmul.f32 %v1015_v57, %v4239_v48  ;;  %v903_v59 = vrot.slane %v4153_v32, %v4073_v8 }
 0x11e   : > { %v771_v29 = vsel %vm758_vm3, %v710_v47, %v770_v39  ;;  %v921_v15 = vrot.slane %v4202_v46, %v4073_v8 }
 0x11f   : > { %v772_v62 = vsel %vm760_vm4, %v719_v6, %v771_v29  ;;  %v754_v31 = vrot.slane %v478_v40, %v4070_v23  ;;  %v908_v14 = vsel %vm619_vm1, %v907_v5, %v903_v59  ;;  %v1100_v5 = vmul.f32 %v1099_v2, %v4239_v48 }
 0x121   : > { %v4222_v54 = vpop.xlane.xlu1 %549  ;;  %1090 = vrot.lane.b32.xlu0 %v1086_v1, %s3710_s13  ;;  %v547_v55 = vpop.xlane.xlu0 %546  ;;  %v925_v1 = vrot.slane %v4198_v30, %v4070_v23  ;;  %v773_v30 = vsel %vm762_vm5, %v728_v61, %v772_v62  ;;  %v755_v26 = vsel %vm619_vm1, %v754_v31, %v750_v60  ;;  %v1072_v62 = vmul.f32 %v1071_v51, %v4239_v48 }
 0x122   : > { %v934_v53 = vrot.slane %v4222_v54, %v4070_v23  ;;  %v930_v47 = vrot.slane %v547_v55, %v4073_v8  ;;  %v774_v55 = vsel %vm764_vm6, %v737_v63, %v773_v30 }
 0x124   : > { %v935_v39 = vsel %vm619_vm1, %v934_v53, %v930_v47  ;;  %v1127_v47 = vstv %s4289_s18  ;;  %s3415_s18 = sld [smem:[#allocation2 + $0x40]] }
 0x125   : > { %v556_v35 = vpop.xlane.xlu1 %555  ;;  %1118 = vrot.lane.b32.xlu0 %v1114_v43, %s3711_s14  ;;  %v553_v45 = vpop.xlane.xlu0 %552  ;;  %v926_v43 = vsel %vm619_vm1, %v925_v1, %v921_v15 }
 0x126   : > { %v943_v36 = vrot.slane %v556_v35, %v4070_v23  ;;  %v939_v46 = vrot.slane %v553_v45, %v4073_v8  ;;  %v775_v35 = vsel %vm766_vm7, %v746_v20, %v774_v55  ;;  %v979_v45 = vsel %vm756_vm2, %v917_v9, %v908_v14 }
 0x127   : > { %v776_v61 = vsel %vm768_vm8, %v755_v26, %v775_v35  ;;  %v980_v63 = vsel %vm758_vm3, %v926_v43, %v979_v45  ;;  %v1141_v20 = vstv %s4309_s19  ;;  %v1155_v26 = vstv %s4325_s20  ;;  %s3416_s19 = sld [smem:[#allocation2 + $0x10]]  ;;  %s3417_s20 = sld [smem:[#allocation2 + $0x41]] }
 0x128   : > { %v944_v29 = vsel %vm619_vm1, %v943_v36, %v939_v46  ;;  %v981_v52 = vsel %vm760_vm4, %v935_v39, %v980_v63  ;;  %v1128_v46 = vmul.f32 %v1127_v47, %v4239_v48  ;;  %v1156_v19 = vmul.f32 %v1155_v26, %v4239_v48 }
 0x129   : > { %v562_v16 = vpop.xlane.xlu1 %561  ;;  %1020 = vrot.lane.b32.xlu0 %v1016_v4, %s3709_s10  ;;  %v559_v0 = vpop.xlane.xlu0 %558  ;;  %v982_v60 = vsel %vm762_vm5, %v944_v29, %v981_v52  ;;  %v4391_v14 = vstv %s3401_s25  ;;  %v4405_v45 = vstv %s3402_s26  ;;  %v4422_v52 = vstv %s3403_s28  ;;  %s3420_s25 = sld [smem:[#allocation2 + $0x12]]  ;;  %s3421_s26 = sld [smem:[#allocation2 + $0x43]] }
 0x12a   : > { %v952_v32 = vrot.slane %v562_v16, %v4070_v23  ;;  %v948_v54 = vrot.slane %v559_v0, %v4073_v8  ;;  %v781_v16 = vsel %vm779_vm9, 0.0, %v776_v61  ;;  %v1240_v35 = vmul.f32 %v4391_v14, %v4181_v38  ;;  %s3422_s28 = sld [smem:[#allocation2 + $0x13]] }
 0x12c   : > { %v953_v4 = vsel %vm619_vm1, %v952_v32, %v948_v54  ;;  %v1142_v54 = vmul.f32 %v1141_v20, %v4181_v38  ;;  %v1246_v63 = vrot.slane %v1240_v35, 1 }
 0x12d   : > { %v568_v6 = vpop.xlane.xlu1 %567  ;;  %1048 = vrot.lane.b32.xlu0 %v1044_v17, %s3708_s9  ;;  %v565_v18 = vpop.xlane.xlu0 %564  ;;  %v983_v0 = vsel %vm764_vm6, %v953_v4, %v982_v60 }
 0x12e   : > { %v961_v40 = vrot.slane %v568_v6, %v4070_v23  ;;  %v957_v27 = vrot.slane %v565_v18, %v4073_v8  ;;  %v1169_v6 = vstv %s4341_s22  ;;  %s3419_s22 = sld [smem:[#allocation2 + $0x42]] }
 0x130   : > { %v962_v3 = vsel %vm619_vm1, %v961_v40, %v957_v27 }
 0x131   : > { %v574_v50 = vpop.xlane.xlu1 %573  ;;  %1076 = vrot.lane.b32.xlu0 %v1072_v62, %s3710_s13  ;;  %v571_v31 = vpop.xlane.xlu0 %570  ;;  %v984_v59 = vsel %vm766_vm7, %v962_v3, %v983_v0 }
 0x132   : > { %v970_v1 = vrot.slane %v574_v50, %v4070_v23  ;;  %v966_v15 = vrot.slane %v571_v31, %v4073_v8  ;;  %v4330_v8 = vsel %vm782_vm10, %v781_v16, 0.0 }
 0x133   : > { %v789_v9 = vrot.slane %v4330_v8, 5 }
 0x134   : > { %v971_v53 = vsel %vm619_vm1, %v970_v1, %v966_v15  ;;  %v4439_v15 = vstv %s3404_s29  ;;  %s3423_s29 = sld [smem:[#allocation2 + $0x44]]  ;;  %vm2624_vm1 = vcmask 1041408  }
 0x135   : > { %v985_v23 = vsel %vm768_vm8, %v971_v53, %v984_v59  ;;  %1104 = vrot.lane.b32.xlu0 %v1100_v5, %s3711_s14  ;;  %v4364_v43 = vsel %vm787_vm11, %v788_v56, %v789_v9 }
 0x136   : > { %v989_v30 = vsel %vm779_vm9, 0.0, %v985_v23  ;;  %v4413_v61 = vmul.f32 %v4405_v45, %v4364_v43  ;;  %v1017_v4 = vmul.f32 %v1015_v57, %v4364_v43  ;;  %v1282_v57 = vmul.f32 %v4422_v52, %v4181_v38 }
 0x137   : > { %v4334_v36 = vsel %vm782_vm10, %v989_v30, 0.0  ;;  %v1045_v1 = vmul.f32 %v1043_v28, %v4364_v43  ;;  %v4447_v5 = vmul.f32 %v4439_v15, %v4364_v43  ;;  %v1303_v28 = vmul.f32 %v4439_v15, %v4239_v48 }
 0x138   : > { %v995_v17 = vrot.slane %v4334_v36, 5  ;;  %v1268_v50 = vrot.slane %v4413_v61, 1  ;;  %v1288_v59 = vrot.slane %v1282_v57, 1  ;;  %v1073_v53 = vmul.f32 %v1071_v51, %v4364_v43 }
 0x139   : > { %1132 = vrot.lane.b32.xlu0 %v1128_v46, %s3712_s24  ;;  %v4456_v23 = vstv %s3405_s30  ;;  %v1310_v46 = vrot.slane %v4447_v5, 1  ;;  %v1129_v35 = vmul.f32 %v1127_v47, %v4364_v43  ;;  %s3424_s30 = sld [smem:[#allocation2 + $0x14]] }
 0x13a   : > { %v4350_v32 = vsel %vm787_vm11, %v994_v42, %v995_v17  ;;  %v1324_v51 = vmul.f32 %v4456_v23, %v4181_v38 }
 0x13b   : > { %v1031_v55 = vmul.f32 %v1029_v49, %v4350_v32  ;;  %v1059_v42 = vmul.f32 %v1057_v7, %v4350_v32  ;;  %v4374_v49 = vstv %s3400_s21  ;;  %v1170_v7 = vmul.f32 %v1169_v6, %v4181_v38  ;;  %s3418_s21 = sld [smem:[#allocation2 + $0x11]] }
 0x13c   : > { %v4379_v44 = vmul.f32 %v4374_v49, %v4364_v43  ;;  %v1219_v56 = vmul.f32 %v4374_v49, %v4239_v48  ;;  %v1087_v18 = vmul.f32 %v1085_v41, %v4350_v32  ;;  %v4396_v40 = vmul.f32 %v4391_v14, %v4350_v32 }
 0x13d   : > { %1146 = vrot.lane.b32.xlu0 %v1142_v54, %s3712_s24  ;;  %1036 = vrot.lane.b32.xlu1 %v1031_v55, %s3709_s10  ;;  %v1115_v41 = vmul.f32 %v1113_v58, %v4350_v32  ;;  %v1261_v58 = vmul.f32 %v4405_v45, %v4239_v48  ;;  %v4430_v31 = vmul.f32 %v4422_v52, %v4350_v32  ;;  %v1309_v55 = vrot.slane %v1303_v28, 1 }
 0x13e   : > { %v1226_v39 = vrot.slane %v4379_v44, 1  ;;  %v1225_v27 = vrot.slane %v1219_v56, 1  ;;  %v1247_v62 = vrot.slane %v4396_v40, 1  ;;  %v4464_v54 = vmul.f32 %v4456_v23, %v4350_v32 }
 0x13f   : > { %v1267_v60 = vrot.slane %v1261_v58, 1  ;;  %v1289_v0 = vrot.slane %v4430_v31, 1  ;;  %v1311_v56 = vsel %vm1190_vm12, %v1309_v55, %v1310_v46 }
 0x140   : > { %v1227_v29 = vsel %vm1190_vm12, %v1225_v27, %v1226_v39  ;;  %v1248_v3 = vsel %vm1190_vm12, %v1246_v63, %v1247_v62  ;;  %v1330_v27 = vrot.slane %v1324_v51, 1 }
 0x141   : > { %1160 = vrot.lane.b32.xlu0 %v1156_v19, %s3713_s27  ;;  %1064 = vrot.lane.b32.xlu1 %v1059_v42, %s3708_s9  ;;  %v1269_v16 = vsel %vm1190_vm12, %v1267_v60, %v1268_v50  ;;  %v1290_v30 = vsel %vm1190_vm12, %v1288_v59, %v1289_v0  ;;  %v1101_v19 = vmul.f32 %v1099_v2, %v4364_v43  ;;  %v4473_v42 = vstv %s3406_s5  ;;  %s3425_s5 = sld [smem:[#allocation2 + $0x45]] }
 0x142   : > { %v1345_v2 = vmul.f32 %v4473_v42, %v4239_v48  ;;  %v4507_v60 = vstv %s3408_s7  ;;  %v4520_v59 = vsel %vm787_vm11, %v789_v9, 0.0  ;;  %s3429_s7 = sld [smem:[#allocation2 + $0x47]] }
 0x143   : > { %v1387_v28 = vmul.f32 %v4507_v60, %v4239_v48  ;;  %v1221_v51 = vmul.f32 %v4374_v49, %v4520_v59  ;;  %v1305_v61 = vmul.f32 %v4439_v15, %v4520_v59  ;;  %v1347_v31 = vmul.f32 %v4473_v42, %v4520_v59 }
 0x145   : > { %1174 = vrot.lane.b32.xlu0 %v1170_v7, %s3713_s27  ;;  %1092 = vrot.lane.b32.xlu1 %v1087_v18, %s3710_s13  ;;  %v1331_v7 = vrot.slane %v4464_v54, 1  ;;  %v4481_v18 = vmul.f32 %v4473_v42, %v4364_v43  ;;  %v1389_v54 = vmul.f32 %v4507_v60, %v4520_v59 }
 0x147   : > { %v1352_v63 = vrot.slane %v4481_v18, 1 }
 0x149   : > { %1230 = vrot.lane.b32.xlu0 %v1227_v29, %s3709_s10  ;;  %1120 = vrot.lane.b32.xlu1 %v1115_v41, %s3711_s14  ;;  %v4490_v41 = vstv %s3407_s6  ;;  %v1332_v29 = vsel %vm1190_vm12, %v1330_v27, %v1331_v7  ;;  %v4550_v27 = vstv %s3410_s11  ;;  %s3428_s6 = sld [smem:[#allocation2 + $0x16]]  ;;  %s3431_s11 = sld [smem:[#allocation2 + $0x48]] }
 0x14a   : > { %v4498_v58 = vmul.f32 %v4490_v41, %v4350_v32  ;;  %v1366_v47 = vmul.f32 %v4490_v41, %v4181_v38  ;;  %v4557_v36 = vmul.f32 %v4550_v27, %v4364_v43 }
 0x14d   : > { %1251 = vrot.lane.b32.xlu0 %v1248_v3, %s3709_s10  ;;  %1022 = vrot.lane.b32.xlu1 %v1017_v4, %s3709_s10  ;;  %v1351_v4 = vrot.slane %v1345_v2, 1  ;;  %v1143_v3 = vmul.f32 %v1141_v20, %v4350_v32  ;;  %v1372_v20 = vrot.slane %v1366_v47, 1  ;;  %v1171_v2 = vmul.f32 %v1169_v6, %v4350_v32 }
 0x14e   : > { %v1429_v6 = vmul.f32 %v4550_v27, %v4239_v48  ;;  %v1436_v47 = vrot.slane %v4557_v36, 1 }
 0x14f   : > { %v1353_v57 = vsel %vm1190_vm12, %v1351_v4, %v1352_v63 }
 0x151   : > { %1272 = vrot.lane.b32.xlu0 %v1269_v16, %s3708_s9  ;;  %1050 = vrot.lane.b32.xlu1 %v1045_v1, %s3708_s9  ;;  %v1373_v1 = vrot.slane %v4498_v58, 1  ;;  %v4515_v16 = vmul.f32 %v4507_v60, %v4364_v43  ;;  %v4724_v58 = vstv %s3421_s26  ;;  %s3442_s26 = sld [smem:[#allocation2 + $0x1d]] }
 0x153   : > { %v1374_v8 = vsel %vm1190_vm12, %v1372_v20, %v1373_v1  ;;  %v1394_v9 = vrot.slane %v4515_v16, 1 }
 0x155   : > { %1293 = vrot.lane.b32.xlu0 %v1290_v30, %s3708_s9  ;;  %1078 = vrot.lane.b32.xlu1 %v1073_v53, %s3710_s13  ;;  %v1157_v53 = vmul.f32 %v1155_v26, %v4364_v43  ;;  %v4529_v30 = vstv %s3409_s8  ;;  %v4544_v26 = vsel %vm787_vm11, %v995_v17, 0.0  ;;  %s3430_s8 = sld [smem:[#allocation2 + $0x17]] }
 0x156   : > { %v4537_v55 = vmul.f32 %v4529_v30, %v4350_v32 }
 0x158   : > { %v1415_v49 = vrot.slane %v4537_v55, 1 }
 0x159   : > { %1314 = vrot.lane.b32.xlu0 %v1311_v56, %s3710_s13  ;;  %1106 = vrot.lane.b32.xlu1 %v1101_v19, %s3711_s14  ;;  %v1393_v19 = vrot.slane %v1387_v28, 1  ;;  %v1408_v56 = vmul.f32 %v4529_v30, %v4181_v38 }
 0x15b   : > { %v1395_v17 = vsel %vm1190_vm12, %v1393_v19, %v1394_v9  ;;  %v1414_v4 = vrot.slane %v1408_v56, 1 }
 0x15d   : > { %1335 = vrot.lane.b32.xlu0 %v1332_v29, %s3710_s13  ;;  %1134 = vrot.lane.b32.xlu1 %v1129_v35, %s3712_s24  ;;  %v1228_v35 = vrot.slane %v1221_v51, 1  ;;  %v1242_v29 = vmul.f32 %v4391_v14, %v4544_v26  ;;  %v1416_v14 = vsel %vm1190_vm12, %v1414_v4, %v1415_v49  ;;  %v4588_v51 = vstv %s3414_s17  ;;  %s3433_s17 = sld [smem:[#allocation2 + $0x49]] }
 0x15e   : > { %v4592_v44 = vmul.f32 %v4588_v51, %v4364_v43 }
 0x15f   : > { %v1229_v20 = vsel %vm1190_vm12, %v1226_v39, %v1228_v35  ;;  %v1249_v28 = vrot.slane %v1242_v29, 1  ;;  %v1506_v35 = vmul.f32 %v4588_v51, %v4239_v48 }
 0x160   : > { %v1513_v40 = vrot.slane %v4592_v44, 2 }
 0x161   : > { %1356 = vrot.lane.b32.xlu0 %v1353_v57, %s3711_s14  ;;  %1148 = vrot.lane.b32.xlu1 %v1143_v3, %s3712_s24  ;;  %v4570_v3 = vstv %s3411_s12  ;;  %v1263_v57 = vmul.f32 %v4405_v45, %v4520_v59  ;;  %v1250_v56 = vsel %vm1190_vm12, %v1247_v62, %v1249_v28  ;;  %v4611_v62 = vstv %s3415_s18  ;;  %s3432_s12 = sld [smem:[#allocation2 + $0x18]]  ;;  %s3434_s18 = sld [smem:[#allocation2 + $0x19]] }
 0x162   : > { %v1450_v45 = vmul.f32 %v4570_v3, %v4181_v38 }
 0x163   : > { %v1270_v19 = vrot.slane %v1263_v57, 1  ;;  %v4618_v57 = vmul.f32 %v4611_v62, %v4350_v32 }
 0x164   : > { %v1456_v29 = vrot.slane %v1450_v45, 1 }
 0x165   : > { %1377 = vrot.lane.b32.xlu0 %v1374_v8, %s3711_s14  ;;  %1162 = vrot.lane.b32.xlu1 %v1157_v53, %s3713_s27  ;;  %v4582_v53 = vmul.f32 %v4570_v3, %v4350_v32  ;;  %v1435_v8 = vrot.slane %v1429_v6, 1  ;;  %v1271_v4 = vsel %vm1190_vm12, %v1268_v50, %v1270_v19  ;;  %v1512_v50 = vrot.slane %v1506_v35, 2 }
 0x166   : > { %v1534_v45 = vrot.slane %v4618_v57, 2  ;;  %v1312_v19 = vrot.slane %v1305_v61, 1  ;;  %v4664_v61 = vstv %s3418_s21  ;;  %s3437_s21 = sld [smem:[#allocation2 + $0x4b]] }
 0x167   : > { %v1437_v39 = vsel %vm1190_vm12, %v1435_v8, %v1436_v47  ;;  %v1514_v28 = vsel %vm1477_vm13, %v1512_v50, %v1513_v40  ;;  %v1354_v50 = vrot.slane %v1347_v31, 1  ;;  %v4668_v5 = vmul.f32 %v4664_v61, %v4364_v43 }
 0x169   : > { %1398 = vrot.lane.b32.xlu0 %v1395_v17, %s3712_s24  ;;  %1176 = vrot.lane.b32.xlu1 %v1171_v2, %s3713_s27  ;;  %v1457_v2 = vrot.slane %v4582_v53, 1  ;;  %v1284_v17 = vmul.f32 %v4422_v52, %v4544_v26  ;;  %v4806_v53 = vstv %s3425_s5  ;;  %s5100_s5 = sld [smem:[#allocation2 + $0x1e]] }
 0x16a   : > { %v1739_v22 = vmul.f32 %v4806_v53, %v4544_v26 }
 0x16b   : > { %v1458_v52 = vsel %vm1190_vm12, %v1456_v29, %v1457_v2  ;;  %v1291_v6 = vrot.slane %v1284_v17, 1  ;;  %v4646_v29 = vstv %s3417_s20  ;;  %s3436_s20 = sld [smem:[#allocation2 + $0x1a]] }
 0x16c   : > { %v1569_v42 = vmul.f32 %v4646_v29, %v4181_v38 }
 0x16d   : > { %1419 = vrot.lane.b32.xlu0 %v1416_v14, %s3712_s24  ;;  %1232 = vrot.lane.b32.xlu1 %v1229_v20, %s3709_s10  ;;  %v1527_v14 = vmul.f32 %v4611_v62, %v4181_v38  ;;  %v4626_v20 = vstv %s3416_s19  ;;  %v1292_v15 = vsel %vm1190_vm12, %v1289_v0, %v1291_v6  ;;  %s3435_s19 = sld [smem:[#allocation2 + $0x4a]] }
 0x16e   : > { %v4633_v8 = vmul.f32 %v4626_v20, %v4364_v43  ;;  %v1548_v17 = vmul.f32 %v4626_v20, %v4239_v48 }
 0x170   : > { %v1555_v35 = vrot.slane %v4633_v8, 2  ;;  %v1554_v6 = vrot.slane %v1548_v17, 2  ;;  %v4684_v17 = vstv %s3419_s22  ;;  %v1592_v8 = vmul.f32 %v4664_v61, %v4520_v59  ;;  %s3438_s22 = sld [smem:[#allocation2 + $0x1b]] }
 0x171   : > { %1440 = vrot.lane.b32.xlu0 %v1437_v39, %s3713_s27  ;;  %1253 = vrot.lane.b32.xlu1 %v1250_v56, %s3709_s10  ;;  %v1326_v39 = vmul.f32 %v4456_v23, %v4544_v26  ;;  %v1533_v56 = vrot.slane %v1527_v14, 2  ;;  %v1313_v23 = vsel %vm1190_vm12, %v1310_v46, %v1312_v19  ;;  %v1575_v19 = vrot.slane %v1569_v42, 2 }
 0x172   : > { %v1556_v46 = vsel %vm1477_vm13, %v1554_v6, %v1555_v35  ;;  %v1611_v60 = vmul.f32 %v4684_v17, %v4181_v38  ;;  %v1396_v6 = vrot.slane %v1389_v54, 1 }
 0x173   : > { %v1535_v0 = vsel %vm1477_vm13, %v1533_v56, %v1534_v45  ;;  %v1597_v56 = vrot.slane %v4668_v5, 2 }
 0x175   : > { %1461 = vrot.lane.b32.xlu0 %v1458_v52, %s3713_s27  ;;  %1274 = vrot.lane.b32.xlu1 %v1271_v4, %s3708_s9  ;;  %v1333_v4 = vrot.slane %v1326_v39, 1  ;;  %v4658_v52 = vmul.f32 %v4646_v29, %v4350_v32  ;;  %v1590_v39 = vmul.f32 %v4664_v61, %v4239_v48 }
 0x176   : > { %v5048_v12 = vstv %s3438_s22  ;;  %s5351_s22 = sld [smem:[#allocation2 + $0x38]] }
 0x177   : > { %v1334_v14 = vsel %vm1190_vm12, %v1331_v7, %v1333_v4  ;;  %v4702_v4 = vstv %s3420_s25  ;;  %s3439_s25 = sld [smem:[#allocation2 + $0x4c]] }
 0x178   : > { %v4706_v18 = vmul.f32 %v4702_v4, %v4364_v43 }
 0x179   : > { %1517 = vrot.lane.b32.xlu0 %v1514_v28, %s3709_s10  ;;  %1295 = vrot.lane.b32.xlu1 %v1292_v15, %s3708_s9  ;;  %v1576_v28 = vrot.slane %v4658_v52, 2  ;;  %v1368_v15 = vmul.f32 %v4490_v41, %v4544_v26  ;;  %v1355_v41 = vsel %vm1190_vm12, %v1352_v63, %v1354_v50 }
 0x17b   : > { %v1577_v7 = vsel %vm1477_vm13, %v1575_v19, %v1576_v28  ;;  %v1375_v31 = vrot.slane %v1368_v15, 1  ;;  %v1632_v15 = vmul.f32 %v4702_v4, %v4239_v48  ;;  %v1397_v19 = vsel %vm1190_vm12, %v1394_v9, %v1396_v6 }
 0x17c   : > { %v1653_v9 = vmul.f32 %v4724_v58, %v4181_v38 }
 0x17d   : > { %1538 = vrot.lane.b32.xlu0 %v1535_v0, %s3709_s10  ;;  %1316 = vrot.lane.b32.xlu1 %v1313_v23, %s3710_s13  ;;  %v4696_v0 = vmul.f32 %v4684_v17, %v4350_v32  ;;  %v1596_v23 = vrot.slane %v1590_v39, 2  ;;  %v1376_v42 = vsel %vm1190_vm12, %v1373_v1, %v1375_v31  ;;  %v1431_v1 = vmul.f32 %v4550_v27, %v4520_v59 }
 0x17e   : > { %v1639_v39 = vrot.slane %v4706_v18, 2  ;;  %v1638_v16 = vrot.slane %v1632_v15, 2  ;;  %v4740_v27 = vstv %s3422_s28  ;;  %s5050_s28 = sld [smem:[#allocation2 + $0x31]] }
 0x17f   : > { %v1598_v63 = vsel %vm1477_vm13, %v1596_v23, %v1597_v56  ;;  %v1618_v50 = vrot.slane %v4696_v0, 2  ;;  %v1438_v31 = vrot.slane %v1431_v1, 1  ;;  %v4746_v23 = vmul.f32 %v4740_v27, %v4364_v43 }
 0x181   : > { %1559 = vrot.lane.b32.xlu0 %v1556_v46, %s3708_s9  ;;  %1337 = vrot.lane.b32.xlu1 %v1334_v14, %s3710_s13  ;;  %v1410_v46 = vmul.f32 %v4529_v30, %v4544_v26  ;;  %v1617_v14 = vrot.slane %v1611_v60, 2  ;;  %v1640_v60 = vsel %vm1477_vm13, %v1638_v16, %v1639_v39  ;;  %v1439_v55 = vsel %vm1190_vm12, %v1436_v47, %v1438_v31 }
 0x182   : > { %v6649_v1 = vrot.slane %v4746_v23, 2 }
 0x183   : > { %v1619_v30 = vsel %vm1477_vm13, %v1617_v14, %v1618_v50  ;;  %v1417_v54 = vrot.slane %v1410_v46, 1  ;;  %v1659_v46 = vrot.slane %v1653_v9, 2  ;;  %v1674_v14 = vmul.f32 %v4740_v27, %v4239_v48 }
 0x185   : > { %1580 = vrot.lane.b32.xlu0 %v1577_v7, %s3708_s9  ;;  %1358 = vrot.lane.b32.xlu1 %v1355_v41, %s3711_s14  ;;  %v4734_v7 = vmul.f32 %v4724_v58, %v4350_v32  ;;  %v1418_v6 = vsel %vm1190_vm12, %v1415_v49, %v1417_v54  ;;  %v4766_v49 = vstv %s3423_s29  ;;  %v1680_v36 = vrot.slane %v1674_v14, 2  ;;  %s5073_s29 = sld [smem:[#allocation2]] }
 0x186   : > { %v4776_v54 = vmul.f32 %v4766_v49, %v4350_v32  ;;  %v1695_v47 = vmul.f32 %v4766_v49, %v4181_v38  ;;  %v1697_v34 = vmul.f32 %v4766_v49, %v4544_v26 }
 0x188   : > { %v1701_v14 = vrot.slane %v1695_v47, 2  ;;  %v4818_v47 = vmul.f32 %v4806_v53, %v4350_v32  ;;  %v1704_v33 = vrot.slane %v1697_v34, 2 }
 0x189   : > { %1601 = vrot.lane.b32.xlu0 %v1598_v63, %s3710_s13  ;;  %1379 = vrot.lane.b32.xlu1 %v1376_v42, %s3711_s14  ;;  %v6651_v63 = vrot.slane %v4734_v7, 2  ;;  %v1452_v42 = vmul.f32 %v4570_v3, %v4544_v26 }
 0x18b   : > { %v1661_v3 = vsel %vm1477_vm13, %v1659_v46, %v6651_v63  ;;  %v1529_v46 = vmul.f32 %v4611_v62, %v4544_v26 }
 0x18d   : > { %1622 = vrot.lane.b32.xlu0 %v1619_v30, %s3710_s13  ;;  %1400 = vrot.lane.b32.xlu1 %v1397_v19, %s3712_s24  ;;  %v1508_v19 = vmul.f32 %v4588_v51, %v4520_v59  ;;  %v1459_v30 = vrot.slane %v1452_v42, 1  ;;  %v4782_v51 = vstv %s3424_s30  ;;  %v6645_v42 = vrot.slane %v4776_v54, 2  ;;  %s3443_s30 = sld [smem:[#allocation2 + $0x4e]] }
 0x18e   : > { %v4788_v31 = vmul.f32 %v4782_v51, %v4364_v43  ;;  %v1718_v49 = vmul.f32 %v4782_v51, %v4520_v59 }
 0x18f   : > { %v4742_v41 = vpop.permute.xlu0 %1062  ;;  %v1515_v9 = vrot.slane %v1508_v19, 2  ;;  %v1703_v62 = vsel %vm1477_vm13, %v1701_v14, %v6645_v42 }
 0x190   : > { %v1725_v34 = vrot.slane %v1718_v49, 2 }
 0x191   : > { %1643 = vrot.lane.b32.xlu0 %v1640_v60, %s3711_s14  ;;  %1421 = vrot.lane.b32.xlu1 %v1418_v6, %s3712_s24  ;;  %v1682_v60 = vsel %vm1477_vm13, %v1680_v36, %v6649_v1  ;;  %v1460_v6 = vsel %vm1190_vm12, %v1457_v2, %v1459_v30  ;;  %v1550_v2 = vmul.f32 %v4626_v20, %v4520_v59  ;;  %v1536_v36 = vrot.slane %v1529_v46, 2 }
 0x192   : > { %v1516_v30 = vsel %vm1477_vm13, %v1513_v40, %v1515_v9  ;;  %v1737_v20 = vmul.f32 %v4806_v53, %v4181_v38  ;;  %v4910_v1 = vstv %s3432_s12  ;;  %s3449_s12 = sld [smem:[#allocation2 + $0x51]] }
 0x193   : > { %v4761_v15 = vpop.permute.xlu0 %1090  ;;  %v1557_v44 = vrot.slane %v1550_v2, 2  ;;  %v1537_v46 = vsel %vm1477_vm13, %v1534_v45, %v1536_v36  ;;  %v4851_v36 = vstv %s3429_s7  ;;  %s3446_s7 = sld [smem:[#allocation2 + $0x1f]] }
 0x194   : > { %v1816_v11 = vmul.f32 %v4851_v36, %v4544_v26 }
 0x195   : > { %1664 = vrot.lane.b32.xlu0 %v1661_v3, %s3711_s14  ;;  %1442 = vrot.lane.b32.xlu1 %v1439_v55, %s3713_s27  ;;  %v1716_v55 = vmul.f32 %v4782_v51, %v4239_v48  ;;  %v6648_v3 = vrot.slane %v4788_v31, 2  ;;  %v1558_v57 = vsel %vm1477_vm13, %v1555_v35, %v1557_v44  ;;  %v1814_v44 = vmul.f32 %v4851_v36, %v4181_v38 }
 0x197   : > { %v4784_v16 = vpop.permute.xlu0 %1118 }
 0x199   : > { %1685 = vrot.lane.b32.xlu0 %v1682_v60, %s3712_s24  ;;  %1463 = vrot.lane.b32.xlu1 %v1460_v6, %s3713_s27  ;;  %v1722_v60 = vrot.slane %v1716_v55, 2  ;;  %v4824_v6 = vstv %s3428_s6  ;;  %v6646_v55 = vrot.slane %v4818_v47, 2  ;;  %s3445_s6 = sld [smem:[#allocation2 + $0x4f]] }
 0x19a   : > { %v4830_v40 = vmul.f32 %v4824_v6, %v4364_v43  ;;  %v1793_v2 = vmul.f32 %v4824_v6, %v4239_v48 }
 0x19b   : > { %v4803_v19 = vpop.permute.xlu0 %1020  ;;  %v1724_v9 = vsel %vm1477_vm13, %v1722_v60, %v6648_v3 }
 0x19c   : > { %v6647_v45 = vrot.slane %v4830_v40, 3  ;;  %v1799_v35 = vrot.slane %v1793_v2, 3 }
 0x19d   : > { %1706 = vrot.lane.b32.xlu0 %v1703_v62, %s3712_s24  ;;  %1519 = vrot.lane.b32.xlu1 %v1516_v30, %s3709_s10  ;;  %v1571_v62 = vmul.f32 %v4646_v29, %v4544_v26  ;;  %v1743_v30 = vrot.slane %v1737_v20, 2  ;;  %v4858_v20 = vmul.f32 %v4851_v36, %v4350_v32 }
 0x19f   : > { %v4826_v14 = vpop.permute.xlu0 %1048  ;;  %v1745_v29 = vsel %vm1477_vm13, %v1743_v30, %v6646_v55  ;;  %v1578_v60 = vrot.slane %v1571_v62, 2  ;;  %v1801_v62 = vsel %vm1764_vm14, %v1799_v35, %v6647_v45  ;;  %v6650_v30 = vrot.slane %v4858_v20, 3  ;;  %v4887_v45 = vpop.permute.xlu1 %1034 }
 0x1a0   : > { %v1820_v55 = vrot.slane %v1814_v44, 3 }
 0x1a1   : > { %1727 = vrot.lane.b32.xlu0 %v1724_v9, %s3713_s27  ;;  %1540 = vrot.lane.b32.xlu1 %v1537_v46, %s3709_s10  ;;  %v4866_v9 = vstv %s3430_s8  ;;  %v1579_v2 = vsel %vm1477_vm13, %v1576_v28, %v1578_v60  ;;  %v4892_v28 = vstv %s3431_s11  ;;  %v1634_v60 = vmul.f32 %v4702_v4, %v4520_v59  ;;  %s3447_s8 = sld [smem:[#allocation2 + $0x50]] }
 0x1a2   : > { %v4875_v61 = vmul.f32 %v4866_v9, %v4364_v43  ;;  %v1835_v35 = vmul.f32 %v4866_v9, %v4239_v48  ;;  %v1856_v4 = vmul.f32 %v4892_v28, %v4181_v38  ;;  %v1837_v36 = vmul.f32 %v4866_v9, %v4520_v59  ;;  %s3448_s11 = sld [smem:[#allocation2 + $0x20]] }
 0x1a3   : > { %v4845_v42 = vpop.permute.xlu0 %1076 }
 0x1a4   : > { %v6652_v52 = vrot.slane %v4875_v61, 3 }
 0x1a5   : > { %1748 = vrot.lane.b32.xlu0 %v1745_v29, %s3713_s27  ;;  %1561 = vrot.lane.b32.xlu1 %v1558_v57, %s3708_s9  ;;  %v1599_v57 = vrot.slane %v1592_v8, 2  ;;  %v1613_v29 = vmul.f32 %v4684_v17, %v4544_v26  ;;  %v1822_v17 = vsel %vm1764_vm14, %v1820_v55, %v6650_v30  ;;  %v1862_v30 = vrot.slane %v1856_v4, 3 }
 0x1a7   : > { %v4868_v46 = vpop.permute.xlu0 %1104  ;;  %v1600_v8 = vsel %vm1477_vm13, %v1597_v56, %v1599_v57  ;;  %v1620_v44 = vrot.slane %v1613_v29, 2  ;;  %v1641_v56 = vrot.slane %v1634_v60, 2  ;;  %v4918_v57 = vmul.f32 %v4910_v1, %v4364_v43 }
 0x1a8   : > { %v1877_v60 = vmul.f32 %v4910_v1, %v4239_v48 }
 0x1a9   : > { %1804 = vrot.lane.b32.xlu0 %v1801_v62, %s3709_s10  ;;  %1582 = vrot.lane.b32.xlu1 %v1579_v2, %s3708_s9  ;;  %v4904_v62 = vmul.f32 %v4892_v28, %v4350_v32  ;;  %v1841_v2 = vrot.slane %v1835_v35, 3  ;;  %v1621_v35 = vsel %vm1477_vm13, %v1618_v50, %v1620_v44  ;;  %v4938_v50 = vstv %s3433_s17  ;;  %s5261_s17 = sld [smem:[#allocation2 + $0x21]] }
 0x1aa   : > { %v1676_v44 = vmul.f32 %v4740_v27, %v4520_v59  ;;  %v1642_v4 = vsel %vm1477_vm13, %v1639_v39, %v1641_v56  ;;  %v1898_v27 = vmul.f32 %v4938_v50, %v4181_v38  ;;  %v6724_v18 = vrot.slane %v4918_v57, 3 }
 0x1ab   : > { %v4889_v3 = vpop.permute.xlu0 %1132  ;;  %v1843_v29 = vsel %vm1764_vm14, %v1841_v2, %v6652_v52  ;;  %v1883_v52 = vrot.slane %v1877_v60, 3  ;;  %v4986_v60 = vstv %s3435_s19  ;;  %s5298_s19 = sld [smem:[#allocation2 + $0x22]] }
 0x1ac   : > { %v1683_v56 = vrot.slane %v1676_v44, 2  ;;  %v4996_v25 = vmul.f32 %v4986_v60, %v4350_v32  ;;  %v1940_v51 = vmul.f32 %v4986_v60, %v4181_v38 }
 0x1ad   : > { %1825 = vrot.lane.b32.xlu0 %v1822_v17, %s3709_s10  ;;  %1603 = vrot.lane.b32.xlu1 %v1600_v8, %s3710_s13  ;;  %v6653_v17 = vrot.slane %v4904_v62, 3  ;;  %v1655_v8 = vmul.f32 %v4724_v58, %v4544_v26  ;;  %v1885_v39 = vsel %vm1764_vm14, %v1883_v52, %v6724_v18  ;;  %v1904_v52 = vrot.slane %v1898_v27, 3 }
 0x1ae   : > { %v6727_v18 = vrot.slane %v4746_v23, 2  ;;  %v6663_v24 = vrot.slane %v4996_v25, 3  ;;  %v1946_v21 = vrot.slane %v1940_v51, 3 }
 0x1af   : > { %v4912_v55 = vpop.permute.xlu1 %1036  ;;  %v4914_v5 = vpop.permute.xlu0 %1146  ;;  %v1864_v58 = vsel %vm1764_vm14, %v1862_v30, %v6653_v17 }
 0x1b0   : > { %v1948_v53 = vsel %vm1764_vm14, %v1946_v21, %v6663_v24 }
 0x1b1   : > { %1846 = vrot.lane.b32.xlu0 %v1843_v29, %s3708_s9  ;;  %1624 = vrot.lane.b32.xlu1 %v1621_v35, %s3710_s13  ;;  %v1662_v29 = vrot.slane %v1655_v8, 2  ;;  %v4950_v35 = vmul.f32 %v4938_v50, %v4350_v32  ;;  %v4963_v8 = vstv %s3434_s18  ;;  %s3451_s18 = sld [smem:[#allocation2 + $0x52]] }
 0x1b2   : > { %v4971_v17 = vmul.f32 %v4963_v8, %v4364_v43  ;;  %v1919_v44 = vmul.f32 %v4963_v8, %v4239_v48 }
 0x1b3   : > { %v4933_v63 = vpop.permute.xlu1 %1064  ;;  %v4935_v2 = vpop.permute.xlu0 %1160 }
 0x1b4   : > { %v1925_v23 = vrot.slane %v1919_v44, 3  ;;  %v6729_v44 = vrot.slane %v4776_v54, 2 }
 0x1b5   : > { %1867 = vrot.lane.b32.xlu0 %v1864_v58, %s3708_s9  ;;  %1645 = vrot.lane.b32.xlu1 %v1642_v4, %s3711_s14  ;;  %v6725_v58 = vrot.slane %v4734_v7, 2 }
 0x1b7   : > { %v4956_v0 = vpop.permute.xlu1 %1092  ;;  %v4958_v30 = vpop.permute.xlu0 %1174  ;;  %v1663_v4 = vsel %vm1477_vm13, %v6725_v58, %v1662_v29  ;;  %v1684_v58 = vsel %vm1477_vm13, %v6727_v18, %v1683_v56  ;;  %v5002_v56 = vstv %s3436_s20  ;;  %s5303_s20 = sld [smem:[#allocation2 + $0x7]] }
 0x1b8   : > { %v1961_v49 = vmul.f32 %v5002_v56, %v4239_v48 }
 0x1b9   : > { %1888 = vrot.lane.b32.xlu0 %v1885_v39, %s3710_s13  ;;  %1666 = vrot.lane.b32.xlu1 %v1663_v4, %s3711_s14  ;;  %v6728_v39 = vrot.slane %v4950_v35, 3  ;;  %v6661_v4 = vrot.slane %v4971_v17, 3 }
 0x1ba   : > { %v1967_v54 = vrot.slane %v1961_v49, 3  ;;  %v6732_v49 = vrot.slane %v4818_v47, 2 }
 0x1bb   : > { %v4979_v7 = vpop.permute.xlu1 %1120  ;;  %v4981_v29 = vpop.permute.xlu0 %1230  ;;  %v1906_v27 = vsel %vm1764_vm14, %v1904_v52, %v6728_v39  ;;  %v5010_v39 = vmul.f32 %v5002_v56, %v4364_v43 }
 0x1bc   : > { %6726 = vst [vmem:[#allocation38_spill] sm:$0xff] %v4979_v7  ;;  %v5098_v7 = vstv %s3442_s26  ;;  %s5411_s26 = sld [smem:[#allocation2 + $0x55]] }
 0x1bd   : > { %1909 = vrot.lane.b32.xlu0 %v1906_v27, %s3710_s13  ;;  %1687 = vrot.lane.b32.xlu1 %v1684_v58, %s3712_s24  ;;  %v1927_v58 = vsel %vm1764_vm14, %v1925_v23, %v6661_v4  ;;  %v1705_v27 = vsel %vm1477_vm13, %v6729_v44, %v1704_v33  ;;  %v5030_v33 = vstv %s3437_s21  ;;  %v1795_v44 = vmul.f32 %v4824_v6, %v4520_v59  ;;  %s5341_s21 = sld [smem:[#allocation2 + $0x53]] }
 0x1be   : > { %v5042_v4 = vmul.f32 %v5030_v33, %v4350_v32  ;;  %v1982_v6 = vmul.f32 %v5030_v33, %v4181_v38 }
 0x1bf   : > { %v5004_v18 = vpop.permute.xlu1 %1022  ;;  %v5006_v52 = vpop.permute.xlu0 %1251  ;;  %v1802_v24 = vrot.slane %v1795_v44, 3 }
 0x1c1   : > { %1930 = vrot.lane.b32.xlu0 %v1927_v58, %s3711_s14  ;;  %1708 = vrot.lane.b32.xlu1 %v1705_v27, %s3712_s24  ;;  %v6730_v58 = vrot.slane %v4788_v31, 2  ;;  %v1746_v27 = vrot.slane %v1739_v22, 2  ;;  %v6731_v31 = vrot.slane %v5010_v39, 3 }
 0x1c3   : > { %v5025_v10 = vpop.permute.xlu1 %1050  ;;  %v5027_v23 = vpop.permute.xlu0 %1272  ;;  %v1726_v51 = vsel %vm1477_vm13, %v6730_v58, %v1725_v34  ;;  %v1969_v34 = vsel %vm1764_vm14, %v1967_v54, %v6731_v31  ;;  %v1747_v58 = vsel %vm1477_vm13, %v6732_v49, %v1746_v27  ;;  %v2003_v54 = vmul.f32 %v5048_v12, %v4239_v48 }
 0x1c4   : > { %v1988_v31 = vrot.slane %v1982_v6, 3  ;;  %v5080_v27 = vstv %s3439_s25  ;;  %v6735_v49 = vrot.slane %v4830_v40, 3  ;;  %s5358_s25 = sld [smem:[#allocation2 + $0x24]] }
 0x1c5   : > { %1951 = vrot.lane.b32.xlu0 %v1948_v53, %s3711_s14  ;;  %1729 = vrot.lane.b32.xlu1 %v1726_v51, %s3713_s27  ;;  %v5061_v53 = vmul.f32 %v5048_v12, %v4364_v43  ;;  %v6668_v51 = vrot.slane %v5042_v4, 3  ;;  %v5092_v37 = vmul.f32 %v5080_v27, %v4350_v32  ;;  %v2009_v44 = vrot.slane %v2003_v54, 3 }
 0x1c6   : > { %v1803_v6 = vsel %vm1764_vm14, %v6735_v49, %v1802_v24  ;;  %v2024_v9 = vmul.f32 %v5080_v27, %v4181_v38  ;;  %v5112_v54 = vmul.f32 %v5098_v7, %v4364_v43  ;;  %v6739_v49 = vrot.slane %v4858_v20, 3 }
 0x1c7   : > { %v5052_v21 = vpop.permute.xlu1 %1078  ;;  %v5054_v22 = vpop.permute.xlu0 %1293  ;;  %v1858_v24 = vmul.f32 %v4892_v28, %v4544_v26  ;;  %v6740_v20 = vstv %s5050_s28  ;;  %v6744_v28 = vstv %s5073_s29 }
 0x1c9   : > { %1972 = vrot.lane.b32.xlu0 %v1969_v34, %s3712_s24  ;;  %1750 = vrot.lane.b32.xlu1 %v1747_v58, %s3713_s27  ;;  %v1990_v34 = vsel %vm1764_vm14, %v1988_v31, %v6668_v51  ;;  %v1823_v58 = vrot.slane %v1816_v11, 3  ;;  %v6738_v31 = vrot.slane %v5061_v53, 3  ;;  %v6669_v51 = vrot.slane %v5092_v37, 3 }
 0x1cb   : > { %v5075_v13 = vpop.permute.xlu1 %1106  ;;  %v5077_v47 = vpop.permute.xlu0 %1314 }
 0x1cc   : > { %6733 = vst [vmem:[#allocation39_spill] sm:$0xff] %v5075_v13  ;;  %6734 = vst [vmem:[#allocation40_spill] sm:$0xff] %v5077_v47  ;;  %v1844_v47 = vrot.slane %v1837_v36, 3 }
 0x1cd   : > { %1993 = vrot.lane.b32.xlu0 %v1990_v34, %s3712_s24  ;;  %1806 = vrot.lane.b32.xlu1 %v1803_v6, %s3709_s10  ;;  %v2011_v34 = vsel %vm1764_vm14, %v2009_v44, %v6738_v31  ;;  %v1824_v6 = vsel %vm1764_vm14, %v6739_v49, %v1823_v58  ;;  %v2080_v44 = vmul.f32 %v5098_v7, %v4239_v48  ;;  %v6743_v31 = vrot.slane %v4875_v61, 3 }
 0x1ce   : > { %v1010_v58 = vmul.f32 %v6740_v20, %v4181_v38 }
 0x1cf   : > { %v5103_v11 = vpop.permute.xlu1 %1134  ;;  %v5105_v40 = vpop.permute.xlu0 %1335  ;;  %v1845_v20 = vsel %vm1764_vm14, %v6743_v31, %v1844_v47  ;;  %v6747_v31 = vrot.slane %v5112_v54, 4 }
 0x1d0   : > { %6736 = vst [vmem:[#allocation41_spill] sm:$0xff] %v5103_v11  ;;  %6737 = vst [vmem:[#allocation42_spill] sm:$0xff] %v5105_v40  ;;  %v2030_v11 = vrot.slane %v2024_v9, 3  ;;  %v1865_v40 = vrot.slane %v1858_v24, 3 }
 0x1d1   : > { %2014 = vrot.lane.b32.xlu0 %v2011_v34, %s3713_s27  ;;  %1827 = vrot.lane.b32.xlu1 %v1824_v6, %s3709_s10  ;;  %v5133_v34 = vstv %s3443_s30  ;;  %v1879_v6 = vmul.f32 %v4910_v1, %v4520_v59  ;;  %v2086_v1 = vrot.slane %v2080_v44, 4  ;;  %v6748_v44 = vrot.slane %v4904_v62, 3  ;;  %s5513_s30 = sld [smem:[#allocation2 + $0x26]] }
 0x1d2   : > { %v2032_v9 = vsel %vm1764_vm14, %v2030_v11, %v6669_v51  ;;  %v2101_v11 = vmul.f32 %v5133_v34, %v4181_v38  ;;  %v5155_v51 = vstv %s5100_s5  ;;  %s5540_s5 = sld [smem:[#allocation2 + $0x57]] }
 0x1d3   : > { %v5128_v49 = vpop.permute.xlu1 %1148  ;;  %v5130_v36 = vpop.permute.xlu0 %1356  ;;  %v2088_v13 = vsel %vm2051_vm15, %v2086_v1, %v6747_v31  ;;  %v2122_v1 = vmul.f32 %v5155_v51, %v4239_v48 }
 0x1d4   : > { %6741 = vst [vmem:[#allocation43_spill] sm:$0xff] %v5128_v49  ;;  %6742 = vst [vmem:[#allocation44_spill] sm:$0xff] %v5130_v36  ;;  %v5145_v49 = vmul.f32 %v5133_v34, %v4350_v32  ;;  %v1004_v36 = vmul.f32 %v6744_v28, %v4239_v48  ;;  %v5166_v28 = vmul.f32 %v5155_v51, %v4364_v43 }
 0x1d5   : > { %2035 = vrot.lane.b32.xlu0 %v2032_v9, %s3713_s27  ;;  %1848 = vrot.lane.b32.xlu1 %v1845_v20, %s3708_s9  ;;  %v1866_v9 = vsel %vm1764_vm14, %v6748_v44, %v1865_v40  ;;  %v6749_v44 = vrot.slane %v4918_v57, 3 }
 0x1d6   : > { %v1012_v61 = vadd.f32 %v1010_v58, %v1004_v36  ;;  %v6670_v20 = vrot.slane %v5145_v49, 4  ;;  %v1886_v58 = vrot.slane %v1879_v6, 3  ;;  %v1900_v36 = vmul.f32 %v4938_v50, %v4544_v26 }
 0x1d7   : > { %v5157_v47 = vpop.permute.xlu1 %1162  ;;  %v5159_v24 = vpop.permute.xlu0 %1377  ;;  %v1921_v6 = vmul.f32 %v4963_v8, %v4520_v59  ;;  %v5186_v50 = vstv %s3445_s6  ;;  %v2128_v8 = vrot.slane %v2122_v1, 4  ;;  %s5551_s6 = sld [smem:[#allocation2 + $0xe]] }
 0x1d8   : > { %6745 = vst [vmem:[#allocation45_spill] sm:$0xff] %v5157_v47  ;;  %6746 = vst [vmem:[#allocation46_spill] sm:$0xff] %v5159_v24  ;;  %v1026_v31 = vadd.f32 %v4803_v19, %v1012_v61  ;;  %v2107_v47 = vrot.slane %v2101_v11, 4  ;;  %v1887_v19 = vsel %vm1764_vm14, %v6749_v44, %v1886_v58  ;;  %v1907_v11 = vrot.slane %v1900_v36, 3 }
 0x1d9   : > { %2091 = vrot.lane.b32.xlu0 %v2088_v13, %s3709_s10  ;;  %1869 = vrot.lane.b32.xlu1 %v1866_v9, %s3708_s9  ;;  %v5196_v61 = vmul.f32 %v5186_v50, %v4350_v32  ;;  %v2143_v40 = vmul.f32 %v5186_v50, %v4181_v38  ;;  %v6751_v58 = vrot.slane %v5166_v28, 4  ;;  %v1928_v44 = vrot.slane %v1921_v6, 3 }
 0x1da   : > { %v2109_v13 = vsel %vm2051_vm15, %v2107_v47, %v6670_v20  ;;  %v1040_v9 = vadd.f32 %v4887_v45, %v1026_v31  ;;  %v5210_v20 = vstv %s3446_s7  ;;  %v1942_v31 = vmul.f32 %v4986_v60, %v4544_v26  ;;  %s5555_s7 = sld [smem:[#allocation2 + $0x27]] }
 0x1db   : > { %v5179_v24 = vpop.permute.xlu1 %1176  ;;  %v5181_v62 = vpop.permute.xlu0 %1398  ;;  %v2130_v36 = vsel %vm2051_vm15, %v2128_v8, %v6751_v58  ;;  %v2149_v8 = vrot.slane %v2143_v40, 4  ;;  %v6754_v60 = vrot.slane %v4971_v17, 3  ;;  %v1963_v45 = vmul.f32 %v5002_v56, %v4520_v59 }
 0x1dc   : > { %v1054_v6 = vadd.f32 %v4826_v14, %v1040_v9  ;;  %v6755_v14 = vrot.slane %v5196_v61, 4  ;;  %v1949_v9 = vrot.slane %v1942_v31, 3 }
 0x1dd   : > { %2112 = vrot.lane.b32.xlu0 %v2109_v13, %s3709_s10  ;;  %1890 = vrot.lane.b32.xlu1 %v1887_v19, %s3710_s13  ;;  %v6752_v13 = vrot.slane %v4950_v35, 3  ;;  %v5220_v19 = vmul.f32 %v5210_v20, %v4364_v43  ;;  %v2164_v35 = vmul.f32 %v5210_v20, %v4239_v48 }
 0x1de   : > { %v2151_v40 = vsel %vm2051_vm15, %v2149_v8, %v6755_v14  ;;  %v1068_v17 = vadd.f32 %v4742_v41, %v1054_v6  ;;  %v1970_v14 = vrot.slane %v1963_v45, 3 }
 0x1df   : > { %v5203_v47 = vpop.permute.xlu1 %1232  ;;  %v5205_v57 = vpop.permute.xlu0 %1419  ;;  %v1908_v1 = vsel %vm1764_vm14, %v6752_v13, %v1907_v11  ;;  %v1929_v13 = vsel %vm1764_vm14, %v6754_v60, %v1928_v44  ;;  %v2170_v56 = vrot.slane %v2164_v35, 4  ;;  %v5251_v60 = vstv %s3448_s11  ;;  %s5585_s11 = sld [smem:[#allocation2 + $0x28]] }
 0x1e0   : > { %6750 = vst [vmem:[#allocation47_spill] sm:$0xff] %v5203_v47  ;;  %v6759_v6 = vrot.slane %v5220_v19, 4  ;;  %v2206_v45 = vmul.f32 %v5251_v60, %v4239_v48 }
 0x1e1   : > { %1911 = vrot.lane.b32.xlu1 %v1908_v1, %s3710_s13  ;;  %2133 = vrot.lane.b32.xlu0 %v2130_v36, %s3708_s9  ;;  %v5236_v1 = vstv %s3447_s8  ;;  %v5259_v36 = vmul.f32 %v5251_v60, %v4364_v43  ;;  %s5581_s8 = sld [smem:[#allocation2 + $0x3f]] }
 0x1e2   : > { %v2185_v44 = vmul.f32 %v5236_v1, %v4181_v38  ;;  %v2172_v35 = vsel %vm2051_vm15, %v2170_v56, %v6759_v6  ;;  %v2005_v6 = vmul.f32 %v5048_v12, %v4520_v59  ;;  %v2212_v12 = vrot.slane %v2206_v45, 4 }
 0x1e3   : > { %v5227_v11 = vpop.permute.xlu1 %1253  ;;  %v5229_v58 = vpop.permute.xlu0 %1440  ;;  %v6672_v56 = vrot.slane %v5259_v36, 4  ;;  %v6765_v45 = vrot.slane %v5042_v4, 3 }
 0x1e4   : > { %6753 = vst [vmem:[#allocation48_spill] sm:$0xff] %v5227_v11  ;;  %v5244_v11 = vmul.f32 %v5236_v1, %v4350_v32  ;;  %v2191_v47 = vrot.slane %v2185_v44, 4 }
 0x1e5   : > { %1932 = vrot.lane.b32.xlu1 %v1929_v13, %s3711_s14  ;;  %2154 = vrot.lane.b32.xlu0 %v2151_v40, %s3708_s9  ;;  %v6758_v13 = vrot.slane %v4996_v25, 3  ;;  %v1082_v25 = vadd.f32 %v4845_v42, %v1068_v17 }
 0x1e6   : > { %v6671_v40 = vrot.slane %v5244_v11, 4 }
 0x1e7   : > { %v5253_v8 = vpop.permute.xlu1 %1274  ;;  %v5255_v31 = vpop.permute.xlu0 %1461  ;;  %v1950_v41 = vsel %vm1764_vm14, %v6758_v13, %v1949_v9 }
 0x1e8   : > { %6756 = vst [vmem:[#allocation49_spill] sm:$0xff] %v5253_v8  ;;  %6757 = vst [vmem:[#allocation50_spill] sm:$0xff] %v5255_v31  ;;  %v1984_v8 = vmul.f32 %v5030_v33, %v4544_v26  ;;  %v5284_v33 = vstv %s3449_s12  ;;  %v2193_v42 = vsel %vm2051_vm15, %v2191_v47, %v6671_v40  ;;  %v2026_v40 = vmul.f32 %v5080_v27, %v4544_v26  ;;  %s5603_s12 = sld [smem:[#allocation2 + $0x58]] }
 0x1e9   : > { %1953 = vrot.lane.b32.xlu1 %v1950_v41, %s3711_s14  ;;  %2175 = vrot.lane.b32.xlu0 %v2172_v35, %s3710_s13  ;;  %v6762_v41 = vrot.slane %v5010_v39, 3  ;;  %v5294_v44 = vmul.f32 %v5284_v33, %v4350_v32  ;;  %v1096_v39 = vadd.f32 %v4761_v15, %v1082_v25  ;;  %v6768_v27 = vrot.slane %v5061_v53, 3 }
 0x1ea   : > { %v1991_v17 = vrot.slane %v1984_v8, 3  ;;  %v5409_v31 = vstv %s5341_s21  ;;  %s5801_s21 = sld [smem:[#allocation2 + $0x5c]] }
 0x1eb   : > { %v5277_v9 = vpop.permute.xlu1 %1295  ;;  %v5279_v13 = vpop.permute.xlu0 %1517  ;;  %v1971_v35 = vsel %vm1764_vm14, %v6762_v41, %v1970_v14  ;;  %v2227_v14 = vmul.f32 %v5284_v33, %v4181_v38  ;;  %v2214_v41 = vsel %vm2051_vm15, %v2212_v12, %v6672_v56  ;;  %v6673_v25 = vrot.slane %v5294_v44, 4 }
 0x1ec   : > { %6760 = vst [vmem:[#allocation51_spill] sm:$0xff] %v5277_v9  ;;  %6761 = vst [vmem:[#allocation52_spill] sm:$0xff] %v5279_v13  ;;  %v1992_v15 = vsel %vm1764_vm14, %v6765_v45, %v1991_v17  ;;  %v2103_v9 = vmul.f32 %v5133_v34, %v4544_v26 }
 0x1ed   : > { %1974 = vrot.lane.b32.xlu1 %v1971_v35, %s3712_s24  ;;  %2196 = vrot.lane.b32.xlu0 %v2193_v42, %s3710_s13  ;;  %v2012_v35 = vrot.slane %v2005_v6, 3  ;;  %v5313_v42 = vstv %s5261_s17  ;;  %v1110_v6 = vadd.f32 %v4868_v46, %v1096_v39  ;;  %v2233_v12 = vrot.slane %v2227_v14, 4  ;;  %s5674_s17 = sld [smem:[#allocation2 + $0x59]] }
 0x1ee   : > { %v2248_v4 = vmul.f32 %v5313_v42, %v4239_v48  ;;  %v2033_v39 = vrot.slane %v2026_v40, 3  ;;  %v6769_v40 = vstv %s5050_s28  ;;  %v5367_v14 = vstv %s5303_s20  ;;  %s5440_s28 = sld [smem:[#allocation2 + $0x25]]  ;;  %s5770_s20 = sld [smem:[#allocation2 + $0x2b]] }
 0x1ef   : > { %v5305_v47 = vpop.permute.xlu1 %1316  ;;  %v5307_v8 = vpop.permute.xlu0 %1538  ;;  %v2013_v56 = vsel %vm1764_vm14, %v6768_v27, %v2012_v35  ;;  %v2235_v46 = vsel %vm2051_vm15, %v2233_v12, %v6673_v25  ;;  %v1124_v35 = vadd.f32 %v4784_v16, %v1110_v6  ;;  %v1011_v12 = vmul.f32 %v6769_v40, %v4350_v32 }
 0x1f0   : > { %6763 = vst [vmem:[#allocation53_spill] sm:$0xff] %v5305_v47  ;;  %6764 = vst [vmem:[#allocation54_spill] sm:$0xff] %v5307_v8  ;;  %v5323_v47 = vmul.f32 %v5313_v42, %v4364_v43  ;;  %v2254_v27 = vrot.slane %v2248_v4, 4  ;;  %v6772_v6 = vstv %s5073_s29  ;;  %v6773_v40 = vrot.slane %v5092_v37, 3  ;;  %s5481_s29 = sld [smem:[#allocation2 + $0x56]] }
 0x1f1   : > { %1995 = vrot.lane.b32.xlu1 %v1992_v15, %s3712_s24  ;;  %2217 = vrot.lane.b32.xlu0 %v2214_v41, %s3711_s14  ;;  %v2082_v15 = vmul.f32 %v5098_v7, %v4520_v59  ;;  %v5339_v41 = vstv %s3451_s18  ;;  %v5356_v7 = vstv %s5298_s19  ;;  %v1005_v4 = vmul.f32 %v6772_v6, %v4364_v43  ;;  %s5694_s18 = sld [smem:[#allocation2 + $0x29]]  ;;  %s5745_s19 = sld [smem:[#allocation2 + $0x5a]] }
 0x1f2   : > { %v5349_v53 = vmul.f32 %v5339_v41, %v4350_v32  ;;  %v2269_v25 = vmul.f32 %v5339_v41, %v4181_v38  ;;  %v5377_v16 = vmul.f32 %v5356_v7, %v4364_v43  ;;  %v6774_v8 = vrot.slane %v5323_v47, 4 }
 0x1f3   : > { %v5330_v17 = vpop.permute.xlu1 %1337  ;;  %v5332_v45 = vpop.permute.xlu0 %1559  ;;  %v5391_v34 = vmul.f32 %v5367_v14, %v4364_v43  ;;  %v2290_v37 = vmul.f32 %v5356_v7, %v4239_v48  ;;  %v1184_v6 = vmul.f32 %v5367_v14, %v4239_v48 }
 0x1f4   : > { %6766 = vst [vmem:[#allocation55_spill] sm:$0xff] %v5330_v17  ;;  %6767 = vst [vmem:[#allocation56_spill] sm:$0xff] %v5332_v45  ;;  %v2034_v45 = vsel %vm1764_vm14, %v6773_v40, %v2033_v39  ;;  %v1138_v39 = vadd.f32 %v4889_v3, %v1124_v35  ;;  %v6674_v13 = vrot.slane %v5377_v16, 4 }
 0x1f5   : > { %2016 = vrot.lane.b32.xlu1 %v2013_v56, %s3713_s27  ;;  %2238 = vrot.lane.b32.xlu0 %v2235_v46, %s3711_s14  ;;  %v2089_v46 = vrot.slane %v2082_v15, 4 }
 0x1f6   : > { %v1152_v3 = vadd.f32 %v4914_v5, %v1138_v39  ;;  %v2296_v5 = vrot.slane %v2290_v37, 4  ;;  %v6779_v37 = vrot.slane %v5145_v49, 4 }
 0x1f7   : > { %v5369_v17 = vpop.permute.xlu1 %1358  ;;  %v5371_v56 = vpop.permute.xlu0 %1580 }
 0x1f8   : > { %6770 = vst [vmem:[#allocation57_spill] sm:$0xff] %v5369_v17  ;;  %6771 = vst [vmem:[#allocation58_spill] sm:$0xff] %v5371_v56  ;;  %v2256_v17 = vsel %vm2051_vm15, %v2254_v27, %v6774_v8  ;;  %v1013_v8 = vadd.f32 %v1011_v12, %v1005_v4  ;;  %v2275_v27 = vrot.slane %v2269_v25, 4  ;;  %v2110_v56 = vrot.slane %v2103_v9, 4 }
 0x1f9   : > { %2037 = vrot.lane.b32.xlu1 %v2034_v45, %s3713_s27  ;;  %2259 = vrot.lane.b32.xlu0 %v2256_v17, %s3712_s24  ;;  %v6776_v45 = vrot.slane %v5112_v54, 4  ;;  %v6777_v25 = vrot.slane %v5349_v53, 4  ;;  %v2124_v12 = vmul.f32 %v5155_v51, %v4520_v59  ;;  %v5421_v54 = vmul.f32 %v5409_v31, %v4350_v32 }
 0x1fa   : > { %v5430_v4 = vstv %s5358_s25  ;;  %v1166_v39 = vadd.f32 %v4935_v2, %v1152_v3  ;;  %v2111_v2 = vsel %vm2051_vm15, %v6779_v37, %v2110_v56  ;;  %v2145_v3 = vmul.f32 %v5186_v50, %v4544_v26  ;;  %s5830_s25 = sld [smem:[#allocation2 + $0x2c]] }
 0x1fb   : > { %v5400_v40 = vpop.permute.xlu1 %1379  ;;  %v5402_v15 = vpop.permute.xlu0 %1601  ;;  %v2090_v17 = vsel %vm2051_vm15, %v6776_v45, %v2089_v46  ;;  %v2277_v35 = vsel %vm2051_vm15, %v2275_v27, %v6777_v25  ;;  %v5425_v46 = vstv %s5351_s22  ;;  %v1027_v27 = vadd.f32 %v5004_v18, %v1013_v8  ;;  %s5821_s22 = sld [smem:[#allocation2 + $0x15]] }
 0x1fc   : > { %6775 = vst [vmem:[#allocation59_spill] sm:$0xff] %v5400_v40  ;;  %v5435_v51 = vmul.f32 %v5425_v46, %v4350_v32  ;;  %v2311_v45 = vmul.f32 %v5409_v31, %v4181_v38  ;;  %v1191_v25 = vrot.slane %v1184_v6, 1  ;;  %v5453_v18 = vmul.f32 %v5430_v4, %v4364_v43 }
 0x1fd   : > { %2093 = vrot.lane.b32.xlu1 %v2090_v17, %s3709_s10  ;;  %2280 = vrot.lane.b32.xlu0 %v2277_v35, %s3712_s24  ;;  %v1180_v8 = vadd.f32 %v4958_v30, %v1166_v39  ;;  %v2298_v6 = vsel %vm2051_vm15, %v2296_v5, %v6674_v13  ;;  %v2131_v9 = vrot.slane %v2124_v12, 4  ;;  %v1202_v49 = vmul.f32 %v5425_v46, %v4181_v38 }
 0x1fe   : > { %v2366_v50 = vmul.f32 %v5430_v4, %v4239_v48  ;;  %v6780_v30 = vrot.slane %v5391_v34, 1  ;;  %v6675_v5 = vrot.slane %v5435_v51, 1  ;;  %v1041_v12 = vadd.f32 %v4912_v55, %v1027_v27 }
 0x1ff   : > { %v5442_v17 = vpop.permute.xlu1 %1400  ;;  %v5444_v35 = vpop.permute.xlu0 %1622  ;;  %v2317_v39 = vrot.slane %v2311_v45, 4  ;;  %v5479_v40 = vstv %s5411_s26  ;;  %v6782_v27 = vrot.slane %v5421_v54, 4  ;;  %s5871_s26 = sld [smem:[#allocation2 + $0x5d]] }
 0x200   : > { %6778 = vst [vmem:[#allocation60_spill] sm:$0xff] %v5442_v17  ;;  %v1193_v56 = vsel %vm1190_vm12, %v1191_v25, %v6780_v30  ;;  %v2166_v17 = vmul.f32 %v5210_v20, %v4520_v59  ;;  %v6781_v30 = vrot.slane %v5166_v28, 4  ;;  %v1055_v20 = vadd.f32 %v5025_v10, %v1041_v12 }
 0x201   : > { %2114 = vrot.lane.b32.xlu1 %v2111_v2, %s3709_s10  ;;  %2301 = vrot.lane.b32.xlu0 %v2298_v6, %s3713_s27  ;;  %v2152_v2 = vrot.slane %v2145_v3, 4  ;;  %v1198_v25 = vadd.f32 %v1193_v56, %v1180_v8  ;;  %v2319_v45 = vsel %vm2051_vm15, %v2317_v39, %v6782_v27  ;;  %v5491_v3 = vmul.f32 %v5479_v40, %v4350_v32 }
 0x202   : > { %v2132_v55 = vsel %vm2051_vm15, %v6781_v30, %v2131_v9  ;;  %v1208_v6 = vrot.slane %v1202_v49, 1  ;;  %v2372_v8 = vrot.slane %v2366_v50, 5  ;;  %v2387_v28 = vmul.f32 %v5479_v40, %v4181_v38 }
 0x203   : > { %v5471_v37 = vpop.permute.xlu1 %1421  ;;  %v5473_v13 = vpop.permute.xlu0 %1643  ;;  %v5499_v9 = vstv %s5440_s28  ;;  %v6784_v49 = vrot.slane %v5196_v61, 4  ;;  %v2173_v27 = vrot.slane %v2166_v17, 4  ;;  %v2187_v10 = vmul.f32 %v5236_v1, %v4544_v26  ;;  %s5891_s28 = sld [smem:[#allocation2 + $0x2d]] }
 0x204   : > { %v1210_v56 = vsel %vm1190_vm12, %v1208_v6, %v6675_v5  ;;  %v6785_v12 = vrot.slane %v5453_v18, 5  ;;  %v5521_v5 = vmul.f32 %v5499_v9, %v4364_v43  ;;  %v1069_v61 = vadd.f32 %v4933_v63, %v1055_v20 }
 0x205   : > { %2135 = vrot.lane.b32.xlu1 %v2132_v55, %s3708_s9  ;;  %2322 = vrot.lane.b32.xlu0 %v2319_v45, %s3713_s27  ;;  %v2153_v55 = vsel %vm2051_vm15, %v6784_v49, %v2152_v2  ;;  %v1215_v50 = vadd.f32 %v1210_v56, %v1198_v25  ;;  %v6678_v45 = vrot.slane %v5491_v3, 5  ;;  %v2393_v1 = vrot.slane %v2387_v28, 5 }
 0x206   : > { %v2374_v6 = vsel %vm787_vm11, %v2372_v8, %v6785_v12  ;;  %v2408_v17 = vmul.f32 %v5499_v9, %v4239_v48  ;;  %v6787_v8 = vrot.slane %v5220_v19, 4  ;;  %v2194_v49 = vrot.slane %v2187_v10, 4 }
 0x207   : > { %v5504_v39 = vpop.permute.xlu1 %1442  ;;  %v5506_v30 = vpop.permute.xlu0 %1664  ;;  %v5538_v12 = vstv %s5481_s29  ;;  %v1236_v63 = vadd.f32 %v4981_v29, %v1215_v50  ;;  %v2395_v20 = vsel %vm787_vm11, %v2393_v1, %v6678_v45  ;;  %v6676_v28 = vrot.slane %v5521_v5, 5  ;;  %s5916_s29 = sld [smem:[#allocation2 + $0x46]] }
 0x208   : > { %6783 = vst [vmem:[#allocation61_spill] sm:$0xff] %v5504_v39  ;;  %v2174_v56 = vsel %vm2051_vm15, %v6787_v8, %v2173_v27  ;;  %v5549_v19 = vmul.f32 %v5538_v12, %v4350_v32  ;;  %v1083_v29 = vadd.f32 %v5052_v21, %v1069_v61  ;;  %v2429_v27 = vmul.f32 %v5538_v12, %v4181_v38 }
 0x209   : > { %2156 = vrot.lane.b32.xlu1 %v2153_v55, %s3708_s9  ;;  %2377 = vrot.lane.b32.xlu0 %v2374_v6, %s3709_s10  ;;  %v2208_v55 = vmul.f32 %v5251_v60, %v4520_v59  ;;  %v2414_v60 = vrot.slane %v2408_v17, 5  ;;  %v6789_v6 = vrot.slane %v5244_v11, 4  ;;  %v1257_v21 = vadd.f32 %v5006_v52, %v1236_v63 }
 0x20a   : > { %v6677_v17 = vrot.slane %v5549_v19, 5  ;;  %v5672_v39 = vstv %s5603_s12  ;;  %s6150_s12 = sld [smem:[#allocation2 + $0x61]] }
 0x20b   : > { %v5528_v2 = vpop.permute.xlu1 %1463  ;;  %v5530_v25 = vpop.permute.xlu0 %1685  ;;  %v2195_v1 = vsel %vm2051_vm15, %v6789_v6, %v2194_v49  ;;  %v2215_v8 = vrot.slane %v2208_v55, 4  ;;  %v2416_v61 = vsel %vm787_vm11, %v2414_v60, %v6676_v28  ;;  %v1278_v52 = vadd.f32 %v5027_v23, %v1257_v21  ;;  %v6794_v21 = vld [vmem:[#allocation40_spill] sm:$0xff] }
 0x20c   : > { %6786 = vst [vmem:[#allocation62_spill] sm:$0xff] %v5528_v2  ;;  %v2435_v49 = vrot.slane %v2429_v27, 5  ;;  %v6792_v6 = vrot.slane %v5259_v36, 4  ;;  %v2250_v28 = vmul.f32 %v5313_v42, %v4520_v59  ;;  %v5601_v23 = vstv %s5540_s5  ;;  %s5979_s5 = sld [smem:[#allocation2 + $0x2e]] }
 0x20d   : > { %2177 = vrot.lane.b32.xlu1 %v2174_v56, %s3710_s13  ;;  %2398 = vrot.lane.b32.xlu0 %v2395_v20, %s3709_s10  ;;  %v2229_v56 = vmul.f32 %v5284_v33, %v4544_v26  ;;  %v5570_v20 = vstv %s5513_s30  ;;  %v1097_v33 = vadd.f32 %v4956_v0, %v1083_v29  ;;  %v1299_v0 = vadd.f32 %v5054_v22, %v1278_v52  ;;  %v6793_v22 = vld [vmem:[#allocation39_spill] sm:$0xff]  ;;  %s5939_s30 = sld [smem:[#allocation2 + $0x5e]] }
 0x20e   : > { %v5579_v11 = vmul.f32 %v5570_v20, %v4364_v43  ;;  %v2450_v55 = vmul.f32 %v5570_v20, %v4239_v48  ;;  %v2437_v29 = vsel %vm787_vm11, %v2435_v49, %v6677_v17  ;;  %v5612_v36 = vmul.f32 %v5601_v23, %v4350_v32 }
 0x20f   : > { %v5560_v10 = vpop.permute.xlu1 %1519  ;;  %v5562_v50 = vpop.permute.xlu0 %1706  ;;  %v5620_v42 = vstv %s5555_s7  ;;  %v1320_v52 = vadd.f32 %v6794_v21, %v1299_v0  ;;  %v2257_v27 = vrot.slane %v2250_v28, 4  ;;  %v5649_v28 = vstv %s5581_s8  ;;  %s6053_s7 = sld [smem:[#allocation2 + $0x2f]]  ;;  %s6079_s8 = sld [smem:[#allocation2 + $0x60]] }
 0x210   : > { %6788 = vst [vmem:[#allocation63_spill] sm:$0xff] %v5560_v10  ;;  %v2456_v49 = vrot.slane %v2450_v55, 5  ;;  %v6799_v55 = vrot.slane %v5579_v11, 5 }
 0x211   : > { %2198 = vrot.lane.b32.xlu1 %v2195_v1, %s3710_s13  ;;  %2419 = vrot.lane.b32.xlu0 %v2416_v61, %s3708_s9  ;;  %v2216_v1 = vsel %vm2051_vm15, %v6792_v6, %v2215_v8  ;;  %v2236_v61 = vrot.slane %v2229_v56, 4  ;;  %v5615_v8 = vstv %s5551_s6  ;;  %v1111_v56 = vadd.f32 %v6793_v22, %v1097_v33  ;;  %v6798_v33 = vld [vmem:[#allocation42_spill] sm:$0xff]  ;;  %s6004_s6 = sld [smem:[#allocation2 + $0x5f]] }
 0x212   : > { %v2471_v6 = vmul.f32 %v5601_v23, %v4181_v38  ;;  %v1341_v22 = vadd.f32 %v6798_v33, %v1320_v52  ;;  %v2458_v0 = vsel %vm787_vm11, %v2456_v49, %v6799_v55  ;;  %v6800_v52 = vld [vmem:[#allocation38_spill] sm:$0xff]  ;;  %v1186_v55 = vmul.f32 %v5367_v14, %v4520_v59 }
 0x213   : > { %v5591_v63 = vpop.permute.xlu1 %1540  ;;  %v5593_v60 = vpop.permute.xlu0 %1727  ;;  %v1125_v49 = vadd.f32 %v6800_v52, %v1111_v56  ;;  %v6804_v56 = vld [vmem:[#allocation46_spill] sm:$0xff]  ;;  %v6805_v14 = vrot.slane %v5612_v36, 5 }
 0x214   : > { %6790 = vst [vmem:[#allocation64_spill] sm:$0xff] %v5591_v63  ;;  %6791 = vst [vmem:[#allocation65_spill] sm:$0xff] %v5593_v60  ;;  %v2271_v63 = vmul.f32 %v5339_v41, %v4544_v26  ;;  %v2492_v41 = vmul.f32 %v5620_v42, %v4239_v48  ;;  %v2477_v21 = vrot.slane %v2471_v6, 5  ;;  %v2292_v60 = vmul.f32 %v5356_v7, %v4520_v59 }
 0x215   : > { %2219 = vrot.lane.b32.xlu1 %v2216_v1, %s3711_s14  ;;  %2440 = vrot.lane.b32.xlu0 %v2437_v29, %s3708_s9  ;;  %v6797_v1 = vrot.slane %v5294_v44, 4  ;;  %v5646_v44 = vmul.f32 %v5615_v8, %v4239_v48 }
 0x216   : > { %v2278_v2 = vrot.slane %v2271_v63, 4  ;;  %v2479_v6 = vsel %vm787_vm11, %v2477_v21, %v6805_v14  ;;  %v5687_v63 = vmul.f32 %v5615_v8, %v4364_v43  ;;  %v1194_v14 = vrot.slane %v1186_v55, 1 }
 0x217   : > { %v5626_v17 = vpop.permute.xlu1 %1561  ;;  %v5628_v45 = vpop.permute.xlu0 %1748  ;;  %v2237_v29 = vsel %vm2051_vm15, %v6797_v1, %v2236_v61  ;;  %v5656_v61 = vstv %s5585_s11  ;;  %v6801_v1 = vld [vmem:[#allocation44_spill] sm:$0xff]  ;;  %v1478_v7 = vrot.slane %v5646_v44, 2  ;;  %v2313_v44 = vmul.f32 %v5409_v31, %v4544_v26  ;;  %s6121_s11 = sld [smem:[#allocation2 + $0x30]] }
 0x218   : > { %6795 = vst [vmem:[#allocation39_spill] sm:$0xff] %v5626_v17  ;;  %6796 = vst [vmem:[#allocation40_spill] sm:$0xff] %v5628_v45  ;;  %v5642_v17 = vmul.f32 %v5620_v42, %v4364_v43  ;;  %v1362_v33 = vadd.f32 %v6801_v1, %v1341_v22  ;;  %v2534_v21 = vmul.f32 %v5656_v61, %v4239_v48  ;;  %v6806_v1 = vld [vmem:[#allocation41_spill] sm:$0xff] }
 0x219   : > { %2240 = vrot.lane.b32.xlu1 %v2237_v29, %s3711_s14  ;;  %2461 = vrot.lane.b32.xlu0 %v2458_v0, %s3710_s13  ;;  %v6803_v29 = vrot.slane %v5323_v47, 4  ;;  %v5683_v47 = vmul.f32 %v5672_v39, %v4350_v32 }
 0x21a   : > { %v1383_v22 = vadd.f32 %v6804_v56, %v1362_v33  ;;  %v1139_v33 = vadd.f32 %v6806_v1, %v1125_v49  ;;  %v2513_v56 = vmul.f32 %v5672_v39, %v4181_v38  ;;  %v5711_v49 = vmul.f32 %v5656_v61, %v4364_v43 }
 0x21b   : > { %v5662_v10 = vpop.permute.xlu1 %1582  ;;  %v5664_v45 = vpop.permute.xlu0 %1804  ;;  %v2258_v0 = vsel %vm2051_vm15, %v6803_v29, %v2257_v27  ;;  %v2498_v27 = vrot.slane %v2492_v41, 5  ;;  %v6809_v41 = vrot.slane %v5349_v53, 4  ;;  %v6811_v31 = vrot.slane %v5642_v17, 5 }
 0x21c   : > { %6802 = vst [vmem:[#allocation42_spill] sm:$0xff] %v5662_v10  ;;  %v1404_v29 = vadd.f32 %v5181_v62, %v1383_v22  ;;  %v2299_v10 = vrot.slane %v2292_v60, 4  ;;  %v6810_v62 = vld [vmem:[#allocation43_spill] sm:$0xff]  ;;  %v1204_v53 = vmul.f32 %v5425_v46, %v4544_v26  ;;  %v1489_v60 = vmul.f32 %v5649_v28, %v4181_v38 }
 0x21d   : > { %2261 = vrot.lane.b32.xlu1 %v2258_v0, %s3712_s24  ;;  %2482 = vrot.lane.b32.xlu0 %v2479_v6, %s3710_s13  ;;  %v2279_v52 = vsel %vm2051_vm15, %v6809_v41, %v2278_v2  ;;  %v1153_v22 = vadd.f32 %v6810_v62, %v1139_v33  ;;  %v2500_v55 = vsel %vm787_vm11, %v2498_v27, %v6811_v31  ;;  %v2519_v41 = vrot.slane %v2513_v56, 5  ;;  %v6814_v56 = vld [vmem:[#allocation50_spill] sm:$0xff] }
 0x21e   : > { %v1425_v1 = vadd.f32 %v5205_v57, %v1404_v29  ;;  %v5726_v33 = vmul.f32 %v5649_v28, %v4350_v32  ;;  %v6812_v57 = vld [vmem:[#allocation45_spill] sm:$0xff]  ;;  %v2320_v62 = vrot.slane %v2313_v44, 4  ;;  %v6813_v2 = vrot.slane %v5377_v16, 4 }
 0x21f   : > { %v5702_v0 = vpop.permute.xlu1 %1603  ;;  %v5704_v6 = vpop.permute.xlu0 %1825  ;;  %v1167_v27 = vadd.f32 %v6812_v57, %v1153_v22  ;;  %v6815_v22 = vrot.slane %v5683_v47, 5  ;;  %v5762_v57 = vstv %s5694_s18  ;;  %s3441_s18 = sld [smem:[#allocation2 + $0x4d]] }
 0x220   : > { %6807 = vst [vmem:[#allocation38_spill] sm:$0xff] %v5702_v0  ;;  %6808 = vst [vmem:[#allocation44_spill] sm:$0xff] %v5704_v6  ;;  %v1446_v29 = vadd.f32 %v5229_v58, %v1425_v1  ;;  %v2300_v0 = vsel %vm2051_vm15, %v6813_v2, %v2299_v10  ;;  %v6680_v6 = vrot.slane %v5711_v49, 5  ;;  %v6816_v10 = vrot.slane %v5391_v34, 1 }
 0x221   : > { %2282 = vrot.lane.b32.xlu1 %v2279_v52, %s3712_s24  ;;  %2503 = vrot.lane.b32.xlu0 %v2500_v55, %s3711_s14  ;;  %v2368_v52 = vmul.f32 %v5430_v4, %v4520_v59  ;;  %v5743_v55 = vstv %s5674_s17  ;;  %v1181_v58 = vadd.f32 %v5179_v24, %v1167_v27  ;;  %v2521_v1 = vsel %vm787_vm11, %v2519_v41, %v6815_v22  ;;  %s3440_s17 = sld [smem:[#allocation2 + $0x1c]] }
 0x222   : > { %v1467_v44 = vadd.f32 %v6814_v56, %v1446_v29  ;;  %v5754_v16 = vmul.f32 %v5743_v55, %v4350_v32  ;;  %v1195_v4 = vsel %vm1190_vm12, %v6816_v10, %v1194_v14  ;;  %v1495_v2 = vrot.slane %v1489_v60, 2 }
 0x223   : > { %v5732_v46 = vpop.permute.xlu1 %1624  ;;  %v5734_v31 = vpop.permute.xlu0 %1846  ;;  %v2540_v24 = vrot.slane %v2534_v21, 5  ;;  %v1211_v27 = vrot.slane %v1204_v53, 1  ;;  %v6817_v29 = vrot.slane %v5687_v63, 2  ;;  %v2555_v34 = vmul.f32 %v5743_v55, %v4181_v38 }
 0x224   : > { %v6818_v21 = vrot.slane %v5421_v54, 4  ;;  %v2375_v53 = vrot.slane %v2368_v52, 5  ;;  %v2389_v22 = vmul.f32 %v5479_v40, %v4544_v26  ;;  %v6679_v56 = vrot.slane %v5754_v16, 5 }
 0x225   : > { %2303 = vrot.lane.b32.xlu1 %v2300_v0, %s3713_s27  ;;  %2524 = vrot.lane.b32.xlu0 %v2521_v1, %s3711_s14  ;;  %v1480_v41 = vsel %vm1477_vm13, %v1478_v7, %v6817_v29  ;;  %v5783_v7 = vmul.f32 %v5762_v57, %v4364_v43  ;;  %v1199_v1 = vadd.f32 %v1195_v4, %v1181_v58  ;;  %v6819_v54 = vrot.slane %v5435_v51, 1 }
 0x226   : > { %v2321_v60 = vsel %vm2051_vm15, %v6818_v21, %v2320_v62  ;;  %v1485_v10 = vadd.f32 %v1480_v41, %v1467_v44  ;;  %v2542_v29 = vsel %vm787_vm11, %v2540_v24, %v6680_v6  ;;  %v2576_v40 = vmul.f32 %v5762_v57, %v4239_v48 }
 0x227   : > { %v5772_v14 = vpop.permute.xlu1 %1645  ;;  %v5774_v0 = vpop.permute.xlu0 %1867  ;;  %v1212_v62 = vsel %vm1190_vm12, %v6819_v54, %v1211_v27  ;;  %v6820_v52 = vrot.slane %v5726_v33, 2  ;;  %v2561_v44 = vrot.slane %v2555_v34, 5  ;;  %v2410_v4 = vmul.f32 %v5499_v9, %v4520_v59 }
 0x228   : > { %v6822_v21 = vrot.slane %v5453_v18, 5  ;;  %v2396_v27 = vrot.slane %v2389_v22, 5  ;;  %v2582_v18 = vrot.slane %v2576_v40, 5  ;;  %v5828_v22 = vstv %s5770_s20  ;;  %s3488_s20 = sshll.u32 %s6934_s16, 8 }
 0x229   : > { %2324 = vrot.lane.b32.xlu1 %v2321_v60, %s3713_s27  ;;  %2545 = vrot.lane.b32.xlu0 %v2542_v29, %s3712_s24  ;;  %v1497_v58 = vsel %vm1477_vm13, %v1495_v2, %v6820_v52  ;;  %v6681_v60 = vrot.slane %v5783_v7, 5  ;;  %v5812_v29 = vstv %s5745_s19  ;;  %v1216_v2 = vadd.f32 %v1212_v62, %v1199_v1  ;;  %s6495_s19 = scalar_lea.vmem %s6621_s3, %s3486_s23 }
 0x22a   : > { %v2376_v51 = vsel %vm787_vm11, %v6822_v21, %v2375_v53  ;;  %v1502_v34 = vadd.f32 %v1497_v58, %v1485_v10  ;;  %v2563_v9 = vsel %vm787_vm11, %v2561_v44, %v6679_v56  ;;  %v5819_v54 = vmul.f32 %v5812_v29, %v4350_v32  ;;  %v6825_v21 = vld [vmem:[#allocation47_spill] sm:$0xff] }
 0x22b   : > { %v5803_v24 = vpop.permute.xlu1 %1666  ;;  %v5805_v41 = vpop.permute.xlu0 %1888  ;;  %v2597_v53 = vmul.f32 %v5812_v29, %v4181_v38  ;;  %v6824_v62 = vrot.slane %v5491_v3, 5  ;;  %v2584_v40 = vsel %vm787_vm11, %v2582_v18, %v6681_v60  ;;  %v2417_v58 = vrot.slane %v2410_v4, 5 }
 0x22c   : > { %6821 = vst [vmem:[#allocation46_spill] sm:$0xff] %v5803_v24  ;;  %v2431_v44 = vmul.f32 %v5538_v12, %v4544_v26  ;;  %v6682_v6 = vrot.slane %v5819_v54, 5  ;;  %v2653_v4 = vmul.f32 %v5828_v22, %v4239_v48  ;;  %v5856_v12 = vstv %s5801_s21 }
 0x22d   : > { %2379 = vrot.lane.b32.xlu1 %v2376_v51, %s3709_s10  ;;  %2566 = vrot.lane.b32.xlu0 %v2563_v9, %s3712_s24  ;;  %v2397_v52 = vsel %vm787_vm11, %v6824_v62, %v2396_v27  ;;  %v1237_v51 = vadd.f32 %v6825_v21, %v1216_v2  ;;  %v6826_v9 = vld [vmem:[#allocation52_spill] sm:$0xff]  ;;  %v2603_v3 = vrot.slane %v2597_v53, 5  ;;  %v5869_v53 = vmul.f32 %v5856_v12, %v4350_v32 }
 0x22e   : > { %v1523_v56 = vadd.f32 %v6826_v9, %v1502_v34  ;;  %v6829_v34 = vrot.slane %v5521_v5, 5  ;;  %v2438_v62 = vrot.slane %v2431_v44, 5  ;;  %v6831_v9 = vld [vmem:[#allocation54_spill] sm:$0xff]  ;;  %v5880_v44 = vstv %s5821_s22  ;;  %s6505_s22 = scalar_lea.vmem %s6622_s4, %s3488_s20 }
 0x22f   : > { %v5832_v1 = vpop.permute.xlu1 %1687  ;;  %v5834_v10 = vpop.permute.xlu0 %1909  ;;  %v2605_v5 = vsel %vm787_vm11, %v2603_v3, %v6682_v6  ;;  %v6683_v24 = vrot.slane %v5869_v53, 6 }
 0x230   : > { %6823 = vst [vmem:[#allocation41_spill] sm:$0xff] %v5832_v1  ;;  %v5849_v1 = vmul.f32 %v5828_v22, %v4364_v43  ;;  %v2418_v18 = vsel %vm787_vm11, %v6829_v34, %v2417_v58  ;;  %v1544_v60 = vadd.f32 %v6831_v9, %v1523_v56  ;;  %v6832_v34 = vld [vmem:[#allocation49_spill] sm:$0xff]  ;;  %v2659_v9 = vrot.slane %v2653_v4, 6 }
 0x231   : > { %2400 = vrot.lane.b32.xlu1 %v2397_v52, %s3709_s10  ;;  %2587 = vrot.lane.b32.xlu0 %v2584_v40, %s3713_s27  ;;  %v2452_v52 = vmul.f32 %v5570_v20, %v4520_v59  ;;  %v6830_v40 = vld [vmem:[#allocation48_spill] sm:$0xff]  ;;  %v2674_v20 = vmul.f32 %v5856_v12, %v4181_v38 }
 0x232   : > { %v1258_v21 = vadd.f32 %v6830_v40, %v1237_v51  ;;  %v6833_v40 = vld [vmem:[#allocation56_spill] sm:$0xff] }
 0x233   : > { %v5858_v27 = vpop.permute.xlu1 %1708  ;;  %v5860_v2 = vpop.permute.xlu0 %1930  ;;  %v1565_v56 = vadd.f32 %v6833_v40, %v1544_v60  ;;  %v2459_v58 = vrot.slane %v2452_v52, 5  ;;  %v6837_v60 = vld [vmem:[#allocation51_spill] sm:$0xff] }
 0x234   : > { %6827 = vst [vmem:[#allocation43_spill] sm:$0xff] %v5858_v27  ;;  %6828 = vst [vmem:[#allocation45_spill] sm:$0xff] %v5860_v2  ;;  %v1279_v51 = vadd.f32 %v6832_v34, %v1258_v21  ;;  %v5889_v27 = vstv %s5830_s25  ;;  %v2473_v21 = vmul.f32 %v5601_v23, %v4544_v26  ;;  %v6838_v34 = vld [vmem:[#allocation58_spill] sm:$0xff]  ;;  %v6839_v2 = vrot.slane %v5849_v1, 6 }
 0x235   : > { %2421 = vrot.lane.b32.xlu1 %v2418_v18, %s3708_s9  ;;  %2608 = vrot.lane.b32.xlu0 %v2605_v5, %s3713_s27  ;;  %v6836_v18 = vrot.slane %v5549_v19, 5  ;;  %v1586_v40 = vadd.f32 %v6838_v34, %v1565_v56  ;;  %v5910_v19 = vmul.f32 %v5889_v27, %v4364_v43  ;;  %v2680_v23 = vrot.slane %v2674_v20, 6 }
 0x236   : > { %v1300_v4 = vadd.f32 %v6837_v60, %v1279_v51  ;;  %v2695_v52 = vmul.f32 %v5889_v27, %v4239_v48  ;;  %v6840_v51 = vld [vmem:[#allocation53_spill] sm:$0xff]  ;;  %v6841_v34 = vrot.slane %v5579_v11, 5 }
 0x237   : > { %v5893_v3 = vpop.permute.xlu1 %1729  ;;  %v5895_v6 = vpop.permute.xlu0 %1951  ;;  %v2439_v5 = vsel %vm787_vm11, %v6836_v18, %v2438_v62  ;;  %v5914_v62 = vmul.f32 %v5880_v44, %v4239_v48  ;;  %v2682_v20 = vsel %vm2624_vm1, %v2680_v23, %v6683_v24 }
 0x238   : > { %6834 = vst [vmem:[#allocation50_spill] sm:$0xff] %v5893_v3  ;;  %6835 = vst [vmem:[#allocation47_spill] sm:$0xff] %v5895_v6  ;;  %v2661_v3 = vsel %vm2624_vm1, %v2659_v9, %v6839_v2  ;;  %v2494_v2 = vmul.f32 %v5620_v42, %v4520_v59  ;;  %v1321_v56 = vadd.f32 %v6840_v51, %v1300_v4  ;;  %v5937_v6 = vstv %s5871_s26  ;;  %v6842_v42 = vld [vmem:[#allocation55_spill] sm:$0xff] }
 0x239   : > { %2442 = vrot.lane.b32.xlu1 %v2439_v5, %s3708_s9  ;;  %2664 = vrot.lane.b32.xlu0 %v2661_v3, %s3709_s10  ;;  %v1607_v9 = vadd.f32 %v5402_v15, %v1586_v40  ;;  %v2460_v5 = vsel %vm787_vm11, %v6841_v34, %v2459_v58  ;;  %v2480_v3 = vrot.slane %v2473_v21, 5  ;;  %v6684_v40 = vrot.slane %v5910_v19, 6 }
 0x23a   : > { %v1342_v15 = vadd.f32 %v6842_v42, %v1321_v56  ;;  %v5946_v11 = vmul.f32 %v5937_v6, %v4350_v32  ;;  %v5950_v58 = vmul.f32 %v5615_v8, %v4520_v59  ;;  %v2701_v23 = vrot.slane %v2695_v52, 6  ;;  %v6843_v56 = vld [vmem:[#allocation57_spill] sm:$0xff] }
 0x23b   : > { %v5926_v18 = vpop.permute.xlu1 %1750  ;;  %v5928_v60 = vpop.permute.xlu0 %1972  ;;  %v1628_v4 = vadd.f32 %v5444_v35, %v1607_v9  ;;  %v2501_v51 = vrot.slane %v2494_v2, 5  ;;  %v2716_v34 = vmul.f32 %v5937_v6, %v4181_v38  ;;  %v5960_v42 = vstv %s5891_s28 }
 0x23c   : > { %v1363_v35 = vadd.f32 %v6843_v56, %v1342_v15  ;;  %v5964_v8 = vmul.f32 %v5649_v28, %v4544_v26  ;;  %v6845_v52 = vrot.slane %v5612_v36, 5  ;;  %v6846_v15 = vld [vmem:[#allocation59_spill] sm:$0xff]  ;;  %v2703_v56 = vsel %vm2624_vm1, %v2701_v23, %v6684_v40 }
 0x23d   : > { %2463 = vrot.lane.b32.xlu1 %v2460_v5, %s3710_s13  ;;  %2685 = vrot.lane.b32.xlu0 %v2682_v20, %s3709_s10  ;;  %v1649_v9 = vadd.f32 %v5473_v13, %v1628_v4  ;;  %v2515_v13 = vmul.f32 %v5672_v39, %v4544_v26  ;;  %v5977_v20 = vmul.f32 %v5960_v42, %v4364_v43  ;;  %v2722_v40 = vrot.slane %v2716_v34, 6 }
 0x23e   : > { %v2481_v2 = vsel %vm787_vm11, %v6845_v52, %v2480_v3  ;;  %v1384_v28 = vadd.f32 %v6846_v15, %v1363_v35  ;;  %v1481_v3 = vrot.slane %v5950_v58, 2  ;;  %v5990_v39 = vmul.f32 %v5880_v44, %v4364_v43  ;;  %v6847_v35 = vld [vmem:[#allocation60_spill] sm:$0xff] }
 0x23f   : > { %v5966_v24 = vpop.permute.xlu1 %1806  ;;  %v5968_v5 = vpop.permute.xlu0 %1993  ;;  %v1670_v4 = vadd.f32 %v5506_v30, %v1649_v9  ;;  %v5993_v52 = vstv %s5916_s29  ;;  %v2737_v30 = vmul.f32 %v5960_v42, %v4239_v48  ;;  %v6848_v58 = vrot.slane %v5642_v17, 5 }
 0x240   : > { %6844 = vst [vmem:[#allocation52_spill] sm:$0xff] %v5966_v24  ;;  %v1405_v23 = vadd.f32 %v6847_v35, %v1384_v28  ;;  %v2536_v24 = vmul.f32 %v5656_v61, %v4520_v59  ;;  %v6014_v28 = vstv %s5939_s30  ;;  %v1776_v61 = vmul.f32 %v5993_v52, %v4181_v38 }
 0x241   : > { %2484 = vrot.lane.b32.xlu1 %v2481_v2, %s3710_s13  ;;  %2706 = vrot.lane.b32.xlu0 %v2703_v56, %s3708_s9  ;;  %v1691_v9 = vadd.f32 %v5530_v25, %v1670_v4  ;;  %v2502_v15 = vsel %vm787_vm11, %v6848_v58, %v2501_v51  ;;  %v2522_v2 = vrot.slane %v2515_v13, 5  ;;  %v6850_v51 = vrot.slane %v5946_v11, 6 }
 0x242   : > { %v1426_v25 = vadd.f32 %v5471_v37, %v1405_v23  ;;  %v6023_v4 = vmul.f32 %v6014_v28, %v4350_v32  ;;  %v6030_v35 = vmul.f32 %v5993_v52, %v4350_v32  ;;  %v2743_v37 = vrot.slane %v2737_v30, 6  ;;  %v6852_v23 = vld [vmem:[#allocation65_spill] sm:$0xff] }
 0x243   : > { %v6006_v21 = vpop.permute.xlu1 %1827  ;;  %v6008_v36 = vpop.permute.xlu0 %2014  ;;  %v1712_v17 = vadd.f32 %v5562_v50, %v1691_v9  ;;  %v2724_v34 = vsel %vm2624_vm1, %v2722_v40, %v6850_v51  ;;  %v6851_v50 = vld [vmem:[#allocation61_spill] sm:$0xff]  ;;  %v2758_v58 = vmul.f32 %v6014_v28, %v4181_v38  ;;  %v2557_v51 = vmul.f32 %v5743_v55, %v4544_v26 }
 0x244   : > { %6849 = vst [vmem:[#allocation48_spill] sm:$0xff] %v6006_v21  ;;  %v1447_v40 = vadd.f32 %v6851_v50, %v1426_v25  ;;  %v6855_v21 = vrot.slane %v5683_v47, 5  ;;  %v6856_v30 = vrot.slane %v5977_v20, 6  ;;  %v6857_v50 = vld [vmem:[#allocation62_spill] sm:$0xff] }
 0x245   : > { %2505 = vrot.lane.b32.xlu1 %v2502_v15, %s3711_s14  ;;  %2727 = vrot.lane.b32.xlu0 %v2724_v34, %s3708_s9  ;;  %v1733_v9 = vadd.f32 %v6852_v23, %v1712_v17  ;;  %v2543_v34 = vrot.slane %v2536_v24, 5  ;;  %v6051_v17 = vstv %s5979_s5  ;;  %v6858_v23 = vld [vmem:[#allocation40_spill] sm:$0xff]  ;;  %v1498_v24 = vrot.slane %v5964_v8, 2 }
 0x246   : > { %v2523_v15 = vsel %vm787_vm11, %v6855_v21, %v2522_v2  ;;  %v2745_v25 = vsel %vm2624_vm1, %v2743_v37, %v6856_v30  ;;  %v1468_v55 = vadd.f32 %v6857_v50, %v1447_v40  ;;  %v6060_v47 = vmul.f32 %v6051_v17, %v4364_v43 }
 0x247   : > { %v6040_v13 = vpop.permute.xlu1 %1848  ;;  %v6042_v56 = vpop.permute.xlu0 %2035  ;;  %v6859_v21 = vrot.slane %v5687_v63, 2  ;;  %v6860_v37 = vrot.slane %v5990_v39, 3  ;;  %v6861_v30 = vrot.slane %v5914_v62, 3  ;;  %v2764_v50 = vrot.slane %v2758_v58, 6 }
 0x248   : > { %6853 = vst [vmem:[#allocation54_spill] sm:$0xff] %v6040_v13  ;;  %6854 = vst [vmem:[#allocation49_spill] sm:$0xff] %v6042_v56  ;;  %v1754_v13 = vadd.f32 %v6858_v23, %v1733_v9  ;;  %v6686_v56 = vrot.slane %v6023_v4, 6  ;;  %v2564_v23 = vrot.slane %v2557_v51, 5  ;;  %v2779_v63 = vmul.f32 %v6051_v17, %v4239_v48 }
 0x249   : > { %v1482_v2 = vsel %vm1477_vm13, %v6859_v21, %v1481_v3  ;;  %v1767_v40 = vsel %vm1764_vm14, %v6861_v30, %v6860_v37  ;;  %2526 = vrot.lane.b32.xlu1 %v2523_v15, %s3711_s14  ;;  %2748 = vrot.lane.b32.xlu0 %v2745_v25, %s3710_s13  ;;  %v6077_v3 = vstv %s6004_s6  ;;  %v1782_v8 = vrot.slane %v1776_v61, 3 }
 0x24a   : > { %v6862_v37 = vrot.slane %v5711_v49, 5  ;;  %v2578_v58 = vmul.f32 %v5762_v57, %v4520_v59  ;;  %v6092_v51 = vmul.f32 %v6077_v3, %v4350_v32  ;;  %v1486_v25 = vadd.f32 %v1482_v2, %v1468_v55 }
 0x24b   : > { %v6081_v21 = vpop.permute.xlu1 %1869  ;;  %v6083_v62 = vpop.permute.xlu0 %2091  ;;  %v1772_v30 = vadd.f32 %v1767_v40, %v1754_v13  ;;  %v2766_v61 = vsel %vm2624_vm1, %v2764_v50, %v6686_v56  ;;  %v6685_v9 = vrot.slane %v6060_v47, 6  ;;  %v6863_v49 = vrot.slane %v5726_v33, 2 }
 0x24c   : > { %v2544_v15 = vsel %vm787_vm11, %v6862_v37, %v2543_v34  ;;  %v6864_v57 = vrot.slane %v6030_v35, 3  ;;  %v6865_v13 = vrot.slane %v5754_v16, 5  ;;  %v2785_v40 = vrot.slane %v2779_v63, 6 }
 0x24d   : > { %v1499_v34 = vsel %vm1477_vm13, %v6863_v49, %v1498_v24  ;;  %2547 = vrot.lane.b32.xlu1 %v2544_v15, %s3712_s24  ;;  %2769 = vrot.lane.b32.xlu0 %v2766_v61, %s3710_s13  ;;  %v2800_v50 = vmul.f32 %v6077_v3, %v4181_v38  ;;  %v2585_v24 = vrot.slane %v2578_v58, 5  ;;  %v6687_v15 = vrot.slane %v6092_v51, 6 }
 0x24e   : > { %v1784_v55 = vsel %vm1764_vm14, %v1782_v8, %v6864_v57  ;;  %v2565_v2 = vsel %vm787_vm11, %v6865_v13, %v2564_v23  ;;  %v2599_v61 = vmul.f32 %v5812_v29, %v4544_v26  ;;  %v6119_v8 = vstv %s6053_s7 }
 0x24f   : > { %v6111_v37 = vpop.permute.xlu1 %1890  ;;  %v6113_v33 = vpop.permute.xlu0 %2112  ;;  %v1503_v16 = vadd.f32 %v1499_v34, %v1486_v25  ;;  %v1789_v23 = vadd.f32 %v1784_v55, %v1772_v30  ;;  %v2787_v63 = vsel %vm2624_vm1, %v2785_v40, %v6685_v9  ;;  %v6128_v49 = vmul.f32 %v6119_v8, %v4364_v43 }
 0x250   : > { %v2806_v58 = vrot.slane %v2800_v50, 6  ;;  %v2821_v29 = vmul.f32 %v6119_v8, %v4239_v48  ;;  %v2655_v25 = vmul.f32 %v5828_v22, %v4520_v59  ;;  %v6137_v30 = vstv %s6079_s8  ;;  %v6867_v50 = vld [vmem:[#allocation63_spill] sm:$0xff] }
 0x251   : > { %2568 = vrot.lane.b32.xlu1 %v2565_v2, %s3712_s24  ;;  %2790 = vrot.lane.b32.xlu0 %v2787_v63, %s3711_s14  ;;  %v6866_v55 = vrot.slane %v5783_v7, 5  ;;  %v2606_v2 = vrot.slane %v2599_v61, 5  ;;  %v6148_v40 = vmul.f32 %v6137_v30, %v4350_v32  ;;  %v1524_v22 = vadd.f32 %v6867_v50, %v1503_v16  ;;  %v6871_v7 = vld [vmem:[#allocation44_spill] sm:$0xff] }
 0x252   : > { %v1810_v63 = vadd.f32 %v5664_v45, %v1789_v23  ;;  %v2808_v9 = vsel %vm2624_vm1, %v2806_v58, %v6687_v15  ;;  %v2827_v61 = vrot.slane %v2821_v29, 6  ;;  %v6869_v45 = vrot.slane %v5819_v54, 5 }
 0x253   : > { %v6139_v34 = vpop.permute.xlu1 %1911  ;;  %v6141_v57 = vpop.permute.xlu0 %2133  ;;  %v2586_v13 = vsel %vm787_vm11, %v6866_v55, %v2585_v24  ;;  %v2842_v24 = vmul.f32 %v6137_v30, %v4181_v38  ;;  %v2662_v55 = vrot.slane %v2655_v25, 6  ;;  %v6688_v58 = vrot.slane %v6148_v40, 6 }
 0x254   : > { %v2607_v23 = vsel %vm787_vm11, %v6869_v45, %v2606_v2  ;;  %v6173_v50 = vstv %s6121_s11  ;;  %v1831_v29 = vadd.f32 %v6871_v7, %v1810_v63  ;;  %v6872_v25 = vrot.slane %v6128_v49, 6  ;;  %v6873_v2 = vld [vmem:[#allocation39_spill] sm:$0xff] }
 0x255   : > { %2589 = vrot.lane.b32.xlu1 %v2586_v13, %s3713_s27  ;;  %2811 = vrot.lane.b32.xlu0 %v2808_v9, %s3711_s14  ;;  %v2676_v13 = vmul.f32 %v5856_v12, %v4544_v26  ;;  %v6870_v9 = vld [vmem:[#allocation64_spill] sm:$0xff]  ;;  %v6182_v54 = vmul.f32 %v6173_v50, %v4364_v43  ;;  %v2848_v12 = vrot.slane %v2842_v24, 6  ;;  %v2863_v7 = vmul.f32 %v6173_v50, %v4239_v48 }
 0x256   : > { %v1545_v15 = vadd.f32 %v6870_v9, %v1524_v22  ;;  %v1852_v22 = vadd.f32 %v5734_v31, %v1831_v29  ;;  %v6874_v9 = vrot.slane %v5849_v1, 6  ;;  %v6203_v31 = vstv %s6150_s12  ;;  %v6875_v1 = vld [vmem:[#allocation42_spill] sm:$0xff] }
 0x257   : > { %v6162_v56 = vpop.permute.xlu1 %1932  ;;  %v6164_v16 = vpop.permute.xlu0 %2154  ;;  %v2683_v24 = vrot.slane %v2676_v13, 6  ;;  %v6689_v29 = vrot.slane %v6182_v54, 6  ;;  %v6876_v13 = vld [vmem:[#allocation38_spill] sm:$0xff] }
 0x258   : > { %6868 = vst [vmem:[#allocation56_spill] sm:$0xff] %v6162_v56  ;;  %v2829_v56 = vsel %vm2624_vm1, %v2827_v61, %v6872_v25  ;;  %v1566_v45 = vadd.f32 %v6873_v2, %v1545_v15  ;;  %v2663_v63 = vsel %vm2624_vm1, %v6874_v9, %v2662_v55  ;;  %v2697_v15 = vmul.f32 %v5889_v27, %v4520_v59 }
 0x259   : > { %2610 = vrot.lane.b32.xlu1 %v2607_v23, %s3713_s27  ;;  %2832 = vrot.lane.b32.xlu0 %v2829_v56, %s3712_s24  ;;  %v2850_v56 = vsel %vm2624_vm1, %v2848_v12, %v6688_v58  ;;  %v1873_v55 = vadd.f32 %v5774_v0, %v1852_v22  ;;  %v6210_v2 = vmul.f32 %v6203_v31, %v4350_v32  ;;  %v2869_v9 = vrot.slane %v2863_v7, 6 }
 0x25a   : > { %v1587_v23 = vadd.f32 %v6875_v1, %v1566_v45  ;;  %v2884_v45 = vmul.f32 %v6203_v31, %v4181_v38  ;;  %v6877_v1 = vrot.slane %v5869_v53, 6 }
 0x25b   : > { %v6193_v61 = vpop.permute.xlu1 %1953  ;;  %v6195_v25 = vpop.permute.xlu0 %2175  ;;  %v1894_v27 = vadd.f32 %v5805_v41, %v1873_v55  ;;  %v2871_v7 = vsel %vm2624_vm1, %v2869_v9, %v6689_v29  ;;  %v2891_v55 = vrot.slane %v6210_v2, 6  ;;  %v6880_v9 = vld [vmem:[#allocation46_spill] sm:$0xff] }
 0x25c   : > { %v1608_v12 = vadd.f32 %v6876_v13, %v1587_v23  ;;  %v2684_v58 = vsel %vm2624_vm1, %v6877_v1, %v2683_v24  ;;  %v6878_v24 = vld [vmem:[#allocation45_spill] sm:$0xff] }
 0x25d   : > { %2666 = vrot.lane.b32.xlu1 %v2663_v63, %s3709_s10  ;;  %2853 = vrot.lane.b32.xlu0 %v2850_v56, %s3712_s24  ;;  %v2704_v63 = vrot.slane %v2697_v15, 6  ;;  %v2718_v56 = vmul.f32 %v5937_v6, %v4544_v26  ;;  %v1915_v41 = vadd.f32 %v5834_v10, %v1894_v27  ;;  %v2890_v6 = vrot.slane %v2884_v45, 6 }
 0x25e   : > { %v1629_v23 = vadd.f32 %v5732_v46, %v1608_v12  ;;  %v6879_v10 = vrot.slane %v5910_v19, 6  ;;  %v2739_v45 = vmul.f32 %v5960_v42, %v4520_v59 }
 0x25f   : > { %v6218_v0 = vpop.permute.xlu1 %1974  ;;  %v6220_v22 = vpop.permute.xlu0 %2196  ;;  %v1936_v15 = vadd.f32 %v6878_v24, %v1915_v41  ;;  %v2725_v27 = vrot.slane %v2718_v56, 6  ;;  %v6255_v56 = vstv %s3440_s17  ;;  %v1760_v41 = vmul.f32 %v5880_v44, %v4520_v59 }
 0x260   : > { %v1650_v53 = vadd.f32 %v5772_v14, %v1629_v23  ;;  %v2705_v12 = vsel %vm2624_vm1, %v6879_v10, %v2704_v63  ;;  %v2892_v14 = vsel %vm2624_vm1, %v2890_v6, %v2891_v55  ;;  %v6882_v23 = vld [vmem:[#allocation41_spill] sm:$0xff]  ;;  %v2760_v24 = vmul.f32 %v6014_v28, %v4544_v26 }
 0x261   : > { %2687 = vrot.lane.b32.xlu1 %v2684_v58, %s3709_s10  ;;  %2874 = vrot.lane.b32.xlu0 %v2871_v7, %s3713_s27  ;;  %v6881_v58 = vld [vmem:[#allocation47_spill] sm:$0xff]  ;;  %v6261_v7 = vmul.f32 %v6255_v56, %v4364_v43  ;;  %v2746_v44 = vrot.slane %v2739_v45, 6  ;;  %s3455_s10 = sld [smem:[#allocation2 + $0x54]] }
 0x262   : > { %v1671_v1 = vadd.f32 %v6880_v9, %v1650_v53  ;;  %v1957_v29 = vadd.f32 %v6881_v58, %v1936_v15  ;;  %v6883_v15 = vld [vmem:[#allocation43_spill] sm:$0xff]  ;;  %v6885_v9 = vld [vmem:[#allocation50_spill] sm:$0xff]  ;;  %v1778_v58 = vmul.f32 %v5993_v52, %v4544_v26 }
 0x263   : > { %v6237_v13 = vpop.permute.xlu1 %1995  ;;  %v6239_v46 = vpop.permute.xlu0 %2217 }
 0x264   : > { %v1692_v19 = vadd.f32 %v6882_v23, %v1671_v1  ;;  %v1978_v63 = vadd.f32 %v5928_v60, %v1957_v29  ;;  %v6884_v29 = vrot.slane %v5946_v11, 6  ;;  %v2053_v11 = vrot.slane %v6261_v7, 4 }
 0x265   : > { %2708 = vrot.lane.b32.xlu1 %v2705_v12, %s3708_s9  ;;  %2895 = vrot.lane.b32.xlu0 %v2892_v14, %s3713_s27  ;;  %v2045_v12 = vmul.f32 %v6255_v56, %v4239_v48  ;;  %v6281_v14 = vstv %s3441_s18 }
 0x266   : > { %v1713_v6 = vadd.f32 %v6883_v15, %v1692_v19  ;;  %v1999_v60 = vadd.f32 %v5968_v5, %v1978_v63  ;;  %v2726_v10 = vsel %vm2624_vm1, %v6884_v29, %v2725_v27  ;;  %v1768_v5 = vrot.slane %v1760_v41, 3  ;;  %v6886_v63 = vld [vmem:[#allocation49_spill] sm:$0xff] }
 0x267   : > { %v6263_v53 = vpop.permute.xlu1 %2016  ;;  %v6265_v42 = vpop.permute.xlu0 %2238  ;;  %v6286_v27 = vmul.f32 %v6281_v14, %v4350_v32  ;;  %v2781_v19 = vmul.f32 %v6051_v17, %v4520_v59  ;;  %v6887_v15 = vrot.slane %v5977_v20, 6  ;;  %v2063_v29 = vmul.f32 %v6281_v14, %v4181_v38 }
 0x268   : > { %v1734_v1 = vadd.f32 %v6885_v9, %v1713_v6  ;;  %v2020_v28 = vadd.f32 %v6008_v36, %v1999_v60  ;;  %v2767_v6 = vrot.slane %v2760_v24, 6  ;;  %v2052_v60 = vrot.slane %v2045_v12, 4 }
 0x269   : > { %2729 = vrot.lane.b32.xlu1 %v2726_v10, %s3708_s9  ;;  %v2747_v41 = vsel %vm2624_vm1, %v6887_v15, %v2746_v44  ;;  %v1785_v10 = vrot.slane %v1778_v58, 3  ;;  %v6888_v9 = vrot.slane %v5990_v39, 3  ;;  %v2070_v20 = vrot.slane %v6286_v27, 4  ;;  %s3454_s9 = sld [smem:[#allocation2 + $0x23]] }
 0x26a   : > { %v1755_v52 = vadd.f32 %v5926_v18, %v1734_v1  ;;  %v2041_v36 = vadd.f32 %v6886_v63, %v2020_v28  ;;  %v2054_v18 = vsel %vm2051_vm15, %v2052_v60, %v2053_v11  ;;  %v2788_v44 = vrot.slane %v2781_v19, 6 }
 0x26b   : > { %v6288_v45 = vpop.permute.xlu1 %2037  ;;  %v6290_v23 = vpop.permute.xlu0 %2259  ;;  %v1769_v17 = vsel %vm1764_vm14, %v6888_v9, %v1768_v5  ;;  %v6889_v63 = vrot.slane %v6023_v4, 6  ;;  %v2802_v39 = vmul.f32 %v6077_v3, %v4544_v26  ;;  %v2069_v5 = vrot.slane %v2063_v29, 4 }
 0x26c   : > { %v1773_v12 = vadd.f32 %v1769_v17, %v1755_v52  ;;  %v2059_v28 = vadd.f32 %v2054_v18, %v2041_v36  ;;  %v6890_v15 = vrot.slane %v6030_v35, 3  ;;  %v6891_v4 = vrot.slane %v6060_v47, 6  ;;  %v6892_v18 = vld [vmem:[#allocation52_spill] sm:$0xff] }
 0x26d   : > { %2750 = vrot.lane.b32.xlu1 %v2747_v41, %s3710_s13  ;;  %v2768_v58 = vsel %vm2624_vm1, %v6889_v63, %v2767_v6  ;;  %v2071_v19 = vsel %vm2051_vm15, %v2069_v5, %v2070_v20  ;;  %v2809_v29 = vrot.slane %v2802_v39, 6  ;;  %v2823_v35 = vmul.f32 %v6119_v8, %v4520_v59  ;;  %v6894_v5 = vld [vmem:[#allocation48_spill] sm:$0xff] }
 0x26e   : > { %v1786_v41 = vsel %vm1764_vm14, %v6890_v15, %v1785_v10  ;;  %v2789_v6 = vsel %vm2624_vm1, %v6891_v4, %v2788_v44  ;;  %v2076_v60 = vadd.f32 %v2071_v19, %v2059_v28  ;;  %v2844_v17 = vmul.f32 %v6137_v30, %v4544_v26  ;;  %v6896_v19 = vld [vmem:[#allocation54_spill] sm:$0xff] }
 0x26f   : > { %v6309_v1 = vpop.permute.xlu1 %2093  ;;  %v6311_v24 = vpop.permute.xlu0 %2280  ;;  %v1790_v3 = vadd.f32 %v1786_v41, %v1773_v12  ;;  %v6893_v44 = vrot.slane %v6092_v51, 6  ;;  %v2830_v28 = vrot.slane %v2823_v35, 6  ;;  %v2865_v39 = vmul.f32 %v6173_v50, %v4520_v59 }
 0x270   : > { %v2097_v47 = vadd.f32 %v6083_v62, %v2076_v60  ;;  %v6895_v62 = vrot.slane %v6128_v49, 6  ;;  %v2851_v41 = vrot.slane %v2844_v17, 6  ;;  %v6897_v49 = vrot.slane %v6148_v40, 6 }
 0x271   : > { %2771 = vrot.lane.b32.xlu1 %v2768_v58, %s3710_s13  ;;  %v1811_v63 = vadd.f32 %v6892_v18, %v1790_v3  ;;  %v2810_v12 = vsel %vm2624_vm1, %v6893_v44, %v2809_v29  ;;  %v2872_v50 = vrot.slane %v2865_v39, 6  ;;  %v2886_v17 = vmul.f32 %v6203_v31, %v4544_v26  ;;  %v6899_v31 = vld [vmem:[#allocation56_spill] sm:$0xff]  ;;  %s3468_s13 = sld [smem:[#allocation2 + $0x2a]] }
 0x272   : > { %v2118_v15 = vadd.f32 %v6113_v33, %v2097_v47  ;;  %v2831_v51 = vsel %vm2624_vm1, %v6895_v62, %v2830_v28  ;;  %v2852_v35 = vsel %vm2624_vm1, %v6897_v49, %v2851_v41  ;;  %v6898_v40 = vrot.slane %v6182_v54, 6 }
 0x273   : > { %v6325_v52 = vpop.permute.xlu1 %2114  ;;  %v6327_v36 = vpop.permute.xlu0 %2301  ;;  %v1832_v30 = vadd.f32 %v6894_v5, %v1811_v63  ;;  %v6409_v41 = vstv %s3455_s10 }
 0x274   : > { %v2873_v44 = vsel %vm2624_vm1, %v6898_v40, %v2872_v50 }
 0x275   : > { %2792 = vrot.lane.b32.xlu1 %v2789_v6, %s3711_s14  ;;  %v1853_v4 = vadd.f32 %v6896_v19, %v1832_v30  ;;  %v2139_v6 = vadd.f32 %v6141_v57, %v2118_v15  ;;  %v6395_v15 = vstv %s3454_s9  ;;  %v2065_v19 = vmul.f32 %v6281_v14, %v4544_v26 }
 0x277   : > { %v6335_v10 = vpop.permute.xlu1 %2135  ;;  %v6337_v9 = vpop.permute.xlu0 %2322  ;;  %v1874_v29 = vadd.f32 %v6081_v21, %v1853_v4  ;;  %v2160_v33 = vadd.f32 %v6164_v16, %v2139_v6 }
 0x279   : > { %2813 = vrot.lane.b32.xlu1 %v2810_v12, %s3711_s14  ;;  %v1895_v57 = vadd.f32 %v6111_v37, %v1874_v29  ;;  %v2181_v18 = vadd.f32 %v6195_v25, %v2160_v33  ;;  %v2893_v12 = vrot.slane %v2886_v17, 6  ;;  %v2072_v33 = vrot.slane %v2065_v19, 4  ;;  %s3469_s14 = sld [smem:[#allocation2 + $0x5b]] }
 0x27b   : > { %v6347_v8 = vpop.permute.xlu1 %2156  ;;  %v6349_v58 = vpop.permute.xlu0 %2377  ;;  %v1916_v21 = vadd.f32 %v6139_v34, %v1895_v57  ;;  %v2202_v16 = vadd.f32 %v6220_v22, %v2181_v18  ;;  %v2894_v54 = vsel %vm2624_vm1, %v2891_v55, %v2893_v12 }
 0x27d   : > { %2834 = vrot.lane.b32.xlu1 %v2831_v51, %s3712_s24  ;;  %v1937_v28 = vadd.f32 %v6899_v31, %v1916_v21  ;;  %v2223_v37 = vadd.f32 %v6239_v46, %v2202_v16  ;;  %v2047_v46 = vmul.f32 %v6255_v56, %v4520_v59  ;;  %v2073_v21 = vsel %vm2051_vm15, %v2070_v20, %v2072_v33 }
 0x27f   : > { %v6361_v3 = vpop.permute.xlu1 %2177  ;;  %v6363_v60 = vpop.permute.xlu0 %2398  ;;  %v1958_v5 = vadd.f32 %v6193_v61, %v1937_v28  ;;  %v2244_v34 = vadd.f32 %v6265_v42, %v2223_v37  ;;  %v6401_v61 = vmul.f32 %v6395_v15, %v4364_v43  ;;  %v2055_v56 = vrot.slane %v2047_v46, 4 }
 0x281   : > { %2855 = vrot.lane.b32.xlu1 %v2852_v35, %s3712_s24  ;;  %v1979_v22 = vadd.f32 %v6218_v0, %v1958_v5  ;;  %v2265_v30 = vadd.f32 %v6290_v23, %v2244_v34  ;;  %v2332_v0 = vmul.f32 %v6395_v15, %v4239_v48  ;;  %v2339_v4 = vrot.slane %v6401_v61, 5 }
 0x282   : > { %v2056_v14 = vsel %vm2051_vm15, %v2053_v11, %v2055_v56 }
 0x283   : > { %v6375_v63 = vpop.permute.xlu1 %2198  ;;  %v2420_v47 = vpop.permute.xlu0 %2419  ;;  %v2000_v2 = vadd.f32 %v6237_v13, %v1979_v22  ;;  %v2286_v55 = vadd.f32 %v6311_v24, %v2265_v30  ;;  %v6416_v13 = vmul.f32 %v6409_v41, %v4350_v32  ;;  %v2338_v29 = vrot.slane %v2332_v0, 5 }
 0x285   : > { %2876 = vrot.lane.b32.xlu1 %v2873_v44, %s3713_s27  ;;  %v2021_v23 = vadd.f32 %v6263_v53, %v2000_v2  ;;  %v2307_v51 = vadd.f32 %v6327_v36, %v2286_v55  ;;  %v2349_v36 = vmul.f32 %v6409_v41, %v4181_v38  ;;  %v2340_v49 = vsel %vm787_vm11, %v2338_v29, %v2339_v4 }
 0x286   : > { %v2356_v35 = vrot.slane %v6416_v13, 5 }
 0x287   : > { %v6385_v25 = vpop.permute.xlu1 %2219  ;;  %v2441_v39 = vpop.permute.xlu0 %2440  ;;  %v2042_v50 = vadd.f32 %v6288_v45, %v2021_v23  ;;  %v2328_v53 = vadd.f32 %v6337_v9, %v2307_v51  ;;  %v2355_v9 = vrot.slane %v2349_v36, 5 }
 0x289   : > { %2897 = vrot.lane.b32.xlu1 %v2894_v54, %s3713_s27  ;;  %v2060_v45 = vadd.f32 %v2056_v14, %v2042_v50  ;;  %v2345_v18 = vadd.f32 %v2340_v49, %v2328_v53  ;;  %v2357_v7 = vsel %vm787_vm11, %v2355_v9, %v2356_v35  ;;  %v2351_v49 = vmul.f32 %v6409_v41, %v4544_v26 }
 0x28b   : > { %v2241_v42 = vpop.permute.xlu1 %2240  ;;  %v2462_v62 = vpop.permute.xlu0 %2461  ;;  %v2077_v40 = vadd.f32 %v2073_v21, %v2060_v45  ;;  %v2362_v44 = vadd.f32 %v2357_v7, %v2345_v18  ;;  %v2358_v7 = vrot.slane %v2351_v49, 5 }
 0x28d   : > { %v2098_v28 = vadd.f32 %v6309_v1, %v2077_v40  ;;  %v2383_v37 = vadd.f32 %v6349_v58, %v2362_v44 }
 0x28f   : > { %v2262_v24 = vpop.permute.xlu1 %2261  ;;  %v2483_v6 = vpop.permute.xlu0 %2482  ;;  %v2119_v27 = vadd.f32 %v6325_v52, %v2098_v28  ;;  %v2404_v20 = vadd.f32 %v6363_v60, %v2383_v37 }
 0x291   : > { %v2140_v54 = vadd.f32 %v6335_v10, %v2119_v27  ;;  %v2425_v22 = vadd.f32 %v2420_v47, %v2404_v20 }
 0x293   : > { %v2283_v17 = vpop.permute.xlu1 %2282  ;;  %v2504_v57 = vpop.permute.xlu0 %2503  ;;  %v2161_v2 = vadd.f32 %v6347_v8, %v2140_v54  ;;  %v2446_v55 = vadd.f32 %v2441_v39, %v2425_v22  ;;  %v6446_v39 = vstv %s3468_s13 }
 0x294   : > { %v2618_v36 = vmul.f32 %v6446_v39, %v4239_v48 }
 0x295   : > { %v2182_v0 = vadd.f32 %v6361_v3, %v2161_v2  ;;  %v2467_v1 = vadd.f32 %v2462_v62, %v2446_v55  ;;  %v2334_v3 = vmul.f32 %v6395_v15, %v4520_v59  ;;  %v6452_v62 = vmul.f32 %v6446_v39, %v4364_v43 }
 0x296   : > { %v2625_v9 = vrot.slane %v2618_v36, 6 }
 0x297   : > { %v2304_v11 = vpop.permute.xlu1 %2303  ;;  %v2525_v16 = vpop.permute.xlu0 %2524  ;;  %v2203_v51 = vadd.f32 %v6375_v63, %v2182_v0  ;;  %v2488_v56 = vadd.f32 %v2483_v6, %v2467_v1  ;;  %v2341_v33 = vrot.slane %v2334_v3, 5  ;;  %v2626_v15 = vrot.slane %v6452_v62, 6 }
 0x299   : > { %v2224_v52 = vadd.f32 %v6385_v25, %v2203_v51  ;;  %v2509_v60 = vadd.f32 %v2504_v57, %v2488_v56  ;;  %v2342_v48 = vsel %vm787_vm11, %v2339_v4, %v2341_v33  ;;  %v2627_v41 = vsel %vm2624_vm1, %v2625_v9, %v2626_v15 }
 0x29b   : > { %v2325_v12 = vpop.permute.xlu1 %2324  ;;  %v2546_v31 = vpop.permute.xlu0 %2545  ;;  %v2245_v19 = vadd.f32 %v2241_v42, %v2224_v52  ;;  %v2530_v50 = vadd.f32 %v2525_v16, %v2509_v60 }
 0x29d   : > { %v2266_v53 = vadd.f32 %v2262_v24, %v2245_v19  ;;  %v2551_v8 = vadd.f32 %v2546_v31, %v2530_v50  ;;  %v2635_v24 = vstv %s3469_s14 }
 0x29e   : > { %v6460_v57 = vmul.f32 %v2635_v24, %v4350_v32  ;;  %v2636_v21 = vmul.f32 %v2635_v24, %v4181_v38  ;;  %v2359_v38 = vsel %vm787_vm11, %v2356_v35, %v2358_v7 }
 0x29f   : > { %v6437_v5 = vpop.permute.xlu1 %2379  ;;  %v2567_v34 = vpop.permute.xlu0 %2566  ;;  %v2287_v25 = vadd.f32 %v2283_v17, %v2266_v53 }
 0x2a0   : > { %v2572_v29 = vadd.f32 %v2567_v34, %v2551_v8 }
 0x2a1   : > { %v2308_v42 = vadd.f32 %v2304_v11, %v2287_v25  ;;  %v2643_v11 = vrot.slane %v6460_v57, 6  ;;  %v2638_v57 = vmul.f32 %v2635_v24, %v4544_v26 }
 0x2a3   : > { %v2401_v30 = vpop.permute.xlu1 %2400  ;;  %v2588_v46 = vpop.permute.xlu0 %2587  ;;  %v2329_v18 = vadd.f32 %v2325_v12, %v2308_v42  ;;  %v2642_v12 = vrot.slane %v2636_v21, 6 }
 0x2a4   : > { %v2593_v14 = vadd.f32 %v2588_v46, %v2572_v29 }
 0x2a5   : > { %v2346_v40 = vadd.f32 %v2342_v48, %v2329_v18  ;;  %v2644_v61 = vsel %vm2624_vm1, %v2642_v12, %v2643_v11  ;;  %v2645_v48 = vrot.slane %v2638_v57, 6  ;;  %v3554_v57 = vld [vmem:[%s6495_s19] sm:$0xff]  }
 0x2a7   : > { %v2422_v58 = vpop.permute.xlu1 %2421  ;;  %v2609_v23 = vpop.permute.xlu0 %2608  ;;  %v2363_v28 = vadd.f32 %v2359_v38, %v2346_v40  ;;  %v2646_v7 = vsel %vm2624_vm1, %v2643_v11, %v2645_v48 }
 0x2a8   : > { %v2614_v17 = vadd.f32 %v2609_v23, %v2593_v14 }
 0x2a9   : > { %v2384_v20 = vadd.f32 %v6437_v5, %v2363_v28  ;;  %v6900_v28 = vld [vmem:[#allocation37_spill] sm:$0xff] }
 0x2aa   : > { %v2632_v44 = vadd.f32 %v2627_v41, %v2614_v17 }
 0x2ab   : > { %v2443_v10 = vpop.permute.xlu1 %2442  ;;  %v2665_v47 = vpop.permute.xlu0 %2664  ;;  %v2405_v2 = vadd.f32 %v2401_v30, %v2384_v20 }
 0x2ac   : > { %v2649_v37 = vadd.f32 %v2644_v61, %v2632_v44 }
 0x2ad   : > { %v2426_v0 = vadd.f32 %v2422_v58, %v2405_v2  ;;  %v2620_v58 = vmul.f32 %v6446_v39, %v4520_v59 }
 0x2ae   : > { %v2670_v54 = vadd.f32 %v2665_v47, %v2649_v37  ;;  %v2917_v37 = vsub.s32 0, %v6900_v28 }
 0x2af   : > { %v2464_v63 = vpop.permute.xlu1 %2463  ;;  %v2686_v6 = vpop.permute.xlu0 %2685  ;;  %v2447_v35 = vadd.f32 %v2443_v10, %v2426_v0  ;;  %v2628_v49 = vrot.slane %v2620_v58, 6 }
 0x2b0   : > { %v2691_v55 = vadd.f32 %v2686_v6, %v2670_v54 }
 0x2b1   : > { %v2468_v56 = vadd.f32 %v2464_v63, %v2447_v35  ;;  %v2629_v21 = vsel %vm2624_vm1, %v2626_v15, %v2628_v49 }
 0x2b3   : > { %v2485_v43 = vpop.permute.xlu1 %2484  ;;  %v2707_v45 = vpop.permute.xlu0 %2706 }
 0x2b4   : > { %v2712_v1 = vadd.f32 %v2707_v45, %v2691_v55  ;;  %v2489_v50 = vadd.f32 %v2485_v43, %v2468_v56  ;;  %v2950_v56 = vsub.s32 3, %v6900_v28 }
 0x2b7   : > { %v2506_v32 = vpop.permute.xlu1 %2505  ;;  %v2728_v16 = vpop.permute.xlu0 %2727 }
 0x2b8   : > { %v2733_v51 = vadd.f32 %v2728_v16, %v2712_v1  ;;  %v2510_v8 = vadd.f32 %v2506_v32, %v2489_v50  ;;  %v2939_v1 = vsub.s32 2, %v6900_v28 }
 0x2bb   : > { %v2527_v31 = vpop.permute.xlu1 %2526  ;;  %v2749_v4 = vpop.permute.xlu0 %2748 }
 0x2bc   : > { %v2754_v52 = vadd.f32 %v2749_v4, %v2733_v51  ;;  %v2531_v25 = vadd.f32 %v2527_v31, %v2510_v8 }
 0x2bf   : > { %v2548_v34 = vpop.permute.xlu1 %2547  ;;  %v2770_v27 = vpop.permute.xlu0 %2769 }
 0x2c0   : > { %v2775_v53 = vadd.f32 %v2770_v27, %v2754_v52  ;;  %v2552_v30 = vadd.f32 %v2548_v34, %v2531_v25 }
 0x2c3   : > { %v2569_v22 = vpop.permute.xlu1 %2568  ;;  %v2791_v46 = vpop.permute.xlu0 %2790 }
 0x2c4   : > { %v2796_v3 = vadd.f32 %v2791_v46, %v2775_v53  ;;  %v2573_v42 = vadd.f32 %v2569_v22, %v2552_v30  ;;  %v2928_v22 = vsub.s32 1, %v6900_v28  ;;  %v2972_v53 = vsub.s32 5, %v6900_v28 }
 0x2c7   : > { %v2590_v13 = vpop.permute.xlu1 %2589  ;;  %v2812_v23 = vpop.permute.xlu0 %2811 }
 0x2c8   : > { %v2817_v29 = vadd.f32 %v2812_v23, %v2796_v3  ;;  %v2594_v14 = vadd.f32 %v2590_v13, %v2573_v42  ;;  %v2983_v3 = vsub.s32 6, %v6900_v28 }
 0x2cb   : > { %v2611_v60 = vpop.permute.xlu1 %2610  ;;  %v2833_v19 = vpop.permute.xlu0 %2832 }
 0x2cc   : > { %v2838_v6 = vadd.f32 %v2833_v19, %v2817_v29  ;;  %v2615_v18 = vadd.f32 %v2611_v60, %v2594_v14  ;;  %v2961_v19 = vsub.s32 4, %v6900_v28  ;;  %v2994_v29 = vsub.s32 7, %v6900_v28 }
 0x2ce   : > { %v2633_v39 = vadd.f32 %v2629_v21, %v2615_v18  ;;  %v6901_v21 = vld [vmem:[#allocation8_spill] sm:$0xff] }
 0x2cf   : > { %v2667_v5 = vpop.permute.xlu1 %2666  ;;  %v2854_v47 = vpop.permute.xlu0 %2853 }
 0x2d0   : > { %v2859_v63 = vadd.f32 %v2854_v47, %v2838_v6  ;;  %v2650_v32 = vadd.f32 %v2646_v7, %v2633_v39 }
 0x2d2   : > { %v2671_v40 = vadd.f32 %v2667_v5, %v2650_v32 }
 0x2d3   : > { %v2688_v36 = vpop.permute.xlu1 %2687  ;;  %v2875_v10 = vpop.permute.xlu0 %2874 }
 0x2d4   : > { %v2880_v33 = vadd.f32 %v2875_v10, %v2859_v63  ;;  %v2692_v12 = vadd.f32 %v2688_v36, %v2671_v40 }
 0x2d7   : > { %v2709_v43 = vpop.permute.xlu1 %2708  ;;  %v2896_v45 = vpop.permute.xlu0 %2895 }
 0x2d8   : > { %v2901_v17 = vadd.f32 %v2896_v45, %v2880_v33  ;;  %v2713_v38 = vadd.f32 %v2709_v43, %v2692_v12  ;;  %v3556_v43 = vunpack.c.h.bf16 %v3554_v57  ;;  %v3555_v45 = vunpack.c.l.bf16 %v3554_v57 }
 0x2da   : > { %v3482_v9 = vmul.f32 -1.442695, %v2901_v17 }
 0x2db   : > { %v2730_v59 = vpop.permute.xlu1 %2729 }
 0x2dc   : > { %3672 = vpow2.f32 %v3482_v9  ;;  %v2734_v62 = vadd.f32 %v2730_v59, %v2713_v38  ;;  %v3632_v9 = vld [vmem:[%s6495_s19 + $0x8] sm:$0xff]   ;;  %v6903_v38 = vld [vmem:[#allocation7_spill] sm:$0xff] }
 0x2dd   : > { %v6902_v59 = vld [vmem:[#allocation6_spill] sm:$0xff]  ;;  %v3560_v32 = vunpack.c.h.bf16 %v3632_v9 }
 0x2df   : > { %v2751_v41 = vpop.permute.xlu1 %2750 }
 0x2e0   : > { %v2755_v31 = vadd.f32 %v2751_v41, %v2734_v62  ;;  %v6904_v62 = vld [vmem:[#allocation5_spill] sm:$0xff] }
 0x2e3   : > { %v2772_v16 = vpop.permute.xlu1 %2771 }
 0x2e4   : > { %v2776_v4 = vadd.f32 %v2772_v16, %v2755_v31  ;;  %v3559_v16 = vunpack.c.l.bf16 %v3632_v9 }
 0x2e6   : > { %v3673_v26 = vpop.eup %3672 }
 0x2e7   : > { %v2909_v24 = vadd.f32 1.0, %v3673_v26  ;;  %v2793_v44 = vpop.permute.xlu1 %2792 }
 0x2e8   : > { %v2797_v34 = vadd.f32 %v2793_v44, %v2776_v4 }
 0x2e9   : > { %3674 = vrcp.f32 %v2909_v24  ;;  %v3633_v24 = vld [vmem:[%s6495_s19 + $0x10] sm:$0xff]  }
 0x2ea   : > { %v3564_v28 = vunpack.c.h.bf16 %v3633_v24 }
 0x2eb   : > { %v2814_v61 = vpop.permute.xlu1 %2813 }
 0x2ec   : > { %v2818_v20 = vadd.f32 %v2814_v61, %v2797_v34 }
 0x2ef   : > { %v2835_v15 = vpop.permute.xlu1 %2834 }
 0x2f0   : > { %v2839_v46 = vadd.f32 %v2835_v15, %v2818_v20 }
 0x2f3   : > { %v3675_v27 = vpop.eup %3674  ;;  %v2856_v11 = vpop.permute.xlu1 %2855 }
 0x2f4   : > { %v2918_v54 = vrot.slane %v3675_v27, %v2917_v37  ;;  %v2860_v55 = vadd.f32 %v2856_v11, %v2839_v46  ;;  %v2929_v0 = vrot.slane %v3675_v27, %v2928_v22  ;;  %v2940_v51 = vrot.slane %v3675_v27, %v2939_v1  ;;  %v3634_v11 = vld [vmem:[%s6495_s19 + $0x18] sm:$0xff]  }
 0x2f5   : > { %v2951_v60 = vrot.slane %v3675_v27, %v2950_v56  ;;  %v2962_v50 = vrot.slane %v3675_v27, %v2961_v19  ;;  %v2973_v8 = vrot.slane %v3675_v27, %v2972_v53  ;;  %v2984_v25 = vrot.slane %v3675_v27, %v2983_v3 }
 0x2f6   : > { %2924 = vbcast.lane.b32.xlu1 %v2918_v54, 264  ;;  %2920 = vbcast.lane.b32.xlu0 %v2918_v54, 256  ;;  %v2995_v30 = vrot.slane %v3675_v27, %v2994_v29 }
 0x2f7   : > { %v2877_v2 = vpop.permute.xlu1 %2876 }
 0x2f8   : > { %v2881_v13 = vadd.f32 %v2877_v2, %v2860_v55  ;;  %v6906_v2 = vld [vmem:[#allocation10_spill] sm:$0xff] }
 0x2fa   : > { %2935 = vbcast.lane.b32.xlu1 %v2929_v0, 264  ;;  %2931 = vbcast.lane.b32.xlu0 %v2929_v0, 256 }
 0x2fb   : > { %v2898_v23 = vpop.permute.xlu1 %2897 }
 0x2fc   : > { %v2902_v35 = vadd.f32 %v2898_v23, %v2881_v13  ;;  %v3568_v13 = vunpack.c.h.bf16 %v3634_v11  ;;  %v3567_v23 = vunpack.c.l.bf16 %v3634_v11 }
 0x2fe   : > { %v3483_v52 = vmul.f32 -1.442695, %v2902_v35  ;;  %2946 = vbcast.lane.b32.xlu1 %v2940_v51, 264  ;;  %2942 = vbcast.lane.b32.xlu0 %v2940_v51, 256 }
 0x300   : > { %3676 = vpow2.f32 %v3483_v52 }
 0x302   : > { %2957 = vbcast.lane.b32.xlu1 %v2951_v60, 264  ;;  %2953 = vbcast.lane.b32.xlu0 %v2951_v60, 256 }
 0x306   : > { %2968 = vbcast.lane.b32.xlu1 %v2962_v50, 264  ;;  %2964 = vbcast.lane.b32.xlu0 %v2962_v50, 256 }
 0x30a   : > { %v3677_v5 = vpop.eup %3676  ;;  %2979 = vbcast.lane.b32.xlu1 %v2973_v8, 264  ;;  %2975 = vbcast.lane.b32.xlu0 %v2973_v8, 256 }
 0x30b   : > { %v2910_v47 = vadd.f32 1.0, %v3677_v5 }
 0x30d   : > { %3678 = vrcp.f32 %v2910_v47 }
 0x30e   : > { %2990 = vbcast.lane.b32.xlu1 %v2984_v25, 264  ;;  %2986 = vbcast.lane.b32.xlu0 %v2984_v25, 256 }
 0x312   : > { %3001 = vbcast.lane.b32.xlu1 %v2995_v30, 264  ;;  %2997 = vbcast.lane.b32.xlu0 %v2995_v30, 256 }
 0x317   : > { %v3679_v6 = vpop.eup %3678 }
 0x318   : > { %v3006_v58 = vrot.slane %v3679_v6, %v2917_v37  ;;  %v3017_v36 = vrot.slane %v3679_v6, %v2928_v22  ;;  %v3028_v10 = vrot.slane %v3679_v6, %v2939_v1  ;;  %v3039_v42 = vrot.slane %v3679_v6, %v2950_v56  ;;  %v6905_v22 = vld [vmem:[#allocation9_spill] sm:$0xff] }
 0x319   : > { %v3050_v63 = vrot.slane %v3679_v6, %v2961_v19  ;;  %v3061_v14 = vrot.slane %v3679_v6, %v2972_v53  ;;  %v3072_v33 = vrot.slane %v3679_v6, %v2983_v3  ;;  %v3083_v49 = vrot.slane %v3679_v6, %v2994_v29  ;;  %v3635_v56 = vld [vmem:[%s6495_s19 + $0x20] sm:$0xff]   ;;  %v6907_v19 = vld [vmem:[#allocation11_spill] sm:$0xff]  ;;  %v6908_v53 = vld [vmem:[#allocation12_spill] sm:$0xff] }
 0x31a   : > { %3012 = vbcast.lane.b32.xlu1 %v3006_v58, 264  ;;  %3008 = vbcast.lane.b32.xlu0 %v3006_v58, 256  ;;  %v3563_v37 = vunpack.c.l.bf16 %v3633_v24  ;;  %v3572_v47 = vunpack.c.h.bf16 %v3635_v56  ;;  %v3571_v25 = vunpack.c.l.bf16 %v3635_v56  ;;  %v3636_v6 = vld [vmem:[%s6495_s19 + $0x28] sm:$0xff]  }
 0x31b   : > { %v3576_v57 = vunpack.c.h.bf16 %v3636_v6 }
 0x31e   : > { %3023 = vbcast.lane.b32.xlu1 %v3017_v36, 264  ;;  %3019 = vbcast.lane.b32.xlu0 %v3017_v36, 256 }
 0x322   : > { %3034 = vbcast.lane.b32.xlu1 %v3028_v10, 264  ;;  %3030 = vbcast.lane.b32.xlu0 %v3028_v10, 256  ;;  %v6909_v10 = vld [vmem:[#allocation13_spill] sm:$0xff] }
 0x326   : > { %3045 = vbcast.lane.b32.xlu1 %v3039_v42, 264  ;;  %3041 = vbcast.lane.b32.xlu0 %v3039_v42, 256 }
 0x32a   : > { %3056 = vbcast.lane.b32.xlu1 %v3050_v63, 264  ;;  %3052 = vbcast.lane.b32.xlu0 %v3050_v63, 256  ;;  %v6910_v63 = vld [vmem:[#allocation14_spill] sm:$0xff] }
 0x32e   : > { %3067 = vbcast.lane.b32.xlu1 %v3061_v14, 264  ;;  %3063 = vbcast.lane.b32.xlu0 %v3061_v14, 256 }
 0x332   : > { %3078 = vbcast.lane.b32.xlu1 %v3072_v33, 264  ;;  %3074 = vbcast.lane.b32.xlu0 %v3072_v33, 256 }
 0x336   : > { %3089 = vbcast.lane.b32.xlu1 %v3083_v49, 264  ;;  %3085 = vbcast.lane.b32.xlu0 %v3083_v49, 256 }
 0x368   : > { %v2925_v18 = vpop.permute.xlu1 %2924  ;;  %v2921_v17 = vpop.permute.xlu0 %2920 }
 0x369   : > { %v3092_v48 = vmul.f32 %v2925_v18, %v6901_v21  ;;  %v3091_v39 = vmul.f32 %v2921_v17, %v6902_v59  ;;  %v3637_v17 = vld [vmem:[%s6495_s19 + $0x30] sm:$0xff]  }
 0x36b   : > { %v3188_v7 = vadd.f32 %v3556_v43, %v3092_v48  ;;  %v3187_v41 = vadd.f32 %v3555_v45, %v3091_v39  ;;  %v3575_v43 = vunpack.c.l.bf16 %v3636_v6  ;;  %v6911_v48 = vld [vmem:[#allocation15_spill] sm:$0xff]  ;;  %v6912_v39 = vld [vmem:[#allocation16_spill] sm:$0xff] }
 0x36c   : > { %v2936_v40 = vpop.permute.xlu1 %2935  ;;  %v2932_v26 = vpop.permute.xlu0 %2931 }
 0x36d   : > { %v3220_v44 = vmax.f32 %v3188_v7, 0.0  ;;  %v3219_v12 = vmax.f32 %v3187_v41, 0.0  ;;  %v3094_v61 = vmul.f32 %v2936_v40, %v6903_v38  ;;  %v3093_v31 = vmul.f32 %v2932_v26, %v6904_v62 }
 0x36e   : > { %v3579_v40 = vunpack.c.l.bf16 %v3637_v17 }
 0x36f   : > { %3252 = vst.msk [vmem:[%s6505_s22 + $0x8] sm:$0xff] %vm349_vm0, %v3220_v44  ;;  %3251 = vst.msk [vmem:[%s6505_s22] sm:$0xff] %vm349_vm0, %v3219_v12  ;;  %v3190_v15 = vadd.f32 %v3560_v32, %v3094_v61  ;;  %v3189_v4 = vadd.f32 %v3559_v16, %v3093_v31  ;;  %v3580_v16 = vunpack.c.h.bf16 %v3637_v17  ;;  %v3638_v44 = vld [vmem:[%s6495_s19 + $0x38] sm:$0xff]   ;;  %v6913_v61 = vld [vmem:[#allocation17_spill] sm:$0xff] }
 0x370   : > { %v2947_v34 = vpop.permute.xlu1 %2946  ;;  %v2943_v27 = vpop.permute.xlu0 %2942  ;;  %v6914_v31 = vld [vmem:[#allocation18_spill] sm:$0xff] }
 0x371   : > { %v3222_v20 = vmax.f32 %v3190_v15, 0.0  ;;  %v3221_v54 = vmax.f32 %v3189_v4, 0.0  ;;  %v3096_v46 = vmul.f32 %v2947_v34, %v6905_v22  ;;  %v3095_v55 = vmul.f32 %v2943_v27, %v6906_v2  ;;  %v6915_v22 = vld [vmem:[#allocation19_spill] sm:$0xff]  ;;  %v6916_v2 = vld [vmem:[#allocation20_spill] sm:$0xff] }
 0x372   : > { %v3583_v34 = vunpack.c.l.bf16 %v3638_v44 }
 0x373   : > { %3254 = vst.msk [vmem:[%s6505_s22 + $0x18] sm:$0xff] %vm349_vm0, %v3222_v20  ;;  %3253 = vst.msk [vmem:[%s6505_s22 + $0x10] sm:$0xff] %vm349_vm0, %v3221_v54  ;;  %v3192_v0 = vadd.f32 %v3564_v28, %v3096_v46  ;;  %v3191_v1 = vadd.f32 %v3563_v37, %v3095_v55  ;;  %v3584_v37 = vunpack.c.h.bf16 %v3638_v44 }
 0x374   : > { %v2958_v35 = vpop.permute.xlu1 %2957  ;;  %v2954_v51 = vpop.permute.xlu0 %2953 }
 0x375   : > { %v3224_v52 = vmax.f32 %v3192_v0, 0.0  ;;  %v3223_v60 = vmax.f32 %v3191_v1, 0.0  ;;  %v3098_v50 = vmul.f32 %v2958_v35, %v6907_v19  ;;  %v3097_v8 = vmul.f32 %v2954_v51, %v6908_v53  ;;  %v3640_v19 = vld [vmem:[%s6495_s19 + $0x48] sm:$0xff]  }
 0x377   : > { %3256 = vst.msk [vmem:[%s6505_s22 + $0x28] sm:$0xff] %vm349_vm0, %v3224_v52  ;;  %3255 = vst.msk [vmem:[%s6505_s22 + $0x20] sm:$0xff] %vm349_vm0, %v3223_v60  ;;  %v3194_v3 = vadd.f32 %v3568_v13, %v3098_v50  ;;  %v3193_v5 = vadd.f32 %v3567_v23, %v3097_v8  ;;  %v3639_v13 = vld [vmem:[%s6495_s19 + $0x40] sm:$0xff]   ;;  %v6918_v8 = vld [vmem:[#allocation22_spill] sm:$0xff] }
 0x378   : > { %v2969_v29 = vpop.permute.xlu1 %2968  ;;  %v2965_v30 = vpop.permute.xlu0 %2964  ;;  %v3588_v51 = vunpack.c.h.bf16 %v3639_v13  ;;  %v3587_v56 = vunpack.c.l.bf16 %v3639_v13  ;;  %v6917_v50 = vld [vmem:[#allocation21_spill] sm:$0xff] }
 0x379   : > { %v3226_v58 = vmax.f32 %v3194_v3, 0.0  ;;  %v3225_v36 = vmax.f32 %v3193_v5, 0.0  ;;  %v3100_v42 = vmul.f32 %v2969_v29, %v6909_v10  ;;  %v3099_v14 = vmul.f32 %v2965_v30, %v6910_v63 }
 0x37a   : > { %v3591_v29 = vunpack.c.l.bf16 %v3640_v19 }
 0x37b   : > { %3258 = vst.msk [vmem:[%s6505_s22 + $0x38] sm:$0xff] %vm349_vm0, %v3226_v58  ;;  %3257 = vst.msk [vmem:[%s6505_s22 + $0x30] sm:$0xff] %vm349_vm0, %v3225_v36  ;;  %v3196_v33 = vadd.f32 %v3572_v47, %v3100_v42  ;;  %v3195_v49 = vadd.f32 %v3571_v25, %v3099_v14  ;;  %v3592_v25 = vunpack.c.h.bf16 %v3640_v19  ;;  %v3641_v58 = vld [vmem:[%s6495_s19 + $0x50] sm:$0xff]   ;;  %v6920_v14 = vld [vmem:[#allocation24_spill] sm:$0xff] }
 0x37c   : > { %v2980_v45 = vpop.permute.xlu1 %2979  ;;  %v2976_v18 = vpop.permute.xlu0 %2975  ;;  %v6919_v42 = vld [vmem:[#allocation23_spill] sm:$0xff] }
 0x37d   : > { %v3228_v9 = vmax.f32 %v3196_v33, 0.0  ;;  %v3227_v21 = vmax.f32 %v3195_v49, 0.0  ;;  %v3102_v59 = vmul.f32 %v2980_v45, %v6911_v48  ;;  %v3101_v7 = vmul.f32 %v2976_v18, %v6912_v39 }
 0x37e   : > { %v3595_v45 = vunpack.c.l.bf16 %v3641_v58 }
 0x37f   : > { %3260 = vst.msk [vmem:[%s6505_s22 + $0x48] sm:$0xff] %vm349_vm0, %v3228_v9  ;;  %3259 = vst.msk [vmem:[%s6505_s22 + $0x40] sm:$0xff] %vm349_vm0, %v3227_v21  ;;  %v3198_v41 = vadd.f32 %v3576_v57, %v3102_v59  ;;  %v3197_v32 = vadd.f32 %v3575_v43, %v3101_v7  ;;  %v3596_v43 = vunpack.c.h.bf16 %v3641_v58  ;;  %v3642_v9 = vld [vmem:[%s6495_s19 + $0x58] sm:$0xff]   ;;  %v6921_v59 = vld [vmem:[#allocation25_spill] sm:$0xff] }
 0x380   : > { %v2991_v26 = vpop.permute.xlu1 %2990  ;;  %v2987_v24 = vpop.permute.xlu0 %2986  ;;  %v6922_v7 = vld [vmem:[#allocation26_spill] sm:$0xff] }
 0x381   : > { %v3230_v12 = vmax.f32 %v3198_v41, 0.0  ;;  %v3229_v38 = vmax.f32 %v3197_v32, 0.0  ;;  %v3104_v62 = vmul.f32 %v2991_v26, %v6913_v61  ;;  %v3103_v15 = vmul.f32 %v2987_v24, %v6914_v31 }
 0x382   : > { %v3599_v26 = vunpack.c.l.bf16 %v3642_v9 }
 0x383   : > { %3262 = vst.msk [vmem:[%s6505_s22 + $0x58] sm:$0xff] %vm349_vm0, %v3230_v12  ;;  %3261 = vst.msk [vmem:[%s6505_s22 + $0x50] sm:$0xff] %vm349_vm0, %v3229_v38  ;;  %v3200_v4 = vadd.f32 %v3580_v16, %v3104_v62  ;;  %v3199_v28 = vadd.f32 %v3579_v40, %v3103_v15  ;;  %v3600_v40 = vunpack.c.h.bf16 %v3642_v9  ;;  %v3643_v12 = vld [vmem:[%s6495_s19 + $0x60] sm:$0xff]   ;;  %v6923_v62 = vld [vmem:[#allocation27_spill] sm:$0xff] }
 0x384   : > { %v3002_v27 = vpop.permute.xlu1 %3001  ;;  %v2998_v11 = vpop.permute.xlu0 %2997  ;;  %v6924_v15 = vld [vmem:[#allocation28_spill] sm:$0xff] }
 0x385   : > { %v3232_v20 = vmax.f32 %v3200_v4, 0.0  ;;  %v3231_v54 = vmax.f32 %v3199_v28, 0.0  ;;  %v3106_v46 = vmul.f32 %v3002_v27, %v6915_v22  ;;  %v3105_v55 = vmul.f32 %v2998_v11, %v6916_v2  ;;  %v6925_v2 = vld [vmem:[#allocation29_spill] sm:$0xff] }
 0x386   : > { %v3603_v27 = vunpack.c.l.bf16 %v3643_v12 }
 0x387   : > { %3264 = vst.msk [vmem:[%s6505_s22 + $0x68] sm:$0xff] %vm349_vm0, %v3232_v20  ;;  %3263 = vst.msk [vmem:[%s6505_s22 + $0x60] sm:$0xff] %vm349_vm0, %v3231_v54  ;;  %v3202_v0 = vadd.f32 %v3584_v37, %v3106_v46  ;;  %v3201_v1 = vadd.f32 %v3583_v34, %v3105_v55  ;;  %v3604_v34 = vunpack.c.h.bf16 %v3643_v12  ;;  %v3644_v54 = vld [vmem:[%s6495_s19 + $0x68] sm:$0xff]  }
 0x389   : > { %v3234_v23 = vmax.f32 %v3202_v0, 0.0  ;;  %v3233_v35 = vmax.f32 %v3201_v1, 0.0  ;;  %v6926_v0 = vld [vmem:[#allocation30_spill] sm:$0xff] }
 0x38b   : > { %3266 = vst.msk [vmem:[%s6505_s22 + $0x78] sm:$0xff] %vm349_vm0, %v3234_v23  ;;  %3265 = vst.msk [vmem:[%s6505_s22 + $0x70] sm:$0xff] %vm349_vm0, %v3233_v35  ;;  %v3608_v35 = vunpack.c.h.bf16 %v3644_v54 }
 0x38c   : > { %v3013_v52 = vpop.permute.xlu1 %3012  ;;  %v3009_v60 = vpop.permute.xlu0 %3008 }
 0x38d   : > { %v3108_v53 = vmul.f32 %v3013_v52, %v6917_v50  ;;  %v3107_v3 = vmul.f32 %v3009_v60, %v6918_v8  ;;  %v3645_v60 = vld [vmem:[%s6495_s19 + $0x70] sm:$0xff]  }
 0x38f   : > { %v3204_v5 = vadd.f32 %v3588_v51, %v3108_v53  ;;  %v3203_v47 = vadd.f32 %v3587_v56, %v3107_v3  ;;  %v3607_v51 = vunpack.c.l.bf16 %v3644_v54  ;;  %v6927_v53 = vld [vmem:[#allocation31_spill] sm:$0xff]  ;;  %v6928_v3 = vld [vmem:[#allocation32_spill] sm:$0xff] }
 0x390   : > { %v3024_v30 = vpop.permute.xlu1 %3023  ;;  %v3020_v6 = vpop.permute.xlu0 %3019 }
 0x391   : > { %v3236_v36 = vmax.f32 %v3204_v5, 0.0  ;;  %v3235_v10 = vmax.f32 %v3203_v47, 0.0  ;;  %v3110_v63 = vmul.f32 %v3024_v30, %v6919_v42  ;;  %v3109_v33 = vmul.f32 %v3020_v6, %v6920_v14 }
 0x392   : > { %v3611_v30 = vunpack.c.l.bf16 %v3645_v60 }
 0x393   : > { %3268 = vst.msk [vmem:[%s6505_s22 + $0x88] sm:$0xff] %vm349_vm0, %v3236_v36  ;;  %3267 = vst.msk [vmem:[%s6505_s22 + $0x80] sm:$0xff] %vm349_vm0, %v3235_v10  ;;  %v3206_v49 = vadd.f32 %v3592_v25, %v3110_v63  ;;  %v3205_v57 = vadd.f32 %v3591_v29, %v3109_v33  ;;  %v3612_v29 = vunpack.c.h.bf16 %v3645_v60  ;;  %v3646_v36 = vld [vmem:[%s6495_s19 + $0x78] sm:$0xff]   ;;  %v6929_v63 = vld [vmem:[#allocation33_spill] sm:$0xff] }
 0x394   : > { %v3035_v18 = vpop.permute.xlu1 %3034  ;;  %v3031_v17 = vpop.permute.xlu0 %3030  ;;  %v6930_v33 = vld [vmem:[#allocation34_spill] sm:$0xff] }
 0x395   : > { %v3238_v21 = vmax.f32 %v3206_v49, 0.0  ;;  %v3237_v48 = vmax.f32 %v3205_v57, 0.0  ;;  %v3112_v39 = vmul.f32 %v3035_v18, %v6921_v59  ;;  %v3111_v41 = vmul.f32 %v3031_v17, %v6922_v7  ;;  %v6931_v59 = vld [vmem:[#allocation35_spill] sm:$0xff]  ;;  %v6932_v7 = vld [vmem:[#allocation36_spill] sm:$0xff] }
 0x396   : > { %v3615_v18 = vunpack.c.l.bf16 %v3646_v36 }
 0x397   : > { %3270 = vst.msk [vmem:[%s6505_s22 + $0x98] sm:$0xff] %vm349_vm0, %v3238_v21  ;;  %3269 = vst.msk [vmem:[%s6505_s22 + $0x90] sm:$0xff] %vm349_vm0, %v3237_v48  ;;  %v3208_v32 = vadd.f32 %v3596_v43, %v3112_v39  ;;  %v3207_v16 = vadd.f32 %v3595_v45, %v3111_v41  ;;  %v3616_v45 = vunpack.c.h.bf16 %v3646_v36 }
 0x398   : > { %v3046_v24 = vpop.permute.xlu1 %3045  ;;  %v3042_v44 = vpop.permute.xlu0 %3041 }
 0x399   : > { %v3240_v38 = vmax.f32 %v3208_v32, 0.0  ;;  %v3239_v61 = vmax.f32 %v3207_v16, 0.0  ;;  %v3114_v31 = vmul.f32 %v3046_v24, %v6923_v62  ;;  %v3113_v4 = vmul.f32 %v3042_v44, %v6924_v15 }
 0x39b   : > { %3272 = vst.msk [vmem:[%s6505_s22 + $0xa8] sm:$0xff] %vm349_vm0, %v3240_v38  ;;  %3271 = vst.msk [vmem:[%s6505_s22 + $0xa0] sm:$0xff] %vm349_vm0, %v3239_v61  ;;  %v3210_v28 = vadd.f32 %v3600_v40, %v3114_v31  ;;  %v3209_v37 = vadd.f32 %v3599_v26, %v3113_v4 }
 0x39c   : > { %v3057_v11 = vpop.permute.xlu1 %3056  ;;  %v3053_v20 = vpop.permute.xlu0 %3052 }
 0x39d   : > { %v3242_v22 = vmax.f32 %v3210_v28, 0.0  ;;  %v3241_v46 = vmax.f32 %v3209_v37, 0.0  ;;  %v3116_v55 = vmul.f32 %v3057_v11, %v6925_v2  ;;  %v3115_v1 = vmul.f32 %v3053_v20, %v6926_v0 }
 0x39f   : > { %3274 = vst.msk [vmem:[%s6505_s22 + $0xb8] sm:$0xff] %vm349_vm0, %v3242_v22  ;;  %3273 = vst.msk [vmem:[%s6505_s22 + $0xb0] sm:$0xff] %vm349_vm0, %v3241_v46  ;;  %v3212_v13 = vadd.f32 %v3604_v34, %v3116_v55  ;;  %v3211_v23 = vadd.f32 %v3603_v27, %v3115_v1 }
 0x3a0   : > { %v3068_v56 = vpop.permute.xlu1 %3067  ;;  %v3064_v52 = vpop.permute.xlu0 %3063 }
 0x3a1   : > { %v3244_v19 = vmax.f32 %v3212_v13, 0.0  ;;  %v3243_v50 = vmax.f32 %v3211_v23, 0.0  ;;  %v3118_v8 = vmul.f32 %v3068_v56, %v6927_v53  ;;  %v3117_v5 = vmul.f32 %v3064_v52, %v6928_v3 }
 0x3a3   : > { %3276 = vst.msk [vmem:[%s6505_s22 + $0xc8] sm:$0xff] %vm349_vm0, %v3244_v19  ;;  %3275 = vst.msk [vmem:[%s6505_s22 + $0xc0] sm:$0xff] %vm349_vm0, %v3243_v50  ;;  %v3214_v47 = vadd.f32 %v3608_v35, %v3118_v8  ;;  %v3213_v25 = vadd.f32 %v3607_v51, %v3117_v5 }
 0x3a4   : > { %v3079_v6 = vpop.permute.xlu1 %3078  ;;  %v3075_v58 = vpop.permute.xlu0 %3074 }
 0x3a5   : > { %v3246_v10 = vmax.f32 %v3214_v47, 0.0  ;;  %v3245_v42 = vmax.f32 %v3213_v25, 0.0  ;;  %v3120_v14 = vmul.f32 %v3079_v6, %v6929_v63  ;;  %v3119_v49 = vmul.f32 %v3075_v58, %v6930_v33 }
 0x3a7   : > { %3278 = vst.msk [vmem:[%s6505_s22 + $0xd8] sm:$0xff] %vm349_vm0, %v3246_v10  ;;  %3277 = vst.msk [vmem:[%s6505_s22 + $0xd0] sm:$0xff] %vm349_vm0, %v3245_v42  ;;  %v3216_v57 = vadd.f32 %v3612_v29, %v3120_v14  ;;  %v3215_v43 = vadd.f32 %v3611_v30, %v3119_v49 }
 0x3a8   : > { %v3090_v17 = vpop.permute.xlu1 %3089  ;;  %v3086_v9 = vpop.permute.xlu0 %3085 }
 0x3a9   : > { %v3248_v21 = vmax.f32 %v3216_v57, 0.0  ;;  %v3247_v48 = vmax.f32 %v3215_v43, 0.0  ;;  %v3122_v39 = vmul.f32 %v3090_v17, %v6931_v59  ;;  %v3121_v41 = vmul.f32 %v3086_v9, %v6932_v7 }
 0x3ab   : > { %3280 = vst.msk [vmem:[%s6505_s22 + $0xe8] sm:$0xff] %vm349_vm0, %v3248_v21  ;;  %3279 = vst.msk [vmem:[%s6505_s22 + $0xe0] sm:$0xff] %vm349_vm0, %v3247_v48  ;;  %v3218_v32 = vadd.f32 %v3616_v45, %v3122_v39  ;;  %v3217_v16 = vadd.f32 %v3615_v18, %v3121_v41 }
 0x3ad   : > { %v3250_v40 = vmax.f32 %v3218_v32, 0.0  ;;  %v3249_v26 = vmax.f32 %v3217_v16, 0.0 }
 0x3af   : > { %3282 = vst.msk [vmem:[%s6505_s22 + $0xf8] sm:$0xff] %vm349_vm0, %v3250_v40  ;;  %3281 = vst.msk [vmem:[%s6505_s22 + $0xf0] sm:$0xff] %vm349_vm0, %v3249_v26 }
 0x3b0 PF: > { %s15_s15 = sadd.s32 1, %s3705_s15  }
 0x3b1   : > { %p12_p1 = scmp.ge.s32.totalorder %s15_s15, 4  }
 0x3b3   :  { %14 = sbr.rel (!%p12_p1) target bundleno = 1 (0x1), region = 77 }
 0x3ba   :  { %3304 = vsyncpa [#allocation3], 1 }
 0x3bb   :  { %3306 = vsyncpa [#allocation3 + $0x1], 1 }

</bundles_post_ra>
